<compile_context>
chip_gen: v5e
topology: v5e:2x2
jax: 0.10.0
libtpu: 0.0.40
codegen_flags: <defaults>
</compile_context>

<pallas_src>
import jax
import jax.numpy as jnp
from jax.experimental import pallas as pl
from jax.experimental.pallas import tpu as pltpu

DIM_IN = 3
DIM_OUT = 32
SIN_W0 = 2.0

PACK = 4                      # points packed per lane-dense row
PACKED_IN = PACK * DIM_IN     # 12
PACKED_OUT = PACK * DIM_OUT   # 128  -> one full lane group per output row


def siren_kernel(x_ref, w_ref, b_ref, o_ref):
    # MXU matmul (skinny K=12 contraction, f32 accumulate) + bias + sin.
    # w0 is already folded into w_ref / b_ref.
    y = jnp.dot(x_ref[...], w_ref[...], preferred_element_type=jnp.float32)
    o_ref[...] = jnp.sin(y + b_ref[...]).astype(o_ref.dtype)


def point_enc_forward(x, w_packed, b_packed, *, tile_rows=2048,
                      out_dtype=jnp.float32):
    """x: (N, DIM_IN) f32; w_packed: (12, 128); b_packed: (1, 128).

    Returns (N, DIM_OUT) in out_dtype (set out_dtype=jnp.bfloat16 to halve
    HBM writeback if the consumer tolerates it).
    """
    N = x.shape[0]

    # --- wrapper-side repacking: 4 points per lane-dense row (free views) ---
    pad_pts = (-N) % PACK
    if pad_pts:
        x = jnp.pad(x, ((0, pad_pts), (0, 0)))
    rows = x.shape[0] // PACK
    xp = x.reshape(rows, PACKED_IN)

    # Clamp the tile to the (sublane-aligned) problem size; keep >= 8 rows.
    tile_rows = int(min(tile_rows, max(8, ((rows + 7) // 8) * 8)))
    pad_rows = (-rows) % tile_rows
    if pad_rows:
        xp = jnp.pad(xp, ((0, pad_rows), (0, 0)))
    R = xp.shape[0]
    grid = (R // tile_rows,)

    out_packed = pl.pallas_call(
        siren_kernel,
        out_shape=jax.ShapeDtypeStruct((R, PACKED_OUT), out_dtype),
        grid_spec=pltpu.PrefetchScalarGridSpec(
            num_scalar_prefetch=0,
            grid=grid,
            in_specs=[
                # packed points, tiled along rows; feature dim at full extent
                pl.BlockSpec((tile_rows, PACKED_IN), lambda i: (i, 0)),
                # small block-diagonal weight / tiled bias stay resident
                pl.BlockSpec((PACKED_IN, PACKED_OUT), lambda i: (0, 0)),
                pl.BlockSpec((1, PACKED_OUT), lambda i: (0, 0)),
            ],
            out_specs=pl.BlockSpec((tile_rows, PACKED_OUT), lambda i: (i, 0)),
        ),
        compiler_params=pltpu.CompilerParams(
            dimension_semantics=("parallel",),
            # Explicit budget (2x in + 2x out buffers ~ 2.3 MB at default tile)
            # so a larger tile_rows choice stays honest on v7x (32/64 MiB VMEM).
            vmem_limit_bytes=32 * 1024 * 1024,
        ),
    )(xp, w_packed, b_packed)

    # Free row-major reshape back to one point per row; drop padding.
    out = out_packed.reshape(R * PACK, DIM_OUT)
    return out[:N]


def init_params(key):
    """Matches PointEnc.__init__ + first_layer_sine_init.

    nn.Linear(3, 32).weight has shape (32, 3); first_layer_sine_init sets
    weight ~ U(-1/num_input, 1/num_input) with num_input = 3.  Bias keeps the
    default nn.Linear init: U(-1/sqrt(fan_in), 1/sqrt(fan_in)).
    """
    kw, kb = jax.random.split(key)
    bound_w = 1.0 / DIM_IN
    weight = jax.random.uniform(
        kw, (DIM_OUT, DIM_IN), jnp.float32, minval=-bound_w, maxval=bound_w
    )
    bound_b = 1.0 / (DIM_IN ** 0.5)
    bias = jax.random.uniform(
        kb, (DIM_OUT,), jnp.float32, minval=-bound_b, maxval=bound_b
    )
    return weight, bias


def pack_params(weight, bias, w0=SIN_W0):
    """Fold w0 into (W, b) and build the lane-dense block-diagonal packing."""
    w_t = (w0 * weight).T.astype(jnp.float32)          # (3, 32), w0 folded
    b_s = (w0 * bias).astype(jnp.float32)              # (32,),  w0 folded
    w_packed = jnp.zeros((PACKED_IN, PACKED_OUT), jnp.float32)
    for k in range(PACK):
        w_packed = w_packed.at[
            k * DIM_IN:(k + 1) * DIM_IN,
            k * DIM_OUT:(k + 1) * DIM_OUT,
        ].set(w_t)
    b_packed = jnp.tile(b_s.reshape(1, DIM_OUT), (1, PACK))   # (1, 128)
    return w_packed, b_packed


if __name__ == "__main__":
    key = jax.random.PRNGKey(0)
    k_param, k_x = jax.random.split(key)

    weight, bias = init_params(k_param)
    w_packed, b_packed = pack_params(weight, bias)

    # Small point cloud; deliberately NOT a multiple of 4 or the tile size to
    # exercise the wrapper-side padding path.
    N = 1000
    x = jax.random.normal(k_x, (N, DIM_IN), jnp.float32)

    out = point_enc_forward(x, w_packed, b_packed)
    out = jax.block_until_ready(out)

    # Pure-JAX reference of the PyTorch forward (unpacked parameters).
    ref = jnp.sin((x @ weight.T + bias) * SIN_W0)
    assert out.shape == (N, DIM_OUT)
    assert jnp.allclose(out, ref, atol=1e-5, rtol=1e-5)

    print("KERNEL_OK")
</pallas_src>

<mosaic_0001>
module attributes {stable_mosaic.version = 11 : i64} {
  func.func @siren_kernel(%arg0: i32, %arg1: memref<256x12xf32, #tpu.memory_space<vmem>>, %arg2: memref<12x128xf32, #tpu.memory_space<vmem>>, %arg3: memref<1x128xf32, #tpu.memory_space<vmem>>, %arg4: memref<256x128xf32, #tpu.memory_space<vmem>>) attributes {dimension_semantics = [#tpu.dimension_semantics<parallel>], iteration_bounds = array<i64: 1>, scalar_prefetch = 0 : i64, scratch_operands = 0 : i64, tpu.core_type = #tpu.core_type<tc>, window_params = [{transform_indices = @transform_0, window_bounds = array<i64: 256, 12>}, {pipeline_mode = #tpu.pipeline_mode<synchronous>, transform_indices = @transform_1, window_bounds = array<i64: 12, 128>}, {pipeline_mode = #tpu.pipeline_mode<synchronous>, transform_indices = @transform_2, window_bounds = array<i64: 1, 128>}, {transform_indices = @transform_3, window_bounds = array<i64: 256, 128>}]} {
    %c0 = arith.constant 0 : index
    %c0_0 = arith.constant 0 : index
    %0 = vector.load %arg1[%c0, %c0_0] : memref<256x12xf32, #tpu.memory_space<vmem>>, vector<256x12xf32>
    %c0_1 = arith.constant 0 : index
    %c0_2 = arith.constant 0 : index
    %1 = vector.load %arg2[%c0_1, %c0_2] : memref<12x128xf32, #tpu.memory_space<vmem>>, vector<12x128xf32>
    %cst = arith.constant dense<0.000000e+00> : vector<256x128xf32>
    %2 = tpu.matmul %0, %1, %cst {dimension_numbers = #tpu.dot_dimension_numbers<[1], [0], [0], [1], [0, 0, 1, 1], [], []>} : vector<256x12xf32>, vector<12x128xf32>, vector<256x128xf32> -> vector<256x128xf32>
    %c0_3 = arith.constant 0 : index
    %c0_4 = arith.constant 0 : index
    %3 = vector.load %arg3[%c0_3, %c0_4] : memref<1x128xf32, #tpu.memory_space<vmem>>, vector<1x128xf32>
    %4 = vector.broadcast %3 : vector<1x128xf32> to vector<256x128xf32>
    %5 = arith.addf %2, %4 : vector<256x128xf32>
    %6 = math.sin %5 : vector<256x128xf32>
    %c0_5 = arith.constant 0 : index
    %c0_6 = arith.constant 0 : index
    %7 = vector.load %arg4[%c0_5, %c0_6] : memref<256x128xf32, #tpu.memory_space<vmem>>, vector<256x128xf32>
    tpu.vector_store %arg4[%c0_5, %c0_6], %6 {strides = array<i32>} : memref<256x128xf32, #tpu.memory_space<vmem>>, vector<256x128xf32>,
    return
  }
  func.func @transform_0(%arg0: i32) -> (i32, i32) {
    %c0_i32 = arith.constant 0 : i32
    %c0_i32_0 = arith.constant 0 : i32
    return %arg0, %c0_i32 : i32, i32
  }
  func.func @transform_1(%arg0: i32) -> (i32, i32) {
    %c0_i32 = arith.constant 0 : i32
    %c0_i32_0 = arith.constant 0 : i32
    %c0_i32_1 = arith.constant 0 : i32
    return %c0_i32, %c0_i32_0 : i32, i32
  }
  func.func @transform_2(%arg0: i32) -> (i32, i32) {
    %c0_i32 = arith.constant 0 : i32
    %c0_i32_0 = arith.constant 0 : i32
    %c0_i32_1 = arith.constant 0 : i32
    return %c0_i32, %c0_i32_0 : i32, i32
  }
  func.func @transform_3(%arg0: i32) -> (i32, i32) {
    %c0_i32 = arith.constant 0 : i32
    %c0_i32_0 = arith.constant 0 : i32
    return %arg0, %c0_i32 : i32, i32
  }
}

</mosaic_0001>

<bundles_post_ra>
// kernel: tpu_custom_call.1
= control target key start
LH: loop header
LB: loop body
LE: loop exit
PB: predicated region body
PF: predicated region fallthrough
CT: control target
= control target key end

     0   :  { %8 = vsyncpa [#allocation3], 0  ;;  %vm150_vm0 = vcmask 1043456   ;;  %vm53_vm1 = vcmask 97280   ;;  %v5456_v51 = vmov 683565275   ;;  %s9263_s0 = inlined_call_operand.vmem [shape: f32[256,12], index: 0, kind: input, shape index: {}]   ;;  %s9264_s1 = inlined_call_operand.vmem [shape: f32[12,128], index: 1, kind: input, shape index: {}]   ;;  %s9265_s2 = inlined_call_operand.vmem [shape: f32[1,128], index: 2, kind: input, shape index: {}]   ;;  %s9266_s3 = inlined_call_operand.hbm [shape: f32[256,128], index: 3, kind: output, shape index: {}]  }
   0x1   :  { %v47_v0 = vld [vmem:[%s9264_s1] sm:$0xff]  ;;  %v48_v1 = vld [vmem:[%s9264_s1 + $0x8] sm:$0xf]  ;;  %v17_v10 = vld [vmem:[%s9263_s0 + $0x10] sm:$0xff]  ;;  %v5457_v53 = vmov 2475754826  }
   0x2   :  { %5277 = vmatpush.msk.msra.mxu0 %vm150_vm0, %v48_v1  ;;  %5406 = vmatpush.msk.msra.mxu1 %vm150_vm0, %v48_v1  ;;  %v15_v2 = vld [vmem:[%s9263_s0] sm:$0xff]  ;;  %v16_v6 = vld [vmem:[%s9263_s0 + $0x8] sm:$0xff]  ;;  %v25_v11 = vld [vmem:[%s9263_s0 + $0x50] sm:$0xff]  ;;  %v5458_v55 = vmov 2131351028   ;;  %s5265_s14 = sshll.u32 %s9266_s3, 4  ;;  %s5266_s14 = int_to_ptr.hbm [resolvable:$true] %s5265_s14 }
   0x3   :  { %v23_v3 = vld [vmem:[%s9263_s0 + $0x40] sm:$0xff]  ;;  %5407 = vmatpush.msk.msra.mxu2 %vm150_vm0, %v48_v1  ;;  %5408 = vmatpush.msk.msra.mxu3 %vm150_vm0, %v48_v1  ;;  %v24_v7 = vld [vmem:[%s9263_s0 + $0x48] sm:$0xff]  ;;  %v33_v12 = vld [vmem:[%s9263_s0 + $0x90] sm:$0xff]  ;;  %v5459_v57 = vmov 2102212464   ;;  %s5464_s15 = smov 128  }
   0x4   :  { %v31_v4 = vld [vmem:[%s9263_s0 + $0x80] sm:$0xff]  ;;  %169 = vmatpush.msra.mxu0 %v47_v0  ;;  %5409 = vmatpush.msra.mxu1 %v47_v0  ;;  %v32_v8 = vld [vmem:[%s9263_s0 + $0x88] sm:$0xff]  ;;  %v41_v13 = vld [vmem:[%s9263_s0 + $0xd0] sm:$0xff]  ;;  %v5460_v59 = vmov 920167782   ;;  %s5465_s16 = smov 8  }
   0x5   :  { %v39_v5 = vld [vmem:[%s9263_s0 + $0xc0] sm:$0xff]  ;;  %5410 = vmatpush.msra.mxu2 %v47_v0  ;;  %5411 = vmatpush.msra.mxu3 %v47_v0  ;;  %v40_v9 = vld [vmem:[%s9263_s0 + $0xc8] sm:$0xff]  ;;  %v18_v14 = vld [vmem:[%s9263_s0 + $0x18] sm:$0xff] }
   0x6   :  { %5278 = vmatmul.msk.f32.vlgmr.msra.gmra.mxu0 %vm53_vm1, %v15_v2  ;;  %5286 = vmatmul.msk.f32.vlgmr.msra.gmra.mxu1 %vm53_vm1, %v23_v3  ;;  %v26_v15 = vld [vmem:[%s9263_s0 + $0x58] sm:$0xff]  ;;  %v19_v18 = vld [vmem:[%s9263_s0 + $0x20] sm:$0xff]  ;;  %v20_v22 = vld [vmem:[%s9263_s0 + $0x28] sm:$0xff]  ;;  %v5461_v2 = vmov 1326507024  }
   0x7   :  { %5294 = vmatmul.msk.f32.vlgmr.msra.gmra.mxu2 %vm53_vm1, %v31_v4  ;;  %5302 = vmatmul.msk.f32.vlgmr.msra.gmra.mxu3 %vm53_vm1, %v39_v5  ;;  %v34_v16 = vld [vmem:[%s9263_s0 + $0x98] sm:$0xff]  ;;  %v27_v19 = vld [vmem:[%s9263_s0 + $0x60] sm:$0xff]  ;;  %v28_v23 = vld [vmem:[%s9263_s0 + $0x68] sm:$0xff] }
   0x8   :  { %v42_v17 = vld [vmem:[%s9263_s0 + $0xd8] sm:$0xff]  ;;  %v35_v20 = vld [vmem:[%s9263_s0 + $0xa0] sm:$0xff]  ;;  %v36_v24 = vld [vmem:[%s9263_s0 + $0xa8] sm:$0xff] }
   0x9   :  { %v43_v21 = vld [vmem:[%s9263_s0 + $0xe0] sm:$0xff]  ;;  %v44_v25 = vld [vmem:[%s9263_s0 + $0xe8] sm:$0xff]  ;;  %v21_v26 = vld [vmem:[%s9263_s0 + $0x30] sm:$0xff] }
   0xa   :  { %v29_v27 = vld [vmem:[%s9263_s0 + $0x70] sm:$0xff]  ;;  %v22_v30 = vld [vmem:[%s9263_s0 + $0x38] sm:$0xff]  ;;  %v5623_v34 = vld [vmem:[%s9265_s2] ss:$0 sm:$0xff] }
   0xb   :  { %v37_v28 = vld [vmem:[%s9263_s0 + $0xb0] sm:$0xff]  ;;  %v30_v31 = vld [vmem:[%s9263_s0 + $0x78] sm:$0xff] }
   0xc   :  { %v45_v29 = vld [vmem:[%s9263_s0 + $0xf0] sm:$0xff]  ;;  %v38_v32 = vld [vmem:[%s9263_s0 + $0xb8] sm:$0xff] }
   0xd   :  { %v46_v33 = vld [vmem:[%s9263_s0 + $0xf8] sm:$0xff] }
   0xe   :  { %5279 = vmatmul.msk.f32.gmra.mxu0 %vm53_vm1, %v16_v6  ;;  %5287 = vmatmul.msk.f32.gmra.mxu1 %vm53_vm1, %v24_v7 }
   0xf   :  { %5295 = vmatmul.msk.f32.gmra.mxu2 %vm53_vm1, %v32_v8  ;;  %5303 = vmatmul.msk.f32.gmra.mxu3 %vm53_vm1, %v40_v9 }
  0x16   :  { %5280 = vmatmul.msk.f32.gmra.mxu0 %vm53_vm1, %v17_v10  ;;  %5288 = vmatmul.msk.f32.gmra.mxu1 %vm53_vm1, %v25_v11 }
  0x17   :  { %5296 = vmatmul.msk.f32.gmra.mxu2 %vm53_vm1, %v33_v12  ;;  %5304 = vmatmul.msk.f32.gmra.mxu3 %vm53_vm1, %v41_v13 }
  0x1e   :  { %5281 = vmatmul.msk.f32.gmra.mxu0 %vm53_vm1, %v18_v14  ;;  %5289 = vmatmul.msk.f32.gmra.mxu1 %vm53_vm1, %v26_v15 }
  0x1f   :  { %5297 = vmatmul.msk.f32.gmra.mxu2 %vm53_vm1, %v34_v16  ;;  %5305 = vmatmul.msk.f32.gmra.mxu3 %vm53_vm1, %v42_v17 }
  0x26   :  { %5282 = vmatmul.msk.f32.gmra.mxu0 %vm53_vm1, %v19_v18  ;;  %5290 = vmatmul.msk.f32.gmra.mxu1 %vm53_vm1, %v27_v19 }
  0x27   :  { %5298 = vmatmul.msk.f32.gmra.mxu2 %vm53_vm1, %v35_v20  ;;  %5306 = vmatmul.msk.f32.gmra.mxu3 %vm53_vm1, %v43_v21 }
  0x2e   :  { %5283 = vmatmul.msk.f32.gmra.mxu0 %vm53_vm1, %v20_v22  ;;  %5291 = vmatmul.msk.f32.gmra.mxu1 %vm53_vm1, %v28_v23 }
  0x2f   :  { %5299 = vmatmul.msk.f32.gmra.mxu2 %vm53_vm1, %v36_v24  ;;  %5307 = vmatmul.msk.f32.gmra.mxu3 %vm53_vm1, %v44_v25 }
  0x36   :  { %5284 = vmatmul.msk.f32.gmra.mxu0 %vm53_vm1, %v21_v26  ;;  %5292 = vmatmul.msk.f32.gmra.mxu1 %vm53_vm1, %v29_v27 }
  0x37   :  { %5300 = vmatmul.msk.f32.gmra.mxu2 %vm53_vm1, %v37_v28  ;;  %5308 = vmatmul.msk.f32.gmra.mxu3 %vm53_vm1, %v45_v29 }
  0x3e   :  { %5285 = vmatmul.msk.f32.gmra.mxu0 %vm53_vm1, %v22_v30  ;;  %5293 = vmatmul.msk.f32.gmra.mxu1 %vm53_vm1, %v30_v31 }
  0x3f   :  { %5301 = vmatmul.msk.f32.gmra.mxu2 %vm53_vm1, %v38_v32  ;;  %5309 = vmatmul.msk.f32.gmra.mxu3 %vm53_vm1, %v46_v33 }
  0x83   :  { %v171_v35 = vpop.f32.mrf.mxu0 }
  0x84   :  { %v5626_v36 = vadd.f32 %v5623_v34, %v171_v35 }
  0x86   :  { %v270_v37 = vand.u32 2139095040, %v5626_v36  ;;  %v267_v39 = vand.u32 2147483647, %v5626_v36 }
  0x88   :  { %v271_v38 = vshrl.u32 %v270_v37, 23  ;;  %v274_v44 = vand.u32 8388607, %v267_v39 }
  0x8a   :  { %v5310_v40 = vadd.s32 4294967169, %v271_v38  ;;  %v275_v48 = vor.u32 8388608, %v274_v44 }
  0x8b   :  { %v174_v41 = vpop.f32.mrf.mxu0 }
  0x8c   :  { %v5631_v42 = vadd.f32 %v5623_v34, %v174_v41  ;;  %v277_v43 = vadd.s32 1, %v5310_v40  ;;  %v5650_v5 = vshll.u32 %v275_v48, 8 }
  0x8e   :  { %vm278_vm2 = vcmp.gt.s32.totalorder %v277_v43, 0  ;;  %v425_v47 = vand.u32 2139095040, %v5631_v42  ;;  %v316_v17 = vand.u32 65535, %v5650_v5  ;;  %v317_v19 = vshrl.u32 %v5650_v5, 16 }
  0x8f   :  { %v279_v45 = vsel %vm278_vm2, %v277_v43, 0  ;;  %v422_v25 = vand.u32 2147483647, %v5631_v42  ;;  %vm269_vm2 = vcmp.lt.s32.totalorder %v5626_v36, 0 }
  0x90   :  { %v281_v46 = vand.u32 31, %v279_v45  ;;  %v5636_v49 = vshrl.u32 %v279_v45, 5  ;;  %v426_v62 = vshrl.u32 %v425_v47, 23 }
  0x91   :  { %v5678_v37 = vand.u32 8388607, %v422_v25 }
  0x92   :  { %v282_v50 = vsub.s32 32, %v281_v46  ;;  %v284_v52 = vshll.u32 %v5456_v51, %v281_v46  ;;  %v287_v54 = vshll.u32 %v5457_v53, %v281_v46  ;;  %v290_v56 = vshll.u32 %v5458_v55, %v281_v46 }
  0x93   :  { %v293_v58 = vshll.u32 %v5459_v57, %v281_v46  ;;  %v296_v60 = vshll.u32 %v5460_v59, %v281_v46  ;;  %vm299_vm3 = vcmp.lt.s32.totalorder %v5636_v49, 1  ;;  %vm301_vm4 = vcmp.lt.s32.totalorder %v5636_v49, 3 }
  0x94   :  { %v285_v61 = vshrl.u32 %v5457_v53, %v282_v50  ;;  %v288_v63 = vshrl.u32 %v5458_v55, %v282_v50  ;;  %v291_v0 = vshrl.u32 %v5459_v57, %v282_v50  ;;  %v294_v1 = vshrl.u32 %v5460_v59, %v282_v50 }
  0x95   :  { %v297_v3 = vshrl.u32 %v5461_v2, %v282_v50  ;;  %vm302_vm5 = vcmp.lt.s32.totalorder %v5636_v49, 4  ;;  %v5313_v10 = vadd.s32 4294967169, %v426_v62  ;;  %vm300_vm6 = vcmp.lt.s32.totalorder %v5636_v49, 2 }
  0x96   :  { %v286_v4 = vor.u32 %v285_v61, %v284_v52  ;;  %v289_v6 = vor.u32 %v288_v63, %v287_v54  ;;  %v292_v7 = vor.u32 %v291_v0, %v290_v56  ;;  %v295_v8 = vor.u32 %v294_v1, %v293_v58 }
  0x97   :  { %v298_v9 = vor.u32 %v297_v3, %v296_v60  ;;  %v432_v21 = vadd.s32 1, %v5313_v10  ;;  %v283_v22 = vshrl.u32 %v5456_v51, %v282_v50  ;;  %v5462_v54 = vmov 0  }
  0x98   :  { %v307_v11 = vsel %vm299_vm3, %v286_v4, %v289_v6  ;;  %v308_v12 = vsel %vm302_vm5, %v295_v8, 920167782  ;;  %v311_v14 = vsel %vm299_vm3, %v289_v6, %v292_v7  ;;  %v304_v38 = vsel %vm302_vm5, %v292_v7, 2102212464 }
  0x99   :  { %v309_v13 = vsel %vm301_vm4, %v292_v7, %v308_v12  ;;  %v312_v15 = vsel %vm302_vm5, %v298_v9, 1326507024  ;;  %vm433_vm7 = vcmp.gt.s32.totalorder %v432_v21, 0  ;;  %v303_v32 = vsel %vm299_vm3, %v283_v22, %v286_v4 }
  0x9a   :  { %v310_v16 = vsel %vm300_vm6, %v307_v11, %v309_v13  ;;  %v313_v18 = vsel %vm301_vm4, %v295_v8, %v312_v15  ;;  %v434_v46 = vsel %vm433_vm7, %v432_v21, 0  ;;  %v305_v52 = vsel %vm301_vm4, %v289_v6, %v304_v38 }
  0x9b   :  { %v340_v20 = vand.u32 65535, %v310_v16  ;;  %v314_v23 = vsel %vm300_vm6, %v311_v14, %v313_v18  ;;  %v341_v24 = vshrl.u32 %v310_v16, 16  ;;  %v430_v0 = vor.u32 8388608, %v5678_v37 }
  0x9c   :  { %v318_v26 = vand.u32 65535, %v314_v23  ;;  %v319_v27 = vshrl.u32 %v314_v23, 16  ;;  %v436_v1 = vand.u32 31, %v434_v46  ;;  %v306_v8 = vsel %vm300_vm6, %v303_v32, %v305_v52 }
  0x9d   :  { %v343_v28 = vmul.u32 %v341_v24, %v316_v17  ;;  %v344_v29 = vmul.u32 %v340_v20, %v317_v19  ;;  %v342_v33 = vmul.u32 %v340_v20, %v316_v17  ;;  %v345_v43 = vmul.u32 %v341_v24, %v317_v19 }
  0x9e   :  { %v321_v30 = vmul.u32 %v319_v27, %v316_v17  ;;  %v322_v31 = vmul.u32 %v318_v26, %v317_v19  ;;  %v320_v40 = vmul.u32 %v318_v26, %v316_v17  ;;  %v323_v47 = vmul.u32 %v319_v27, %v317_v19 }
  0x9f   :  { %v346_v35 = vshll.u32 %v343_v28, 16  ;;  %v348_v44 = vshll.u32 %v344_v29, 16  ;;  %v347_v7 = vshrl.u32 %v343_v28, 16  ;;  %v349_v10 = vshrl.u32 %v344_v29, 16 }
  0xa0   :  { %v324_v41 = vshll.u32 %v321_v30, 16  ;;  %v326_v48 = vshll.u32 %v322_v31, 16  ;;  %v325_v3 = vshrl.u32 %v321_v30, 16  ;;  %v327_v9 = vshrl.u32 %v322_v31, 16 }
  0xa1   :  { %vm350_vm8 = vc.u32 %v342_v33, %v346_v35  ;;  %v352_v45 = vadd.s32 %v346_v35, %v342_v33  ;;  %v437_v11 = vsub.s32 32, %v436_v1  ;;  %v5691_v14 = vshrl.u32 %v434_v46, 5 }
  0xa2   :  { %vm328_vm9 = vc.u32 %v320_v40, %v324_v41  ;;  %v330_v50 = vadd.s32 %v324_v41, %v320_v40  ;;  %v351_v58 = vsel %vm350_vm8, 1, %v5462_v54  ;;  %v439_v15 = vshll.u32 %v5456_v51, %v436_v1 }
  0xa3   :  { %v329_v56 = vsel %vm328_vm9, 1, %v5462_v54  ;;  %vm354_vm10 = vc.u32 %v352_v45, %v348_v44  ;;  %v353_v61 = vadd.s32 %v351_v58, %v345_v43  ;;  %v440_v16 = vshrl.u32 %v5457_v53, %v437_v11 }
  0xa4   :  { %v331_v60 = vadd.s32 %v329_v56, %v323_v47  ;;  %vm332_vm11 = vc.u32 %v330_v50, %v326_v48  ;;  %v355_v62 = vsel %vm354_vm10, 1, %v5462_v54  ;;  %v442_v17 = vshll.u32 %v5457_v53, %v436_v1 }
  0xa5   :  { %v333_v63 = vsel %vm332_vm11, 1, %v5462_v54  ;;  %v357_v6 = vadd.s32 %v355_v62, %v353_v61  ;;  %v445_v18 = vshll.u32 %v5458_v55, %v436_v1  ;;  %v448_v19 = vshll.u32 %v5459_v57, %v436_v1 }
  0xa6   :  { %v335_v4 = vadd.s32 %v333_v63, %v331_v60  ;;  %v356_v49 = vadd.s32 %v352_v45, %v348_v44  ;;  %v451_v22 = vshll.u32 %v5460_v59, %v436_v1  ;;  %v360_v23 = vmul.u32 %v5650_v5, %v306_v8 }
  0xa7   :  { %v358_v13 = vadd.s32 %v357_v6, %v347_v7  ;;  %v443_v24 = vshrl.u32 %v5458_v55, %v437_v11  ;;  %v446_v26 = vshrl.u32 %v5459_v57, %v437_v11  ;;  %v449_v27 = vshrl.u32 %v5460_v59, %v437_v11 }
  0xa8   :  { %v336_v12 = vadd.s32 %v335_v4, %v325_v3  ;;  %v441_v29 = vor.u32 %v440_v16, %v439_v15  ;;  %v452_v30 = vshrl.u32 %v5461_v2, %v437_v11  ;;  %vm454_vm13 = vcmp.lt.s32.totalorder %v5691_v14, 1  ;;  %v177_v4 = vpop.f32.mrf.mxu0 }
  0xa9   :  { %v359_v21 = vadd.s32 %v358_v13, %v349_v10  ;;  %v5704_v31 = vor.u32 %v443_v24, %v442_v17  ;;  %v5706_v32 = vor.u32 %v446_v26, %v445_v18  ;;  %v450_v33 = vor.u32 %v449_v27, %v448_v19 }
  0xaa   :  { %v337_v20 = vadd.s32 %v336_v12, %v327_v9  ;;  %v453_v5 = vor.u32 %v452_v30, %v451_v22  ;;  %vm456_vm14 = vcmp.lt.s32.totalorder %v5691_v14, 3  ;;  %vm457_vm15 = vcmp.lt.s32.totalorder %v5691_v14, 4 }
  0xab   :  { %v363_v28 = vadd.s32 1, %v359_v21  ;;  %v462_v38 = vsel %vm454_vm13, %v441_v29, %v5704_v31  ;;  %v463_v40 = vsel %vm457_vm15, %v450_v33, 920167782  ;;  %v466_v44 = vsel %vm454_vm13, %v5704_v31, %v5706_v32 }
  0xac   :  { %vm362_vm12 = vc.u32 %v337_v20, %v356_v49  ;;  %v467_v41 = vsel %vm457_vm15, %v453_v5, 1326507024  ;;  %v5722_v45 = vshll.u32 %v430_v0, 8  ;;  %vm455_vm0 = vcmp.lt.s32.totalorder %v5691_v14, 2 }
  0xad   :  { %v364_v35 = vsel %vm362_vm12, %v363_v28, %v359_v21  ;;  %v464_v46 = vsel %vm456_vm14, %v5706_v32, %v463_v40  ;;  %v468_v50 = vsel %vm456_vm14, %v450_v33, %v467_v41  ;;  %v438_v9 = vshrl.u32 %v5456_v51, %v437_v11 }
  0xae   :  { %v365_v37 = vadd.s32 %v364_v35, %v360_v23  ;;  %v465_v48 = vsel %vm455_vm0, %v462_v38, %v464_v46  ;;  %v469_v52 = vsel %vm455_vm0, %v466_v44, %v468_v50  ;;  %v471_v60 = vand.u32 65535, %v5722_v45 }
  0xaf   :  { %v496_v56 = vshrl.u32 %v465_v48, 16  ;;  %v473_v61 = vand.u32 65535, %v469_v52  ;;  %v474_v62 = vshrl.u32 %v469_v52, 16  ;;  %v472_v0 = vshrl.u32 %v5722_v45, 16 }
  0xb0   :  { %v366_v43 = vadd.s32 536870912, %v365_v37  ;;  %v495_v7 = vand.u32 65535, %v465_v48  ;;  %v5741_v13 = vadd.f32 %v5623_v34, %v177_v4  ;;  %v361_v26 = vadd.s32 %v356_v49, %v337_v20 }
  0xb1   :  { %v476_v1 = vmul.u32 %v474_v62, %v471_v60  ;;  %v498_v3 = vmul.u32 %v496_v56, %v471_v60  ;;  %v477_v8 = vmul.u32 %v473_v61, %v472_v0  ;;  %v475_v10 = vmul.u32 %v473_v61, %v471_v60 }
  0xb2   :  { %v5728_v47 = vshrl.u32 %v366_v43, 30  ;;  %v497_v19 = vmul.u32 %v495_v7, %v471_v60  ;;  %v478_v21 = vmul.u32 %v474_v62, %v472_v0  ;;  %v499_v24 = vmul.u32 %v495_v7, %v472_v0 }
  0xb3   :  { %v479_v12 = vshll.u32 %v476_v1, 16  ;;  %v501_v16 = vshll.u32 %v498_v3, 16  ;;  %v481_v22 = vshll.u32 %v477_v8, 16  ;;  %v458_v28 = vsel %vm454_vm13, %v438_v9, %v441_v29 }
  0xb4   :  { %v368_v58 = vshll.u32 %v5728_v47, 30  ;;  %v391_v27 = vsub.s32 4, %v5728_v47  ;;  %vm5750_vm4 = vcmp.le.f32.partialorder %v267_v39, 0.7853982  ;;  %v500_v20 = vmul.u32 %v496_v56, %v472_v0 }
  0xb5   :  { %vm483_vm3 = vc.u32 %v475_v10, %v479_v12  ;;  %v485_v18 = vadd.s32 %v479_v12, %v475_v10  ;;  %vm505_vm6 = vc.u32 %v497_v19, %v501_v16  ;;  %v507_v35 = vadd.s32 %v501_v16, %v497_v19 }
  0xb6   :  { %v369_v63 = vsub.s32 %v365_v37, %v368_v58  ;;  %v484_v23 = vsel %vm483_vm3, 1, %v5462_v54  ;;  %v506_v49 = vsel %vm505_vm6, 1, %v5462_v54  ;;  %v480_v38 = vshrl.u32 %v476_v1, 16 }
  0xb7   :  { %v486_v33 = vadd.s32 %v484_v23, %v478_v21  ;;  %vm487_vm5 = vc.u32 %v485_v18, %v481_v22  ;;  %v503_v29 = vshll.u32 %v499_v24, 16  ;;  %v459_v39 = vsel %vm457_vm15, %v5706_v32, 2102212464  ;;  %v180_v23 = vpop.f32.mrf.mxu0 }
  0xb8   :  { %vm370_vm1 = vcmp.lt.s32.totalorder %v369_v63, 0  ;;  %v371_v6 = vsub.s32 0, %v369_v63  ;;  %v488_v5 = vsel %vm487_vm5, 1, %v5462_v54  ;;  %v508_v44 = vadd.s32 %v506_v49, %v500_v20 }
  0xb9   :  { %v490_v40 = vadd.s32 %v488_v5, %v486_v33  ;;  %v482_v46 = vshrl.u32 %v477_v8, 16  ;;  %vm509_vm8 = vc.u32 %v507_v35, %v503_v29  ;;  %v580_v50 = vand.u32 2139095040, %v5741_v13 }
  0xba   :  { %v372_v15 = vsel %vm370_vm1, %v371_v6, %v369_v63  ;;  %v510_v60 = vsel %vm509_vm8, 1, %v5462_v54  ;;  %v392_v61 = vsel %vm269_vm2, %v391_v27, %v5728_v47  ;;  %v502_v62 = vshrl.u32 %v498_v3, 16 }
  0xbb   :  { %v373_v17 = vclz %v372_v15  ;;  %v491_v48 = vadd.s32 %v490_v40, %v480_v38  ;;  %v512_v0 = vadd.s32 %v510_v60, %v508_v44  ;;  %v581_v1 = vshrl.u32 %v580_v50, 23 }
  0xbc   :  { %v460_v7 = vsel %vm456_vm14, %v5704_v31, %v459_v39  ;;  %v577_v9 = vand.u32 2147483647, %v5741_v13  ;;  %v394_v47 = vsel %vm5750_vm4, 0, %v392_v61  ;;  %v511_v3 = vadd.s32 %v507_v35, %v503_v29 }
  0xbd   :  { %v5311_v11 = vadd.s32 4294967294, %v373_v17  ;;  %v5767_v6 = vadd.s32 %v491_v48, %v482_v46  ;;  %v513_v8 = vadd.s32 %v512_v0, %v502_v62  ;;  %v5316_v10 = vadd.s32 4294967169, %v581_v1 }
  0xbe   :  { %v461_v15 = vsel %vm455_vm0, %v458_v28, %v460_v7  ;;  %v411_v31 = vadd.s32 3, %v394_v47  ;;  %v584_v22 = vand.u32 8388607, %v577_v9  ;;  %v5779_v35 = vadd.f32 %v5623_v34, %v180_v23 }
  0xbf   :  { %vm5312_vm7 = vcmp.lt.s32.totalorder %v5311_v11, 0  ;;  %v587_v17 = vadd.s32 1, %v5316_v10  ;;  %vm517_vm9 = vc.u32 %v5767_v6, %v511_v3  ;;  %vm424_vm11 = vcmp.lt.s32.totalorder %v5631_v42, 0 }
  0xc0   :  { %v376_v37 = vsel %vm5312_vm7, 0, %v5311_v11  ;;  %v5781_v5 = vand.u32 3, %v411_v31  ;;  %v585_v20 = vor.u32 8388608, %v584_v22  ;;  %vm5869_vm6 = vcmp.le.f32.partialorder %v422_v25, 0.7853982 }
  0xc1   :  { %v377_v41 = vsub.s32 32, %v376_v37  ;;  %v381_v43 = vsub.s32 4294967266, %v376_v37  ;;  %v378_v52 = vshll.u32 %v369_v63, %v376_v37  ;;  %v504_v63 = vshrl.u32 %v499_v24, 16 }
  0xc2   :  { %vm588_vm10 = vcmp.gt.s32.totalorder %v587_v17, 0  ;;  %v5814_v47 = vshll.u32 %v585_v20, 8  ;;  %vm414_vm0 = vcmp.eq.s32.totalorder %v5781_v5, 0  ;;  %vm417_vm1 = vcmp.eq.s32.totalorder %v5781_v5, 2 }
  0xc3   :  { %v379_v56 = vshrl.u32 %v361_v26, %v377_v41  ;;  %v382_v58 = vadd.s32 127, %v381_v43  ;;  %v514_v16 = vadd.s32 %v513_v8, %v504_v63  ;;  %v515_v26 = vmul.u32 %v5722_v45, %v461_v15 }
  0xc4   :  { %v589_v11 = vsel %vm588_vm10, %v587_v17, 0  ;;  %vm413_vm3 = vcmp.lt.s32.totalorder %v5781_v5, 2 }
  0xc5   :  { %v380_v4 = vor.u32 %v379_v56, %v378_v52  ;;  %v383_v32 = vshll.u32 %v382_v58, 23  ;;  %v518_v21 = vadd.s32 1, %v514_v16  ;;  %v591_v14 = vand.u32 31, %v589_v11 }
  0xc6   :  { %v5797_v48 = vshrl.u32 %v589_v11, 5  ;;  %v732_v56 = vand.u32 2147483647, %v5779_v35  ;;  %v735_v58 = vand.u32 2139095040, %v5779_v35 }
  0xc7   :  { %v384_v12 = vor.u32 4788187, %v383_v32  ;;  %v387_v19 = vcvt.s32.f32 %v380_v4  ;;  %v519_v27 = vsel %vm517_vm9, %v518_v21, %v514_v16  ;;  %v592_v49 = vsub.s32 32, %v591_v14 }
  0xc8   :  { %v520_v33 = vadd.s32 %v519_v27, %v515_v26  ;;  %v594_v40 = vshll.u32 %v5456_v51, %v591_v14  ;;  %v597_v45 = vshll.u32 %v5457_v53, %v591_v14  ;;  %v603_v39 = vshll.u32 %v5459_v57, %v591_v14 }
  0xc9   :  { %v385_v18 = vand.u32 2147483647, %v384_v12  ;;  %v595_v41 = vshrl.u32 %v5457_v53, %v592_v49  ;;  %v598_v43 = vshrl.u32 %v5458_v55, %v592_v49  ;;  %v604_v50 = vshrl.u32 %v5460_v59, %v592_v49 }
  0xca   :  { %v521_v38 = vadd.s32 536870912, %v520_v33  ;;  %v600_v52 = vshll.u32 %v5458_v55, %v591_v14  ;;  %v601_v30 = vshrl.u32 %v5459_v57, %v592_v49  ;;  %v606_v0 = vshll.u32 %v5460_v59, %v591_v14 }
  0xcb   :  { %v388_v24 = vmul.f32 %v387_v19, %v385_v18  ;;  %v596_v1 = vor.u32 %v595_v41, %v594_v40  ;;  %v5805_v4 = vor.u32 %v598_v43, %v597_v45  ;;  %v605_v32 = vor.u32 %v604_v50, %v603_v39 }
  0xcc   :  { %v522_v46 = vshrl.u32 %v521_v38, 30  ;;  %v607_v7 = vshrl.u32 %v5461_v2, %v592_v49  ;;  %vm609_vm12 = vcmp.lt.s32.totalorder %v5797_v48, 1  ;;  %v602_v12 = vor.u32 %v601_v30, %v600_v52 }
  0xcd   :  { %v389_v28 = vxor.u32 2147483648, %v388_v24  ;;  %vm611_vm13 = vcmp.lt.s32.totalorder %v5797_v48, 3  ;;  %vm612_vm14 = vcmp.lt.s32.totalorder %v5797_v48, 4  ;;  %v516_v18 = vadd.s32 %v511_v3, %v5767_v6 }
  0xce   :  { %v523_v62 = vshll.u32 %v522_v46, 30  ;;  %v617_v19 = vsel %vm609_vm12, %v596_v1, %v5805_v4  ;;  %v618_v31 = vsel %vm612_vm14, %v605_v32, 920167782  ;;  %v736_v21 = vshrl.u32 %v735_v58, 23 }
  0xcf   :  { %v390_v37 = vsel %vm269_vm2, %v389_v28, %v388_v24  ;;  %v608_v26 = vor.u32 %v607_v7, %v606_v0  ;;  %v546_v27 = vsub.s32 4, %v522_v46  ;;  %vm610_vm2 = vcmp.lt.s32.totalorder %v5797_v48, 2 }
  0xd0   :  { %v5790_v29 = vsel %vm5750_vm4, %v5626_v36, %v390_v37  ;;  %v5809_v10 = vsub.s32 %v520_v33, %v523_v62  ;;  %v619_v6 = vsel %vm611_vm13, %v602_v12, %v618_v31  ;;  %v626_v33 = vand.u32 65535, %v5814_v47 }
  0xd1   :  { %v395_v44 = vmul.f32 %v5790_v29, %v5790_v29  ;;  %v620_v28 = vsel %vm610_vm2, %v617_v19, %v619_v6  ;;  %vm410_vm4 = vweird.f32 %v5626_v36  ;;  %v593_v37 = vshrl.u32 %v5456_v51, %v592_v49 }
  0xd2   :  { %vm525_vm15 = vcmp.lt.s32.totalorder %v5809_v10, 0  ;;  %v526_v17 = vsub.s32 0, %v5809_v10  ;;  %v621_v38 = vsel %vm609_vm12, %v5805_v4, %v602_v12  ;;  %v627_v40 = vshrl.u32 %v5814_v47, 16 }
  0xd3   :  { %v396_v60 = vmul.f32 -0.001358992, %v395_v44  ;;  %v403_v61 = vmul.f32 -0.00019511016, %v395_v44  ;;  %v622_v43 = vsel %vm612_vm14, %v608_v26, 1326507024  ;;  %v613_v0 = vsel %vm609_vm12, %v593_v37, %v596_v1 }
  0xd4   :  { %v527_v24 = vsel %vm525_vm15, %v526_v17, %v5809_v10  ;;  %v5319_v39 = vadd.s32 4294967169, %v736_v21  ;;  %v623_v49 = vsel %vm611_vm13, %v605_v32, %v622_v43  ;;  %v651_v50 = vshrl.u32 %v620_v28, 16 }
  0xd5   :  { %v397_v63 = vadd.f32 0.041655596, %v396_v60  ;;  %v404_v8 = vadd.f32 0.008332121, %v403_v61  ;;  %v528_v11 = vclz %v527_v24  ;;  %v624_v60 = vsel %vm610_vm2, %v621_v38, %v623_v49 }
  0xd6   :  { %v628_v7 = vand.u32 65535, %v624_v60  ;;  %v650_v32 = vand.u32 65535, %v620_v28  ;;  %v653_v1 = vmul.u32 %v651_v50, %v626_v33  ;;  %v655_v38 = vmul.u32 %v651_v50, %v627_v40 }
  0xd7   :  { %v398_v15 = vmul.f32 %v397_v63, %v395_v44  ;;  %v405_v16 = vmul.f32 %v404_v8, %v395_v44  ;;  %v5314_v20 = vadd.s32 4294967294, %v528_v11  ;;  %v629_v8 = vshrl.u32 %v624_v60, 16 }
  0xd8   :  { %v632_v17 = vmul.u32 %v628_v7, %v627_v40  ;;  %v630_v26 = vmul.u32 %v628_v7, %v626_v33  ;;  %v657_v50 = vshrl.u32 %v653_v1, 16 }
  0xd9   :  { %v399_v22 = vadd.f32 -0.4999988, %v398_v15  ;;  %v406_v23 = vadd.f32 -0.16666654, %v405_v16  ;;  %vm5315_vm5 = vcmp.lt.s32.totalorder %v5314_v20, 0  ;;  %v631_v21 = vmul.u32 %v629_v8, %v626_v33 }
  0xda   :  { %v531_v58 = vsel %vm5315_vm5, 0, %v5314_v20  ;;  %v633_v6 = vmul.u32 %v629_v8, %v627_v40  ;;  %v656_v20 = vshll.u32 %v653_v1, 16 }
  0xdb   :  { %v400_v3 = vmul.f32 %v399_v22, %v395_v44  ;;  %v407_v14 = vmul.f32 %v406_v23, %v395_v44  ;;  %v5844_v44 = vsel %vm424_vm11, %v546_v27, %v522_v46  ;;  %v532_v61 = vsub.s32 32, %v531_v58 }
  0xdc   :  { %v536_v62 = vsub.s32 4294967266, %v531_v58  ;;  %v614_v46 = vsel %vm612_vm14, %v602_v12, 2102212464  ;;  %v533_v15 = vshll.u32 %v5809_v10, %v531_v58  ;;  %v634_v11 = vshll.u32 %v631_v21, 16 }
  0xdd   :  { %v401_v45 = vadd.f32 1.0, %v400_v3  ;;  %v408_v41 = vadd.f32 1.0, %v407_v14  ;;  %v615_v10 = vsel %vm611_vm13, %v5805_v4, %v614_v46  ;;  %v652_v27 = vmul.u32 %v650_v32, %v626_v33 }
  0xde   :  { %v537_v16 = vadd.s32 127, %v536_v62  ;;  %v636_v3 = vshll.u32 %v632_v17, 16  ;;  %v654_v14 = vmul.u32 %v650_v32, %v627_v40  ;;  %vm638_vm7 = vc.u32 %v630_v26, %v634_v11 }
  0xdf   :  { %v409_v52 = vmul.f32 %v408_v41, %v5790_v29  ;;  %v418_v30 = vxor.u32 2147483648, %v401_v45  ;;  %v534_v29 = vshrl.u32 %v516_v18, %v532_v61  ;;  %v640_v4 = vadd.s32 %v634_v11, %v630_v26 }
  0xe0   :  { %v538_v12 = vshll.u32 %v537_v16, 23  ;;  %v639_v37 = vsel %vm638_vm7, 1, %v5462_v54  ;;  %v658_v25 = vshll.u32 %v654_v14, 16  ;;  %vm660_vm9 = vc.u32 %v652_v27, %v656_v20 }
  0xe1   :  { %v415_v63 = vxor.u32 2147483648, %v409_v52  ;;  %v419_v31 = vsel %vm417_vm1, %v418_v30, %v409_v52  ;;  %v535_v23 = vor.u32 %v534_v29, %v533_v15  ;;  %vm642_vm8 = vc.u32 %v640_v4, %v636_v3 }
  0xe2   :  { %v539_v5 = vor.u32 4788187, %v538_v12  ;;  %v662_v41 = vadd.s32 %v656_v20, %v652_v27  ;;  %v643_v33 = vsel %vm642_vm8, 1, %v5462_v54  ;;  %v661_v49 = vsel %vm660_vm9, 1, %v5462_v54 }
  0xe3   :  { %v416_v19 = vsel %vm414_vm0, %v401_v45, %v415_v63  ;;  %v542_v28 = vcvt.s32.f32 %v535_v23  ;;  %v641_v45 = vadd.s32 %v639_v37, %v633_v6  ;;  %v742_v52 = vadd.s32 1, %v5319_v39 }
  0xe4   :  { %v420_v22 = vsel %vm413_vm3, %v416_v19, %v419_v31  ;;  %v540_v36 = vand.u32 2147483647, %v539_v5  ;;  %v635_v30 = vshrl.u32 %v631_v21, 16  ;;  %v663_v60 = vadd.s32 %v661_v49, %v655_v38  ;;  %v183_v49 = vpop.f32.mrf.mxu0 }
  0xe5   :  { %v421_v18 = vsel %vm410_vm4, nan, %v420_v22  ;;  %v645_v58 = vadd.s32 %v643_v33, %v641_v45  ;;  %vm664_vm10 = vc.u32 %v662_v41, %v658_v25  ;;  %v637_v62 = vshrl.u32 %v632_v17, 16 }
  0xe6   :  { %5227 = vst [vmem:[#allocation2] sm:$0xff] %v421_v18  ;;  %v543_v43 = vmul.f32 %v542_v28, %v540_v36  ;;  %v665_v7 = vsel %vm664_vm10, 1, %v5462_v54  ;;  %vm743_vm12 = vcmp.gt.s32.totalorder %v742_v52, 0  ;;  %v549_v39 = vsel %vm5869_vm6, 0, %v5844_v44 }
  0xe7   :  { %v646_v40 = vadd.s32 %v645_v58, %v635_v30  ;;  %v667_v63 = vadd.s32 %v665_v7, %v663_v60  ;;  %v744_v46 = vsel %vm743_vm12, %v742_v52, 0  ;;  %v616_v32 = vsel %vm610_vm2, %v613_v0, %v615_v10 }
  0xe8   :  { %v544_v61 = vxor.u32 2147483648, %v543_v43  ;;  %v746_v15 = vand.u32 31, %v744_v46  ;;  %v659_v17 = vshrl.u32 %v654_v14, 16  ;;  %v5893_v21 = vadd.s32 %v662_v41, %v658_v25 }
  0xe9   :  { %v5889_v16 = vadd.s32 %v646_v40, %v637_v62  ;;  %v668_v19 = vadd.s32 %v667_v63, %v657_v50  ;;  %v739_v44 = vand.u32 8388607, %v732_v56  ;;  %v566_v0 = vadd.s32 3, %v549_v39 }
  0xea   :  { %v545_v8 = vsel %vm424_vm11, %v544_v61, %v543_v43  ;;  %v5897_v48 = vsub.s32 32, %v746_v15  ;;  %v670_v22 = vmul.u32 %v5814_v47, %v616_v32  ;;  %v752_v23 = vshll.u32 %v5457_v53, %v746_v15 }
  0xeb   :  { %v5887_v29 = vsel %vm5869_vm6, %v5631_v42, %v545_v8  ;;  %v669_v1 = vadd.s32 %v668_v19, %v659_v17  ;;  %vm672_vm11 = vc.u32 %v5889_v16, %v5893_v21  ;;  %v755_v18 = vshll.u32 %v5458_v55, %v746_v15 }
  0xec   :  { %v550_v31 = vmul.f32 %v5887_v29, %v5887_v29  ;;  %v753_v26 = vshrl.u32 %v5458_v55, %v5897_v48  ;;  %v756_v11 = vshrl.u32 %v5459_v57, %v5897_v48  ;;  %v758_v27 = vshll.u32 %v5459_v57, %v746_v15 }
  0xed   :  { %v673_v24 = vadd.s32 1, %v669_v1  ;;  %v5909_v6 = vshrl.u32 %v744_v46, 5  ;;  %v759_v3 = vshrl.u32 %v5460_v59, %v5897_v48  ;;  %v749_v28 = vshll.u32 %v5456_v51, %v746_v15 }
  0xee   :  { %v551_v12 = vmul.f32 -0.001358992, %v550_v31  ;;  %v558_v10 = vmul.f32 -0.00019511016, %v550_v31  ;;  %v750_v4 = vshrl.u32 %v5457_v53, %v5897_v48  ;;  %v761_v20 = vshll.u32 %v5460_v59, %v746_v15 }
  0xef   :  { %v674_v14 = vsel %vm672_vm11, %v673_v24, %v669_v1  ;;  %v740_v25 = vor.u32 8388608, %v739_v44  ;;  %v5917_v45 = vor.u32 %v753_v26, %v752_v23  ;;  %v757_v41 = vor.u32 %v756_v11, %v755_v18 }
  0xf0   :  { %v552_v5 = vadd.f32 0.041655596, %v551_v12  ;;  %v559_v47 = vadd.f32 0.008332121, %v558_v10  ;;  %v675_v38 = vadd.s32 %v674_v14, %v670_v22  ;;  %v760_v43 = vor.u32 %v759_v3, %v758_v27 }
  0xf1   :  { %v762_v33 = vshrl.u32 %v5461_v2, %v5897_v48  ;;  %vm767_vm13 = vcmp.lt.s32.totalorder %v5909_v6, 4  ;;  %v567_v60 = vand.u32 3, %v566_v0  ;;  %v751_v61 = vor.u32 %v750_v4, %v749_v28 }
  0xf2   :  { %v553_v36 = vmul.f32 %v552_v5, %v550_v31  ;;  %v560_v37 = vmul.f32 %v559_v47, %v550_v31  ;;  %v676_v58 = vadd.s32 536870912, %v675_v38  ;;  %vm764_vm14 = vcmp.lt.s32.totalorder %v5909_v6, 1 }
  0xf3   :  { %v763_v62 = vor.u32 %v762_v33, %v761_v20  ;;  %vm766_vm15 = vcmp.lt.s32.totalorder %v5909_v6, 3  ;;  %v5925_v63 = vadd.f32 %v5623_v34, %v183_v49  ;;  %vm565_vm0 = vweird.f32 %v5631_v42 }
  0xf4   :  { %v554_v52 = vadd.f32 -0.4999988, %v553_v36  ;;  %v561_v30 = vadd.f32 -0.16666654, %v560_v37  ;;  %v677_v50 = vshrl.u32 %v676_v58, 30  ;;  %v5932_v39 = vshll.u32 %v740_v25, 8 }
  0xf5   :  { %v773_v46 = vsel %vm767_vm13, %v760_v43, 920167782  ;;  %v777_v8 = vsel %vm767_vm13, %v763_v62, 1326507024  ;;  %v776_v19 = vsel %vm764_vm14, %v5917_v45, %v757_v41  ;;  %vm568_vm1 = vcmp.lt.s32.totalorder %v567_v60, 2 }
  0xf6   :  { %v555_v7 = vmul.f32 %v554_v52, %v550_v31  ;;  %v562_v40 = vmul.f32 %v561_v30, %v550_v31  ;;  %v678_v17 = vshll.u32 %v677_v50, 30  ;;  %v772_v34 = vsel %vm764_vm14, %v751_v61, %v5917_v45 }
  0xf7   :  { %v774_v31 = vsel %vm766_vm15, %v757_v41, %v773_v46  ;;  %v778_v44 = vsel %vm766_vm15, %v760_v43, %v777_v8  ;;  %vm765_vm2 = vcmp.lt.s32.totalorder %v5909_v6, 2  ;;  %vm569_vm3 = vcmp.eq.s32.totalorder %v567_v60, 0 }
  0xf8   :  { %v556_v32 = vadd.f32 1.0, %v555_v7  ;;  %v563_v15 = vadd.f32 1.0, %v562_v40  ;;  %v679_v22 = vsub.s32 %v675_v38, %v678_v17  ;;  %vm572_vm4 = vcmp.eq.s32.totalorder %v567_v60, 2 }
  0xf9   :  { %v779_v23 = vsel %vm765_vm2, %v776_v19, %v778_v44  ;;  %v781_v12 = vand.u32 65535, %v5932_v39  ;;  %v775_v24 = vsel %vm765_vm2, %v772_v34, %v774_v31  ;;  %v782_v26 = vshrl.u32 %v5932_v39, 16 }
  0xfa   :  { %v564_v0 = vmul.f32 %v563_v15, %v5887_v29  ;;  %v573_v1 = vxor.u32 2147483648, %v556_v32  ;;  %vm680_vm5 = vcmp.lt.s32.totalorder %v679_v22, 0  ;;  %v681_v18 = vsub.s32 0, %v679_v22 }
  0xfb   :  { %v748_v29 = vshrl.u32 %v5456_v51, %v5897_v48  ;;  %v783_v11 = vand.u32 65535, %v779_v23  ;;  %v784_v27 = vshrl.u32 %v779_v23, 16  ;;  %v701_v14 = vsub.s32 4, %v677_v50 }
  0xfc   :  { %v570_v10 = vxor.u32 2147483648, %v564_v0  ;;  %v574_v47 = vsel %vm572_vm4, %v573_v1, %v564_v0  ;;  %v682_v3 = vsel %vm680_vm5, %v681_v18, %v679_v22  ;;  %vm579_vm6 = vcmp.lt.s32.totalorder %v5741_v13, 0 }
  0xfd   :  { %v683_v4 = vclz %v682_v3  ;;  %v806_v20 = vshrl.u32 %v775_v24, 16  ;;  %v786_v37 = vmul.u32 %v784_v27, %v781_v12  ;;  %v787_v38 = vmul.u32 %v783_v11, %v782_v26 }
  0xfe   :  { %v571_v5 = vsel %vm569_vm3, %v556_v32, %v570_v10  ;;  %v805_v48 = vand.u32 65535, %v775_v24  ;;  %v671_v25 = vadd.s32 %v5893_v21, %v5889_v16  ;;  %v768_v33 = vsel %vm764_vm14, %v748_v29, %v751_v61 }
  0xff   :  { %v575_v28 = vsel %vm568_vm1, %v571_v5, %v574_v47  ;;  %v5317_v43 = vadd.s32 4294967294, %v683_v4  ;;  %v769_v49 = vsel %vm767_vm13, %v757_v41, 2102212464  ;;  %v702_v52 = vsel %vm579_vm6, %v701_v14, %v677_v50 }
 0x100   :  { %v576_v36 = vsel %vm565_vm0, nan, %v575_v28  ;;  %v785_v30 = vmul.u32 %v783_v11, %v781_v12  ;;  %v788_v42 = vmul.u32 %v784_v27, %v782_v26  ;;  %v789_v58 = vshll.u32 %v786_v37, 16 }
 0x101   :  { %5228 = vst [vmem:[#allocation2 + $0x8] sm:$0xff] %v576_v36  ;;  %vm5968_vm7 = vcmp.le.f32.partialorder %v577_v9, 0.7853982  ;;  %vm5318_vm8 = vcmp.lt.s32.totalorder %v5317_v43, 0  ;;  %v790_v16 = vshrl.u32 %v786_v37, 16  ;;  %v791_v21 = vshll.u32 %v787_v38, 16 }
 0x102   :  { %v808_v61 = vmul.u32 %v806_v20, %v781_v12  ;;  %v686_v62 = vsel %vm5318_vm8, 0, %v5317_v43  ;;  %vm793_vm9 = vc.u32 %v785_v30, %v789_v58  ;;  %v795_v41 = vadd.s32 %v789_v58, %v785_v30  ;;  %v186_v43 = vpop.f32.mrf.mxu0 }
 0x103   :  { %v809_v7 = vmul.u32 %v805_v48, %v782_v26  ;;  %v687_v40 = vsub.s32 32, %v686_v62  ;;  %v691_v46 = vsub.s32 4294967266, %v686_v62  ;;  %v794_v50 = vsel %vm793_vm9, 1, %v5462_v54 }
 0x104   :  { %v807_v8 = vmul.u32 %v805_v48, %v781_v12  ;;  %v796_v32 = vadd.s32 %v794_v50, %v788_v42  ;;  %vm797_vm10 = vc.u32 %v795_v41, %v791_v21  ;;  %v810_v15 = vmul.u32 %v806_v20, %v782_v26  ;;  %v5990_v21 = vld [vmem:[%s9265_s2] ss:$0 sm:$0xff] }
 0x105   :  { %v811_v9 = vshll.u32 %v808_v61, 16  ;;  %v688_v17 = vshll.u32 %v679_v22, %v686_v62  ;;  %v689_v19 = vshrl.u32 %v671_v25, %v687_v40  ;;  %v692_v34 = vadd.s32 127, %v691_v46 }
 0x106   :  { %v798_v31 = vsel %vm797_vm10, 1, %v5462_v54  ;;  %v813_v0 = vshll.u32 %v809_v7, 16  ;;  %v890_v24 = vand.u32 2139095040, %v5925_v63  ;;  %v887_v26 = vand.u32 2147483647, %v5925_v63 }
 0x107   :  { %v800_v44 = vadd.s32 %v798_v31, %v796_v32  ;;  %vm815_vm12 = vc.u32 %v807_v8, %v811_v9  ;;  %v817_v1 = vadd.s32 %v811_v9, %v807_v8  ;;  %v690_v23 = vor.u32 %v689_v19, %v688_v17 }
 0x108   :  { %v693_v10 = vshll.u32 %v692_v34, 23  ;;  %v816_v18 = vsel %vm815_vm12, 1, %v5462_v54  ;;  %v792_v11 = vshrl.u32 %v787_v38, 16  ;;  %v891_v5 = vshrl.u32 %v890_v24, 23 }
 0x109   :  { %v801_v12 = vadd.s32 %v800_v44, %v790_v16  ;;  %v818_v29 = vadd.s32 %v816_v18, %v810_v15  ;;  %vm819_vm11 = vc.u32 %v817_v1, %v813_v0  ;;  %v704_v47 = vsel %vm5968_vm7, 0, %v702_v52 }
 0x10a   :  { %v694_v22 = vor.u32 4788187, %v693_v10  ;;  %v820_v27 = vsel %vm819_vm11, 1, %v5462_v54  ;;  %v770_v3 = vsel %vm766_vm15, %v5917_v45, %v769_v49  ;;  %v812_v14 = vshrl.u32 %v808_v61, 16 }
 0x10b   :  { %v822_v28 = vadd.s32 %v820_v27, %v818_v29  ;;  %v697_v20 = vcvt.s32.f32 %v690_v23  ;;  %v802_v36 = vadd.s32 %v801_v12, %v792_v11  ;;  %v5322_v37 = vadd.s32 4294967169, %v891_v5 }
 0x10c   :  { %v695_v4 = vand.u32 2147483647, %v694_v22  ;;  %v814_v48 = vshrl.u32 %v809_v7, 16  ;;  %v894_v38 = vand.u32 8388607, %v887_v26  ;;  %v821_v42 = vadd.s32 %v817_v1, %v813_v0 }
 0x10d   :  { %v823_v25 = vadd.s32 %v822_v28, %v812_v14  ;;  %v897_v58 = vadd.s32 1, %v5322_v37  ;;  %v721_v52 = vadd.s32 3, %v704_v47  ;;  %v771_v16 = vsel %vm765_vm2, %v768_v33, %v770_v3 }
 0x10e   :  { %v698_v30 = vmul.f32 %v697_v20, %v695_v4  ;;  %vm827_vm13 = vc.u32 %v802_v36, %v821_v42  ;;  %v5993_v61 = vadd.f32 %v5990_v21, %v186_v43  ;;  %v895_v41 = vor.u32 8388608, %v894_v38 }
 0x10f   :  { %v824_v45 = vadd.s32 %v823_v25, %v814_v48  ;;  %vm898_vm14 = vcmp.gt.s32.totalorder %v897_v58, 0  ;;  %v825_v6 = vmul.u32 %v5932_v39, %v771_v16  ;;  %v6003_v50 = vand.u32 3, %v721_v52 }
 0x110   :  { %v699_v49 = vxor.u32 2147483648, %v698_v30  ;;  %v899_v7 = vsel %vm898_vm14, %v897_v58, 0  ;;  %v1042_v17 = vand.u32 2147483647, %v5993_v61  ;;  %v6010_v19 = vadd.s32 %v821_v42, %v802_v36 }
 0x111   :  { %v828_v62 = vadd.s32 1, %v824_v45  ;;  %v901_v33 = vand.u32 31, %v899_v7  ;;  %v6013_v34 = vshll.u32 %v895_v41, 8  ;;  %v1045_v60 = vand.u32 2139095040, %v5993_v61 }
 0x112   :  { %v700_v40 = vsel %vm579_vm6, %v699_v49, %v698_v30  ;;  %v6024_v11 = vshrl.u32 %v899_v7, 5  ;;  %v6034_v20 = vand.u32 8388607, %v1042_v17  ;;  %vm734_vm15 = vcmp.lt.s32.totalorder %v5779_v35, 0 }
 0x113   :  { %v6001_v46 = vsel %vm5968_vm7, %v5741_v13, %v700_v40  ;;  %v829_v8 = vsel %vm827_vm13, %v828_v62, %v824_v45  ;;  %v6007_v9 = vsub.s32 32, %v901_v33  ;;  %v904_v39 = vshll.u32 %v5456_v51, %v901_v33 }
 0x114   :  { %v705_v32 = vmul.f32 %v6001_v46, %v6001_v46  ;;  %v830_v15 = vadd.s32 %v829_v8, %v825_v6  ;;  %v907_v1 = vshll.u32 %v5457_v53, %v901_v33  ;;  %v913_v18 = vshll.u32 %v5459_v57, %v901_v33 }
 0x115   :  { %v905_v23 = vshrl.u32 %v5457_v53, %v6007_v9  ;;  %v908_v10 = vshrl.u32 %v5458_v55, %v6007_v9  ;;  %v914_v24 = vshrl.u32 %v5460_v59, %v6007_v9  ;;  %v910_v27 = vshll.u32 %v5458_v55, %v901_v33 }
 0x116   :  { %v706_v31 = vmul.f32 -0.001358992, %v705_v32  ;;  %v713_v44 = vmul.f32 -0.00019511016, %v705_v32  ;;  %v831_v0 = vadd.s32 536870912, %v830_v15  ;;  %v911_v5 = vshrl.u32 %v5459_v57, %v6007_v9 }
 0x117   :  { %v916_v47 = vshll.u32 %v5460_v59, %v901_v33  ;;  %v917_v3 = vshrl.u32 %v5461_v2, %v6007_v9  ;;  %v906_v36 = vor.u32 %v905_v23, %v904_v39  ;;  %v6037_v37 = vor.u32 %v908_v10, %v907_v1 }
 0x118   :  { %v707_v12 = vadd.f32 0.041655596, %v706_v31  ;;  %v714_v29 = vadd.f32 0.008332121, %v713_v44  ;;  %v832_v22 = vshrl.u32 %v831_v0, 30  ;;  %v915_v48 = vor.u32 %v914_v24, %v913_v18 }
 0x119   :  { %v1046_v25 = vshrl.u32 %v1045_v60, 23  ;;  %vm727_vm0 = vcmp.eq.s32.totalorder %v6003_v50, 2  ;;  %vm919_vm1 = vcmp.lt.s32.totalorder %v6024_v11, 1  ;;  %vm724_vm2 = vcmp.eq.s32.totalorder %v6003_v50, 0 }
 0x11a   :  { %v708_v14 = vmul.f32 %v707_v12, %v705_v32  ;;  %v715_v28 = vmul.f32 %v714_v29, %v705_v32  ;;  %v833_v4 = vshll.u32 %v832_v22, 30  ;;  %v912_v42 = vor.u32 %v911_v5, %v910_v27 }
 0x11b   :  { %v918_v58 = vor.u32 %v917_v3, %v916_v47  ;;  %vm921_vm3 = vcmp.lt.s32.totalorder %v6024_v11, 3  ;;  %vm922_vm4 = vcmp.lt.s32.totalorder %v6024_v11, 4  ;;  %vm723_vm5 = vcmp.lt.s32.totalorder %v6003_v50, 2 }
 0x11c   :  { %v709_v38 = vadd.f32 -0.4999988, %v708_v14  ;;  %v716_v43 = vadd.f32 -0.16666654, %v715_v28  ;;  %v6040_v30 = vsub.s32 %v830_v15, %v833_v4  ;;  %vm720_vm7 = vweird.f32 %v5741_v13 }
 0x11d   :  { %v927_v49 = vsel %vm919_vm1, %v906_v36, %v6037_v37  ;;  %v928_v62 = vsel %vm922_vm4, %v915_v48, 920167782  ;;  %v936_v41 = vand.u32 65535, %v6013_v34  ;;  %v937_v7 = vshrl.u32 %v6013_v34, 16 }
 0x11e   :  { %v710_v52 = vmul.f32 %v709_v38, %v705_v32  ;;  %v717_v16 = vmul.f32 %v716_v43, %v705_v32  ;;  %vm835_vm6 = vcmp.lt.s32.totalorder %v6040_v30, 0  ;;  %v836_v45 = vsub.s32 0, %v6040_v30 }
 0x11f   :  { %v856_v8 = vsub.s32 4, %v832_v22  ;;  %vm920_vm8 = vcmp.lt.s32.totalorder %v6024_v11, 2  ;;  %v929_v15 = vsel %vm921_vm3, %v912_v42, %v928_v62  ;;  %v931_v39 = vsel %vm919_vm1, %v6037_v37, %v912_v42 }
 0x120   :  { %v711_v40 = vadd.f32 1.0, %v710_v52  ;;  %v718_v6 = vadd.f32 1.0, %v717_v16  ;;  %v837_v33 = vsel %vm835_vm6, %v836_v45, %v6040_v30  ;;  %v930_v44 = vsel %vm920_vm8, %v927_v49, %v929_v15 }
 0x121   :  { %v838_v32 = vclz %v837_v33  ;;  %v932_v0 = vsel %vm922_vm4, %v918_v58, 1326507024  ;;  %v903_v23 = vshrl.u32 %v5456_v51, %v6007_v9  ;;  %v5325_v10 = vadd.s32 4294967169, %v1046_v25 }
 0x122   :  { %v719_v60 = vmul.f32 %v718_v6, %v6001_v46  ;;  %v728_v31 = vxor.u32 2147483648, %v711_v40  ;;  %v1050_v18 = vor.u32 8388608, %v6034_v20  ;;  %v6074_v12 = vsel %vm734_vm15, %v856_v8, %v832_v22 }
 0x123   :  { %v5320_v1 = vadd.s32 4294967294, %v838_v32  ;;  %v924_v46 = vsel %vm922_vm4, %v912_v42, 2102212464  ;;  %v933_v29 = vsel %vm921_vm3, %v915_v48, %v932_v0  ;;  %v960_v5 = vand.u32 65535, %v930_v44 }
 0x124   :  { %v725_v24 = vxor.u32 2147483648, %v719_v60  ;;  %v729_v27 = vsel %vm727_vm0, %v728_v31, %v719_v60  ;;  %v934_v9 = vsel %vm920_vm8, %v931_v39, %v933_v29  ;;  %v961_v48 = vshrl.u32 %v930_v44, 16 }
 0x125   :  { %vm5321_vm9 = vcmp.lt.s32.totalorder %v5320_v1, 0  ;;  %v938_v22 = vand.u32 65535, %v934_v9  ;;  %v939_v14 = vshrl.u32 %v934_v9, 16  ;;  %v923_v43 = vsel %vm919_vm1, %v903_v23, %v906_v36 }
 0x126   :  { %v726_v47 = vsel %vm724_vm2, %v711_v40, %v725_v24  ;;  %v841_v3 = vsel %vm5321_vm9, 0, %v5320_v1  ;;  %vm6094_vm10 = vcmp.le.f32.partialorder %v732_v56, 0.7853982  ;;  %v925_v13 = vsel %vm921_vm3, %v6037_v37, %v924_v46 }
 0x127   :  { %v730_v28 = vsel %vm723_vm5, %v726_v47, %v729_v27  ;;  %v842_v4 = vsub.s32 32, %v841_v3  ;;  %v846_v25 = vsub.s32 4294967266, %v841_v3  ;;  %v941_v42 = vmul.u32 %v939_v14, %v936_v41 }
 0x128   :  { %v731_v38 = vsel %vm720_vm7, nan, %v730_v28  ;;  %v942_v58 = vmul.u32 %v938_v22, %v937_v7  ;;  %v843_v50 = vshll.u32 %v6040_v30, %v841_v3  ;;  %v940_v49 = vmul.u32 %v938_v22, %v936_v41 }
 0x129   :  { %v844_v16 = vshrl.u32 %v6010_v19, %v842_v4  ;;  %v847_v45 = vadd.s32 127, %v846_v25  ;;  %5229 = vst [vmem:[#allocation2 + $0x10] sm:$0xff] %v731_v38  ;;  %v943_v36 = vmul.u32 %v939_v14, %v937_v7  ;;  %v944_v62 = vshll.u32 %v941_v42, 16 }
 0x12a   :  { %v962_v40 = vmul.u32 %v960_v5, %v936_v41  ;;  %v963_v56 = vmul.u32 %v961_v48, %v936_v41  ;;  %v964_v8 = vmul.u32 %v960_v5, %v937_v7  ;;  %v946_v32 = vshll.u32 %v942_v58, 16 }
 0x12b   :  { %v845_v6 = vor.u32 %v844_v16, %v843_v50  ;;  %v848_v33 = vshll.u32 %v847_v45, 23  ;;  %vm948_vm12 = vc.u32 %v940_v49, %v944_v62  ;;  %v950_v15 = vadd.s32 %v944_v62, %v940_v49 }
 0x12c   :  { %v1052_v30 = vadd.s32 1, %v5325_v10  ;;  %v945_v19 = vshrl.u32 %v941_v42, 16  ;;  %v949_v60 = vsel %vm948_vm12, 1, %v5462_v54  ;;  %v966_v31 = vshll.u32 %v963_v56, 16 }
 0x12d   :  { %v849_v39 = vor.u32 4788187, %v848_v33  ;;  %v852_v44 = vcvt.s32.f32 %v845_v6  ;;  %v951_v37 = vadd.s32 %v949_v60, %v943_v36  ;;  %vm952_vm11 = vc.u32 %v950_v15, %v946_v32 }
 0x12e   :  { %v965_v0 = vmul.u32 %v961_v48, %v937_v7  ;;  %v953_v23 = vsel %vm952_vm11, 1, %v5462_v54  ;;  %v968_v24 = vshll.u32 %v964_v8, 16  ;;  %vm970_vm13 = vc.u32 %v962_v40, %v966_v31 }
 0x12f   :  { %v850_v1 = vand.u32 2147483647, %v849_v39  ;;  %v955_v41 = vadd.s32 %v953_v23, %v951_v37  ;;  %v971_v46 = vsel %vm970_vm13, 1, %v5462_v54  ;;  %v972_v29 = vadd.s32 %v966_v31, %v962_v40 }
 0x130   :  { %vm1053_vm14 = vcmp.gt.s32.totalorder %v1052_v30, 0  ;;  %v926_v27 = vsel %vm920_vm8, %v923_v43, %v925_v13  ;;  %v973_v9 = vadd.s32 %v971_v46, %v965_v0  ;;  %v859_v7 = vsel %vm6094_vm10, 0, %v6074_v12 }
 0x131   :  { %v853_v10 = vmul.f32 %v852_v44, %v850_v1  ;;  %v1054_v5 = vsel %vm1053_vm14, %v1052_v30, 0  ;;  %v947_v47 = vshrl.u32 %v942_v58, 16  ;;  %v956_v3 = vadd.s32 %v955_v41, %v945_v19 }
 0x132   :  { %vm974_vm0 = vc.u32 %v972_v29, %v968_v24  ;;  %v6112_v28 = vshrl.u32 %v1054_v5, 5  ;;  %v1056_v4 = vand.u32 31, %v1054_v5  ;;  %v967_v25 = vshrl.u32 %v963_v56, 16 }
 0x133   :  { %v854_v22 = vxor.u32 2147483648, %v853_v10  ;;  %v975_v14 = vsel %vm974_vm0, 1, %v5462_v54  ;;  %v969_v48 = vshrl.u32 %v964_v8, 16  ;;  %v980_v11 = vmul.u32 %v6013_v34, %v926_v27 }
 0x134   :  { %v977_v38 = vadd.s32 %v975_v14, %v973_v9  ;;  %v6117_v42 = vadd.s32 %v956_v3, %v947_v47  ;;  %v6119_v12 = vsub.s32 32, %v1056_v4  ;;  %v1059_v58 = vshll.u32 %v5456_v51, %v1056_v4  ;;  %v189_v14 = vpop.f32.mrf.mxu0 }
 0x135   :  { %v855_v43 = vsel %vm734_vm15, %v854_v22, %v853_v10  ;;  %v6125_v16 = vadd.s32 %v972_v29, %v968_v24  ;;  %v1062_v13 = vshll.u32 %v5457_v53, %v1056_v4  ;;  %vm1074_vm15 = vcmp.lt.s32.totalorder %v6112_v28, 1 }
 0x136   :  { %v858_v50 = vsel %vm6094_vm10, %v5779_v35, %v855_v43  ;;  %v978_v45 = vadd.s32 %v977_v38, %v967_v25  ;;  %v1060_v34 = vshrl.u32 %v5457_v53, %v6119_v12  ;;  %v1063_v36 = vshrl.u32 %v5458_v55, %v6119_v12 }
 0x137   :  { %v860_v49 = vmul.f32 %v858_v50, %v858_v50  ;;  %v1065_v40 = vshll.u32 %v5458_v55, %v1056_v4  ;;  %v1066_v52 = vshrl.u32 %v5459_v57, %v6119_v12  ;;  %v1068_v6 = vshll.u32 %v5459_v57, %v1056_v4 }
 0x138   :  { %v979_v62 = vadd.s32 %v978_v45, %v969_v48  ;;  %vm982_vm1 = vc.u32 %v6117_v42, %v6125_v16  ;;  %v6139_v8 = vor.u32 %v1060_v34, %v1059_v58  ;;  %v6141_v15 = vor.u32 %v1063_v36, %v1062_v13 }
 0x139   :  { %v861_v33 = vmul.f32 -0.001358992, %v860_v49  ;;  %v868_v56 = vmul.f32 -0.00019511016, %v860_v49  ;;  %v1069_v30 = vshrl.u32 %v5460_v59, %v6119_v12  ;;  %v1071_v39 = vshll.u32 %v5460_v59, %v1056_v4 }
 0x13a   :  { %v983_v32 = vadd.s32 1, %v979_v62  ;;  %v6146_v31 = vor.u32 %v1066_v52, %v1065_v40  ;;  %v1072_v44 = vshrl.u32 %v5461_v2, %v6119_v12  ;;  %vm1076_vm2 = vcmp.lt.s32.totalorder %v6112_v28, 3 }
 0x13b   :  { %v862_v19 = vadd.f32 0.041655596, %v861_v33  ;;  %v869_v60 = vadd.f32 0.008332121, %v868_v56  ;;  %v1070_v0 = vor.u32 %v1069_v30, %v1068_v6  ;;  %vm1077_vm3 = vcmp.lt.s32.totalorder %v6112_v28, 4 }
 0x13c   :  { %v984_v37 = vsel %vm982_vm1, %v983_v32, %v979_v62  ;;  %v1073_v41 = vor.u32 %v1072_v44, %v1071_v39  ;;  %v876_v46 = vadd.s32 3, %v859_v7  ;;  %v1082_v29 = vsel %vm1074_vm15, %v6139_v8, %v6141_v15 }
 0x13d   :  { %v863_v1 = vmul.f32 %v862_v19, %v860_v49  ;;  %v870_v23 = vmul.f32 %v869_v60, %v860_v49  ;;  %v985_v24 = vadd.s32 %v984_v37, %v980_v11  ;;  %v1083_v10 = vsel %vm1077_vm3, %v1070_v0, 920167782 }
 0x13e   :  { %v6160_v47 = vshll.u32 %v1050_v18, 8  ;;  %vm1075_vm4 = vcmp.lt.s32.totalorder %v6112_v28, 2  ;;  %v1084_v7 = vsel %vm1076_vm2, %v6146_v31, %v1083_v10  ;;  %v1086_v3 = vsel %vm1074_vm15, %v6141_v15, %v6146_v31 }
 0x13f   :  { %v864_v27 = vadd.f32 -0.4999988, %v863_v1  ;;  %v871_v9 = vadd.f32 -0.16666654, %v870_v23  ;;  %v986_v5 = vadd.s32 536870912, %v985_v24  ;;  %v1085_v18 = vsel %vm1075_vm4, %v1082_v29, %v1084_v7 }
 0x140   :  { %v1087_v22 = vsel %vm1077_vm3, %v1073_v41, 1326507024  ;;  %v877_v48 = vand.u32 3, %v876_v46  ;;  %v1116_v11 = vshrl.u32 %v1085_v18, 16  ;;  %v6180_v13 = vadd.f32 %v5990_v21, %v189_v14 }
 0x141   :  { %v865_v4 = vmul.f32 %v864_v27, %v860_v49  ;;  %v872_v25 = vmul.f32 %v871_v9, %v860_v49  ;;  %v6172_v20 = vshrl.u32 %v986_v5, 30  ;;  %v1088_v38 = vsel %vm1076_vm2, %v1070_v0, %v1087_v22 }
 0x142   :  { %v1089_v49 = vsel %vm1075_vm4, %v1086_v3, %v1088_v38  ;;  %v1091_v34 = vand.u32 65535, %v6160_v47  ;;  %vm875_vm5 = vweird.f32 %v5779_v35  ;;  %vm878_vm6 = vcmp.lt.s32.totalorder %v877_v48, 2 }
 0x143   :  { %v866_v43 = vadd.f32 1.0, %v865_v4  ;;  %v873_v58 = vadd.f32 1.0, %v872_v25  ;;  %v988_v45 = vshll.u32 %v6172_v20, 30  ;;  %v1093_v52 = vand.u32 65535, %v1089_v49 }
 0x144   :  { %v1094_v6 = vshrl.u32 %v1089_v49, 16  ;;  %v6186_v33 = vmul.u32 %v1116_v11, %v1091_v34  ;;  %v1092_v30 = vshrl.u32 %v6160_v47, 16  ;;  %vm879_vm8 = vcmp.eq.s32.totalorder %v877_v48, 0 }
 0x145   :  { %v874_v36 = vmul.f32 %v873_v58, %v858_v50  ;;  %v883_v62 = vxor.u32 2147483648, %v866_v43  ;;  %v989_v40 = vsub.s32 %v985_v24, %v988_v45  ;;  %vm882_vm9 = vcmp.eq.s32.totalorder %v877_v48, 2 }
 0x146   :  { %v1096_v39 = vmul.u32 %v1094_v6, %v1091_v34  ;;  %v1115_v19 = vand.u32 65535, %v1085_v18  ;;  %v1097_v37 = vmul.u32 %v1093_v52, %v1092_v30  ;;  %vm889_vm10 = vcmp.lt.s32.totalorder %v5925_v63, 0 }
 0x147   :  { %v880_v56 = vxor.u32 2147483648, %v874_v36  ;;  %vm990_vm7 = vcmp.lt.s32.totalorder %v989_v40, 0  ;;  %v991_v32 = vsub.s32 0, %v989_v40  ;;  %v884_v50 = vsel %vm882_vm9, %v883_v62, %v874_v36 }
 0x148   :  { %v1099_v23 = vshll.u32 %v1096_v39, 16  ;;  %v1121_v24 = vshll.u32 %v6186_v33, 16  ;;  %v981_v46 = vadd.s32 %v6125_v16, %v6117_v42  ;;  %v1058_v29 = vshrl.u32 %v5456_v51, %v6119_v12 }
 0x149   :  { %v881_v60 = vsel %vm879_vm8, %v866_v43, %v880_v56  ;;  %v992_v44 = vsel %vm990_vm7, %v991_v32, %v989_v40  ;;  %v1095_v10 = vmul.u32 %v1093_v52, %v1091_v34  ;;  %v1011_v9 = vsub.s32 4, %v6172_v20 }
 0x14a   :  { %v885_v0 = vsel %vm878_vm6, %v881_v60, %v884_v50  ;;  %v993_v1 = vclz %v992_v44  ;;  %v1117_v5 = vmul.u32 %v1115_v19, %v1091_v34  ;;  %v1119_v7 = vmul.u32 %v1115_v19, %v1092_v30 }
 0x14b   :  { %v886_v41 = vsel %vm875_vm5, nan, %v885_v0  ;;  %v1098_v3 = vmul.u32 %v1094_v6, %v1092_v30  ;;  %v1101_v22 = vshll.u32 %v1097_v37, 16  ;;  %vm1103_vm12 = vc.u32 %v1095_v10, %v1099_v23 }
 0x14c   :  { %v5323_v27 = vadd.s32 4294967294, %v993_v1  ;;  %5230 = vst [vmem:[#allocation2 + $0x18] sm:$0xff] %v886_v41  ;;  %v1105_v14 = vadd.s32 %v1099_v23, %v1095_v10  ;;  %v1104_v35 = vsel %vm1103_vm12, 1, %v5462_v54  ;;  %v1120_v4 = vmul.u32 %v1116_v11, %v1092_v30 }
 0x14d   :  { %vm1125_vm13 = vc.u32 %v1117_v5, %v1121_v24  ;;  %v1106_v16 = vadd.s32 %v1104_v35, %v1098_v3  ;;  %v1100_v48 = vshrl.u32 %v1096_v39, 16  ;;  %v1123_v58 = vshll.u32 %v1119_v7, 16 }
 0x14e   :  { %vm5324_vm11 = vcmp.lt.s32.totalorder %v5323_v27, 0  ;;  %vm1107_vm14 = vc.u32 %v1105_v14, %v1101_v22  ;;  %v1126_v12 = vsel %vm1125_vm13, 1, %v5462_v54  ;;  %v1127_v45 = vadd.s32 %v1121_v24, %v1117_v5 }
 0x14f   :  { %v996_v42 = vsel %vm5324_vm11, 0, %v5323_v27  ;;  %v1108_v38 = vsel %vm1107_vm14, 1, %v5462_v54  ;;  %v1128_v49 = vadd.s32 %v1126_v12, %v1120_v4  ;;  %v1079_v11 = vsel %vm1077_vm3, %v6146_v31, 2102212464 }
 0x150   :  { %v997_v25 = vsub.s32 32, %v996_v42  ;;  %v1001_v18 = vsub.s32 4294967266, %v996_v42  ;;  %v1110_v43 = vadd.s32 %v1108_v38, %v1106_v16  ;;  %v998_v34 = vshll.u32 %v989_v40, %v996_v42 }
 0x151   :  { %v1012_v52 = vsel %vm889_vm10, %v1011_v9, %v6172_v20  ;;  %vm1129_vm0 = vc.u32 %v1127_v45, %v1123_v58  ;;  %v1200_v56 = vand.u32 2139095040, %v6180_v13  ;;  %v1102_v39 = vshrl.u32 %v1097_v37, 16  ;;  %v192_v9 = vpop.f32.mrf.mxu0 }
 0x152   :  { %v999_v36 = vshrl.u32 %v981_v46, %v997_v25  ;;  %v1002_v62 = vadd.s32 127, %v1001_v18  ;;  %v1111_v6 = vadd.s32 %v1110_v43, %v1100_v48  ;;  %v1130_v19 = vsel %vm1129_vm0, 1, %v5462_v54 }
 0x153   :  { %vm6212_vm1 = vcmp.le.f32.partialorder %v887_v26, 0.7853982  ;;  %v1122_v31 = vshrl.u32 %v6186_v33, 16  ;;  %v1132_v60 = vadd.s32 %v1130_v19, %v1128_v49  ;;  %v1201_v50 = vshrl.u32 %v1200_v56, 23 }
 0x154   :  { %v1000_v32 = vor.u32 %v999_v36, %v998_v34  ;;  %v1003_v30 = vshll.u32 %v1002_v62, 23  ;;  %v1078_v44 = vsel %vm1074_vm15, %v1058_v29, %v6139_v8  ;;  %v1080_v37 = vsel %vm1076_vm2, %v6141_v15, %v1079_v11 }
 0x155   :  { %v1112_v0 = vadd.s32 %v1111_v6, %v1102_v39  ;;  %v1014_v26 = vsel %vm6212_vm1, 0, %v1012_v52  ;;  %v1124_v1 = vshrl.u32 %v1119_v7, 16  ;;  %v1133_v23 = vadd.s32 %v1132_v60, %v1122_v31 }
 0x156   :  { %v1004_v20 = vor.u32 4788187, %v1003_v30  ;;  %v5328_v24 = vadd.s32 4294967169, %v1201_v50  ;;  %v1007_v33 = vcvt.s32.f32 %v1000_v32  ;;  %v1131_v46 = vadd.s32 %v1127_v45, %v1123_v58 }
 0x157   :  { %v1197_v10 = vand.u32 2147483647, %v6180_v13  ;;  %v1081_v27 = vsel %vm1075_vm4, %v1078_v44, %v1080_v37  ;;  %v1134_v8 = vadd.s32 %v1133_v23, %v1124_v1  ;;  %v1031_v15 = vadd.s32 3, %v1014_v26 }
 0x158   :  { %v1005_v41 = vand.u32 2147483647, %v1004_v20  ;;  %v1207_v29 = vadd.s32 1, %v5328_v24  ;;  %vm1137_vm15 = vc.u32 %v1112_v0, %v1131_v46  ;;  %v1135_v7 = vmul.u32 %v6160_v47, %v1081_v27 }
 0x159   :  { %v1138_v3 = vadd.s32 1, %v1134_v8  ;;  %v1204_v14 = vand.u32 8388607, %v1197_v10  ;;  %v6232_v4 = vadd.f32 %v5990_v21, %v192_v9  ;;  %v6241_v18 = vand.u32 3, %v1031_v15 }
 0x15a   :  { %v1008_v5 = vmul.f32 %v1007_v33, %v1005_v41  ;;  %vm1208_vm2 = vcmp.gt.s32.totalorder %v1207_v29, 0  ;;  %v6248_v43 = vadd.s32 %v1131_v46, %v1112_v0  ;;  %vm1044_vm3 = vcmp.lt.s32.totalorder %v5993_v61, 0 }
 0x15b   :  { %v1209_v35 = vsel %vm1208_vm2, %v1207_v29, 0  ;;  %v1139_v28 = vsel %vm1137_vm15, %v1138_v3, %v1134_v8  ;;  %v1352_v48 = vand.u32 2147483647, %v6232_v4  ;;  %v1205_v45 = vor.u32 8388608, %v1204_v14 }
 0x15c   :  { %v1009_v22 = vxor.u32 2147483648, %v1008_v5  ;;  %v1211_v42 = vand.u32 31, %v1209_v35  ;;  %v1140_v12 = vadd.s32 %v1139_v28, %v1135_v7  ;;  %v6256_v56 = vshrl.u32 %v1209_v35, 5 }
 0x15d   :  { %v1355_v50 = vand.u32 2139095040, %v6232_v4  ;;  %v6271_v0 = vshll.u32 %v1205_v45, 8  ;;  %vm6279_vm4 = vcmp.le.f32.partialorder %v1042_v17, 0.7853982  ;;  %vm1034_vm8 = vcmp.eq.s32.totalorder %v6241_v18, 0 }
 0x15e   :  { %v1010_v16 = vsel %vm889_vm10, %v1009_v22, %v1008_v5  ;;  %v6243_v47 = vsub.s32 32, %v1211_v42  ;;  %v1141_v58 = vadd.s32 536870912, %v1140_v12  ;;  %v1214_v49 = vshll.u32 %v5456_v51, %v1211_v42 }
 0x15f   :  { %v6239_v25 = vsel %vm6212_vm1, %v5925_v63, %v1010_v16  ;;  %v1217_v36 = vshll.u32 %v5457_v53, %v1211_v42  ;;  %v1220_v32 = vshll.u32 %v5458_v55, %v1211_v42  ;;  %v1223_v39 = vshll.u32 %v5459_v57, %v1211_v42 }
 0x160   :  { %v1015_v38 = vmul.f32 %v6239_v25, %v6239_v25  ;;  %v1215_v34 = vshrl.u32 %v5457_v53, %v6243_v47  ;;  %v1218_v62 = vshrl.u32 %v5458_v55, %v6243_v47  ;;  %v1142_v6 = vshrl.u32 %v1141_v58, 30 }
 0x161   :  { %v1221_v30 = vshrl.u32 %v5459_v57, %v6243_v47  ;;  %v1224_v19 = vshrl.u32 %v5460_v59, %v6243_v47  ;;  %v1226_v37 = vshll.u32 %v5460_v59, %v1211_v42  ;;  %v1227_v24 = vshrl.u32 %v5461_v2, %v6243_v47 }
 0x162   :  { %v1016_v11 = vmul.f32 -0.001358992, %v1015_v38  ;;  %v1023_v52 = vmul.f32 -0.00019511016, %v1015_v38  ;;  %v1143_v60 = vshll.u32 %v1142_v6, 30  ;;  %v6266_v20 = vor.u32 %v1215_v34, %v1214_v49 }
 0x163   :  { %v6268_v44 = vor.u32 %v1218_v62, %v1217_v36  ;;  %v6283_v33 = vor.u32 %v1221_v30, %v1220_v32  ;;  %v1225_v46 = vor.u32 %v1224_v19, %v1223_v39  ;;  %vm1229_vm5 = vcmp.lt.s32.totalorder %v6256_v56, 1 }
 0x164   :  { %v1017_v40 = vadd.f32 0.041655596, %v1016_v11  ;;  %v1024_v31 = vadd.f32 0.008332121, %v1023_v52  ;;  %v6273_v23 = vsub.s32 %v1140_v12, %v1143_v60  ;;  %vm1232_vm6 = vcmp.lt.s32.totalorder %v6256_v56, 4 }
 0x165   :  { %vm1037_vm9 = vcmp.eq.s32.totalorder %v6241_v18, 2  ;;  %v1166_v17 = vsub.s32 4, %v1142_v6  ;;  %vm1231_vm10 = vcmp.lt.s32.totalorder %v6256_v56, 3  ;;  %v1356_v9 = vshrl.u32 %v1355_v50, 23 }
 0x166   :  { %v1018_v26 = vmul.f32 %v1017_v40, %v1015_v38  ;;  %v1025_v1 = vmul.f32 %v1024_v31, %v1015_v38  ;;  %vm1145_vm7 = vcmp.lt.s32.totalorder %v6273_v23, 0  ;;  %v1146_v29 = vsub.s32 0, %v6273_v23 }
 0x167   :  { %v6294_v5 = vand.u32 8388607, %v1352_v48  ;;  %vm1033_vm12 = vcmp.lt.s32.totalorder %v6241_v18, 2  ;;  %v1228_v7 = vor.u32 %v1227_v24, %v1226_v37  ;;  %vm1030_vm11 = vweird.f32 %v5925_v63 }
 0x168   :  { %v1019_v27 = vadd.f32 -0.4999988, %v1018_v26  ;;  %v1026_v8 = vadd.f32 -0.16666654, %v1025_v1  ;;  %v1147_v22 = vsel %vm1145_vm7, %v1146_v29, %v6273_v23  ;;  %v1237_v35 = vsel %vm1229_vm5, %v6266_v20, %v6268_v44 }
 0x169   :  { %v1148_v14 = vclz %v1147_v22  ;;  %v1238_v28 = vsel %vm1232_vm6, %v1225_v46, 920167782  ;;  %v1246_v42 = vand.u32 65535, %v6271_v0  ;;  %v1247_v58 = vshrl.u32 %v6271_v0, 16 }
 0x16a   :  { %v1020_v15 = vmul.f32 %v1019_v27, %v1015_v38  ;;  %v1027_v3 = vmul.f32 %v1026_v8, %v1015_v38  ;;  %v1239_v38 = vsel %vm1231_vm10, %v6283_v33, %v1238_v28  ;;  %v1167_v49 = vsel %vm1044_vm3, %v1166_v17, %v1142_v6 }
 0x16b   :  { %v5326_v45 = vadd.s32 4294967294, %v1148_v14  ;;  %vm1230_vm13 = vcmp.lt.s32.totalorder %v6256_v56, 2  ;;  %v1241_v34 = vsel %vm1229_vm5, %v6268_v44, %v6283_v33  ;;  %v1242_v52 = vsel %vm1232_vm6, %v1228_v7, 1326507024 }
 0x16c   :  { %v1021_v16 = vadd.f32 1.0, %v1020_v15  ;;  %v1028_v12 = vadd.f32 1.0, %v1027_v3  ;;  %v1240_v11 = vsel %vm1230_vm13, %v1237_v35, %v1239_v38  ;;  %v1243_v6 = vsel %vm1231_vm10, %v1225_v46, %v1242_v52 }
 0x16d   :  { %vm5327_vm14 = vcmp.lt.s32.totalorder %v5326_v45, 0  ;;  %v1271_v32 = vshrl.u32 %v1240_v11, 16  ;;  %v5331_v30 = vadd.s32 4294967169, %v1356_v9  ;;  %v1169_v40 = vsel %vm6279_vm4, 0, %v1167_v49 }
 0x16e   :  { %v1029_v36 = vmul.f32 %v1028_v12, %v6239_v25  ;;  %v1038_v62 = vxor.u32 2147483648, %v1021_v16  ;;  %v1151_v19 = vsel %vm5327_vm14, 0, %v5326_v45  ;;  %v1244_v25 = vsel %vm1230_vm13, %v1241_v34, %v1243_v6 }
 0x16f   :  { %v1152_v31 = vsub.s32 32, %v1151_v19  ;;  %v1156_v60 = vsub.s32 4294967266, %v1151_v19  ;;  %v1248_v50 = vand.u32 65535, %v1244_v25  ;;  %v1270_v37 = vand.u32 65535, %v1240_v11 }
 0x170   :  { %v1035_v39 = vxor.u32 2147483648, %v1029_v36  ;;  %v1039_v1 = vsel %vm1037_vm9, %v1038_v62, %v1029_v36  ;;  %v1153_v24 = vshll.u32 %v6273_v23, %v1151_v19  ;;  %v1249_v46 = vshrl.u32 %v1244_v25, 16 }
 0x171   :  { %v1154_v8 = vshrl.u32 %v6248_v43, %v1152_v31  ;;  %v1157_v29 = vadd.s32 127, %v1156_v60  ;;  %v1273_v17 = vmul.u32 %v1271_v32, %v1246_v42  ;;  %v1213_v15 = vshrl.u32 %v5456_v51, %v6243_v47 }
 0x172   :  { %v1036_v26 = vsel %vm1034_vm8, %v1021_v16, %v1035_v39  ;;  %v1251_v3 = vmul.u32 %v1249_v46, %v1246_v42  ;;  %v1252_v22 = vmul.u32 %v1248_v50, %v1247_v58  ;;  %v1186_v35 = vadd.s32 3, %v1169_v40 }
 0x173   :  { %v1040_v27 = vsel %vm1033_vm12, %v1036_v26, %v1039_v1  ;;  %v1155_v7 = vor.u32 %v1154_v8, %v1153_v24  ;;  %v1158_v14 = vshll.u32 %v1157_v29, 23  ;;  %v1274_v23 = vmul.u32 %v1270_v37, %v1247_v58  ;;  %v195_v26 = vpop.f32.mrf.mxu1 }
 0x174   :  { %v1041_v9 = vsel %vm1030_vm11, nan, %v1040_v27  ;;  %v1250_v28 = vmul.u32 %v1248_v50, %v1246_v42  ;;  %v1253_v18 = vmul.u32 %v1249_v46, %v1247_v58  ;;  %v1254_v16 = vshll.u32 %v1251_v3, 16 }
 0x175   :  { %5231 = vst [vmem:[#allocation2 + $0x20] sm:$0xff] %v1041_v9  ;;  %v1272_v12 = vmul.u32 %v1270_v37, %v1246_v42  ;;  %v1159_v43 = vor.u32 4788187, %v1158_v14  ;;  %v1256_v38 = vshll.u32 %v1252_v22, 16  ;;  %v1275_v45 = vmul.u32 %v1271_v32, %v1247_v58 }
 0x176   :  { %v1276_v49 = vshll.u32 %v1273_v17, 16  ;;  %v1162_v63 = vcvt.s32.f32 %v1155_v7  ;;  %vm1258_vm0 = vc.u32 %v1250_v28, %v1254_v16  ;;  %v1260_v34 = vadd.s32 %v1254_v16, %v1250_v28 }
 0x177   :  { %v1278_v36 = vshll.u32 %v1274_v23, 16  ;;  %v1160_v47 = vand.u32 2147483647, %v1159_v43  ;;  %v1259_v62 = vsel %vm1258_vm0, 1, %v5462_v54  ;;  %v1234_v52 = vsel %vm1232_vm6, %v6283_v33, 2102212464 }
 0x178   :  { %vm1280_vm1 = vc.u32 %v1272_v12, %v1276_v49  ;;  %v1282_v11 = vadd.s32 %v1276_v49, %v1272_v12  ;;  %v1261_v6 = vadd.s32 %v1259_v62, %v1253_v18  ;;  %vm1262_vm15 = vc.u32 %v1260_v34, %v1256_v38 }
 0x179   :  { %v1281_v42 = vsel %vm1280_vm1, 1, %v5462_v54  ;;  %v1163_v39 = vmul.f32 %v1162_v63, %v1160_v47  ;;  %v1263_v58 = vsel %vm1262_vm15, 1, %v5462_v54  ;;  %v1255_v19 = vshrl.u32 %v1251_v3, 16 }
 0x17a   :  { %v1283_v32 = vadd.s32 %v1281_v42, %v1275_v45  ;;  %vm1284_vm2 = vc.u32 %v1282_v11, %v1278_v36  ;;  %v1265_v40 = vadd.s32 %v1263_v58, %v1261_v6  ;;  %v1362_v31 = vadd.s32 1, %v5331_v30 }
 0x17b   :  { %v1285_v25 = vsel %vm1284_vm2, 1, %v5462_v54  ;;  %v1164_v60 = vxor.u32 2147483648, %v1163_v39  ;;  %v1233_v50 = vsel %vm1229_vm5, %v1213_v15, %v6266_v20  ;;  %v1277_v33 = vshrl.u32 %v1273_v17, 16 }
 0x17c   :  { %v1287_v37 = vadd.s32 %v1285_v25, %v1283_v32  ;;  %v1235_v1 = vsel %vm1231_vm10, %v6268_v44, %v1234_v52  ;;  %v1257_v24 = vshrl.u32 %v1252_v22, 16  ;;  %v1266_v46 = vadd.s32 %v1265_v40, %v1255_v19 }
 0x17d   :  { %vm1363_vm6 = vcmp.gt.s32.totalorder %v1362_v31, 0  ;;  %v1165_v27 = vsel %vm1044_vm3, %v1164_v60, %v1163_v39  ;;  %v1279_v8 = vshrl.u32 %v1274_v23, 16  ;;  %v6360_v9 = vadd.s32 %v1282_v11, %v1278_v36 }
 0x17e   :  { %v1288_v30 = vadd.s32 %v1287_v37, %v1277_v33  ;;  %v1364_v29 = vsel %vm1363_vm6, %v1362_v31, 0  ;;  %v1168_v20 = vsel %vm6279_vm4, %v5993_v61, %v1165_v27  ;;  %v6358_v17 = vadd.s32 %v1266_v46, %v1257_v24 }
 0x17f   :  { %v1366_v15 = vand.u32 31, %v1364_v29  ;;  %v6363_v44 = vadd.f32 %v5990_v21, %v195_v26  ;;  %v1170_v3 = vmul.f32 %v1168_v20, %v1168_v20  ;;  %v1236_v22 = vsel %vm1230_vm13, %v1233_v50, %v1235_v1 }
 0x180   :  { %v1289_v7 = vadd.s32 %v1288_v30, %v1279_v8  ;;  %v6367_v14 = vand.u32 3, %v1186_v35  ;;  %vm1292_vm3 = vc.u32 %v6358_v17, %v6360_v9  ;;  %v1360_v41 = vor.u32 8388608, %v6294_v5 }
 0x181   :  { %v1367_v23 = vsub.s32 32, %v1366_v15  ;;  %v1171_v28 = vmul.f32 -0.001358992, %v1170_v3  ;;  %v1178_v18 = vmul.f32 -0.00019511016, %v1170_v3  ;;  %v1369_v12 = vshll.u32 %v5456_v51, %v1366_v15 }
 0x182   :  { %v1293_v16 = vadd.s32 1, %v1289_v7  ;;  %v1290_v21 = vmul.u32 %v6271_v0, %v1236_v22  ;;  %v1372_v56 = vshll.u32 %v5457_v53, %v1366_v15  ;;  %v6377_v63 = vshrl.u32 %v1364_v29, 5 }
 0x183   :  { %v1370_v43 = vshrl.u32 %v5457_v53, %v1367_v23  ;;  %v1373_v35 = vshrl.u32 %v5458_v55, %v1367_v23  ;;  %v1172_v38 = vadd.f32 0.041655596, %v1171_v28  ;;  %v1179_v45 = vadd.f32 0.008332121, %v1178_v18 }
 0x184   :  { %v1294_v49 = vsel %vm1292_vm3, %v1293_v16, %v1289_v7  ;;  %v1375_v34 = vshll.u32 %v5458_v55, %v1366_v15  ;;  %v1376_v36 = vshrl.u32 %v5459_v57, %v1367_v23  ;;  %v1378_v47 = vshll.u32 %v5459_v57, %v1366_v15 }
 0x185   :  { %v1295_v5 = vadd.s32 %v1294_v49, %v1290_v21  ;;  %v1173_v62 = vmul.f32 %v1172_v38, %v1170_v3  ;;  %v1180_v0 = vmul.f32 %v1179_v45, %v1170_v3  ;;  %v6382_v11 = vor.u32 %v1370_v43, %v1369_v12 }
 0x186   :  { %v1379_v52 = vshrl.u32 %v5460_v59, %v1367_v23  ;;  %v6385_v42 = vor.u32 %v1373_v35, %v1372_v56  ;;  %v1381_v39 = vshll.u32 %v5460_v59, %v1366_v15  ;;  %v1382_v58 = vshrl.u32 %v5461_v2, %v1367_v23 }
 0x187   :  { %v1296_v6 = vadd.s32 536870912, %v1295_v5  ;;  %v1174_v32 = vadd.f32 -0.4999988, %v1173_v62  ;;  %v1181_v19 = vadd.f32 -0.16666654, %v1180_v0  ;;  %vm1384_vm4 = vcmp.lt.s32.totalorder %v6377_v63, 1 }
 0x188   :  { %v1380_v40 = vor.u32 %v1379_v52, %v1378_v47  ;;  %v1377_v31 = vor.u32 %v1376_v36, %v1375_v34  ;;  %vm1387_vm5 = vcmp.lt.s32.totalorder %v6377_v63, 4  ;;  %v1510_v60 = vand.u32 2139095040, %v6363_v44 }
 0x189   :  { %v6390_v25 = vshrl.u32 %v1296_v6, 30  ;;  %v1175_v50 = vmul.f32 %v1174_v32, %v1170_v3  ;;  %v1182_v33 = vmul.f32 %v1181_v19, %v1170_v3  ;;  %vm1188_vm7 = vcmp.lt.s32.totalorder %v6367_v14, 2 }
 0x18a   :  { %vm1189_vm8 = vcmp.eq.s32.totalorder %v6367_v14, 0  ;;  %vm1386_vm9 = vcmp.lt.s32.totalorder %v6377_v63, 3  ;;  %vm1185_vm10 = vweird.f32 %v5993_v61  ;;  %v1383_v26 = vor.u32 %v1382_v58, %v1381_v39 }
 0x18b   :  { %v1298_v37 = vshll.u32 %v6390_v25, 30  ;;  %v1392_v1 = vsel %vm1384_vm4, %v6382_v11, %v6385_v42  ;;  %v6403_v24 = vshll.u32 %v1360_v41, 8  ;;  %v1176_v46 = vadd.f32 1.0, %v1175_v50 }
 0x18c   :  { %v1183_v27 = vadd.f32 1.0, %v1182_v33  ;;  %vm1192_vm12 = vcmp.eq.s32.totalorder %v6367_v14, 2  ;;  %v1393_v8 = vsel %vm1387_vm5, %v1380_v40, 920167782  ;;  %vm1385_vm11 = vcmp.lt.s32.totalorder %v6377_v63, 2 }
 0x18d   :  { %v6408_v30 = vsub.s32 %v1295_v5, %v1298_v37  ;;  %v1394_v29 = vsel %vm1386_vm9, %v1377_v31, %v1393_v8  ;;  %v1511_v15 = vshrl.u32 %v1510_v60, 23  ;;  %v1193_v22 = vxor.u32 2147483648, %v1176_v46 }
 0x18e   :  { %v1184_v3 = vmul.f32 %v1183_v27, %v1168_v20  ;;  %v1395_v7 = vsel %vm1385_vm11, %v1392_v1, %v1394_v29  ;;  %v1396_v41 = vsel %vm1384_vm4, %v6385_v42, %v1377_v31  ;;  %v1397_v18 = vsel %vm1387_vm5, %v1383_v26, 1326507024 }
 0x18f   :  { %vm1300_vm13 = vcmp.lt.s32.totalorder %v6408_v30, 0  ;;  %v1301_v28 = vsub.s32 0, %v6408_v30  ;;  %v1401_v16 = vand.u32 65535, %v6403_v24  ;;  %v1368_v20 = vshrl.u32 %v5456_v51, %v1367_v23 }
 0x190   :  { %v1190_v12 = vxor.u32 2147483648, %v1184_v3  ;;  %v1398_v21 = vsel %vm1386_vm9, %v1380_v40, %v1397_v18  ;;  %v1402_v43 = vshrl.u32 %v6403_v24, 16  ;;  %v1194_v56 = vsel %vm1192_vm12, %v1193_v22, %v1184_v3 }
 0x191   :  { %v1302_v35 = vsel %vm1300_vm13, %v1301_v28, %v6408_v30  ;;  %v1399_v38 = vsel %vm1385_vm11, %v1396_v41, %v1398_v21  ;;  %v1426_v45 = vshrl.u32 %v1395_v7, 16  ;;  %v1389_v47 = vsel %vm1387_vm5, %v1377_v31, 2102212464 }
 0x192   :  { %v1191_v49 = vsel %vm1189_vm8, %v1176_v46, %v1190_v12  ;;  %v1303_v5 = vclz %v1302_v35  ;;  %v1403_v34 = vand.u32 65535, %v1399_v38  ;;  %v1404_v23 = vshrl.u32 %v1399_v38, 16 }
 0x193   :  { %v1195_v36 = vsel %vm1188_vm7, %v1191_v49, %v1194_v56  ;;  %v1425_v62 = vand.u32 65535, %v1395_v7  ;;  %v5334_v0 = vadd.s32 4294967169, %v1511_v15  ;;  %v1291_v6 = vadd.s32 %v6360_v9, %v6358_v17 }
 0x194   :  { %v1196_v52 = vsel %vm1185_vm10, nan, %v1195_v36  ;;  %v5329_v39 = vadd.s32 4294967294, %v1303_v5  ;;  %v1406_v58 = vmul.u32 %v1404_v23, %v1401_v16  ;;  %vm1199_vm14 = vcmp.lt.s32.totalorder %v6180_v13, 0 }
 0x195   :  { %v1321_v32 = vsub.s32 4, %v6390_v25  ;;  %v1388_v14 = vsel %vm1384_vm4, %v1368_v20, %v6382_v11  ;;  %v1407_v19 = vmul.u32 %v1403_v34, %v1402_v43  ;;  %v1428_v40 = vmul.u32 %v1426_v45, %v1401_v16  ;;  %5232 = vst [vmem:[#allocation2 + $0x28] sm:$0xff] %v1196_v52 }
 0x196   :  { %vm5330_vm0 = vcmp.lt.s32.totalorder %v5329_v39, 0  ;;  %v1390_v61 = vsel %vm1386_vm9, %v6385_v42, %v1389_v47  ;;  %v1405_v31 = vmul.u32 %v1403_v34, %v1401_v16  ;;  %v1409_v17 = vshll.u32 %v1406_v58, 16 }
 0x197   :  { %v1306_v9 = vsel %vm5330_vm0, 0, %v5329_v39  ;;  %v1408_v60 = vmul.u32 %v1404_v23, %v1402_v43  ;;  %v1427_v50 = vmul.u32 %v1425_v62, %v1401_v16  ;;  %v1429_v33 = vmul.u32 %v1425_v62, %v1402_v43 }
 0x198   :  { %v1307_v37 = vsub.s32 32, %v1306_v9  ;;  %v1311_v26 = vsub.s32 4294967266, %v1306_v9  ;;  %v1411_v1 = vshll.u32 %v1407_v19, 16  ;;  %vm1413_vm1 = vc.u32 %v1405_v31, %v1409_v17 }
 0x199   :  { %vm6452_vm15 = vcmp.le.f32.partialorder %v1197_v10, 0.7853982  ;;  %v1414_v46 = vsel %vm1413_vm1, 1, %v5462_v54  ;;  %v1415_v27 = vadd.s32 %v1409_v17, %v1405_v31  ;;  %v1430_v42 = vmul.u32 %v1426_v45, %v1402_v43 }
 0x19a   :  { %v1431_v8 = vshll.u32 %v1428_v40, 16  ;;  %v1308_v29 = vshll.u32 %v6408_v30, %v1306_v9  ;;  %v1309_v15 = vshrl.u32 %v1291_v6, %v1307_v37  ;;  %v1312_v3 = vadd.s32 127, %v1311_v26 }
 0x19b   :  { %v1416_v22 = vadd.s32 %v1414_v46, %v1408_v60  ;;  %vm1417_vm2 = vc.u32 %v1415_v27, %v1411_v1  ;;  %v1433_v7 = vshll.u32 %v1429_v33, 16  ;;  %v1410_v12 = vshrl.u32 %v1406_v58, 16 }
 0x19c   :  { %vm1435_vm6 = vc.u32 %v1427_v50, %v1431_v8  ;;  %v1437_v41 = vadd.s32 %v1431_v8, %v1427_v50  ;;  %v1310_v28 = vor.u32 %v1309_v15, %v1308_v29  ;;  %v1313_v18 = vshll.u32 %v1312_v3, 23  ;;  %v198_v3 = vpop.f32.mrf.mxu1 }
 0x19d   :  { %v1418_v10 = vsel %vm1417_vm2, 1, %v5462_v54  ;;  %v1436_v16 = vsel %vm1435_vm6, 1, %v5462_v54  ;;  %v1322_v30 = vsel %vm1199_vm14, %v1321_v32, %v6390_v25  ;;  %v1412_v56 = vshrl.u32 %v1407_v19, 16 }
 0x19e   :  { %v1420_v20 = vadd.s32 %v1418_v10, %v1416_v22  ;;  %v1438_v21 = vadd.s32 %v1436_v16, %v1430_v42  ;;  %vm1439_vm3 = vc.u32 %v1437_v41, %v1433_v7  ;;  %v1314_v43 = vor.u32 4788187, %v1313_v18 }
 0x19f   :  { %v1440_v35 = vsel %vm1439_vm3, 1, %v5462_v54  ;;  %v1432_v45 = vshrl.u32 %v1428_v40, 16  ;;  %v1517_v5 = vadd.s32 1, %v5334_v0  ;;  %v1317_v23 = vcvt.s32.f32 %v1310_v28 }
 0x1a0   :  { %v1421_v38 = vadd.s32 %v1420_v20, %v1410_v12  ;;  %v1442_v49 = vadd.s32 %v1440_v35, %v1438_v21  ;;  %v1315_v34 = vand.u32 2147483647, %v1314_v43  ;;  %v1391_v36 = vsel %vm1385_vm11, %v1388_v14, %v1390_v61 }
 0x1a1   :  { %v1507_v47 = vand.u32 2147483647, %v6363_v44  ;;  %v1434_v52 = vshrl.u32 %v1429_v33, 16  ;;  %vm1518_vm4 = vcmp.gt.s32.totalorder %v1517_v5, 0  ;;  %v1324_v39 = vsel %vm6452_vm15, 0, %v1322_v30 }
 0x1a2   :  { %v6467_v62 = vadd.s32 %v1421_v38, %v1412_v56  ;;  %v1443_v6 = vadd.s32 %v1442_v49, %v1432_v45  ;;  %v1318_v25 = vmul.f32 %v1317_v23, %v1315_v34  ;;  %v6471_v58 = vadd.s32 %v1437_v41, %v1433_v7  ;;  %v6516_v30 = vld [vmem:[%s9265_s2] ss:$0 sm:$0xff] }
 0x1a3   :  { %v1519_v32 = vsel %vm1518_vm4, %v1517_v5, 0  ;;  %v1341_v14 = vadd.s32 3, %v1324_v39  ;;  %v1445_v40 = vmul.u32 %v6403_v24, %v1391_v36  ;;  %v1514_v31 = vand.u32 8388607, %v1507_v47 }
 0x1a4   :  { %v1444_v0 = vadd.s32 %v1443_v6, %v1434_v52  ;;  %v1319_v19 = vxor.u32 2147483648, %v1318_v25  ;;  %vm1447_vm5 = vc.u32 %v6467_v62, %v6471_v58  ;;  %v1521_v63 = vand.u32 31, %v1519_v32 }
 0x1a5   :  { %v6480_v9 = vshrl.u32 %v1519_v32, 5  ;;  %v1515_v28 = vor.u32 8388608, %v1514_v31  ;;  %v6519_v56 = vadd.f32 %v6516_v30, %v198_v3  ;;  %v1342_v34 = vand.u32 3, %v1341_v14 }
 0x1a6   :  { %v1448_v61 = vadd.s32 1, %v1444_v0  ;;  %v1320_v17 = vsel %vm1199_vm14, %v1319_v19, %v1318_v25  ;;  %v6482_v60 = vsub.s32 32, %v1521_v63  ;;  %v1527_v50 = vshll.u32 %v5457_v53, %v1521_v63 }
 0x1a7   :  { %v6488_v33 = vsel %vm6452_vm15, %v6180_v13, %v1320_v17  ;;  %v1530_v24 = vshll.u32 %v5458_v55, %v1521_v63  ;;  %v1533_v26 = vshll.u32 %v5459_v57, %v1521_v63  ;;  %v1524_v27 = vshll.u32 %v5456_v51, %v1521_v63 }
 0x1a8   :  { %v1449_v37 = vsel %vm1447_vm5, %v1448_v61, %v1444_v0  ;;  %v1325_v1 = vmul.f32 %v6488_v33, %v6488_v33  ;;  %v1525_v42 = vshrl.u32 %v5457_v53, %v6482_v60  ;;  %v1528_v8 = vshrl.u32 %v5458_v55, %v6482_v60 }
 0x1a9   :  { %v1450_v46 = vadd.s32 %v1449_v37, %v1445_v40  ;;  %v1531_v11 = vshrl.u32 %v5459_v57, %v6482_v60  ;;  %v1534_v29 = vshrl.u32 %v5460_v59, %v6482_v60  ;;  %v1536_v15 = vshll.u32 %v5460_v59, %v1521_v63 }
 0x1aa   :  { %v1326_v22 = vmul.f32 -0.001358992, %v1325_v1  ;;  %v1333_v7 = vmul.f32 -0.00019511016, %v1325_v1  ;;  %v6504_v18 = vor.u32 %v1528_v8, %v1527_v50  ;;  %v1537_v12 = vshrl.u32 %v5461_v2, %v6482_v60 }
 0x1ab   :  { %v1451_v41 = vadd.s32 536870912, %v1450_v46  ;;  %v6506_v10 = vor.u32 %v1531_v11, %v1530_v24  ;;  %v1535_v16 = vor.u32 %v1534_v29, %v1533_v26  ;;  %vm1542_vm7 = vcmp.lt.s32.totalorder %v6480_v9, 4 }
 0x1ac   :  { %v1327_v20 = vadd.f32 0.041655596, %v1326_v22  ;;  %v1334_v21 = vadd.f32 0.008332121, %v1333_v7  ;;  %v6521_v35 = vor.u32 %v1525_v42, %v1524_v27  ;;  %v1538_v38 = vor.u32 %v1537_v12, %v1536_v15 }
 0x1ad   :  { %v6510_v43 = vshrl.u32 %v1451_v41, 30  ;;  %vm1539_vm8 = vcmp.lt.s32.totalorder %v6480_v9, 1  ;;  %vm1541_vm9 = vcmp.lt.s32.totalorder %v6480_v9, 3  ;;  %v1548_v23 = vsel %vm1542_vm7, %v1535_v16, 920167782 }
 0x1ae   :  { %v1328_v45 = vmul.f32 %v1327_v20, %v1325_v1  ;;  %v1335_v49 = vmul.f32 %v1334_v21, %v1325_v1  ;;  %v1552_v36 = vsel %vm1542_vm7, %v1538_v38, 1326507024  ;;  %v6530_v52 = vshll.u32 %v1515_v28, 8 }
 0x1af   :  { %v1453_v5 = vshll.u32 %v6510_v43, 30  ;;  %v1551_v32 = vsel %vm1539_vm8, %v6504_v18, %v6506_v10  ;;  %vm1540_vm10 = vcmp.lt.s32.totalorder %v6480_v9, 2  ;;  %v1547_v0 = vsel %vm1539_vm8, %v6521_v35, %v6504_v18 }
 0x1b0   :  { %v1329_v6 = vadd.f32 -0.4999988, %v1328_v45  ;;  %v1336_v25 = vadd.f32 -0.16666654, %v1335_v49  ;;  %v1549_v19 = vsel %vm1541_vm9, %v6506_v10, %v1548_v23  ;;  %v1553_v63 = vsel %vm1541_vm9, %v1535_v16, %v1552_v36 }
 0x1b1   :  { %v1454_v39 = vsub.s32 %v1450_v46, %v1453_v5  ;;  %vm1340_vm11 = vweird.f32 %v6180_v13  ;;  %vm1343_vm13 = vcmp.lt.s32.totalorder %v1342_v34, 2  ;;  %vm1344_vm14 = vcmp.eq.s32.totalorder %v1342_v34, 0 }
 0x1b2   :  { %v1330_v14 = vmul.f32 %v1329_v6, %v1325_v1  ;;  %v1337_v40 = vmul.f32 %v1336_v25, %v1325_v1  ;;  %vm1347_vm0 = vcmp.eq.s32.totalorder %v1342_v34, 2  ;;  %v1554_v31 = vsel %vm1540_vm10, %v1551_v32, %v1553_v63 }
 0x1b3   :  { %vm1455_vm12 = vcmp.lt.s32.totalorder %v1454_v39, 0  ;;  %v1456_v61 = vsub.s32 0, %v1454_v39  ;;  %v1558_v24 = vand.u32 65535, %v1554_v31  ;;  %v1550_v46 = vsel %vm1540_vm10, %v1547_v0, %v1549_v19 }
 0x1b4   :  { %v1331_v17 = vadd.f32 1.0, %v1330_v14  ;;  %v1338_v50 = vadd.f32 1.0, %v1337_v40  ;;  %v1557_v1 = vshrl.u32 %v6530_v52, 16  ;;  %v1559_v27 = vshrl.u32 %v1554_v31, 16 }
 0x1b5   :  { %v1457_v37 = vsel %vm1455_vm12, %v1456_v61, %v1454_v39  ;;  %v1556_v11 = vand.u32 65535, %v6530_v52  ;;  %v1665_v29 = vand.u32 2139095040, %v6519_v56  ;;  %v1446_v15 = vadd.s32 %v6471_v58, %v6467_v62 }
 0x1b6   :  { %v1458_v26 = vclz %v1457_v37  ;;  %v1339_v42 = vmul.f32 %v1338_v50, %v6488_v33  ;;  %v1348_v8 = vxor.u32 2147483648, %v1331_v17  ;;  %v1523_v22 = vshrl.u32 %v5456_v51, %v6482_v60 }
 0x1b7   :  { %v1562_v7 = vmul.u32 %v1558_v24, %v1557_v1  ;;  %v1476_v28 = vsub.s32 4, %v6510_v43  ;;  %v1561_v16 = vmul.u32 %v1559_v27, %v1556_v11  ;;  %v1580_v12 = vand.u32 65535, %v1550_v46 }
 0x1b8   :  { %v5332_v3 = vadd.s32 4294967294, %v1458_v26  ;;  %v1345_v41 = vxor.u32 2147483648, %v1339_v42  ;;  %v1349_v33 = vsel %vm1347_vm0, %v1348_v8, %v1339_v42  ;;  %vm1354_vm1 = vcmp.lt.s32.totalorder %v6232_v4, 0 }
 0x1b9   :  { %v1560_v20 = vmul.u32 %v1558_v24, %v1556_v11  ;;  %v1581_v21 = vshrl.u32 %v1550_v46, 16  ;;  %v1563_v58 = vmul.u32 %v1559_v27, %v1557_v1  ;;  %v1564_v45 = vshll.u32 %v1561_v16, 16 }
 0x1ba   :  { %vm5333_vm15 = vcmp.lt.s32.totalorder %v5332_v3, 0  ;;  %v1346_v38 = vsel %vm1344_vm14, %v1331_v17, %v1345_v41  ;;  %v1566_v23 = vshll.u32 %v1562_v7, 16  ;;  %v1582_v40 = vmul.u32 %v1580_v12, %v1556_v11 }
 0x1bb   :  { %v1461_v62 = vsel %vm5333_vm15, 0, %v5332_v3  ;;  %v1350_v60 = vsel %vm1343_vm13, %v1346_v38, %v1349_v33  ;;  %vm1568_vm2 = vc.u32 %v1560_v20, %v1564_v45  ;;  %v1570_v25 = vadd.s32 %v1564_v45, %v1560_v20 }
 0x1bc   :  { %v1462_v49 = vsub.s32 32, %v1461_v62  ;;  %v1466_v5 = vsub.s32 4294967266, %v1461_v62  ;;  %v1351_v36 = vsel %vm1340_vm11, nan, %v1350_v60  ;;  %v1463_v6 = vshll.u32 %v1454_v39, %v1461_v62 }
 0x1bd   :  { %v1569_v19 = vsel %vm1568_vm2, 1, %v5462_v54  ;;  %v1583_v63 = vmul.u32 %v1581_v21, %v1556_v11  ;;  %5233 = vst [vmem:[#allocation2 + $0x30] sm:$0xff] %v1351_v36  ;;  %vm1572_vm6 = vc.u32 %v1570_v25, %v1566_v23  ;;  %v1584_v34 = vmul.u32 %v1580_v12, %v1557_v1 }
 0x1be   :  { %v1464_v32 = vshrl.u32 %v1446_v15, %v1462_v49  ;;  %v1467_v0 = vadd.s32 127, %v1466_v5  ;;  %v1571_v14 = vadd.s32 %v1569_v19, %v1563_v58  ;;  %v1573_v17 = vsel %vm1572_vm6, 1, %v5462_v54 }
 0x1bf   :  { %v1586_v50 = vshll.u32 %v1583_v63, 16  ;;  %v1544_v13 = vsel %vm1542_vm7, %v6506_v10, 2102212464  ;;  %v1565_v39 = vshrl.u32 %v1561_v16, 16  ;;  %v1585_v24 = vmul.u32 %v1581_v21, %v1557_v1 }
 0x1c0   :  { %v1465_v61 = vor.u32 %v1464_v32, %v1463_v6  ;;  %v1468_v31 = vshll.u32 %v1467_v0, 23  ;;  %v1575_v37 = vadd.s32 %v1573_v17, %v1571_v14  ;;  %v1588_v46 = vshll.u32 %v1584_v34, 16 }
 0x1c1   :  { %vm1590_vm3 = vc.u32 %v1582_v40, %v1586_v50  ;;  %v1592_v27 = vadd.s32 %v1586_v50, %v1582_v40  ;;  %v1477_v42 = vsel %vm1354_vm1, %v1476_v28, %v6510_v43  ;;  %v1666_v15 = vshrl.u32 %v1665_v29, 23 }
 0x1c2   :  { %v1469_v26 = vor.u32 4788187, %v1468_v31  ;;  %v1576_v8 = vadd.s32 %v1575_v37, %v1565_v39  ;;  %v1591_v11 = vsel %vm1590_vm3, 1, %v5462_v54  ;;  %v1472_v41 = vcvt.s32.f32 %v1465_v61 }
 0x1c3   :  { %v1593_v12 = vadd.s32 %v1591_v11, %v1585_v24  ;;  %vm1594_vm4 = vc.u32 %v1592_v27, %v1588_v46  ;;  %vm6577_vm5 = vcmp.le.f32.partialorder %v1352_v48, 0.7853982  ;;  %v1567_v1 = vshrl.u32 %v1562_v7, 16 }
 0x1c4   :  { %v1470_v3 = vand.u32 2147483647, %v1469_v26  ;;  %v1595_v16 = vsel %vm1594_vm4, 1, %v5462_v54  ;;  %v5337_v33 = vadd.s32 4294967169, %v1666_v15  ;;  %v1479_v43 = vsel %vm6577_vm5, 0, %v1477_v42  ;;  %v201_v26 = vpop.f32.mrf.mxu1 }
 0x1c5   :  { %v1587_v28 = vshrl.u32 %v1583_v63, 16  ;;  %v1597_v29 = vadd.s32 %v1595_v16, %v1593_v12  ;;  %v1543_v21 = vsel %vm1539_vm8, %v1523_v22, %v6521_v35  ;;  %v1545_v48 = vsel %vm1541_vm9, %v6504_v18, %v1544_v13 }
 0x1c6   :  { %v1473_v20 = vmul.f32 %v1472_v41, %v1470_v3  ;;  %v6590_v38 = vadd.s32 %v1576_v8, %v1567_v1  ;;  %v1672_v7 = vadd.s32 1, %v5337_v33  ;;  %v1589_v58 = vshrl.u32 %v1584_v34, 16 }
 0x1c7   :  { %v1598_v45 = vadd.s32 %v1597_v29, %v1587_v28  ;;  %v1496_v60 = vadd.s32 3, %v1479_v43  ;;  %v6592_v49 = vadd.s32 %v1592_v27, %v1588_v46  ;;  %v1662_v5 = vand.u32 2147483647, %v6519_v56 }
 0x1c8   :  { %v1474_v62 = vxor.u32 2147483648, %v1473_v20  ;;  %vm1673_vm7 = vcmp.gt.s32.totalorder %v1672_v7, 0  ;;  %v1546_v35 = vsel %vm1540_vm10, %v1543_v21, %v1545_v48  ;;  %v6631_v16 = vadd.f32 %v6516_v30, %v201_v26 }
 0x1c9   :  { %v1599_v22 = vadd.s32 %v1598_v45, %v1589_v58  ;;  %v1674_v18 = vsel %vm1673_vm7, %v1672_v7, 0  ;;  %vm1602_vm8 = vc.u32 %v6590_v38, %v6592_v49  ;;  %v6604_v0 = vand.u32 3, %v1496_v60 }
 0x1ca   :  { %v1475_v23 = vsel %vm1354_vm1, %v1474_v62, %v1473_v20  ;;  %v1676_v6 = vand.u32 31, %v1674_v18  ;;  %v1600_v19 = vmul.u32 %v6530_v52, %v1546_v35  ;;  %v1669_v9 = vand.u32 8388607, %v1662_v5 }
 0x1cb   :  { %v1478_v36 = vsel %vm6577_vm5, %v6232_v4, %v1475_v23  ;;  %v1603_v32 = vadd.s32 1, %v1599_v22  ;;  %v6611_v61 = vshrl.u32 %v1674_v18, 5  ;;  %vm1499_vm10 = vcmp.eq.s32.totalorder %v6604_v0, 0 }
 0x1cc   :  { %v1480_v25 = vmul.f32 %v1478_v36, %v1478_v36  ;;  %v6609_v63 = vsub.s32 32, %v1676_v6  ;;  %v1679_v17 = vshll.u32 %v5456_v51, %v1676_v6  ;;  %v1682_v50 = vshll.u32 %v5457_v53, %v1676_v6 }
 0x1cd   :  { %v1604_v34 = vsel %vm1602_vm8, %v1603_v32, %v1599_v22  ;;  %v1688_v13 = vshll.u32 %v5459_v57, %v1676_v6  ;;  %v1685_v52 = vshll.u32 %v5458_v55, %v1676_v6  ;;  %v1670_v3 = vor.u32 8388608, %v1669_v9 }
 0x1ce   :  { %v1481_v14 = vmul.f32 -0.001358992, %v1480_v25  ;;  %v1488_v40 = vmul.f32 -0.00019511016, %v1480_v25  ;;  %v1605_v31 = vadd.s32 %v1604_v34, %v1600_v19  ;;  %v1689_v24 = vshrl.u32 %v5460_v59, %v6609_v63 }
 0x1cf   :  { %v1680_v27 = vshrl.u32 %v5457_v53, %v6609_v63  ;;  %v1683_v42 = vshrl.u32 %v5458_v55, %v6609_v63  ;;  %v1686_v8 = vshrl.u32 %v5459_v57, %v6609_v63  ;;  %v1691_v10 = vshll.u32 %v5460_v59, %v1676_v6 }
 0x1d0   :  { %v1482_v39 = vadd.f32 0.041655596, %v1481_v14  ;;  %v1489_v37 = vadd.f32 0.008332121, %v1488_v40  ;;  %v1606_v46 = vadd.s32 536870912, %v1605_v31  ;;  %v1690_v12 = vor.u32 %v1689_v24, %v1688_v13 }
 0x1d1   :  { %v1692_v1 = vshrl.u32 %v5461_v2, %v6609_v63  ;;  %vm1697_vm9 = vcmp.lt.s32.totalorder %v6611_v61, 4  ;;  %v6636_v28 = vor.u32 %v1680_v27, %v1679_v17  ;;  %v6638_v29 = vor.u32 %v1683_v42, %v1682_v50 }
 0x1d2   :  { %v1483_v11 = vmul.f32 %v1482_v39, %v1480_v25  ;;  %v1490_v15 = vmul.f32 %v1489_v37, %v1480_v25  ;;  %v6625_v41 = vshrl.u32 %v1606_v46, 30  ;;  %v1687_v21 = vor.u32 %v1686_v8, %v1685_v52 }
 0x1d3   :  { %vm1498_vm12 = vcmp.lt.s32.totalorder %v6604_v0, 2  ;;  %vm1694_vm11 = vcmp.lt.s32.totalorder %v6611_v61, 1  ;;  %vm1696_vm13 = vcmp.lt.s32.totalorder %v6611_v61, 3  ;;  %vm1495_vm14 = vweird.f32 %v6232_v4 }
 0x1d4   :  { %v1484_v33 = vadd.f32 -0.4999988, %v1483_v11  ;;  %v1491_v20 = vadd.f32 -0.16666654, %v1490_v15  ;;  %v1608_v43 = vshll.u32 %v6625_v41, 30  ;;  %v1693_v58 = vor.u32 %v1692_v1, %v1691_v10 }
 0x1d5   :  { %v1703_v45 = vsel %vm1697_vm9, %v1690_v12, 920167782  ;;  %v6648_v60 = vshll.u32 %v1670_v3, 8  ;;  %vm1502_vm0 = vcmp.eq.s32.totalorder %v6604_v0, 2  ;;  %v1820_v22 = vand.u32 2139095040, %v6631_v16 }
 0x1d6   :  { %v1485_v48 = vmul.f32 %v1484_v33, %v1480_v25  ;;  %v1492_v7 = vmul.f32 %v1491_v20, %v1480_v25  ;;  %v6644_v62 = vsub.s32 %v1605_v31, %v1608_v43  ;;  %v1702_v6 = vsel %vm1694_vm11, %v6636_v28, %v6638_v29 }
 0x1d7   :  { %v1704_v25 = vsel %vm1696_vm13, %v1687_v21, %v1703_v45  ;;  %v1601_v9 = vadd.s32 %v6592_v49, %v6590_v38  ;;  %v1706_v14 = vsel %vm1694_vm11, %v6638_v29, %v1687_v21  ;;  %vm1695_vm15 = vcmp.lt.s32.totalorder %v6611_v61, 2 }
 0x1d8   :  { %v1486_v23 = vadd.f32 1.0, %v1485_v48  ;;  %v1493_v35 = vadd.f32 1.0, %v1492_v7  ;;  %vm1610_vm1 = vcmp.lt.s32.totalorder %v6644_v62, 0  ;;  %v1611_v18 = vsub.s32 0, %v6644_v62 }
 0x1d9   :  { %v1707_v34 = vsel %vm1697_vm9, %v1693_v58, 1326507024  ;;  %v1711_v31 = vand.u32 65535, %v6648_v60  ;;  %v1712_v39 = vshrl.u32 %v6648_v60, 16  ;;  %v1821_v37 = vshrl.u32 %v1820_v22, 23 }
 0x1da   :  { %v1494_v32 = vmul.f32 %v1493_v35, %v1478_v36  ;;  %v1503_v19 = vxor.u32 2147483648, %v1486_v23  ;;  %v1612_v40 = vsel %vm1610_vm1, %v1611_v18, %v6644_v62  ;;  %v1705_v36 = vsel %vm1695_vm15, %v1702_v6, %v1704_v25 }
 0x1db   :  { %v1613_v50 = vclz %v1612_v40  ;;  %v1708_v38 = vsel %vm1696_vm13, %v1690_v12, %v1707_v34  ;;  %v1678_v42 = vshrl.u32 %v5456_v51, %v6609_v63  ;;  %v1735_v8 = vand.u32 65535, %v1705_v36 }
 0x1dc   :  { %v1500_v17 = vxor.u32 2147483648, %v1494_v32  ;;  %v1504_v49 = vsel %vm1502_vm0, %v1503_v19, %v1494_v32  ;;  %v1709_v13 = vsel %vm1695_vm15, %v1706_v14, %v1708_v38  ;;  %v1736_v11 = vshrl.u32 %v1705_v36, 16 }
 0x1dd   :  { %v5335_v24 = vadd.s32 4294967294, %v1613_v50  ;;  %v1713_v26 = vand.u32 65535, %v1709_v13  ;;  %v1714_v46 = vshrl.u32 %v1709_v13, 16  ;;  %v1631_v3 = vsub.s32 4, %v6625_v41 }
 0x1de   :  { %v1501_v52 = vsel %vm1499_vm10, %v1486_v23, %v1500_v17  ;;  %v1699_v1 = vsel %vm1697_vm9, %v1687_v21, 2102212464  ;;  %v1738_v20 = vmul.u32 %v1736_v11, %v1711_v31  ;;  %vm1509_vm6 = vcmp.lt.s32.totalorder %v6363_v44, 0 }
 0x1df   :  { %v1505_v27 = vsel %vm1498_vm12, %v1501_v52, %v1504_v49  ;;  %vm5336_vm2 = vcmp.lt.s32.totalorder %v5335_v24, 0  ;;  %v1716_v12 = vmul.u32 %v1714_v46, %v1711_v31  ;;  %v1717_v33 = vmul.u32 %v1713_v26, %v1712_v39 }
 0x1e0   :  { %v1506_v15 = vsel %vm1495_vm14, nan, %v1505_v27  ;;  %v1616_v10 = vsel %vm5336_vm2, 0, %v5335_v24  ;;  %v1715_v43 = vmul.u32 %v1713_v26, %v1711_v31  ;;  %v1718_v7 = vmul.u32 %v1714_v46, %v1712_v39 }
 0x1e1   :  { %5234 = vst [vmem:[#allocation2 + $0x38] sm:$0xff] %v1506_v15  ;;  %v1617_v0 = vsub.s32 32, %v1616_v10  ;;  %v1621_v63 = vsub.s32 4294967266, %v1616_v10  ;;  %v1719_v48 = vshll.u32 %v1716_v12, 16  ;;  %v1618_v4 = vshll.u32 %v6644_v62, %v1616_v10 }
 0x1e2   :  { %v1721_v58 = vshll.u32 %v1717_v33, 16  ;;  %v1739_v45 = vmul.u32 %v1735_v8, %v1712_v39  ;;  %v1737_v18 = vmul.u32 %v1735_v8, %v1711_v31  ;;  %v1740_v6 = vmul.u32 %v1736_v11, %v1712_v39 }
 0x1e3   :  { %v1619_v23 = vshrl.u32 %v1601_v9, %v1617_v0  ;;  %v1622_v35 = vadd.s32 127, %v1621_v63  ;;  %vm1723_vm3 = vc.u32 %v1715_v43, %v1719_v48  ;;  %v1725_v22 = vadd.s32 %v1719_v48, %v1715_v43 }
 0x1e4   :  { %v1724_v21 = vsel %vm1723_vm3, 1, %v5462_v54  ;;  %v1741_v25 = vshll.u32 %v1738_v20, 16  ;;  %v1743_v34 = vshll.u32 %v1739_v45, 16  ;;  %v1720_v50 = vshrl.u32 %v1716_v12, 16 }
 0x1e5   :  { %v1620_v32 = vor.u32 %v1619_v23, %v1618_v4  ;;  %v1623_v19 = vshll.u32 %v1622_v35, 23  ;;  %v1726_v14 = vadd.s32 %v1724_v21, %v1718_v7  ;;  %vm1727_vm4 = vc.u32 %v1725_v22, %v1721_v58 }
 0x1e6   :  { %v1728_v40 = vsel %vm1727_vm4, 1, %v5462_v54  ;;  %vm1745_vm5 = vc.u32 %v1737_v18, %v1741_v25  ;;  %v1747_v62 = vadd.s32 %v1741_v25, %v1737_v18  ;;  %v1722_v49 = vshrl.u32 %v1717_v33, 16  ;;  %v204_v33 = vpop.f32.mrf.mxu1 }
 0x1e7   :  { %v1624_v17 = vor.u32 4788187, %v1623_v19  ;;  %v1730_v9 = vadd.s32 %v1728_v40, %v1726_v14  ;;  %v1746_v36 = vsel %vm1745_vm5, 1, %v5462_v54  ;;  %v1627_v38 = vcvt.s32.f32 %v1620_v32 }
 0x1e8   :  { %v1748_v13 = vadd.s32 %v1746_v36, %v1740_v6  ;;  %vm1749_vm7 = vc.u32 %v1747_v62, %v1743_v34  ;;  %v5340_v24 = vadd.s32 4294967169, %v1821_v37  ;;  %v1632_v26 = vsel %vm1509_vm6, %v1631_v3, %v6625_v41 }
 0x1e9   :  { %v1625_v31 = vand.u32 2147483647, %v1624_v17  ;;  %v1731_v39 = vadd.s32 %v1730_v9, %v1720_v50  ;;  %v1750_v52 = vsel %vm1749_vm7, 1, %v5462_v54  ;;  %v1698_v46 = vsel %vm1694_vm11, %v1678_v42, %v6636_v28 }
 0x1ea   :  { %v1742_v27 = vshrl.u32 %v1738_v20, 16  ;;  %v1752_v8 = vadd.s32 %v1750_v52, %v1748_v13  ;;  %v1700_v15 = vsel %vm1696_vm13, %v6638_v29, %v1699_v1  ;;  %v1827_v10 = vadd.s32 1, %v5340_v24 }
 0x1eb   :  { %v1628_v11 = vmul.f32 %v1627_v38, %v1625_v31  ;;  %v6705_v12 = vadd.s32 %v1731_v39, %v1722_v49  ;;  %vm6709_vm8 = vcmp.le.f32.partialorder %v1507_v47, 0.7853982  ;;  %v1744_v41 = vshrl.u32 %v1739_v45, 16 }
 0x1ec   :  { %v1753_v3 = vadd.s32 %v1752_v8, %v1742_v27  ;;  %v1751_v42 = vadd.s32 %v1747_v62, %v1743_v34  ;;  %v1817_v20 = vand.u32 2147483647, %v6631_v16  ;;  %vm1828_vm9 = vcmp.gt.s32.totalorder %v1827_v10, 0 }
 0x1ed   :  { %v1629_v28 = vxor.u32 2147483648, %v1628_v11  ;;  %v1634_v29 = vsel %vm6709_vm8, 0, %v1632_v26  ;;  %v1701_v1 = vsel %vm1695_vm15, %v1698_v46, %v1700_v15  ;;  %v1829_v63 = vsel %vm1828_vm9, %v1827_v10, 0 }
 0x1ee   :  { %v1754_v0 = vadd.s32 %v1753_v3, %v1744_v41  ;;  %vm1757_vm10 = vc.u32 %v6705_v12, %v1751_v42  ;;  %v1831_v43 = vand.u32 31, %v1829_v63  ;;  %v6722_v48 = vadd.f32 %v6516_v30, %v204_v33 }
 0x1ef   :  { %v1630_v47 = vsel %vm1509_vm6, %v1629_v28, %v1628_v11  ;;  %v1651_v45 = vadd.s32 3, %v1634_v29  ;;  %v1755_v61 = vmul.u32 %v6648_v60, %v1701_v1  ;;  %v1824_v22 = vand.u32 8388607, %v1817_v20 }
 0x1f0   :  { %v1633_v4 = vsel %vm6709_vm8, %v6363_v44, %v1630_v47  ;;  %v1758_v7 = vadd.s32 1, %v1754_v0  ;;  %v6728_v23 = vsub.s32 32, %v1831_v43  ;;  %v6732_v21 = vshrl.u32 %v1829_v63, 5 }
 0x1f1   :  { %v1635_v58 = vmul.f32 %v1633_v4, %v1633_v4  ;;  %v1837_v18 = vshll.u32 %v5457_v53, %v1831_v43  ;;  %v1843_v19 = vshll.u32 %v5459_v57, %v1831_v43  ;;  %v1840_v60 = vshll.u32 %v5458_v55, %v1831_v43 }
 0x1f2   :  { %v1759_v35 = vsel %vm1757_vm10, %v1758_v7, %v1754_v0  ;;  %v1838_v14 = vshrl.u32 %v5458_v55, %v6728_v23  ;;  %v1841_v40 = vshrl.u32 %v5459_v57, %v6728_v23  ;;  %v1844_v34 = vshrl.u32 %v5460_v59, %v6728_v23 }
 0x1f3   :  { %v1636_v6 = vmul.f32 -0.001358992, %v1635_v58  ;;  %v1643_v25 = vmul.f32 -0.00019511016, %v1635_v58  ;;  %v1760_v32 = vadd.s32 %v1759_v35, %v1755_v61  ;;  %v6743_v50 = vand.u32 3, %v1651_v45 }
 0x1f4   :  { %v1834_v36 = vshll.u32 %v5456_v51, %v1831_v43  ;;  %v1835_v38 = vshrl.u32 %v5457_v53, %v6728_v23  ;;  %v1846_v49 = vshll.u32 %v5460_v59, %v1831_v43  ;;  %v1847_v13 = vshrl.u32 %v5461_v2, %v6728_v23 }
 0x1f5   :  { %v1637_v62 = vadd.f32 0.041655596, %v1636_v6  ;;  %v1644_v17 = vadd.f32 0.008332121, %v1643_v25  ;;  %v1761_v9 = vadd.s32 536870912, %v1760_v32  ;;  %v1845_v24 = vor.u32 %v1844_v34, %v1843_v19 }
 0x1f6   :  { %v1825_v26 = vor.u32 8388608, %v1824_v22  ;;  %v6753_v46 = vor.u32 %v1838_v14, %v1837_v18  ;;  %v1842_v27 = vor.u32 %v1841_v40, %v1840_v60  ;;  %vm1852_vm12 = vcmp.lt.s32.totalorder %v6732_v21, 4 }
 0x1f7   :  { %v1638_v31 = vmul.f32 %v1637_v62, %v1635_v58  ;;  %v1645_v39 = vmul.f32 %v1644_v17, %v1635_v58  ;;  %v6751_v52 = vshrl.u32 %v1761_v9, 30  ;;  %vm1849_vm11 = vcmp.lt.s32.totalorder %v6732_v21, 1 }
 0x1f8   :  { %vm1654_vm13 = vcmp.eq.s32.totalorder %v6743_v50, 0  ;;  %vm1657_vm14 = vcmp.eq.s32.totalorder %v6743_v50, 2  ;;  %v6760_v10 = vor.u32 %v1835_v38, %v1834_v36  ;;  %v1848_v37 = vor.u32 %v1847_v13, %v1846_v49 }
 0x1f9   :  { %v1639_v8 = vadd.f32 -0.4999988, %v1638_v31  ;;  %v1646_v11 = vadd.f32 -0.16666654, %v1645_v39  ;;  %v1763_v15 = vshll.u32 %v6751_v52, 30  ;;  %vm1851_vm0 = vcmp.lt.s32.totalorder %v6732_v21, 3 }
 0x1fa   :  { %vm1653_vm1 = vcmp.lt.s32.totalorder %v6743_v50, 2  ;;  %v1858_v28 = vsel %vm1852_vm12, %v1845_v24, 920167782  ;;  %vm1650_vm15 = vweird.f32 %v6363_v44  ;;  %v1756_v29 = vadd.s32 %v1751_v42, %v6705_v12 }
 0x1fb   :  { %v1640_v41 = vmul.f32 %v1639_v8, %v1635_v58  ;;  %v1647_v3 = vmul.f32 %v1646_v11, %v1635_v58  ;;  %v1764_v33 = vsub.s32 %v1760_v32, %v1763_v15  ;;  %v1861_v1 = vsel %vm1849_vm11, %v6753_v46, %v1842_v27 }
 0x1fc   :  { %v6771_v0 = vshll.u32 %v1825_v26, 8  ;;  %v1975_v63 = vand.u32 2139095040, %v6722_v48  ;;  %vm1850_vm6 = vcmp.lt.s32.totalorder %v6732_v21, 2  ;;  %v1857_v58 = vsel %vm1849_vm11, %v6760_v10, %v6753_v46 }
 0x1fd   :  { %v1641_v47 = vadd.f32 1.0, %v1640_v41  ;;  %v1648_v43 = vadd.f32 1.0, %v1647_v3  ;;  %vm1765_vm2 = vcmp.lt.s32.totalorder %v1764_v33, 0  ;;  %v1766_v7 = vsub.s32 0, %v1764_v33 }
 0x1fe   :  { %v1859_v12 = vsel %vm1851_vm0, %v1842_v27, %v1858_v28  ;;  %v1862_v42 = vsel %vm1852_vm12, %v1848_v37, 1326507024  ;;  %v1866_v25 = vand.u32 65535, %v6771_v0  ;;  %v1867_v32 = vshrl.u32 %v6771_v0, 16 }
 0x1ff   :  { %v1649_v45 = vmul.f32 %v1648_v43, %v1633_v4  ;;  %v1658_v61 = vxor.u32 2147483648, %v1641_v47  ;;  %v1767_v35 = vsel %vm1765_vm2, %v1766_v7, %v1764_v33  ;;  %v1863_v22 = vsel %vm1851_vm0, %v1845_v24, %v1862_v42 }
 0x200   :  { %v1768_v18 = vclz %v1767_v35  ;;  %v1864_v6 = vsel %vm1850_vm6, %v1861_v1, %v1863_v22  ;;  %v1860_v14 = vsel %vm1850_vm6, %v1857_v58, %v1859_v12  ;;  %v1786_v34 = vsub.s32 4, %v6751_v52 }
 0x201   :  { %v1655_v19 = vxor.u32 2147483648, %v1649_v45  ;;  %v1868_v60 = vand.u32 65535, %v1864_v6  ;;  %v1869_v40 = vshrl.u32 %v1864_v6, 16  ;;  %v1833_v62 = vshrl.u32 %v5456_v51, %v6728_v23 }
 0x202   :  { %v5338_v4 = vadd.s32 4294967294, %v1768_v18  ;;  %v1976_v17 = vshrl.u32 %v1975_v63, 23  ;;  %v1659_v36 = vsel %vm1657_vm14, %v1658_v61, %v1649_v45  ;;  %v1890_v31 = vand.u32 65535, %v1860_v14 }
 0x203   :  { %v1656_v9 = vsel %vm1654_vm13, %v1641_v47, %v1655_v19  ;;  %v1871_v38 = vmul.u32 %v1869_v40, %v1866_v25  ;;  %v1872_v49 = vmul.u32 %v1868_v60, %v1867_v32  ;;  %v1891_v39 = vshrl.u32 %v1860_v14, 16 }
 0x204   :  { %v1660_v13 = vsel %vm1653_vm1, %v1656_v9, %v1659_v36  ;;  %vm5339_vm3 = vcmp.lt.s32.totalorder %v5338_v4, 0  ;;  %v1870_v23 = vmul.u32 %v1868_v60, %v1866_v25  ;;  %v1854_v37 = vsel %vm1852_vm12, %v1842_v27, 2102212464 }
 0x205   :  { %v1661_v24 = vsel %vm1650_vm15, nan, %v1660_v13  ;;  %v1771_v26 = vsel %vm5339_vm3, 0, %v5338_v4  ;;  %v1874_v8 = vshll.u32 %v1871_v38, 16  ;;  %v1873_v41 = vmul.u32 %v1869_v40, %v1867_v32 }
 0x206   :  { %v1772_v11 = vsub.s32 32, %v1771_v26  ;;  %v1776_v15 = vsub.s32 4294967266, %v1771_v26  ;;  %5235 = vst [vmem:[#allocation2 + $0x40] sm:$0xff] %v1661_v24  ;;  %v1773_v3 = vshll.u32 %v1764_v33, %v1771_v26  ;;  %v1876_v28 = vshll.u32 %v1872_v49, 16 }
 0x207   :  { %vm1878_vm4 = vc.u32 %v1870_v23, %v1874_v8  ;;  %v1880_v50 = vadd.s32 %v1874_v8, %v1870_v23  ;;  %v1893_v44 = vmul.u32 %v1891_v39, %v1866_v25  ;;  %v1892_v7 = vmul.u32 %v1890_v31, %v1866_v25 }
 0x208   :  { %v1774_v1 = vshrl.u32 %v1756_v29, %v1772_v11  ;;  %v1777_v63 = vadd.s32 127, %v1776_v15  ;;  %v1879_v47 = vsel %vm1878_vm4, 1, %v5462_v54  ;;  %v1894_v58 = vmul.u32 %v1890_v31, %v1867_v32 }
 0x209   :  { %v1881_v43 = vadd.s32 %v1879_v47, %v1873_v41  ;;  %vm1882_vm5 = vc.u32 %v1880_v50, %v1876_v28  ;;  %v1896_v27 = vshll.u32 %v1893_v44, 16  ;;  %v1853_v33 = vsel %vm1849_vm11, %v1833_v62, %v6760_v10 }
 0x20a   :  { %v1775_v12 = vor.u32 %v1774_v1, %v1773_v3  ;;  %v1778_v42 = vshll.u32 %v1777_v63, 23  ;;  %v1883_v45 = vsel %vm1882_vm5, 1, %v5462_v54  ;;  %v1875_v61 = vshrl.u32 %v1871_v38, 16 }
 0x20b   :  { %v1885_v35 = vadd.s32 %v1883_v45, %v1881_v43  ;;  %v1895_v29 = vmul.u32 %v1891_v39, %v1867_v32  ;;  %v1898_v18 = vshll.u32 %v1894_v58, 16  ;;  %vm1900_vm7 = vc.u32 %v1892_v7, %v1896_v27 }
 0x20c   :  { %v1779_v22 = vor.u32 4788187, %v1778_v42  ;;  %v1902_v6 = vadd.s32 %v1896_v27, %v1892_v7  ;;  %v1855_v25 = vsel %vm1851_vm0, %v6753_v46, %v1854_v37  ;;  %v1901_v14 = vsel %vm1900_vm7, 1, %v5462_v54 }
 0x20d   :  { %v1886_v19 = vadd.s32 %v1885_v35, %v1875_v61  ;;  %v5343_v60 = vadd.s32 4294967169, %v1976_v17  ;;  %v1782_v4 = vcvt.s32.f32 %v1775_v12  ;;  %v1903_v9 = vadd.s32 %v1901_v14, %v1895_v29 }
 0x20e   :  { %v1780_v40 = vand.u32 2147483647, %v1779_v22  ;;  %vm1904_vm8 = vc.u32 %v1902_v6, %v1898_v18  ;;  %vm1664_vm9 = vcmp.lt.s32.totalorder %v6519_v56, 0  ;;  %v1877_v10 = vshrl.u32 %v1872_v49, 16 }
 0x20f   :  { %v1905_v32 = vsel %vm1904_vm8, 1, %v5462_v54  ;;  %v1982_v62 = vadd.s32 1, %v5343_v60  ;;  %v1897_v38 = vshrl.u32 %v1893_v44, 16  ;;  %v1972_v31 = vand.u32 2147483647, %v6722_v48  ;;  %v207_v60 = vpop.f32.mrf.mxu1 }
 0x210   :  { %v1783_v36 = vmul.f32 %v1782_v4, %v1780_v40  ;;  %v1907_v13 = vadd.s32 %v1905_v32, %v1903_v9  ;;  %v1787_v46 = vsel %vm1664_vm9, %v1786_v34, %v6751_v52  ;;  %v1856_v17 = vsel %vm1850_vm6, %v1853_v33, %v1855_v25 }
 0x211   :  { %v6821_v39 = vadd.s32 %v1886_v19, %v1877_v10  ;;  %vm1983_vm10 = vcmp.gt.s32.totalorder %v1982_v62, 0  ;;  %v1899_v49 = vshrl.u32 %v1894_v58, 16  ;;  %vm6825_vm12 = vcmp.le.f32.partialorder %v1662_v5, 0.7853982 }
 0x212   :  { %v1784_v24 = vxor.u32 2147483648, %v1783_v36  ;;  %v1908_v26 = vadd.s32 %v1907_v13, %v1897_v38  ;;  %v1984_v23 = vsel %vm1983_vm10, %v1982_v62, 0  ;;  %v6829_v11 = vadd.s32 %v1902_v6, %v1898_v18 }
 0x213   :  { %v1986_v15 = vand.u32 31, %v1984_v23  ;;  %v1789_v52 = vsel %vm6825_vm12, 0, %v1787_v46  ;;  %v1910_v37 = vmul.u32 %v6771_v0, %v1856_v17  ;;  %v1979_v5 = vand.u32 8388607, %v1972_v31 }
 0x214   :  { %v1785_v21 = vsel %vm1664_vm9, %v1784_v24, %v1783_v36  ;;  %v1909_v34 = vadd.s32 %v1908_v26, %v1899_v49  ;;  %vm1912_vm11 = vc.u32 %v6821_v39, %v6829_v11  ;;  %v6845_v1 = vshrl.u32 %v1984_v23, 5 }
 0x215   :  { %v1788_v41 = vsel %vm6825_vm12, %v6519_v56, %v1785_v21  ;;  %v6843_v3 = vsub.s32 32, %v1986_v15  ;;  %v1992_v63 = vshll.u32 %v5457_v53, %v1986_v15  ;;  %v1995_v47 = vshll.u32 %v5458_v55, %v1986_v15 }
 0x216   :  { %v1790_v28 = vmul.f32 %v1788_v41, %v1788_v41  ;;  %v1913_v50 = vadd.s32 1, %v1909_v34  ;;  %v1998_v43 = vshll.u32 %v5459_v57, %v1986_v15  ;;  %v1806_v45 = vadd.s32 3, %v1789_v52 }
 0x217   :  { %v1993_v0 = vshrl.u32 %v5458_v55, %v6843_v3  ;;  %v1996_v44 = vshrl.u32 %v5459_v57, %v6843_v3  ;;  %v1999_v42 = vshrl.u32 %v5460_v59, %v6843_v3  ;;  %v1989_v33 = vshll.u32 %v5456_v51, %v1986_v15 }
 0x218   :  { %v1791_v7 = vmul.f32 -0.001358992, %v1790_v28  ;;  %v1798_v58 = vmul.f32 -0.00019511016, %v1790_v28  ;;  %v1914_v12 = vsel %vm1912_vm11, %v1913_v50, %v1909_v34  ;;  %v1990_v61 = vshrl.u32 %v5457_v53, %v6843_v3 }
 0x219   :  { %v1915_v27 = vadd.s32 %v1914_v12, %v1910_v37  ;;  %v1980_v22 = vor.u32 8388608, %v1979_v5  ;;  %v2001_v18 = vshll.u32 %v5460_v59, %v1986_v15  ;;  %v6860_v25 = vor.u32 %v1993_v0, %v1992_v63 }
 0x21a   :  { %v1792_v35 = vadd.f32 0.041655596, %v1791_v7  ;;  %v1799_v29 = vadd.f32 0.008332121, %v1798_v58  ;;  %v2000_v19 = vor.u32 %v1999_v42, %v1998_v43  ;;  %v2002_v14 = vshrl.u32 %v5461_v2, %v6843_v3 }
 0x21b   :  { %v1916_v6 = vadd.s32 536870912, %v1915_v27  ;;  %v6864_v9 = vor.u32 %v1996_v44, %v1995_v47  ;;  %vm2007_vm13 = vcmp.lt.s32.totalorder %v6845_v1, 4  ;;  %v6869_v32 = vor.u32 %v1990_v61, %v1989_v33 }
 0x21c   :  { %v1793_v40 = vmul.f32 %v1792_v35, %v1790_v28  ;;  %v1800_v4 = vmul.f32 %v1799_v29, %v1790_v28  ;;  %v2003_v62 = vor.u32 %v2002_v14, %v2001_v18  ;;  %vm2004_vm14 = vcmp.lt.s32.totalorder %v6845_v1, 1 }
 0x21d   :  { %v6867_v10 = vshrl.u32 %v1916_v6, 30  ;;  %vm2006_vm0 = vcmp.lt.s32.totalorder %v6845_v1, 3  ;;  %v6874_v13 = vadd.f32 %v6516_v30, %v207_v60  ;;  %v1807_v46 = vand.u32 3, %v1806_v45 }
 0x21e   :  { %v1794_v36 = vadd.f32 -0.4999988, %v1793_v40  ;;  %v1801_v38 = vadd.f32 -0.16666654, %v1800_v4  ;;  %v2013_v24 = vsel %vm2007_vm13, %v2000_v19, 920167782  ;;  %v2016_v23 = vsel %vm2004_vm14, %v6860_v25, %v6864_v9 }
 0x21f   :  { %v1918_v17 = vshll.u32 %v6867_v10, 30  ;;  %v6883_v8 = vshll.u32 %v1980_v22, 8  ;;  %v2012_v30 = vsel %vm2004_vm14, %v6869_v32, %v6860_v25  ;;  %v2014_v21 = vsel %vm2006_vm0, %v6864_v9, %v2013_v24 }
 0x220   :  { %v1795_v49 = vmul.f32 %v1794_v36, %v1790_v28  ;;  %v1802_v26 = vmul.f32 %v1801_v38, %v1790_v28  ;;  %v2017_v52 = vsel %vm2007_vm13, %v2003_v62, 1326507024  ;;  %vm2005_vm1 = vcmp.lt.s32.totalorder %v6845_v1, 2 }
 0x221   :  { %v6885_v15 = vsub.s32 %v1915_v27, %v1918_v17  ;;  %v2018_v5 = vsel %vm2006_vm0, %v2000_v19, %v2017_v52  ;;  %vm1805_vm15 = vweird.f32 %v6519_v56  ;;  %vm1808_vm6 = vcmp.lt.s32.totalorder %v1807_v46, 2 }
 0x222   :  { %v1796_v34 = vadd.f32 1.0, %v1795_v49  ;;  %v1803_v37 = vadd.f32 1.0, %v1802_v26  ;;  %v2019_v50 = vsel %vm2005_vm1, %v2016_v23, %v2018_v5  ;;  %v2015_v47 = vsel %vm2005_vm1, %v2012_v30, %v2014_v21 }
 0x223   :  { %vm1920_vm2 = vcmp.lt.s32.totalorder %v6885_v15, 0  ;;  %v1921_v28 = vsub.s32 0, %v6885_v15  ;;  %vm1812_vm3 = vcmp.eq.s32.totalorder %v1807_v46, 2  ;;  %v2023_v43 = vand.u32 65535, %v2019_v50 }
 0x224   :  { %v1804_v63 = vmul.f32 %v1803_v37, %v1788_v41  ;;  %v1813_v0 = vxor.u32 2147483648, %v1796_v34  ;;  %v2024_v7 = vshrl.u32 %v2019_v50, 16  ;;  %v2021_v42 = vand.u32 65535, %v6883_v8 }
 0x225   :  { %v1922_v44 = vsel %vm1920_vm2, %v1921_v28, %v6885_v15  ;;  %v2022_v45 = vshrl.u32 %v6883_v8, 16  ;;  %vm1809_vm4 = vcmp.eq.s32.totalorder %v1807_v46, 0  ;;  %v1911_v41 = vadd.s32 %v6829_v11, %v6821_v39 }
 0x226   :  { %v1810_v58 = vxor.u32 2147483648, %v1804_v63  ;;  %v1923_v12 = vclz %v1922_v44  ;;  %v1814_v27 = vsel %vm1812_vm3, %v1813_v0, %v1804_v63  ;;  %v2045_v33 = vand.u32 65535, %v2015_v47 }
 0x227   :  { %v2026_v29 = vmul.u32 %v2024_v7, %v2021_v42  ;;  %v2027_v22 = vmul.u32 %v2023_v43, %v2022_v45  ;;  %v1988_v6 = vshrl.u32 %v5456_v51, %v6843_v3  ;;  %v2046_v19 = vshrl.u32 %v2015_v47, 16 }
 0x228   :  { %v1811_v61 = vsel %vm1809_vm4, %v1796_v34, %v1810_v58  ;;  %v5341_v35 = vadd.s32 4294967294, %v1923_v12  ;;  %v2130_v14 = vand.u32 2139095040, %v6874_v13  ;;  %vm1819_vm5 = vcmp.lt.s32.totalorder %v6631_v16, 0 }
 0x229   :  { %v1815_v18 = vsel %vm1808_vm6, %v1811_v61, %v1814_v27  ;;  %v2025_v39 = vmul.u32 %v2023_v43, %v2021_v42  ;;  %v2029_v11 = vshll.u32 %v2026_v29, 16  ;;  %v2028_v4 = vmul.u32 %v2024_v7, %v2022_v45 }
 0x22a   :  { %v1816_v60 = vsel %vm1805_vm15, nan, %v1815_v18  ;;  %vm5342_vm7 = vcmp.lt.s32.totalorder %v5341_v35, 0  ;;  %v2047_v62 = vmul.u32 %v2045_v33, %v2021_v42  ;;  %v2048_v36 = vmul.u32 %v2046_v19, %v2021_v42 }
 0x22b   :  { %v1926_v40 = vsel %vm5342_vm7, 0, %v5341_v35  ;;  %5236 = vst [vmem:[#allocation2 + $0x48] sm:$0xff] %v1816_v60  ;;  %v2031_v17 = vshll.u32 %v2027_v22, 16  ;;  %vm2033_vm8 = vc.u32 %v2025_v39, %v2029_v11  ;;  %vm6920_vm9 = vcmp.le.f32.partialorder %v1817_v20, 0.7853982 }
 0x22c   :  { %v1927_v38 = vsub.s32 32, %v1926_v40  ;;  %v1931_v46 = vsub.s32 4294967266, %v1926_v40  ;;  %v1928_v56 = vshll.u32 %v6885_v15, %v1926_v40  ;;  %v2034_v24 = vsel %vm2033_vm8, 1, %v5462_v54 }
 0x22d   :  { %v2035_v49 = vadd.s32 %v2029_v11, %v2025_v39  ;;  %v2049_v26 = vmul.u32 %v2045_v33, %v2022_v45  ;;  %v2036_v21 = vadd.s32 %v2034_v24, %v2028_v4  ;;  %v2051_v52 = vshll.u32 %v2048_v36, 16  ;;  %v210_v11 = vpop.f32.mrf.mxu1 }
 0x22e   :  { %v1929_v23 = vshrl.u32 %v1911_v41, %v1927_v38  ;;  %v1932_v30 = vadd.s32 127, %v1931_v46  ;;  %v1941_v34 = vsub.s32 4, %v6867_v10  ;;  %v2030_v37 = vshrl.u32 %v2026_v29, 16 }
 0x22f   :  { %vm2037_vm10 = vc.u32 %v2035_v49, %v2031_v17  ;;  %v2050_v5 = vmul.u32 %v2046_v19, %v2022_v45  ;;  %vm2055_vm12 = vc.u32 %v2047_v62, %v2051_v52  ;;  %v2053_v15 = vshll.u32 %v2049_v26, 16  ;;  %v6952_v17 = vld [vmem:[%s9265_s2] ss:$0 sm:$0xff] }
 0x230   :  { %v1930_v28 = vor.u32 %v1929_v23, %v1928_v56  ;;  %v1933_v20 = vshll.u32 %v1932_v30, 23  ;;  %v2038_v50 = vsel %vm2037_vm10, 1, %v5462_v54  ;;  %v2056_v0 = vsel %vm2055_vm12, 1, %v5462_v54 }
 0x231   :  { %v2040_v63 = vadd.s32 %v2038_v50, %v2036_v21  ;;  %v2057_v47 = vadd.s32 %v2051_v52, %v2047_v62  ;;  %v2009_v43 = vsel %vm2007_vm13, %v6864_v9, 2102212464  ;;  %v2058_v7 = vadd.s32 %v2056_v0, %v2050_v5 }
 0x232   :  { %v1934_v44 = vor.u32 4788187, %v1933_v20  ;;  %v2131_v58 = vshrl.u32 %v2130_v14, 23  ;;  %v1942_v12 = vsel %vm1819_vm5, %v1941_v34, %v6867_v10  ;;  %v2032_v42 = vshrl.u32 %v2027_v22, 16 }
 0x233   :  { %v2041_v45 = vadd.s32 %v2040_v63, %v2030_v37  ;;  %vm2059_vm11 = vc.u32 %v2057_v47, %v2053_v15  ;;  %v1937_v41 = vcvt.s32.f32 %v1930_v28  ;;  %v2008_v35 = vsel %vm2004_vm14, %v1988_v6, %v6869_v32 }
 0x234   :  { %v1935_v27 = vand.u32 2147483647, %v1934_v44  ;;  %v2060_v33 = vsel %vm2059_vm11, 1, %v5462_v54  ;;  %v5346_v61 = vadd.s32 4294967169, %v2131_v58  ;;  %v2010_v9 = vsel %vm2006_vm0, %v6860_v25, %v2009_v43 }
 0x235   :  { %v2052_v29 = vshrl.u32 %v2048_v36, 16  ;;  %v2062_v18 = vadd.s32 %v2060_v33, %v2058_v7  ;;  %v1944_v10 = vsel %vm6920_vm9, 0, %v1942_v12  ;;  %v2042_v22 = vadd.s32 %v2041_v45, %v2032_v42 }
 0x236   :  { %v1938_v19 = vmul.f32 %v1937_v41, %v1935_v27  ;;  %v2137_v14 = vadd.s32 1, %v5346_v61  ;;  %v2054_v60 = vshrl.u32 %v2049_v26, 16  ;;  %v2061_v4 = vadd.s32 %v2057_v47, %v2053_v15 }
 0x237   :  { %v2063_v39 = vadd.s32 %v2062_v18, %v2052_v29  ;;  %v2127_v62 = vand.u32 2147483647, %v6874_v13  ;;  %v1961_v32 = vadd.s32 3, %v1944_v10  ;;  %v2011_v25 = vsel %vm2005_vm1, %v2008_v35, %v2010_v9 }
 0x238   :  { %v1939_v40 = vxor.u32 2147483648, %v1938_v19  ;;  %vm2138_vm13 = vcmp.gt.s32.totalorder %v2137_v14, 0  ;;  %vm2067_vm14 = vc.u32 %v2042_v22, %v2061_v4  ;;  %v6955_v56 = vadd.f32 %v6952_v17, %v210_v11 }
 0x239   :  { %v2064_v6 = vadd.s32 %v2063_v39, %v2054_v60  ;;  %v2139_v36 = vsel %vm2138_vm13, %v2137_v14, 0  ;;  %v2065_v26 = vmul.u32 %v6883_v8, %v2011_v25  ;;  %v2134_v23 = vand.u32 8388607, %v2127_v62 }
 0x23a   :  { %v1940_v38 = vsel %vm1819_vm5, %v1939_v40, %v1938_v19  ;;  %v2141_v46 = vand.u32 31, %v2139_v36  ;;  %v6963_v21 = vand.u32 3, %v1961_v32  ;;  %v6965_v34 = vshrl.u32 %v2139_v36, 5 }
 0x23b   :  { %v1943_v1 = vsel %vm6920_vm9, %v6631_v16, %v1940_v38  ;;  %v2068_v24 = vadd.s32 1, %v2064_v6  ;;  %v2135_v43 = vor.u32 8388608, %v2134_v23  ;;  %v2285_v9 = vand.u32 2139095040, %v6955_v56 }
 0x23c   :  { %v1945_v49 = vmul.f32 %v1943_v1, %v1943_v1  ;;  %v2142_v30 = vsub.s32 32, %v2141_v46  ;;  %v2147_v37 = vshll.u32 %v5457_v53, %v2141_v46  ;;  %v2153_v3 = vshll.u32 %v5459_v57, %v2141_v46 }
 0x23d   :  { %v2069_v52 = vsel %vm2067_vm14, %v2068_v24, %v2064_v6  ;;  %v2150_v8 = vshll.u32 %v5458_v55, %v2141_v46  ;;  %v2144_v7 = vshll.u32 %v5456_v51, %v2141_v46  ;;  %v2156_v12 = vshll.u32 %v5460_v59, %v2141_v46 }
 0x23e   :  { %v1946_v5 = vmul.f32 -0.001358992, %v1945_v49  ;;  %v1953_v28 = vmul.f32 -0.00019511016, %v1945_v49  ;;  %v2070_v20 = vadd.s32 %v2069_v52, %v2065_v26  ;;  %v2148_v50 = vshrl.u32 %v5458_v55, %v2142_v30 }
 0x23f   :  { %v2151_v63 = vshrl.u32 %v5459_v57, %v2142_v30  ;;  %v2154_v15 = vshrl.u32 %v5460_v59, %v2142_v30  ;;  %v2145_v58 = vshrl.u32 %v5457_v53, %v2142_v30  ;;  %v2157_v42 = vshrl.u32 %v5461_v2, %v2142_v30 }
 0x240   :  { %v1947_v0 = vadd.f32 0.041655596, %v1946_v5  ;;  %v1954_v47 = vadd.f32 0.008332121, %v1953_v28  ;;  %v2071_v44 = vadd.s32 536870912, %v2070_v20  ;;  %v6979_v61 = vor.u32 %v2148_v50, %v2147_v37 }
 0x241   :  { %v2155_v33 = vor.u32 %v2154_v15, %v2153_v3  ;;  %v6981_v35 = vor.u32 %v2151_v63, %v2150_v8  ;;  %vm2162_vm0 = vcmp.lt.s32.totalorder %v6965_v34, 4  ;;  %vm2159_vm1 = vcmp.lt.s32.totalorder %v6965_v34, 1 }
 0x242   :  { %v1948_v45 = vmul.f32 %v1947_v0, %v1945_v49  ;;  %v1955_v27 = vmul.f32 %v1954_v47, %v1945_v49  ;;  %v6977_v41 = vshrl.u32 %v2071_v44, 30  ;;  %vm1964_vm15 = vcmp.eq.s32.totalorder %v6963_v21, 0 }
 0x243   :  { %vm1967_vm2 = vcmp.eq.s32.totalorder %v6963_v21, 2  ;;  %v2066_v10 = vadd.s32 %v2061_v4, %v2042_v22  ;;  %v2146_v14 = vor.u32 %v2145_v58, %v2144_v7  ;;  %v2158_v60 = vor.u32 %v2157_v42, %v2156_v12 }
 0x244   :  { %v1949_v29 = vadd.f32 -0.4999988, %v1948_v45  ;;  %v1956_v18 = vadd.f32 -0.16666654, %v1955_v27  ;;  %v2073_v19 = vshll.u32 %v6977_v41, 30  ;;  %vm2161_vm6 = vcmp.lt.s32.totalorder %v6965_v34, 3 }
 0x245   :  { %vm1963_vm3 = vcmp.lt.s32.totalorder %v6963_v21, 2  ;;  %v2168_v32 = vsel %vm2162_vm0, %v2155_v33, 920167782  ;;  %vm1960_vm4 = vweird.f32 %v6631_v16  ;;  %v2143_v25 = vshrl.u32 %v5456_v51, %v2142_v30 }
 0x246   :  { %v1950_v39 = vmul.f32 %v1949_v29, %v1945_v49  ;;  %v1957_v11 = vmul.f32 %v1956_v18, %v1945_v49  ;;  %v6991_v40 = vsub.s32 %v2070_v20, %v2073_v19  ;;  %v2171_v22 = vsel %vm2159_vm1, %v6979_v61, %v6981_v35 }
 0x247   :  { %v7001_v4 = vshll.u32 %v2135_v43, 8  ;;  %v2286_v6 = vshrl.u32 %v2285_v9, 23  ;;  %vm2160_vm7 = vcmp.lt.s32.totalorder %v6965_v34, 2  ;;  %v2167_v24 = vsel %vm2159_vm1, %v2146_v14, %v6979_v61 }
 0x248   :  { %v1951_v36 = vadd.f32 1.0, %v1950_v39  ;;  %v1958_v38 = vadd.f32 1.0, %v1957_v11  ;;  %vm2075_vm5 = vcmp.lt.s32.totalorder %v6991_v40, 0  ;;  %v2076_v46 = vsub.s32 0, %v6991_v40 }
 0x249   :  { %v2169_v49 = vsel %vm2161_vm6, %v6981_v35, %v2168_v32  ;;  %v2172_v26 = vsel %vm2162_vm0, %v2158_v60, 1326507024  ;;  %v2176_v20 = vand.u32 65535, %v7001_v4  ;;  %v2177_v3 = vshrl.u32 %v7001_v4, 16 }
 0x24a   :  { %v1959_v23 = vmul.f32 %v1958_v38, %v1943_v1  ;;  %v1968_v30 = vxor.u32 2147483648, %v1951_v36  ;;  %v2077_v52 = vsel %vm2075_vm5, %v2076_v46, %v6991_v40  ;;  %v2173_v37 = vsel %vm2161_vm6, %v2155_v33, %v2172_v26 }
 0x24b   :  { %v2078_v5 = vclz %v2077_v52  ;;  %v2174_v28 = vsel %vm2160_vm7, %v2171_v22, %v2173_v37  ;;  %v2170_v8 = vsel %vm2160_vm7, %v2167_v24, %v2169_v49  ;;  %vm1974_vm8 = vcmp.lt.s32.totalorder %v6722_v48, 0 }
 0x24c   :  { %v1965_v50 = vxor.u32 2147483648, %v1959_v23  ;;  %v2178_v63 = vand.u32 65535, %v2174_v28  ;;  %v2179_v1 = vshrl.u32 %v2174_v28, 16  ;;  %v2096_v0 = vsub.s32 4, %v6977_v41 }
 0x24d   :  { %v5344_v15 = vadd.s32 4294967294, %v2078_v5  ;;  %v2163_v47 = vsel %vm2159_vm1, %v2143_v25, %v2146_v14  ;;  %v5349_v44 = vadd.s32 4294967169, %v2286_v6  ;;  %v1969_v7 = vsel %vm1967_vm2, %v1968_v30, %v1959_v23 }
 0x24e   :  { %v1966_v43 = vsel %vm1964_vm15, %v1951_v36, %v1965_v50  ;;  %v2181_v58 = vmul.u32 %v2179_v1, %v2176_v20  ;;  %v2182_v12 = vmul.u32 %v2178_v63, %v2177_v3  ;;  %v2200_v45 = vand.u32 65535, %v2170_v8 }
 0x24f   :  { %v1970_v42 = vsel %vm1963_vm3, %v1966_v43, %v1969_v7  ;;  %vm5345_vm9 = vcmp.lt.s32.totalorder %v5344_v15, 0  ;;  %v2201_v27 = vshrl.u32 %v2170_v8, 16  ;;  %v2180_v29 = vmul.u32 %v2178_v63, %v2176_v20 }
 0x250   :  { %v1971_v33 = vsel %vm1960_vm4, nan, %v1970_v42  ;;  %v2081_v9 = vsel %vm5345_vm9, 0, %v5344_v15  ;;  %v2184_v18 = vshll.u32 %v2181_v58, 16  ;;  %vm7037_vm10 = vcmp.le.f32.partialorder %v1972_v31, 0.7853982 }
 0x251   :  { %v2082_v14 = vsub.s32 32, %v2081_v9  ;;  %v2086_v60 = vsub.s32 4294967266, %v2081_v9  ;;  %v2164_v21 = vsel %vm2162_vm0, %v6981_v35, 2102212464  ;;  %v2183_v39 = vmul.u32 %v2179_v1, %v2177_v3  ;;  %5237 = vst [vmem:[#allocation2 + $0x50] sm:$0xff] %v1971_v33 }
 0x252   :  { %v2083_v16 = vshll.u32 %v6991_v40, %v2081_v9  ;;  %v2186_v11 = vshll.u32 %v2182_v12, 16  ;;  %vm2188_vm12 = vc.u32 %v2180_v29, %v2184_v18  ;;  %v2190_v32 = vadd.s32 %v2184_v18, %v2180_v29 }
 0x253   :  { %v2084_v25 = vshrl.u32 %v2066_v10, %v2082_v14  ;;  %v2087_v22 = vadd.s32 127, %v2086_v60  ;;  %v2189_v31 = vsel %vm2188_vm12, 1, %v5462_v54  ;;  %v2203_v6 = vmul.u32 %v2201_v27, %v2176_v20 }
 0x254   :  { %v2191_v36 = vadd.s32 %v2189_v31, %v2183_v39  ;;  %vm2192_vm11 = vc.u32 %v2190_v32, %v2186_v11  ;;  %v2202_v38 = vmul.u32 %v2200_v45, %v2176_v20  ;;  %v2204_v46 = vmul.u32 %v2200_v45, %v2177_v3 }
 0x255   :  { %v2085_v24 = vor.u32 %v2084_v25, %v2083_v16  ;;  %v2088_v49 = vshll.u32 %v2087_v22, 23  ;;  %v2193_v35 = vsel %vm2192_vm11, 1, %v5462_v54  ;;  %v2206_v26 = vshll.u32 %v2203_v6, 16 }
 0x256   :  { %v2097_v40 = vsel %vm1974_vm8, %v2096_v0, %v6977_v41  ;;  %v2185_v23 = vshrl.u32 %v2181_v58, 16  ;;  %v2195_v30 = vadd.s32 %v2193_v35, %v2191_v36  ;;  %v2205_v10 = vmul.u32 %v2201_v27, %v2177_v3 }
 0x257   :  { %v2089_v52 = vor.u32 4788187, %v2088_v49  ;;  %v2208_v37 = vshll.u32 %v2204_v46, 16  ;;  %vm2210_vm13 = vc.u32 %v2202_v38, %v2206_v26  ;;  %v2212_v5 = vadd.s32 %v2206_v26, %v2202_v38 }
 0x258   :  { %v2165_v28 = vsel %vm2161_vm6, %v6979_v61, %v2164_v21  ;;  %v2187_v20 = vshrl.u32 %v2182_v12, 16  ;;  %v2196_v50 = vadd.s32 %v2195_v30, %v2185_v23  ;;  %v2211_v8 = vsel %vm2210_vm13, 1, %v5462_v54 }
 0x259   :  { %v2090_v63 = vand.u32 2147483647, %v2089_v52  ;;  %v2092_v1 = vcvt.s32.f32 %v2085_v24  ;;  %v2213_v15 = vadd.s32 %v2211_v8, %v2205_v10  ;;  %vm2214_vm14 = vc.u32 %v2212_v5, %v2208_v37 }
 0x25a   :  { %v2099_v41 = vsel %vm7037_vm10, 0, %v2097_v40  ;;  %v2215_v3 = vsel %vm2214_vm14, 1, %v5462_v54  ;;  %v2292_v0 = vadd.s32 1, %v5349_v44  ;;  %v7057_v7 = vadd.s32 %v2196_v50, %v2187_v20  ;;  %v213_v50 = vpop.f32.mrf.mxu1 }
 0x25b   :  { %v2093_v43 = vmul.f32 %v2092_v1, %v2090_v63  ;;  %v2207_v58 = vshrl.u32 %v2203_v6, 16  ;;  %v2217_v42 = vadd.s32 %v2215_v3, %v2213_v15  ;;  %v2166_v61 = vsel %vm2160_vm7, %v2163_v47, %v2165_v28 }
 0x25c   :  { %v2209_v12 = vshrl.u32 %v2204_v46, 16  ;;  %vm2293_vm0 = vcmp.gt.s32.totalorder %v2292_v0, 0  ;;  %v7061_v27 = vadd.s32 %v2212_v5, %v2208_v37  ;;  %v2116_v29 = vadd.s32 3, %v2099_v41 }
 0x25d   :  { %v2094_v45 = vxor.u32 2147483648, %v2093_v43  ;;  %v2218_v33 = vadd.s32 %v2217_v42, %v2207_v58  ;;  %v2294_v9 = vsel %vm2293_vm0, %v2292_v0, 0  ;;  %v2282_v18 = vand.u32 2147483647, %v6955_v56 }
 0x25e   :  { %v2296_v14 = vand.u32 31, %v2294_v9  ;;  %v2220_v21 = vmul.u32 %v7001_v4, %v2166_v61  ;;  %vm2222_vm1 = vc.u32 %v7057_v7, %v7061_v27  ;;  %v7072_v47 = vshrl.u32 %v2294_v9, 5 }
 0x25f   :  { %v2095_v44 = vsel %vm1974_vm8, %v2094_v45, %v2093_v43  ;;  %v2219_v60 = vadd.s32 %v2218_v33, %v2209_v12  ;;  %v7088_v49 = vand.u32 3, %v2116_v29  ;;  %v2289_v26 = vand.u32 8388607, %v2282_v18 }
 0x260   :  { %v2098_v34 = vsel %vm7037_vm10, %v6722_v48, %v2095_v44  ;;  %v7074_v39 = vsub.s32 32, %v2296_v14  ;;  %v2299_v16 = vshll.u32 %v5456_v51, %v2296_v14  ;;  %v2302_v25 = vshll.u32 %v5457_v53, %v2296_v14 }
 0x261   :  { %v2100_v11 = vmul.f32 %v2098_v34, %v2098_v34  ;;  %v2223_v32 = vadd.s32 1, %v2219_v60  ;;  %v2305_v22 = vshll.u32 %v5458_v55, %v2296_v14  ;;  %v2308_v6 = vshll.u32 %v5459_v57, %v2296_v14 }
 0x262   :  { %v2300_v4 = vshrl.u32 %v5457_v53, %v7074_v39  ;;  %v2303_v31 = vshrl.u32 %v5458_v55, %v7074_v39  ;;  %v2306_v19 = vshrl.u32 %v5459_v57, %v7074_v39  ;;  %v2309_v24 = vshrl.u32 %v5460_v59, %v7074_v39 }
 0x263   :  { %v2101_v36 = vmul.f32 -0.001358992, %v2100_v11  ;;  %v2108_v38 = vmul.f32 -0.00019511016, %v2100_v11  ;;  %v2224_v46 = vsel %vm2222_vm1, %v2223_v32, %v2219_v60  ;;  %v2311_v52 = vshll.u32 %v5460_v59, %v2296_v14 }
 0x264   :  { %v2225_v35 = vadd.s32 %v2224_v46, %v2220_v21  ;;  %v7092_v40 = vor.u32 %v2300_v4, %v2299_v16  ;;  %v7094_v10 = vor.u32 %v2303_v31, %v2302_v25  ;;  %v7097_v5 = vor.u32 %v2306_v19, %v2305_v22 }
 0x265   :  { %v2102_v23 = vadd.f32 0.041655596, %v2101_v36  ;;  %v2109_v30 = vadd.f32 0.008332121, %v2108_v38  ;;  %v2310_v28 = vor.u32 %v2309_v24, %v2308_v6  ;;  %v2312_v20 = vshrl.u32 %v5461_v2, %v7074_v39 }
 0x266   :  { %v2226_v37 = vadd.s32 536870912, %v2225_v35  ;;  %vm2314_vm15 = vcmp.lt.s32.totalorder %v7072_v47, 1  ;;  %vm2317_vm2 = vcmp.lt.s32.totalorder %v7072_v47, 4  ;;  %v2290_v15 = vor.u32 8388608, %v2289_v26 }
 0x267   :  { %v2103_v8 = vmul.f32 %v2102_v23, %v2100_v11  ;;  %v2110_v63 = vmul.f32 %v2109_v30, %v2100_v11  ;;  %v2313_v41 = vor.u32 %v2312_v20, %v2311_v52  ;;  %vm2316_vm6 = vcmp.lt.s32.totalorder %v7072_v47, 3 }
 0x268   :  { %v7103_v1 = vshrl.u32 %v2226_v37, 30  ;;  %v7107_v43 = vadd.f32 %v6952_v17, %v213_v50  ;;  %v2322_v42 = vsel %vm2314_vm15, %v7092_v40, %v7094_v10  ;;  %v2323_v61 = vsel %vm2317_vm2, %v2310_v28, 920167782 }
 0x269   :  { %v2104_v3 = vadd.f32 -0.4999988, %v2103_v8  ;;  %v2111_v0 = vadd.f32 -0.16666654, %v2110_v63  ;;  %v2324_v33 = vsel %vm2316_vm6, %v7097_v5, %v2323_v61  ;;  %v2326_v9 = vsel %vm2314_vm15, %v7094_v10, %v7097_v5 }
 0x26a   :  { %v2228_v58 = vshll.u32 %v7103_v1, 30  ;;  %vm2115_vm3 = vweird.f32 %v6722_v48  ;;  %vm2118_vm4 = vcmp.lt.s32.totalorder %v7088_v49, 2  ;;  %v2327_v14 = vsel %vm2317_vm2, %v2313_v41, 1326507024 }
 0x26b   :  { %v2105_v12 = vmul.f32 %v2104_v3, %v2100_v11  ;;  %v2112_v45 = vmul.f32 %v2111_v0, %v2100_v11  ;;  %v7127_v44 = vshll.u32 %v2290_v15, 8  ;;  %vm2315_vm5 = vcmp.lt.s32.totalorder %v7072_v47, 2 }
 0x26c   :  { %v2229_v29 = vsub.s32 %v2225_v35, %v2228_v58  ;;  %v2328_v16 = vsel %vm2316_vm6, %v2310_v28, %v2327_v14  ;;  %v2325_v32 = vsel %vm2315_vm5, %v2322_v42, %v2324_v33  ;;  %vm2119_vm8 = vcmp.eq.s32.totalorder %v7088_v49, 0 }
 0x26d   :  { %v2106_v60 = vadd.f32 1.0, %v2105_v12  ;;  %v2113_v21 = vadd.f32 1.0, %v2112_v45  ;;  %v2329_v25 = vsel %vm2315_vm5, %v2326_v9, %v2328_v16  ;;  %vm2122_vm9 = vcmp.eq.s32.totalorder %v7088_v49, 2 }
 0x26e   :  { %vm2230_vm7 = vcmp.lt.s32.totalorder %v2229_v29, 0  ;;  %v2231_v11 = vsub.s32 0, %v2229_v29  ;;  %v2333_v31 = vand.u32 65535, %v2329_v25  ;;  %v2334_v19 = vshrl.u32 %v2329_v25, 16 }
 0x26f   :  { %v2114_v22 = vmul.f32 %v2113_v21, %v2098_v34  ;;  %v2123_v4 = vxor.u32 2147483648, %v2106_v60  ;;  %v2331_v36 = vand.u32 65535, %v7127_v44  ;;  %v2221_v46 = vadd.s32 %v7061_v27, %v7057_v7 }
 0x270   :  { %v2232_v6 = vsel %vm2230_vm7, %v2231_v11, %v2229_v29  ;;  %v2332_v35 = vshrl.u32 %v7127_v44, 16  ;;  %v2355_v23 = vand.u32 65535, %v2325_v32  ;;  %v2356_v34 = vshrl.u32 %v2325_v32, 16 }
 0x271   :  { %v2120_v38 = vxor.u32 2147483648, %v2114_v22  ;;  %v2233_v24 = vclz %v2232_v6  ;;  %v2336_v26 = vmul.u32 %v2334_v19, %v2331_v36  ;;  %v2440_v30 = vand.u32 2139095040, %v7107_v43 }
 0x272   :  { %v2124_v37 = vsel %vm2122_vm9, %v2123_v4, %v2114_v22  ;;  %v2337_v20 = vmul.u32 %v2333_v31, %v2332_v35  ;;  %v2251_v8 = vsub.s32 4, %v7103_v1  ;;  %v2335_v63 = vmul.u32 %v2333_v31, %v2331_v36 }
 0x273   :  { %v2121_v52 = vsel %vm2119_vm8, %v2106_v60, %v2120_v38  ;;  %v5347_v28 = vadd.s32 4294967294, %v2233_v24  ;;  %v2339_v15 = vshll.u32 %v2336_v26, 16  ;;  %vm2129_vm10 = vcmp.lt.s32.totalorder %v6874_v13, 0 }
 0x274   :  { %v2125_v50 = vsel %vm2118_vm4, %v2121_v52, %v2124_v37  ;;  %v2338_v27 = vmul.u32 %v2334_v19, %v2332_v35  ;;  %v2341_v41 = vshll.u32 %v2337_v20, 16  ;;  %v2358_v58 = vmul.u32 %v2356_v34, %v2331_v36 }
 0x275   :  { %v2126_v7 = vsel %vm2115_vm3, nan, %v2125_v50  ;;  %vm5348_vm12 = vcmp.lt.s32.totalorder %v5347_v28, 0  ;;  %vm2343_vm11 = vc.u32 %v2335_v63, %v2339_v15  ;;  %v2345_v0 = vadd.s32 %v2339_v15, %v2335_v63 }
 0x276   :  { %v2236_v3 = vsel %vm5348_vm12, 0, %v5347_v28  ;;  %5238 = vst [vmem:[#allocation2 + $0x58] sm:$0xff] %v2126_v7  ;;  %v2344_v61 = vsel %vm2343_vm11, 1, %v5462_v54  ;;  %v2357_v12 = vmul.u32 %v2355_v23, %v2331_v36  ;;  %v2359_v48 = vmul.u32 %v2355_v23, %v2332_v35  ;;  %v216_v7 = vpop.f32.mrf.mxu1 }
 0x277   :  { %v2237_v42 = vsub.s32 32, %v2236_v3  ;;  %v2241_v49 = vsub.s32 4294967266, %v2236_v3  ;;  %v2238_v45 = vshll.u32 %v2229_v29, %v2236_v3  ;;  %v2346_v33 = vadd.s32 %v2344_v61, %v2338_v27 }
 0x278   :  { %vm2347_vm13 = vc.u32 %v2345_v0, %v2341_v41  ;;  %v2361_v21 = vshll.u32 %v2358_v58, 16  ;;  %v2340_v16 = vshrl.u32 %v2336_v26, 16  ;;  %v2360_v32 = vmul.u32 %v2356_v34, %v2332_v35 }
 0x279   :  { %v2239_v9 = vshrl.u32 %v2221_v46, %v2237_v42  ;;  %v2242_v14 = vadd.s32 127, %v2241_v49  ;;  %v2348_v60 = vsel %vm2347_vm13, 1, %v5462_v54  ;;  %v2363_v25 = vshll.u32 %v2359_v48, 16 }
 0x27a   :  { %v2350_v11 = vadd.s32 %v2348_v60, %v2346_v33  ;;  %vm2365_vm14 = vc.u32 %v2357_v12, %v2361_v21  ;;  %v2367_v31 = vadd.s32 %v2361_v21, %v2357_v12  ;;  %v2298_v19 = vshrl.u32 %v5456_v51, %v7074_v39 }
 0x27b   :  { %v2240_v22 = vor.u32 %v2239_v9, %v2238_v45  ;;  %v2243_v4 = vshll.u32 %v2242_v14, 23  ;;  %v2366_v6 = vsel %vm2365_vm14, 1, %v5462_v54  ;;  %v2441_v36 = vshrl.u32 %v2440_v30, 23 }
 0x27c   :  { %v2351_v29 = vadd.s32 %v2350_v11, %v2340_v16  ;;  %v2319_v46 = vsel %vm2317_vm2, %v7097_v5, 2102212464  ;;  %v2368_v24 = vadd.s32 %v2366_v6, %v2360_v32  ;;  %vm2369_vm0 = vc.u32 %v2367_v31, %v2363_v25 }
 0x27d   :  { %v2244_v38 = vor.u32 4788187, %v2243_v4  ;;  %v2252_v35 = vsel %vm2129_vm10, %v2251_v8, %v7103_v1  ;;  %v2342_v26 = vshrl.u32 %v2337_v20, 16  ;;  %v2370_v23 = vsel %vm2369_vm0, 1, %v5462_v54 }
 0x27e   :  { %v5352_v34 = vadd.s32 4294967169, %v2441_v36  ;;  %v2247_v52 = vcvt.s32.f32 %v2240_v22  ;;  %v2362_v37 = vshrl.u32 %v2358_v58, 16  ;;  %v2372_v28 = vadd.s32 %v2370_v23, %v2368_v24 }
 0x27f   :  { %v2245_v39 = vand.u32 2147483647, %v2244_v38  ;;  %v2318_v30 = vsel %vm2314_vm15, %v2298_v19, %v7092_v40  ;;  %v2320_v5 = vsel %vm2316_vm6, %v7094_v10, %v2319_v46  ;;  %v2352_v50 = vadd.s32 %v2351_v29, %v2342_v26 }
 0x280   :  { %v2447_v63 = vadd.s32 1, %v5352_v34  ;;  %vm7169_vm1 = vcmp.le.f32.partialorder %v2127_v62, 0.7853982  ;;  %v2364_v8 = vshrl.u32 %v2359_v48, 16  ;;  %v2373_v15 = vadd.s32 %v2372_v28, %v2362_v37 }
 0x281   :  { %v2248_v20 = vmul.f32 %v2247_v52, %v2245_v39  ;;  %v2254_v27 = vsel %vm7169_vm1, 0, %v2252_v35  ;;  %v2371_v40 = vadd.s32 %v2367_v31, %v2363_v25  ;;  %v2437_v41 = vand.u32 2147483647, %v7107_v43 }
 0x282   :  { %vm2448_vm15 = vcmp.gt.s32.totalorder %v2447_v63, 0  ;;  %v2321_v3 = vsel %vm2315_vm5, %v2318_v30, %v2320_v5  ;;  %v2374_v0 = vadd.s32 %v2373_v15, %v2364_v8  ;;  %v7179_v42 = vadd.f32 %v6952_v17, %v216_v7 }
 0x283   :  { %v2249_v10 = vxor.u32 2147483648, %v2248_v20  ;;  %v2449_v62 = vsel %vm2448_vm15, %v2447_v63, 0  ;;  %vm2377_vm2 = vc.u32 %v2352_v50, %v2371_v40  ;;  %v2271_v61 = vadd.s32 3, %v2254_v27 }
 0x284   :  { %v2451_v58 = vand.u32 31, %v2449_v62  ;;  %v2378_v12 = vadd.s32 1, %v2374_v0  ;;  %v2375_v47 = vmul.u32 %v7127_v44, %v2321_v3  ;;  %v2444_v33 = vand.u32 8388607, %v2437_v41 }
 0x285   :  { %v2250_v49 = vsel %vm2129_vm10, %v2249_v10, %v2248_v20  ;;  %v7193_v60 = vshrl.u32 %v2449_v62, 5  ;;  %v7201_v19 = vand.u32 3, %v2271_v61  ;;  %vm2284_vm4 = vcmp.lt.s32.totalorder %v6955_v56, 0 }
 0x286   :  { %v7186_v45 = vsel %vm7169_vm1, %v6874_v13, %v2250_v49  ;;  %v2452_v48 = vsub.s32 32, %v2451_v58  ;;  %v2379_v14 = vsel %vm2377_vm2, %v2378_v12, %v2374_v0  ;;  %v2454_v21 = vshll.u32 %v5456_v51, %v2451_v58 }
 0x287   :  { %v2255_v9 = vmul.f32 %v7186_v45, %v7186_v45  ;;  %v2380_v16 = vadd.s32 %v2379_v14, %v2375_v47  ;;  %v2457_v32 = vshll.u32 %v5457_v53, %v2451_v58  ;;  %v2463_v25 = vshll.u32 %v5459_v57, %v2451_v58 }
 0x288   :  { %v2455_v11 = vshrl.u32 %v5457_v53, %v2452_v48  ;;  %v2458_v4 = vshrl.u32 %v5458_v55, %v2452_v48  ;;  %v2464_v31 = vshrl.u32 %v5460_v59, %v2452_v48  ;;  %v2460_v6 = vshll.u32 %v5458_v55, %v2451_v58 }
 0x289   :  { %v2256_v44 = vmul.f32 -0.001358992, %v2255_v9  ;;  %v2263_v22 = vmul.f32 -0.00019511016, %v2255_v9  ;;  %v2381_v29 = vadd.s32 536870912, %v2380_v16  ;;  %v2461_v36 = vshrl.u32 %v5459_v57, %v2452_v48 }
 0x28a   :  { %v2445_v24 = vor.u32 8388608, %v2444_v33  ;;  %v2456_v35 = vor.u32 %v2455_v11, %v2454_v21  ;;  %v2465_v23 = vor.u32 %v2464_v31, %v2463_v25  ;;  %v2466_v34 = vshll.u32 %v5460_v59, %v2451_v58 }
 0x28b   :  { %v2257_v38 = vadd.f32 0.041655596, %v2256_v44  ;;  %v2264_v46 = vadd.f32 0.008332121, %v2263_v22  ;;  %v2382_v26 = vshrl.u32 %v2381_v29, 30  ;;  %v2467_v39 = vshrl.u32 %v5461_v2, %v2452_v48 }
 0x28c   :  { %v2459_v28 = vor.u32 %v2458_v4, %v2457_v32  ;;  %vm2472_vm6 = vcmp.lt.s32.totalorder %v7193_v60, 4  ;;  %v2462_v5 = vor.u32 %v2461_v36, %v2460_v6  ;;  %vm2469_vm3 = vcmp.lt.s32.totalorder %v7193_v60, 1 }
 0x28d   :  { %v2258_v52 = vmul.f32 %v2257_v38, %v2255_v9  ;;  %v2265_v37 = vmul.f32 %v2264_v46, %v2255_v9  ;;  %v2383_v30 = vshll.u32 %v2382_v26, 30  ;;  %v2376_v20 = vadd.s32 %v2371_v40, %v2352_v50 }
 0x28e   :  { %vm2471_vm5 = vcmp.lt.s32.totalorder %v7193_v60, 3  ;;  %vm2274_vm7 = vcmp.eq.s32.totalorder %v7201_v19, 0  ;;  %vm2277_vm8 = vcmp.eq.s32.totalorder %v7201_v19, 2  ;;  %v2468_v15 = vor.u32 %v2467_v39, %v2466_v34 }
 0x28f   :  { %v2259_v63 = vadd.f32 -0.4999988, %v2258_v52  ;;  %v2266_v1 = vadd.f32 -0.16666654, %v2265_v37  ;;  %v7213_v8 = vsub.s32 %v2380_v16, %v2383_v30  ;;  %v2478_v7 = vsel %vm2472_vm6, %v2465_v23, 920167782 }
 0x290   :  { %v2595_v27 = vand.u32 2139095040, %v7179_v42  ;;  %vm2273_vm9 = vcmp.lt.s32.totalorder %v7201_v19, 2  ;;  %v2477_v50 = vsel %vm2469_vm3, %v2456_v35, %v2459_v28  ;;  %v7221_v40 = vshll.u32 %v2445_v24, 8 }
 0x291   :  { %v2260_v10 = vmul.f32 %v2259_v63, %v2255_v9  ;;  %v2267_v3 = vmul.f32 %v2266_v1, %v2255_v9  ;;  %vm2270_vm10 = vweird.f32 %v6874_v13  ;;  %vm2385_vm12 = vcmp.lt.s32.totalorder %v7213_v8, 0 }
 0x292   :  { %v2386_v0 = vsub.s32 0, %v7213_v8  ;;  %v2453_v62 = vshrl.u32 %v5456_v51, %v2452_v48  ;;  %v2479_v58 = vsel %vm2471_vm5, %v2462_v5, %v2478_v7  ;;  %vm2470_vm11 = vcmp.lt.s32.totalorder %v7193_v60, 2 }
 0x293   :  { %v2261_v49 = vadd.f32 1.0, %v2260_v10  ;;  %v2268_v61 = vadd.f32 1.0, %v2267_v3  ;;  %v2481_v12 = vsel %vm2469_vm3, %v2459_v28, %v2462_v5  ;;  %v2406_v33 = vsub.s32 4, %v2382_v26 }
 0x294   :  { %v2387_v47 = vsel %vm2385_vm12, %v2386_v0, %v7213_v8  ;;  %v2480_v9 = vsel %vm2470_vm11, %v2477_v50, %v2479_v58  ;;  %v2482_v14 = vsel %vm2472_vm6, %v2468_v15, 1326507024  ;;  %v2486_v25 = vand.u32 65535, %v7221_v40 }
 0x295   :  { %v2269_v48 = vmul.f32 %v2268_v61, %v7186_v45  ;;  %v2278_v21 = vxor.u32 2147483648, %v2261_v49  ;;  %v2388_v16 = vclz %v2387_v47  ;;  %v2483_v11 = vsel %vm2471_vm5, %v2465_v23, %v2482_v14 }
 0x296   :  { %v2484_v32 = vsel %vm2470_vm11, %v2481_v12, %v2483_v11  ;;  %v2487_v44 = vshrl.u32 %v7221_v40, 16  ;;  %v2596_v22 = vshrl.u32 %v2595_v27, 23  ;;  %v2473_v29 = vsel %vm2469_vm3, %v2453_v62, %v2456_v35 }
 0x297   :  { %v2275_v4 = vxor.u32 2147483648, %v2269_v48  ;;  %v5350_v31 = vadd.s32 4294967294, %v2388_v16  ;;  %v2488_v6 = vand.u32 65535, %v2484_v32  ;;  %v7248_v45 = vsel %vm2284_vm4, %v2406_v33, %v2382_v26 }
 0x298   :  { %v2474_v36 = vsel %vm2472_vm6, %v2462_v5, 2102212464  ;;  %v2489_v38 = vshrl.u32 %v2484_v32, 16  ;;  %v2510_v46 = vand.u32 65535, %v2480_v9  ;;  %v2279_v23 = vsel %vm2277_vm8, %v2278_v21, %v2269_v48 }
 0x299   :  { %v2276_v24 = vsel %vm2274_vm7, %v2261_v49, %v2275_v4  ;;  %vm5351_vm13 = vcmp.lt.s32.totalorder %v5350_v31, 0  ;;  %v2511_v34 = vshrl.u32 %v2480_v9, 16  ;;  %v2492_v26 = vmul.u32 %v2488_v6, %v2487_v44 }
 0x29a   :  { %v2280_v35 = vsel %vm2273_vm9, %v2276_v24, %v2279_v23  ;;  %v2391_v39 = vsel %vm5351_vm13, 0, %v5350_v31  ;;  %v2491_v52 = vmul.u32 %v2489_v38, %v2486_v25  ;;  %v2475_v63 = vsel %vm2471_vm5, %v2459_v28, %v2474_v36 }
 0x29b   :  { %v2281_v37 = vsel %vm2270_vm10, nan, %v2280_v35  ;;  %v2392_v30 = vsub.s32 32, %v2391_v39  ;;  %v2396_v5 = vsub.s32 4294967266, %v2391_v39  ;;  %vm7264_vm14 = vcmp.le.f32.partialorder %v2282_v18, 0.7853982 }
 0x29c   :  { %v2490_v15 = vmul.u32 %v2488_v6, %v2486_v25  ;;  %v2494_v19 = vshll.u32 %v2491_v52, 16  ;;  %v2512_v7 = vmul.u32 %v2510_v46, %v2486_v25  ;;  %v2514_v27 = vmul.u32 %v2510_v46, %v2487_v44  ;;  %5239 = vst [vmem:[#allocation2 + $0x60] sm:$0xff] %v2281_v37 }
 0x29d   :  { %v2393_v10 = vshll.u32 %v7213_v8, %v2391_v39  ;;  %v2394_v13 = vshrl.u32 %v2376_v20, %v2392_v30  ;;  %v2397_v3 = vadd.s32 127, %v2396_v5  ;;  %v2513_v50 = vmul.u32 %v2511_v34, %v2486_v25 }
 0x29e   :  { %v2493_v0 = vmul.u32 %v2489_v38, %v2487_v44  ;;  %v2496_v62 = vshll.u32 %v2492_v26, 16  ;;  %vm2498_vm0 = vc.u32 %v2490_v15, %v2494_v19  ;;  %v2500_v28 = vadd.s32 %v2494_v19, %v2490_v15 }
 0x29f   :  { %v2395_v58 = vor.u32 %v2394_v13, %v2393_v10  ;;  %v2398_v49 = vshll.u32 %v2397_v3, 23  ;;  %v2499_v18 = vsel %vm2498_vm0, 1, %v5462_v54  ;;  %v2516_v61 = vshll.u32 %v2513_v50, 16 }
 0x2a0   :  { %v2495_v12 = vshrl.u32 %v2491_v52, 16  ;;  %v2501_v47 = vadd.s32 %v2499_v18, %v2493_v0  ;;  %vm2502_vm1 = vc.u32 %v2500_v28, %v2496_v62  ;;  %v2515_v33 = vmul.u32 %v2511_v34, %v2487_v44 }
 0x2a1   :  { %v2399_v9 = vor.u32 4788187, %v2398_v49  ;;  %v2503_v14 = vsel %vm2502_vm1, 1, %v5462_v54  ;;  %v2518_v8 = vshll.u32 %v2514_v27, 16  ;;  %vm2520_vm15 = vc.u32 %v2512_v7, %v2516_v61 }
 0x2a2   :  { %v2505_v20 = vadd.s32 %v2503_v14, %v2501_v47  ;;  %v2521_v48 = vsel %vm2520_vm15, 1, %v5462_v54  ;;  %v2522_v21 = vadd.s32 %v2516_v61, %v2512_v7  ;;  %v5355_v16 = vadd.s32 4294967169, %v2596_v22 }
 0x2a3   :  { %v2400_v11 = vand.u32 2147483647, %v2399_v9  ;;  %v2402_v32 = vcvt.s32.f32 %v2395_v58  ;;  %v2523_v25 = vadd.s32 %v2521_v48, %v2515_v33  ;;  %v2592_v4 = vand.u32 2147483647, %v7179_v42  ;;  %v219_v48 = vpop.f32.mrf.mxu2 }
 0x2a4   :  { %v2497_v31 = vshrl.u32 %v2492_v26, 16  ;;  %v2506_v6 = vadd.s32 %v2505_v20, %v2495_v12  ;;  %vm2524_vm2 = vc.u32 %v2522_v21, %v2518_v8  ;;  %v2602_v36 = vadd.s32 1, %v5355_v16 }
 0x2a5   :  { %v2403_v44 = vmul.f32 %v2402_v32, %v2400_v11  ;;  %v2409_v38 = vsel %vm7264_vm14, 0, %v7248_v45  ;;  %v2476_v46 = vsel %vm2470_vm11, %v2473_v29, %v2475_v63  ;;  %v2525_v24 = vsel %vm2524_vm2, 1, %v5462_v54 }
 0x2a6   :  { %v7279_v22 = vadd.s32 %v2506_v6, %v2497_v31  ;;  %v2517_v23 = vshrl.u32 %v2513_v50, 16  ;;  %v2527_v34 = vadd.s32 %v2525_v24, %v2523_v25  ;;  %vm2603_vm6 = vcmp.gt.s32.totalorder %v2602_v36, 0 }
 0x2a7   :  { %v2404_v35 = vxor.u32 2147483648, %v2403_v44  ;;  %v2604_v39 = vsel %vm2603_vm6, %v2602_v36, 0  ;;  %v2519_v52 = vshrl.u32 %v2514_v27, 16  ;;  %v7281_v26 = vadd.s32 %v2522_v21, %v2518_v8 }
 0x2a8   :  { %v2528_v37 = vadd.s32 %v2527_v34, %v2517_v23  ;;  %v2426_v45 = vadd.s32 3, %v2409_v38  ;;  %v2530_v60 = vmul.u32 %v7221_v40, %v2476_v46  ;;  %v2606_v29 = vand.u32 31, %v2604_v39 }
 0x2a9   :  { %v2405_v30 = vsel %vm2284_vm4, %v2404_v35, %v2403_v44  ;;  %vm2532_vm3 = vc.u32 %v7279_v22, %v7281_v26  ;;  %v2599_v15 = vand.u32 8388607, %v2592_v4  ;;  %v7297_v7 = vshrl.u32 %v2604_v39, 5 }
 0x2aa   :  { %v7289_v5 = vsel %vm7264_vm14, %v6955_v56, %v2405_v30  ;;  %v2529_v63 = vadd.s32 %v2528_v37, %v2519_v52  ;;  %v7299_v27 = vsub.s32 32, %v2606_v29  ;;  %v2609_v40 = vshll.u32 %v5456_v51, %v2606_v29 }
 0x2ab   :  { %v2410_v19 = vmul.f32 %v7289_v5, %v7289_v5  ;;  %v2612_v1 = vshll.u32 %v5457_v53, %v2606_v29  ;;  %v2615_v13 = vshll.u32 %v5458_v55, %v2606_v29  ;;  %v2618_v3 = vshll.u32 %v5459_v57, %v2606_v29 }
 0x2ac   :  { %v2533_v10 = vadd.s32 1, %v2529_v63  ;;  %v2610_v62 = vshrl.u32 %v5457_v53, %v7299_v27  ;;  %v2621_v28 = vshll.u32 %v5460_v59, %v2606_v29  ;;  %v2613_v49 = vshrl.u32 %v5458_v55, %v7299_v27 }
 0x2ad   :  { %v2411_v50 = vmul.f32 -0.001358992, %v2410_v19  ;;  %v2418_v0 = vmul.f32 -0.00019511016, %v2410_v19  ;;  %v2616_v18 = vshrl.u32 %v5459_v57, %v7299_v27  ;;  %v2619_v61 = vshrl.u32 %v5460_v59, %v7299_v27 }
 0x2ae   :  { %v2534_v58 = vsel %vm2532_vm3, %v2533_v10, %v2529_v63  ;;  %vm2624_vm4 = vcmp.lt.s32.totalorder %v7297_v7, 1  ;;  %v7315_v9 = vor.u32 %v2610_v62, %v2609_v40  ;;  %v7317_v14 = vor.u32 %v2613_v49, %v2612_v1 }
 0x2af   :  { %v2412_v12 = vadd.f32 0.041655596, %v2411_v50  ;;  %v2419_v47 = vadd.f32 0.008332121, %v2418_v0  ;;  %v2535_v33 = vadd.s32 %v2534_v58, %v2530_v60  ;;  %v2620_v8 = vor.u32 %v2619_v61, %v2618_v3 }
 0x2b0   :  { %v2622_v20 = vshrl.u32 %v5461_v2, %v7299_v27  ;;  %v2617_v32 = vor.u32 %v2616_v18, %v2615_v13  ;;  %v2427_v25 = vand.u32 3, %v2426_v45  ;;  %v2600_v31 = vor.u32 8388608, %v2599_v15 }
 0x2b1   :  { %v2413_v21 = vmul.f32 %v2412_v12, %v2410_v19  ;;  %v2420_v16 = vmul.f32 %v2419_v47, %v2410_v19  ;;  %v2536_v11 = vadd.s32 536870912, %v2535_v33  ;;  %vm2627_vm5 = vcmp.lt.s32.totalorder %v7297_v7, 4 }
 0x2b2   :  { %v2623_v6 = vor.u32 %v2622_v20, %v2621_v28  ;;  %vm2626_vm7 = vcmp.lt.s32.totalorder %v7297_v7, 3  ;;  %v7326_v46 = vadd.f32 %v6952_v17, %v219_v48  ;;  %v2632_v24 = vsel %vm2624_vm4, %v7315_v9, %v7317_v14 }
 0x2b3   :  { %v2414_v36 = vadd.f32 -0.4999988, %v2413_v21  ;;  %v2421_v44 = vadd.f32 -0.16666654, %v2420_v16  ;;  %v7322_v38 = vshrl.u32 %v2536_v11, 30  ;;  %v2636_v17 = vsel %vm2624_vm4, %v7317_v14, %v2617_v32 }
 0x2b4   :  { %v2633_v23 = vsel %vm2627_vm5, %v2620_v8, 920167782  ;;  %v2637_v34 = vsel %vm2627_vm5, %v2623_v6, 1326507024  ;;  %vm2425_vm8 = vweird.f32 %v6955_v56  ;;  %vm2428_vm9 = vcmp.lt.s32.totalorder %v2427_v25, 2 }
 0x2b5   :  { %v2415_v35 = vmul.f32 %v2414_v36, %v2410_v19  ;;  %v2422_v39 = vmul.f32 %v2421_v44, %v2410_v19  ;;  %v2538_v52 = vshll.u32 %v7322_v38, 30  ;;  %v2634_v37 = vsel %vm2626_vm7, %v2617_v32, %v2633_v23 }
 0x2b6   :  { %v2638_v30 = vsel %vm2626_vm7, %v2620_v8, %v2637_v34  ;;  %v7345_v45 = vshll.u32 %v2600_v31, 8  ;;  %vm2625_vm10 = vcmp.lt.s32.totalorder %v7297_v7, 2  ;;  %vm2429_vm12 = vcmp.eq.s32.totalorder %v2427_v25, 0 }
 0x2b7   :  { %v2416_v60 = vadd.f32 1.0, %v2415_v35  ;;  %v2423_v29 = vadd.f32 1.0, %v2422_v39  ;;  %v2539_v63 = vsub.s32 %v2535_v33, %v2538_v52  ;;  %vm2432_vm11 = vcmp.eq.s32.totalorder %v2427_v25, 2 }
 0x2b8   :  { %v2635_v15 = vsel %vm2625_vm10, %v2632_v24, %v2634_v37  ;;  %v2639_v19 = vsel %vm2625_vm10, %v2636_v17, %v2638_v30  ;;  %v2641_v13 = vand.u32 65535, %v7345_v45  ;;  %v2750_v0 = vand.u32 2139095040, %v7326_v46 }
 0x2b9   :  { %v2424_v40 = vmul.f32 %v2423_v29, %v7289_v5  ;;  %v2433_v10 = vxor.u32 2147483648, %v2416_v60  ;;  %vm2540_vm13 = vcmp.lt.s32.totalorder %v2539_v63, 0  ;;  %v2541_v1 = vsub.s32 0, %v2539_v63 }
 0x2ba   :  { %v2643_v3 = vand.u32 65535, %v2639_v19  ;;  %v2644_v50 = vshrl.u32 %v2639_v19, 16  ;;  %v2531_v28 = vadd.s32 %v7281_v26, %v7279_v22  ;;  %v2642_v49 = vshrl.u32 %v7345_v45, 16 }
 0x2bb   :  { %v2430_v62 = vxor.u32 2147483648, %v2424_v40  ;;  %v2542_v58 = vsel %vm2540_vm13, %v2541_v1, %v2539_v63  ;;  %v2608_v5 = vshrl.u32 %v5456_v51, %v7299_v27  ;;  %v2666_v12 = vshrl.u32 %v2635_v15, 16 }
 0x2bc   :  { %v2543_v18 = vclz %v2542_v58  ;;  %v2646_v61 = vmul.u32 %v2644_v50, %v2641_v13  ;;  %v2434_v33 = vsel %vm2432_vm11, %v2433_v10, %v2424_v40  ;;  %v2647_v8 = vmul.u32 %v2643_v3, %v2642_v49 }
 0x2bd   :  { %v2431_v47 = vsel %vm2429_vm12, %v2416_v60, %v2430_v62  ;;  %v2665_v20 = vand.u32 65535, %v2635_v15  ;;  %v2561_v22 = vsub.s32 4, %v7322_v38  ;;  %v2629_v26 = vsel %vm2627_vm5, %v2617_v32, 2102212464 }
 0x2be   :  { %v2435_v48 = vsel %vm2428_vm9, %v2431_v47, %v2434_v33  ;;  %v5353_v21 = vadd.s32 4294967294, %v2543_v18  ;;  %v2645_v27 = vmul.u32 %v2643_v3, %v2641_v13  ;;  %v2649_v11 = vshll.u32 %v2646_v61, 16 }
 0x2bf   :  { %v2436_v16 = vsel %vm2425_vm8, nan, %v2435_v48  ;;  %v2751_v31 = vshrl.u32 %v2750_v0, 23  ;;  %v2648_v6 = vmul.u32 %v2644_v50, %v2642_v49  ;;  %v2651_v36 = vshll.u32 %v2647_v8, 16 }
 0x2c0   :  { %vm5354_vm14 = vcmp.lt.s32.totalorder %v5353_v21, 0  ;;  %v2668_v44 = vmul.u32 %v2666_v12, %v2641_v13  ;;  %5240 = vst [vmem:[#allocation2 + $0x68] sm:$0xff] %v2436_v16  ;;  %vm2653_vm0 = vc.u32 %v2645_v27, %v2649_v11  ;;  %v2655_v25 = vadd.s32 %v2649_v11, %v2645_v27 }
 0x2c1   :  { %v2546_v24 = vsel %vm5354_vm14, 0, %v5353_v21  ;;  %v2669_v23 = vmul.u32 %v2665_v20, %v2642_v49  ;;  %vm7370_vm1 = vcmp.le.f32.partialorder %v2437_v41, 0.7853982  ;;  %v2654_v35 = vsel %vm2653_vm0, 1, %v5462_v54 }
 0x2c2   :  { %v2547_v56 = vsub.s32 32, %v2546_v24  ;;  %v2551_v32 = vsub.s32 4294967266, %v2546_v24  ;;  %v2667_v39 = vmul.u32 %v2665_v20, %v2641_v13  ;;  %v2650_v52 = vshrl.u32 %v2646_v61, 16 }
 0x2c3   :  { %v2656_v17 = vadd.s32 %v2654_v35, %v2648_v6  ;;  %vm2657_vm15 = vc.u32 %v2655_v25, %v2651_v36  ;;  %v2671_v37 = vshll.u32 %v2668_v44, 16  ;;  %v2548_v30 = vshll.u32 %v2539_v63, %v2546_v24 }
 0x2c4   :  { %v2549_v60 = vshrl.u32 %v2531_v28, %v2547_v56  ;;  %v2552_v29 = vadd.s32 127, %v2551_v32  ;;  %v2658_v15 = vsel %vm2657_vm15, 1, %v5462_v54  ;;  %v2670_v40 = vmul.u32 %v2666_v12, %v2642_v49 }
 0x2c5   :  { %v2660_v19 = vadd.s32 %v2658_v15, %v2656_v17  ;;  %v2673_v41 = vshll.u32 %v2669_v23, 16  ;;  %vm2675_vm2 = vc.u32 %v2667_v39, %v2671_v37  ;;  %v2677_v50 = vadd.s32 %v2671_v37, %v2667_v39 }
 0x2c6   :  { %v2550_v10 = vor.u32 %v2549_v60, %v2548_v30  ;;  %v2553_v1 = vshll.u32 %v2552_v29, 23  ;;  %v2676_v3 = vsel %vm2675_vm2, 1, %v5462_v54  ;;  %vm2439_vm6 = vcmp.lt.s32.totalorder %v7107_v43, 0 }
 0x2c7   :  { %v2661_v13 = vadd.s32 %v2660_v19, %v2650_v52  ;;  %v2678_v0 = vadd.s32 %v2676_v3, %v2670_v40  ;;  %v5358_v62 = vadd.s32 4294967169, %v2751_v31  ;;  %v2562_v63 = vsel %vm2439_vm6, %v2561_v22, %v7322_v38 }
 0x2c8   :  { %v2554_v58 = vor.u32 4788187, %v2553_v1  ;;  %v2628_v28 = vsel %vm2624_vm4, %v2608_v5, %v7315_v9  ;;  %vm2679_vm3 = vc.u32 %v2677_v50, %v2673_v41  ;;  %v2630_v49 = vsel %vm2626_vm7, %v7317_v14, %v2629_v26 }
 0x2c9   :  { %v2652_v18 = vshrl.u32 %v2647_v8, 16  ;;  %v2680_v61 = vsel %vm2679_vm3, 1, %v5462_v54  ;;  %v2757_v12 = vadd.s32 1, %v5358_v62  ;;  %v2557_v33 = vcvt.s32.f32 %v2550_v10 }
 0x2ca   :  { %v2555_v47 = vand.u32 2147483647, %v2554_v58  ;;  %v2672_v20 = vshrl.u32 %v2668_v44, 16  ;;  %v2682_v48 = vadd.s32 %v2680_v61, %v2678_v0  ;;  %v2564_v38 = vsel %vm7370_vm1, 0, %v2562_v63 }
 0x2cb   :  { %v7390_v21 = vadd.s32 %v2661_v13, %v2652_v18  ;;  %v2747_v9 = vand.u32 2147483647, %v7326_v46  ;;  %vm2758_vm4 = vcmp.gt.s32.totalorder %v2757_v12, 0  ;;  %v2674_v22 = vshrl.u32 %v2669_v23, 16  ;;  %v222_v18 = vpop.f32.mrf.mxu2 }
 0x2cc   :  { %v2558_v5 = vmul.f32 %v2557_v33, %v2555_v47  ;;  %v2683_v16 = vadd.s32 %v2682_v48, %v2672_v20  ;;  %v2759_v14 = vsel %vm2758_vm4, %v2757_v12, 0  ;;  %v2631_v8 = vsel %vm2625_vm10, %v2628_v28, %v2630_v49 }
 0x2cd   :  { %v7395_v26 = vadd.s32 %v2677_v50, %v2673_v41  ;;  %v2761_v27 = vand.u32 31, %v2759_v14  ;;  %v2581_v6 = vadd.s32 3, %v2564_v38  ;;  %v2754_v36 = vand.u32 8388607, %v2747_v9 }
 0x2ce   :  { %v2559_v11 = vxor.u32 2147483648, %v2558_v5  ;;  %v2684_v31 = vadd.s32 %v2683_v16, %v2674_v22  ;;  %v2685_v7 = vmul.u32 %v7345_v45, %v2631_v8  ;;  %v7406_v23 = vshrl.u32 %v2759_v14, 5  ;;  %v7460_v16 = vld [vmem:[%s9265_s2] ss:$0 sm:$0xff] }
 0x2cf   :  { %vm2687_vm5 = vc.u32 %v7390_v21, %v7395_v26  ;;  %v7401_v44 = vsub.s32 32, %v2761_v27  ;;  %v2773_v39 = vshll.u32 %v5459_v57, %v2761_v27  ;;  %v2764_v30 = vshll.u32 %v5456_v51, %v2761_v27 }
 0x2d0   :  { %v2560_v24 = vsel %vm2439_vm6, %v2559_v11, %v2558_v5  ;;  %v2688_v25 = vadd.s32 1, %v2684_v31  ;;  %v2767_v60 = vshll.u32 %v5457_v53, %v2761_v27  ;;  %v2770_v40 = vshll.u32 %v5458_v55, %v2761_v27 }
 0x2d1   :  { %v7411_v56 = vsel %vm7370_vm1, %v7107_v43, %v2560_v24  ;;  %v2765_v32 = vshrl.u32 %v5457_v53, %v7401_v44  ;;  %v2768_v35 = vshrl.u32 %v5458_v55, %v7401_v44  ;;  %v2771_v17 = vshrl.u32 %v5459_v57, %v7401_v44 }
 0x2d2   :  { %v2565_v52 = vmul.f32 %v7411_v56, %v7411_v56  ;;  %v2689_v45 = vsel %vm2687_vm5, %v2688_v25, %v2684_v31  ;;  %v2774_v34 = vshrl.u32 %v5460_v59, %v7401_v44  ;;  %v2777_v29 = vshrl.u32 %v5461_v2, %v7401_v44 }
 0x2d3   :  { %v2690_v37 = vadd.s32 %v2689_v45, %v2685_v7  ;;  %v7429_v1 = vor.u32 %v2765_v32, %v2764_v30  ;;  %v7431_v3 = vor.u32 %v2768_v35, %v2767_v60  ;;  %v2776_v50 = vshll.u32 %v5460_v59, %v2761_v27 }
 0x2d4   :  { %v2566_v15 = vmul.f32 -0.001358992, %v2565_v52  ;;  %v2573_v19 = vmul.f32 -0.00019511016, %v2565_v52  ;;  %v2775_v41 = vor.u32 %v2774_v34, %v2773_v39  ;;  %v7434_v62 = vand.u32 3, %v2581_v6 }
 0x2d5   :  { %v2691_v10 = vadd.s32 536870912, %v2690_v37  ;;  %v7436_v58 = vor.u32 %v2771_v17, %v2770_v40  ;;  %v2755_v28 = vor.u32 8388608, %v2754_v36  ;;  %v2778_v49 = vor.u32 %v2777_v29, %v2776_v50 }
 0x2d6   :  { %v2567_v13 = vadd.f32 0.041655596, %v2566_v15  ;;  %v2574_v0 = vadd.f32 0.008332121, %v2573_v19  ;;  %vm2782_vm7 = vcmp.lt.s32.totalorder %v7406_v23, 4  ;;  %vm2779_vm8 = vcmp.lt.s32.totalorder %v7406_v23, 1 }
 0x2d7   :  { %v7438_v63 = vshrl.u32 %v2691_v10, 30  ;;  %v2788_v47 = vsel %vm2782_vm7, %v2775_v41, 920167782  ;;  %vm2781_vm9 = vcmp.lt.s32.totalorder %v7406_v23, 3  ;;  %v2787_v20 = vsel %vm2779_vm8, %v7429_v1, %v7431_v3 }
 0x2d8   :  { %v2568_v61 = vmul.f32 %v2567_v13, %v2565_v52  ;;  %v2575_v12 = vmul.f32 %v2574_v0, %v2565_v52  ;;  %v2789_v5 = vsel %vm2781_vm9, %v7436_v58, %v2788_v47  ;;  %v2791_v22 = vsel %vm2779_vm8, %v7431_v3, %v7436_v58 }
 0x2d9   :  { %v2693_v33 = vshll.u32 %v7438_v63, 30  ;;  %v7463_v14 = vadd.f32 %v7460_v16, %v222_v18  ;;  %v2792_v27 = vsel %vm2782_vm7, %v2778_v49, 1326507024  ;;  %v7469_v11 = vshll.u32 %v2755_v28, 8 }
 0x2da   :  { %v2569_v48 = vadd.f32 -0.4999988, %v2568_v61  ;;  %v2576_v38 = vadd.f32 -0.16666654, %v2575_v12  ;;  %vm2583_vm10 = vcmp.lt.s32.totalorder %v7434_v62, 2  ;;  %vm2780_vm12 = vcmp.lt.s32.totalorder %v7406_v23, 2 }
 0x2db   :  { %v7465_v8 = vsub.s32 %v2690_v37, %v2693_v33  ;;  %v2793_v36 = vsel %vm2781_vm9, %v2775_v41, %v2792_v27  ;;  %vm2580_vm11 = vweird.f32 %v7107_v43  ;;  %v2790_v7 = vsel %vm2780_vm12, %v2787_v20, %v2789_v5 }
 0x2dc   :  { %v2570_v31 = vmul.f32 %v2569_v48, %v2565_v52  ;;  %v2577_v6 = vmul.f32 %v2576_v38, %v2565_v52  ;;  %v2794_v25 = vsel %vm2780_vm12, %v2791_v22, %v2793_v36  ;;  %vm2584_vm14 = vcmp.eq.s32.totalorder %v7434_v62, 0 }
 0x2dd   :  { %vm2695_vm13 = vcmp.lt.s32.totalorder %v7465_v8, 0  ;;  %v2696_v24 = vsub.s32 0, %v7465_v8  ;;  %v2798_v39 = vand.u32 65535, %v2794_v25  ;;  %v2799_v52 = vshrl.u32 %v2794_v25, 16 }
 0x2de   :  { %v2571_v32 = vadd.f32 1.0, %v2570_v31  ;;  %v2578_v35 = vadd.f32 1.0, %v2577_v6  ;;  %v2796_v17 = vand.u32 65535, %v7469_v11  ;;  %v2797_v34 = vshrl.u32 %v7469_v11, 16 }
 0x2df   :  { %v2697_v45 = vsel %vm2695_vm13, %v2696_v24, %v7465_v8  ;;  %v2821_v29 = vshrl.u32 %v2790_v7, 16  ;;  %vm2587_vm0 = vcmp.eq.s32.totalorder %v7434_v62, 2  ;;  %v2686_v15 = vadd.s32 %v7395_v26, %v7390_v21 }
 0x2e0   :  { %v2579_v37 = vmul.f32 %v2578_v35, %v7411_v56  ;;  %v2588_v30 = vxor.u32 2147483648, %v2571_v32  ;;  %v2698_v60 = vclz %v2697_v45  ;;  %v2801_v19 = vmul.u32 %v2799_v52, %v2796_v17 }
 0x2e1   :  { %v2902_v40 = vand.u32 2147483647, %v7463_v14  ;;  %v2802_v50 = vmul.u32 %v2798_v39, %v2797_v34  ;;  %v2905_v13 = vand.u32 2139095040, %v7463_v14  ;;  %v2800_v28 = vmul.u32 %v2798_v39, %v2796_v17 }
 0x2e2   :  { %v2585_v41 = vxor.u32 2147483648, %v2579_v37  ;;  %v5356_v10 = vadd.s32 4294967294, %v2698_v60  ;;  %v2589_v0 = vsel %vm2587_vm0, %v2588_v30, %v2579_v37  ;;  %v2804_v49 = vshll.u32 %v2801_v19, 16 }
 0x2e3   :  { %v2820_v56 = vand.u32 65535, %v2790_v7  ;;  %v2806_v61 = vshll.u32 %v2802_v50, 16  ;;  %v2823_v12 = vmul.u32 %v2821_v29, %v2796_v17  ;;  %v2803_v38 = vmul.u32 %v2799_v52, %v2797_v34 }
 0x2e4   :  { %v2586_v18 = vsel %vm2584_vm14, %v2571_v32, %v2585_v41  ;;  %vm5357_vm1 = vcmp.lt.s32.totalorder %v5356_v10, 0  ;;  %vm2808_vm15 = vc.u32 %v2800_v28, %v2804_v49  ;;  %v2810_v47 = vadd.s32 %v2804_v49, %v2800_v28 }
 0x2e5   :  { %v2590_v21 = vsel %vm2583_vm10, %v2586_v18, %v2589_v0  ;;  %v2701_v26 = vsel %vm5357_vm1, 0, %v5356_v10  ;;  %vm2594_vm2 = vcmp.lt.s32.totalorder %v7179_v42, 0  ;;  %v2809_v22 = vsel %vm2808_vm15, 1, %v5462_v54 }
 0x2e6   :  { %v2591_v33 = vsel %vm2580_vm11, nan, %v2590_v21  ;;  %v2702_v20 = vsub.s32 32, %v2701_v26  ;;  %v2706_v48 = vsub.s32 4294967266, %v2701_v26  ;;  %v2703_v5 = vshll.u32 %v7465_v8, %v2701_v26  ;;  %v225_v26 = vpop.f32.mrf.mxu2 }
 0x2e7   :  { %vm2812_vm6 = vc.u32 %v2810_v47, %v2806_v61  ;;  %v2824_v27 = vmul.u32 %v2820_v56, %v2797_v34  ;;  %5241 = vst [vmem:[#allocation2 + $0x70] sm:$0xff] %v2591_v33  ;;  %v2811_v6 = vadd.s32 %v2809_v22, %v2803_v38  ;;  %v2763_v43 = vshrl.u32 %v5456_v51, %v7401_v44 }
 0x2e8   :  { %v2704_v62 = vshrl.u32 %v2686_v15, %v2702_v20  ;;  %v2707_v31 = vadd.s32 127, %v2706_v48  ;;  %v2813_v36 = vsel %vm2812_vm6, 1, %v5462_v54  ;;  %v2805_v24 = vshrl.u32 %v2801_v19, 16 }
 0x2e9   :  { %v2822_v7 = vmul.u32 %v2820_v56, %v2796_v17  ;;  %v2826_v25 = vshll.u32 %v2823_v12, 16  ;;  %v2815_v39 = vadd.s32 %v2813_v36, %v2811_v6  ;;  %v2825_v8 = vmul.u32 %v2821_v29, %v2797_v34 }
 0x2ea   :  { %v2705_v32 = vor.u32 %v2704_v62, %v2703_v5  ;;  %v2708_v35 = vshll.u32 %v2707_v31, 23  ;;  %v2828_v52 = vshll.u32 %v2824_v27, 16  ;;  %v2906_v37 = vshrl.u32 %v2905_v13, 23 }
 0x2eb   :  { %vm2830_vm3 = vc.u32 %v2822_v7, %v2826_v25  ;;  %v2832_v45 = vadd.s32 %v2826_v25, %v2822_v7  ;;  %v2716_v60 = vsub.s32 4, %v7438_v63  ;;  %v2816_v15 = vadd.s32 %v2815_v39, %v2805_v24 }
 0x2ec   :  { %v2709_v30 = vor.u32 4788187, %v2708_v35  ;;  %v2831_v41 = vsel %vm2830_vm3, 1, %v5462_v54  ;;  %v2784_v44 = vsel %vm2782_vm7, %v7436_v58, 2102212464  ;;  %v5361_v19 = vadd.s32 4294967169, %v2906_v37 }
 0x2ed   :  { %v2833_v17 = vadd.s32 %v2831_v41, %v2825_v8  ;;  %vm2834_vm4 = vc.u32 %v2832_v45, %v2828_v52  ;;  %v2712_v0 = vcvt.s32.f32 %v2705_v32  ;;  %v2807_v34 = vshrl.u32 %v2802_v50, 16 }
 0x2ee   :  { %v2710_v10 = vand.u32 2147483647, %v2709_v30  ;;  %v2835_v29 = vsel %vm2834_vm4, 1, %v5462_v54  ;;  %v2783_v13 = vsel %vm2779_vm8, %v2763_v43, %v7429_v1  ;;  %v2827_v28 = vshrl.u32 %v2823_v12, 16 }
 0x2ef   :  { %v2837_v49 = vadd.s32 %v2835_v29, %v2833_v17  ;;  %v2912_v56 = vadd.s32 1, %v5361_v19  ;;  %v2717_v58 = vsel %vm2594_vm2, %v2716_v60, %v7438_v63  ;;  %v2785_v61 = vsel %vm2781_vm9, %v7431_v3, %v2784_v44 }
 0x2f0   :  { %v2713_v18 = vmul.f32 %v2712_v0, %v2710_v10  ;;  %v7519_v21 = vadd.s32 %v2816_v15, %v2807_v34  ;;  %vm7523_vm5 = vcmp.le.f32.partialorder %v2592_v4, 0.7853982  ;;  %v2829_v1 = vshrl.u32 %v2824_v27, 16 }
 0x2f1   :  { %v2838_v12 = vadd.s32 %v2837_v49, %v2827_v28  ;;  %vm2913_vm7 = vcmp.gt.s32.totalorder %v2912_v56, 0  ;;  %v7527_v33 = vadd.s32 %v2832_v45, %v2828_v52  ;;  %v2909_v63 = vand.u32 8388607, %v2902_v40 }
 0x2f2   :  { %v2714_v47 = vxor.u32 2147483648, %v2713_v18  ;;  %v2914_v20 = vsel %vm2913_vm7, %v2912_v56, 0  ;;  %v2719_v3 = vsel %vm7523_vm5, 0, %v2717_v58  ;;  %v2786_v4 = vsel %vm2780_vm12, %v2783_v13, %v2785_v61 }
 0x2f3   :  { %v2839_v48 = vadd.s32 %v2838_v12, %v2829_v1  ;;  %v2916_v38 = vand.u32 31, %v2914_v20  ;;  %vm2842_vm8 = vc.u32 %v7519_v21, %v7527_v33  ;;  %v7540_v22 = vadd.f32 %v7460_v16, %v225_v26 }
 0x2f4   :  { %v2715_v5 = vsel %vm2594_vm2, %v2714_v47, %v2713_v18  ;;  %v2736_v6 = vadd.s32 3, %v2719_v3  ;;  %v2840_v36 = vmul.u32 %v7469_v11, %v2786_v4  ;;  %v2910_v43 = vor.u32 8388608, %v2909_v63 }
 0x2f5   :  { %v2718_v27 = vsel %vm7523_vm5, %v7179_v42, %v2715_v5  ;;  %v2843_v62 = vadd.s32 1, %v2839_v48  ;;  %v7545_v31 = vsub.s32 32, %v2916_v38  ;;  %v7548_v7 = vshrl.u32 %v2914_v20, 5 }
 0x2f6   :  { %v2720_v23 = vmul.f32 %v2718_v27, %v2718_v27  ;;  %v2919_v25 = vshll.u32 %v5456_v51, %v2916_v38  ;;  %v2922_v11 = vshll.u32 %v5457_v53, %v2916_v38  ;;  %v2928_v37 = vshll.u32 %v5459_v57, %v2916_v38 }
 0x2f7   :  { %v2844_v24 = vsel %vm2842_vm8, %v2843_v62, %v2839_v48  ;;  %v2923_v32 = vshrl.u32 %v5458_v55, %v7545_v31  ;;  %v2926_v52 = vshrl.u32 %v5459_v57, %v7545_v31  ;;  %v2920_v45 = vshrl.u32 %v5457_v53, %v7545_v31 }
 0x2f8   :  { %v2721_v35 = vmul.f32 -0.001358992, %v2720_v23  ;;  %v2728_v39 = vmul.f32 -0.00019511016, %v2720_v23  ;;  %v2845_v8 = vadd.s32 %v2844_v24, %v2840_v36  ;;  %v2929_v30 = vshrl.u32 %v5460_v59, %v7545_v31 }
 0x2f9   :  { %v2925_v44 = vshll.u32 %v5458_v55, %v2916_v38  ;;  %v7562_v17 = vor.u32 %v2923_v32, %v2922_v11  ;;  %v2931_v10 = vshll.u32 %v5460_v59, %v2916_v38  ;;  %v2932_v0 = vshrl.u32 %v5461_v2, %v7545_v31 }
 0x2fa   :  { %v2722_v60 = vadd.f32 0.041655596, %v2721_v35  ;;  %v2729_v15 = vadd.f32 0.008332121, %v2728_v39  ;;  %v2846_v41 = vadd.s32 536870912, %v2845_v8  ;;  %v2930_v19 = vor.u32 %v2929_v30, %v2928_v37 }
 0x2fb   :  { %v7569_v28 = vor.u32 %v2926_v52, %v2925_v44  ;;  %v2737_v49 = vand.u32 3, %v2736_v6  ;;  %v7571_v56 = vor.u32 %v2920_v45, %v2919_v25  ;;  %v2933_v18 = vor.u32 %v2932_v0, %v2931_v10 }
 0x2fc   :  { %v2723_v34 = vmul.f32 %v2722_v60, %v2720_v23  ;;  %v2730_v29 = vmul.f32 %v2729_v15, %v2720_v23  ;;  %v7567_v13 = vshrl.u32 %v2846_v41, 30  ;;  %v7573_v58 = vshll.u32 %v2910_v43, 8 }
 0x2fd   :  { %vm2937_vm9 = vcmp.lt.s32.totalorder %v7548_v7, 4  ;;  %vm2934_vm10 = vcmp.lt.s32.totalorder %v7548_v7, 1  ;;  %vm2936_vm12 = vcmp.lt.s32.totalorder %v7548_v7, 3  ;;  %vm2735_vm11 = vweird.f32 %v7179_v42 }
 0x2fe   :  { %v2724_v61 = vadd.f32 -0.4999988, %v2723_v34  ;;  %v2731_v50 = vadd.f32 -0.16666654, %v2730_v29  ;;  %v2848_v1 = vshll.u32 %v7567_v13, 30  ;;  %v2946_v3 = vsel %vm2934_vm10, %v7562_v17, %v7569_v28 }
 0x2ff   :  { %v2943_v12 = vsel %vm2937_vm9, %v2930_v19, 920167782  ;;  %v2947_v26 = vsel %vm2937_vm9, %v2933_v18, 1326507024  ;;  %vm2935_vm13 = vcmp.lt.s32.totalorder %v7548_v7, 2  ;;  %v2942_v4 = vsel %vm2934_vm10, %v7571_v56, %v7562_v17 }
 0x300   :  { %v2725_v47 = vmul.f32 %v2724_v61, %v2720_v23  ;;  %v2732_v63 = vmul.f32 %v2731_v50, %v2720_v23  ;;  %v2849_v20 = vsub.s32 %v2845_v8, %v2848_v1  ;;  %v2944_v48 = vsel %vm2936_vm12, %v7569_v28, %v2943_v12 }
 0x301   :  { %v2948_v38 = vsel %vm2936_vm12, %v2930_v19, %v2947_v26  ;;  %vm2738_vm0 = vcmp.lt.s32.totalorder %v2737_v49, 2  ;;  %vm2739_vm1 = vcmp.eq.s32.totalorder %v2737_v49, 0  ;;  %vm2742_vm15 = vcmp.eq.s32.totalorder %v2737_v49, 2 }
 0x302   :  { %v2726_v5 = vadd.f32 1.0, %v2725_v47  ;;  %v2733_v62 = vadd.f32 1.0, %v2732_v63  ;;  %vm2850_vm14 = vcmp.lt.s32.totalorder %v2849_v20, 0  ;;  %v2851_v23 = vsub.s32 0, %v2849_v20 }
 0x303   :  { %v2949_v6 = vsel %vm2935_vm13, %v2946_v3, %v2948_v38  ;;  %v2945_v35 = vsel %vm2935_vm13, %v2942_v4, %v2944_v48  ;;  %v2952_v39 = vshrl.u32 %v7573_v58, 16  ;;  %v2841_v45 = vadd.s32 %v7527_v33, %v7519_v21 }
 0x304   :  { %v2734_v36 = vmul.f32 %v2733_v62, %v2718_v27  ;;  %v2743_v43 = vxor.u32 2147483648, %v2726_v5  ;;  %v2852_v24 = vsel %vm2850_vm14, %v2851_v23, %v2849_v20  ;;  %v2953_v25 = vand.u32 65535, %v2949_v6 }
 0x305   :  { %v2853_v32 = vclz %v2852_v24  ;;  %v2954_v8 = vshrl.u32 %v2949_v6, 16  ;;  %v2951_v11 = vand.u32 65535, %v7573_v58  ;;  %v3057_v37 = vand.u32 2147483647, %v7540_v22 }
 0x306   :  { %v2740_v52 = vxor.u32 2147483648, %v2734_v36  ;;  %v2871_v27 = vsub.s32 4, %v7567_v13  ;;  %v2957_v60 = vmul.u32 %v2953_v25, %v2952_v39  ;;  %v3060_v15 = vand.u32 2139095040, %v7540_v22 }
 0x307   :  { %v5359_v30 = vadd.s32 4294967294, %v2853_v32  ;;  %v2744_v44 = vsel %vm2742_vm15, %v2743_v43, %v2734_v36  ;;  %v2956_v19 = vmul.u32 %v2954_v8, %v2951_v11  ;;  %v2975_v10 = vand.u32 65535, %v2945_v35 }
 0x308   :  { %v2741_v41 = vsel %vm2739_vm1, %v2726_v5, %v2740_v52  ;;  %v2955_v21 = vmul.u32 %v2953_v25, %v2951_v11  ;;  %v2976_v33 = vshrl.u32 %v2945_v35, 16  ;;  %v2958_v18 = vmul.u32 %v2954_v8, %v2952_v39 }
 0x309   :  { %v2745_v0 = vsel %vm2738_vm0, %v2741_v41, %v2744_v44  ;;  %vm5360_vm2 = vcmp.lt.s32.totalorder %v5359_v30, 0  ;;  %v2959_v61 = vshll.u32 %v2956_v19, 16  ;;  %vm2749_vm6 = vcmp.lt.s32.totalorder %v7326_v46, 0 }
 0x30a   :  { %v2746_v34 = vsel %vm2735_vm11, nan, %v2745_v0  ;;  %v2856_v29 = vsel %vm5360_vm2, 0, %v5359_v30  ;;  %v2960_v12 = vshrl.u32 %v2956_v19, 16  ;;  %v2961_v26 = vshll.u32 %v2957_v60, 16 }
 0x30b   :  { %v2857_v50 = vsub.s32 32, %v2856_v29  ;;  %v2861_v1 = vsub.s32 4294967266, %v2856_v29  ;;  %5242 = vst [vmem:[#allocation2 + $0x78] sm:$0xff] %v2746_v34  ;;  %vm2963_vm3 = vc.u32 %v2955_v21, %v2959_v61  ;;  %v2965_v47 = vadd.s32 %v2959_v61, %v2955_v21 }
 0x30c   :  { %v2978_v49 = vmul.u32 %v2976_v33, %v2951_v11  ;;  %v2979_v63 = vmul.u32 %v2975_v10, %v2952_v39  ;;  %v2858_v3 = vshll.u32 %v2849_v20, %v2856_v29  ;;  %v2964_v42 = vsel %vm2963_vm3, 1, %v5462_v54  ;;  %v228_v29 = vpop.f32.mrf.mxu2 }
 0x30d   :  { %v2859_v4 = vshrl.u32 %v2841_v45, %v2857_v50  ;;  %v2862_v48 = vadd.s32 127, %v2861_v1  ;;  %v2966_v38 = vadd.s32 %v2964_v42, %v2958_v18  ;;  %vm2967_vm4 = vc.u32 %v2965_v47, %v2961_v26 }
 0x30e   :  { %v2977_v5 = vmul.u32 %v2975_v10, %v2951_v11  ;;  %v2981_v62 = vshll.u32 %v2978_v49, 16  ;;  %v2968_v36 = vsel %vm2967_vm4, 1, %v5462_v54  ;;  %v2980_v43 = vmul.u32 %v2976_v33, %v2952_v39 }
 0x30f   :  { %v2860_v23 = vor.u32 %v2859_v4, %v2858_v3  ;;  %v2863_v6 = vshll.u32 %v2862_v48, 23  ;;  %v2970_v24 = vadd.s32 %v2968_v36, %v2966_v38  ;;  %v2983_v25 = vshll.u32 %v2979_v63, 16 }
 0x310   :  { %vm2985_vm5 = vc.u32 %v2977_v5, %v2981_v62  ;;  %v2987_v32 = vadd.s32 %v2981_v62, %v2977_v5  ;;  %v2918_v20 = vshrl.u32 %v5456_v51, %v7545_v31  ;;  %v2939_v8 = vsel %vm2937_vm9, %v7569_v28, 2102212464 }
 0x311   :  { %v2864_v35 = vor.u32 4788187, %v2863_v6  ;;  %v2986_v52 = vsel %vm2985_vm5, 1, %v5462_v54  ;;  %v2962_v45 = vshrl.u32 %v2957_v60, 16  ;;  %v2971_v11 = vadd.s32 %v2970_v24, %v2960_v12 }
 0x312   :  { %v2988_v30 = vadd.s32 %v2986_v52, %v2980_v43  ;;  %vm2989_vm7 = vc.u32 %v2987_v32, %v2983_v25  ;;  %v2867_v39 = vcvt.s32.f32 %v2860_v23  ;;  %v3061_v19 = vshrl.u32 %v3060_v15, 23 }
 0x313   :  { %v2865_v41 = vand.u32 2147483647, %v2864_v35  ;;  %v2990_v44 = vsel %vm2989_vm7, 1, %v5462_v54  ;;  %v2872_v10 = vsel %vm2749_vm6, %v2871_v27, %v7567_v13  ;;  %v2938_v31 = vsel %vm2934_vm10, %v2918_v20, %v7571_v56 }
 0x314   :  { %v2982_v28 = vshrl.u32 %v2978_v49, 16  ;;  %v2992_v0 = vadd.s32 %v2990_v44, %v2988_v30  ;;  %v2940_v60 = vsel %vm2936_vm12, %v7562_v17, %v2939_v8  ;;  %v2972_v33 = vadd.s32 %v2971_v11, %v2962_v45 }
 0x315   :  { %v2868_v21 = vmul.f32 %v2867_v39, %v2865_v41  ;;  %v5364_v34 = vadd.s32 4294967169, %v3061_v19  ;;  %vm2748_vm8 = vcmp.le.f32.partialorder %v2747_v9, 0.7853982  ;;  %v2984_v15 = vshrl.u32 %v2979_v63, 16 }
 0x316   :  { %v2993_v18 = vadd.s32 %v2992_v0, %v2982_v28  ;;  %v3064_v13 = vand.u32 8388607, %v3057_v37  ;;  %v2874_v56 = vsel %vm2748_vm8, 0, %v2872_v10  ;;  %v2991_v61 = vadd.s32 %v2987_v32, %v2983_v25 }
 0x317   :  { %v2869_v27 = vxor.u32 2147483648, %v2868_v21  ;;  %v3067_v50 = vadd.s32 1, %v5364_v34  ;;  %v2941_v1 = vsel %vm2935_vm13, %v2938_v31, %v2940_v60  ;;  %v7640_v17 = vadd.f32 %v7460_v16, %v228_v29 }
 0x318   :  { %v2994_v12 = vadd.s32 %v2993_v18, %v2984_v15  ;;  %vm2997_vm9 = vc.u32 %v2972_v33, %v2991_v61  ;;  %v2891_v47 = vadd.s32 3, %v2874_v56  ;;  %v2995_v4 = vmul.u32 %v7573_v58, %v2941_v1 }
 0x319   :  { %v2870_v26 = vsel %vm2749_vm6, %v2869_v27, %v2868_v21  ;;  %vm3068_vm10 = vcmp.gt.s32.totalorder %v3067_v50, 0  ;;  %v3065_v48 = vor.u32 8388608, %v3064_v13  ;;  %v3212_v36 = vand.u32 2147483647, %v7640_v17 }
 0x31a   :  { %v2873_v9 = vsel %vm2748_vm8, %v7326_v46, %v2870_v26  ;;  %v2998_v49 = vadd.s32 1, %v2994_v12  ;;  %v3069_v63 = vsel %vm3068_vm10, %v3067_v50, 0  ;;  %v7648_v6 = vand.u32 3, %v2891_v47 }
 0x31b   :  { %v2875_v3 = vmul.f32 %v2873_v9, %v2873_v9  ;;  %v3071_v7 = vand.u32 31, %v3069_v63  ;;  %v7651_v32 = vshll.u32 %v3065_v48, 8  ;;  %v7653_v35 = vadd.s32 %v2991_v61, %v2972_v33 }
 0x31c   :  { %v2999_v42 = vsel %vm2997_vm9, %v2998_v49, %v2994_v12  ;;  %v7661_v30 = vshrl.u32 %v3069_v63, 5  ;;  %vm2897_vm12 = vcmp.eq.s32.totalorder %v7648_v6, 2  ;;  %v3215_v0 = vand.u32 2139095040, %v7640_v17 }
 0x31d   :  { %v2876_v38 = vmul.f32 -0.001358992, %v2875_v3  ;;  %v2883_v5 = vmul.f32 -0.00019511016, %v2875_v3  ;;  %v3000_v62 = vadd.s32 %v2999_v42, %v2995_v4  ;;  %v7646_v23 = vsub.s32 32, %v3071_v7 }
 0x31e   :  { %v3074_v41 = vshll.u32 %v5456_v51, %v3071_v7  ;;  %v3077_v39 = vshll.u32 %v5457_v53, %v3071_v7  ;;  %v3083_v19 = vshll.u32 %v5459_v57, %v3071_v7  ;;  %vm2894_vm11 = vcmp.eq.s32.totalorder %v7648_v6, 0 }
 0x31f   :  { %v2877_v43 = vadd.f32 0.041655596, %v2876_v38  ;;  %v2884_v24 = vadd.f32 0.008332121, %v2883_v5  ;;  %v3001_v25 = vadd.s32 536870912, %v3000_v62  ;;  %v3075_v58 = vshrl.u32 %v5457_v53, %v7646_v23 }
 0x320   :  { %v3078_v20 = vshrl.u32 %v5458_v55, %v7646_v23  ;;  %v3084_v8 = vshrl.u32 %v5460_v59, %v7646_v23  ;;  %v3081_v44 = vshrl.u32 %v5459_v57, %v7646_v23  ;;  %v3080_v33 = vshll.u32 %v5458_v55, %v3071_v7 }
 0x321   :  { %v2878_v52 = vmul.f32 %v2877_v43, %v2875_v3  ;;  %v2885_v45 = vmul.f32 %v2884_v24, %v2875_v3  ;;  %v3002_v11 = vshrl.u32 %v3001_v25, 30  ;;  %v3076_v21 = vor.u32 %v3075_v58, %v3074_v41 }
 0x322   :  { %v7671_v60 = vor.u32 %v3078_v20, %v3077_v39  ;;  %v3085_v34 = vor.u32 %v3084_v8, %v3083_v19  ;;  %vm2893_vm13 = vcmp.lt.s32.totalorder %v7648_v6, 2  ;;  %v3087_v13 = vshrl.u32 %v5461_v2, %v7646_v23 }
 0x323   :  { %v2879_v10 = vadd.f32 -0.4999988, %v2878_v52  ;;  %v2886_v31 = vadd.f32 -0.16666654, %v2885_v45  ;;  %v3003_v28 = vshll.u32 %v3002_v11, 30  ;;  %vm2890_vm14 = vweird.f32 %v7326_v46 }
 0x324   :  { %vm2904_vm0 = vcmp.lt.s32.totalorder %v7463_v14, 0  ;;  %v3082_v27 = vor.u32 %v3081_v44, %v3080_v33  ;;  %v3086_v56 = vshll.u32 %v5460_v59, %v3071_v7  ;;  %vm3089_vm1 = vcmp.lt.s32.totalorder %v7661_v30, 1 }
 0x325   :  { %v2880_v29 = vmul.f32 %v2879_v10, %v2875_v3  ;;  %v2887_v15 = vmul.f32 %v2886_v31, %v2875_v3  ;;  %v7675_v18 = vsub.s32 %v3000_v62, %v3003_v28  ;;  %vm3092_vm15 = vcmp.lt.s32.totalorder %v7661_v30, 4 }
 0x326   :  { %vm3091_vm6 = vcmp.lt.s32.totalorder %v7661_v30, 3  ;;  %v3097_v12 = vsel %vm3089_vm1, %v3076_v21, %v7671_v60  ;;  %v3098_v26 = vsel %vm3092_vm15, %v3085_v34, 920167782  ;;  %v3216_v47 = vshrl.u32 %v3215_v0, 23 }
 0x327   :  { %v2881_v61 = vadd.f32 1.0, %v2880_v29  ;;  %v2888_v50 = vadd.f32 1.0, %v2887_v15  ;;  %vm3005_vm2 = vcmp.lt.s32.totalorder %v7675_v18, 0  ;;  %v3006_v1 = vsub.s32 0, %v7675_v18 }
 0x328   :  { %v3088_v4 = vor.u32 %v3087_v13, %v3086_v56  ;;  %vm3090_vm3 = vcmp.lt.s32.totalorder %v7661_v30, 2  ;;  %v3099_v7 = vsel %vm3091_vm6, %v3082_v27, %v3098_v26  ;;  %v3106_v42 = vand.u32 65535, %v7651_v32 }
 0x329   :  { %v2889_v49 = vmul.f32 %v2888_v50, %v2873_v9  ;;  %v2898_v63 = vxor.u32 2147483648, %v2881_v61  ;;  %v3007_v3 = vsel %vm3005_vm2, %v3006_v1, %v7675_v18  ;;  %v3026_v5 = vsub.s32 4, %v3002_v11 }
 0x32a   :  { %v3008_v48 = vclz %v3007_v3  ;;  %v3100_v62 = vsel %vm3090_vm3, %v3097_v12, %v3099_v7  ;;  %v3107_v43 = vshrl.u32 %v7651_v32, 16  ;;  %v3101_v25 = vsel %vm3089_vm1, %v7671_v60, %v3082_v27 }
 0x32b   :  { %v2895_v38 = vxor.u32 2147483648, %v2889_v49  ;;  %v2899_v9 = vsel %vm2897_vm12, %v2898_v63, %v2889_v49  ;;  %v5367_v58 = vadd.s32 4294967169, %v3216_v47  ;;  %v3102_v8 = vsel %vm3092_vm15, %v3088_v4, 1326507024 }
 0x32c   :  { %v5362_v24 = vadd.s32 4294967294, %v3008_v48  ;;  %v3130_v52 = vand.u32 65535, %v3100_v62  ;;  %v3131_v45 = vshrl.u32 %v3100_v62, 16  ;;  %v3073_v39 = vshrl.u32 %v5456_v51, %v7646_v23 }
 0x32d   :  { %v2896_v20 = vsel %vm2894_vm11, %v2881_v61, %v2895_v38  ;;  %v3103_v44 = vsel %vm3091_vm6, %v3085_v34, %v3102_v8  ;;  %v7719_v31 = vsel %vm2904_vm0, %v3026_v5, %v3002_v11  ;;  %v3094_v33 = vsel %vm3092_vm15, %v3082_v27, 2102212464 }
 0x32e   :  { %v2900_v41 = vsel %vm2893_vm13, %v2896_v20, %v2899_v9  ;;  %vm5363_vm4 = vcmp.lt.s32.totalorder %v5362_v24, 0  ;;  %v3104_v28 = vsel %vm3090_vm3, %v3101_v25, %v3103_v44  ;;  %v3093_v34 = vsel %vm3089_vm1, %v3073_v39, %v3076_v21  ;;  %v231_v20 = vpop.f32.mrf.mxu2 }
 0x32f   :  { %v2901_v19 = vsel %vm2890_vm14, nan, %v2900_v41  ;;  %v3011_v10 = vsel %vm5363_vm4, 0, %v5362_v24  ;;  %v3108_v23 = vand.u32 65535, %v3104_v28  ;;  %v3109_v46 = vshrl.u32 %v3104_v28, 16 }
 0x330   :  { %v3012_v6 = vsub.s32 32, %v3011_v10  ;;  %v3016_v0 = vsub.s32 4294967266, %v3011_v10  ;;  %5243 = vst [vmem:[#allocation2 + $0x80] sm:$0xff] %v2901_v19  ;;  %v3133_v29 = vmul.u32 %v3131_v45, %v3106_v42  ;;  %v3134_v15 = vmul.u32 %v3130_v52, %v3107_v43 }
 0x331   :  { %vm7729_vm5 = vcmp.le.f32.partialorder %v2902_v40, 0.7853982  ;;  %v3013_v13 = vshll.u32 %v7675_v18, %v3011_v10  ;;  %v3112_v27 = vmul.u32 %v3108_v23, %v3107_v43  ;;  %v3095_v50 = vsel %vm3091_vm6, %v7671_v60, %v3094_v33 }
 0x332   :  { %v3014_v56 = vshrl.u32 %v7653_v35, %v3012_v6  ;;  %v3017_v61 = vadd.s32 127, %v3016_v0  ;;  %v3111_v21 = vmul.u32 %v3109_v46, %v3106_v42  ;;  %v3132_v1 = vmul.u32 %v3130_v52, %v3106_v42 }
 0x333   :  { %v3136_v12 = vshll.u32 %v3133_v29, 16  ;;  %v3110_v49 = vmul.u32 %v3108_v23, %v3106_v42  ;;  %v3135_v40 = vmul.u32 %v3131_v45, %v3107_v43  ;;  %v3113_v63 = vmul.u32 %v3109_v46, %v3107_v43 }
 0x334   :  { %v3015_v26 = vor.u32 %v3014_v56, %v3013_v13  ;;  %v3018_v47 = vshll.u32 %v3017_v61, 23  ;;  %v3114_v3 = vshll.u32 %v3111_v21, 16  ;;  %v3116_v4 = vshll.u32 %v3112_v27, 16 }
 0x335   :  { %v3138_v48 = vshll.u32 %v3134_v15, 16  ;;  %vm3140_vm7 = vc.u32 %v3132_v1, %v3136_v12  ;;  %v3142_v35 = vadd.s32 %v3136_v12, %v3132_v1  ;;  %v3222_v60 = vadd.s32 1, %v5367_v58 }
 0x336   :  { %v3019_v18 = vor.u32 4788187, %v3018_v47  ;;  %v3022_v7 = vcvt.s32.f32 %v3015_v26  ;;  %vm3118_vm8 = vc.u32 %v3110_v49, %v3114_v3  ;;  %v3120_v38 = vadd.s32 %v3114_v3, %v3110_v49 }
 0x337   :  { %v3141_v5 = vsel %vm3140_vm7, 1, %v5462_v54  ;;  %v3119_v9 = vsel %vm3118_vm8, 1, %v5462_v54  ;;  %vm3144_vm9 = vc.u32 %v3142_v35, %v3138_v48  ;;  %v3137_v43 = vshrl.u32 %v3133_v29, 16 }
 0x338   :  { %v3020_v62 = vand.u32 2147483647, %v3019_v18  ;;  %v3143_v24 = vadd.s32 %v3141_v5, %v3135_v40  ;;  %v3121_v42 = vadd.s32 %v3119_v9, %v3113_v63  ;;  %vm3122_vm10 = vc.u32 %v3120_v38, %v3116_v4  ;;  %v234_v18 = vpop.f32.mrf.mxu2 }
 0x339   :  { %v3145_v25 = vsel %vm3144_vm9, 1, %v5462_v54  ;;  %v3123_v52 = vsel %vm3122_vm10, 1, %v5462_v54  ;;  %vm3223_vm12 = vcmp.gt.s32.totalorder %v3222_v60, 0  ;;  %v3029_v58 = vsel %vm7729_vm5, 0, %v7719_v31 }
 0x33a   :  { %v3023_v8 = vmul.f32 %v3022_v7, %v3020_v62  ;;  %v3147_v45 = vadd.s32 %v3145_v25, %v3143_v24  ;;  %v3115_v41 = vshrl.u32 %v3111_v21, 16  ;;  %v3125_v39 = vadd.s32 %v3123_v52, %v3121_v42 }
 0x33b   :  { %v3224_v44 = vsel %vm3223_vm12, %v3222_v60, 0  ;;  %v3139_v10 = vshrl.u32 %v3134_v15, 16  ;;  %v7746_v0 = vadd.f32 %v7460_v16, %v231_v20  ;;  %v3096_v33 = vsel %vm3090_vm3, %v3093_v34, %v3095_v50 }
 0x33c   :  { %v3024_v19 = vxor.u32 2147483648, %v3023_v8  ;;  %v3148_v28 = vadd.s32 %v3147_v45, %v3137_v43  ;;  %v3226_v6 = vand.u32 31, %v3224_v44  ;;  %v3117_v23 = vshrl.u32 %v3112_v27, 16 }
 0x33d   :  { %v3126_v46 = vadd.s32 %v3125_v39, %v3115_v41  ;;  %v3219_v31 = vand.u32 8388607, %v3212_v36  ;;  %v3046_v61 = vadd.s32 3, %v3029_v58  ;;  %v7763_v30 = vadd.s32 %v3142_v35, %v3138_v48 }
 0x33e   :  { %v3025_v29 = vsel %vm2904_vm0, %v3024_v19, %v3023_v8  ;;  %v3149_v13 = vadd.s32 %v3148_v28, %v3139_v10  ;;  %v7754_v56 = vsub.s32 32, %v3226_v6  ;;  %v3150_v27 = vmul.u32 %v7651_v32, %v3096_v33 }
 0x33f   :  { %v7759_v15 = vsel %vm7729_vm5, %v7463_v14, %v3025_v29  ;;  %v7761_v21 = vadd.s32 %v3126_v46, %v3117_v23  ;;  %v3229_v11 = vshll.u32 %v5456_v51, %v3226_v6  ;;  %v7777_v63 = vshrl.u32 %v3224_v44, 5 }
 0x340   :  { %v3030_v34 = vmul.f32 %v7759_v15, %v7759_v15  ;;  %v3153_v50 = vadd.s32 1, %v3149_v13  ;;  %v3230_v1 = vshrl.u32 %v5457_v53, %v7754_v56  ;;  %v3233_v12 = vshrl.u32 %v5458_v55, %v7754_v56 }
 0x341   :  { %vm3152_vm11 = vc.u32 %v7761_v21, %v7763_v30  ;;  %v3236_v26 = vshrl.u32 %v5459_v57, %v7754_v56  ;;  %v3232_v4 = vshll.u32 %v5457_v53, %v3226_v6  ;;  %v3235_v48 = vshll.u32 %v5458_v55, %v3226_v6 }
 0x342   :  { %v3031_v47 = vmul.f32 -0.001358992, %v3030_v34  ;;  %v3038_v49 = vmul.f32 -0.00019511016, %v3030_v34  ;;  %v3154_v40 = vsel %vm3152_vm11, %v3153_v50, %v3149_v13  ;;  %v7779_v3 = vor.u32 %v3230_v1, %v3229_v11 }
 0x343   :  { %v3155_v32 = vadd.s32 %v3154_v40, %v3150_v27  ;;  %v3238_v38 = vshll.u32 %v5459_v57, %v3226_v6  ;;  %v3239_v5 = vshrl.u32 %v5460_v59, %v7754_v56  ;;  %v7786_v62 = vor.u32 %v3233_v12, %v3232_v4 }
 0x344   :  { %v3032_v7 = vadd.f32 0.041655596, %v3031_v47  ;;  %v3039_v35 = vadd.f32 0.008332121, %v3038_v49  ;;  %v3237_v9 = vor.u32 %v3236_v26, %v3235_v48  ;;  %v3242_v24 = vshrl.u32 %v5461_v2, %v7754_v56 }
 0x345   :  { %v3156_v60 = vadd.s32 536870912, %v3155_v32  ;;  %v3240_v25 = vor.u32 %v3239_v5, %v3238_v38  ;;  %v3241_v20 = vshll.u32 %v5460_v59, %v3226_v6  ;;  %v7792_v8 = vadd.f32 %v7460_v16, %v234_v18 }
 0x346   :  { %v3033_v42 = vmul.f32 %v3032_v7, %v3030_v34  ;;  %v3040_v43 = vmul.f32 %v3039_v35, %v3030_v34  ;;  %v3047_v52 = vand.u32 3, %v3046_v61  ;;  %v3220_v58 = vor.u32 8388608, %v3219_v31 }
 0x347   :  { %v7794_v45 = vshrl.u32 %v3156_v60, 30  ;;  %v3243_v44 = vor.u32 %v3242_v24, %v3241_v20  ;;  %vm3247_vm13 = vcmp.lt.s32.totalorder %v7777_v63, 4  ;;  %vm3244_vm14 = vcmp.lt.s32.totalorder %v7777_v63, 1 }
 0x348   :  { %v3034_v41 = vadd.f32 -0.4999988, %v3033_v42  ;;  %v3041_v39 = vadd.f32 -0.16666654, %v3040_v43  ;;  %vm3246_vm0 = vcmp.lt.s32.totalorder %v7777_v63, 3  ;;  %v3252_v6 = vsel %vm3244_vm14, %v7779_v3, %v7786_v62 }
 0x349   :  { %v3158_v19 = vshll.u32 %v7794_v45, 30  ;;  %v3253_v10 = vsel %vm3247_vm13, %v3240_v25, 920167782  ;;  %vm3045_vm1 = vweird.f32 %v7463_v14  ;;  %vm3048_vm15 = vcmp.lt.s32.totalorder %v3047_v52, 2 }
 0x34a   :  { %v3035_v16 = vmul.f32 %v3034_v41, %v3030_v34  ;;  %v3042_v28 = vmul.f32 %v3041_v39, %v3030_v34  ;;  %v3254_v33 = vsel %vm3246_vm0, %v3237_v9, %v3253_v10  ;;  %v3256_v46 = vsel %vm3244_vm14, %v7786_v62, %v3237_v9 }
 0x34b   :  { %v3159_v23 = vsub.s32 %v3155_v32, %v3158_v19  ;;  %v7812_v29 = vshll.u32 %v3220_v58, 8  ;;  %vm3245_vm2 = vcmp.lt.s32.totalorder %v7777_v63, 2  ;;  %v3257_v61 = vsel %vm3247_vm13, %v3243_v44, 1326507024 }
 0x34c   :  { %v3036_v13 = vadd.f32 1.0, %v3035_v16  ;;  %v3043_v31 = vadd.f32 1.0, %v3042_v28  ;;  %v3255_v27 = vsel %vm3245_vm2, %v3252_v6, %v3254_v33  ;;  %v3258_v50 = vsel %vm3246_vm0, %v3240_v25, %v3257_v61 }
 0x34d   :  { %vm3160_vm6 = vcmp.lt.s32.totalorder %v3159_v23, 0  ;;  %v3161_v34 = vsub.s32 0, %v3159_v23  ;;  %vm3052_vm3 = vcmp.eq.s32.totalorder %v3047_v52, 2  ;;  %v3259_v12 = vsel %vm3245_vm2, %v3256_v46, %v3258_v50 }
 0x34e   :  { %v3044_v1 = vmul.f32 %v3043_v31, %v7759_v15  ;;  %v3053_v11 = vxor.u32 2147483648, %v3036_v13  ;;  %v3261_v47 = vand.u32 65535, %v7812_v29  ;;  %v3263_v49 = vand.u32 65535, %v3259_v12 }
 0x34f   :  { %v3162_v26 = vsel %vm3160_vm6, %v3161_v34, %v3159_v23  ;;  %v3264_v40 = vshrl.u32 %v3259_v12, 16  ;;  %v3262_v48 = vshrl.u32 %v7812_v29, 16  ;;  %v3286_v18 = vshrl.u32 %v3255_v27, 16 }
 0x350   :  { %v3050_v32 = vxor.u32 2147483648, %v3044_v1  ;;  %v3163_v4 = vclz %v3162_v26  ;;  %vm3049_vm4 = vcmp.eq.s32.totalorder %v3047_v52, 0  ;;  %v3054_v7 = vsel %vm3052_vm3, %v3053_v11, %v3044_v1 }
 0x351   :  { %v3228_v15 = vshrl.u32 %v5456_v51, %v7754_v56  ;;  %v3285_v35 = vand.u32 65535, %v3255_v27  ;;  %v3266_v60 = vmul.u32 %v3264_v40, %v3261_v47  ;;  %v3267_v24 = vmul.u32 %v3263_v49, %v3262_v48 }
 0x352   :  { %v3051_v38 = vsel %vm3049_vm4, %v3036_v13, %v3050_v32  ;;  %v5365_v5 = vadd.s32 4294967294, %v3163_v4  ;;  %v3151_v43 = vadd.s32 %v7763_v30, %v7761_v21  ;;  %v3249_v25 = vsel %vm3247_vm13, %v3237_v9, 2102212464 }
 0x353   :  { %v3055_v42 = vsel %vm3048_vm15, %v3051_v38, %v3054_v7  ;;  %v3288_v20 = vmul.u32 %v3286_v18, %v3261_v47  ;;  %v3265_v41 = vmul.u32 %v3263_v49, %v3261_v47  ;;  %v3269_v56 = vshll.u32 %v3266_v60, 16 }
 0x354   :  { %v3056_v58 = vsel %vm3045_vm1, nan, %v3055_v42  ;;  %vm5366_vm5 = vcmp.lt.s32.totalorder %v5365_v5, 0  ;;  %v3181_v44 = vsub.s32 4, %v7794_v45  ;;  %v3268_v19 = vmul.u32 %v3264_v40, %v3262_v48 }
 0x355   :  { %v3166_v39 = vsel %vm5366_vm5, 0, %v5365_v5  ;;  %v3287_v10 = vmul.u32 %v3285_v35, %v3261_v47  ;;  %5244 = vst [vmem:[#allocation2 + $0x88] sm:$0xff] %v3056_v58  ;;  %v3271_v28 = vshll.u32 %v3267_v24, 16  ;;  %vm3273_vm7 = vc.u32 %v3265_v41, %v3269_v56 }
 0x356   :  { %v3167_v52 = vsub.s32 32, %v3166_v39  ;;  %v3171_v16 = vsub.s32 4294967266, %v3166_v39  ;;  %v3274_v21 = vsel %vm3273_vm7, 1, %v5462_v54  ;;  %v3275_v30 = vadd.s32 %v3269_v56, %v3265_v41 }
 0x357   :  { %v3289_v9 = vmul.u32 %v3285_v35, %v3262_v48  ;;  %v3291_v6 = vshll.u32 %v3288_v20, 16  ;;  %v3168_v14 = vshll.u32 %v3159_v23, %v3166_v39  ;;  %v3276_v13 = vadd.s32 %v3274_v21, %v3268_v19 }
 0x358   :  { %v3169_v33 = vshrl.u32 %v3151_v43, %v3167_v52  ;;  %v3172_v46 = vadd.s32 127, %v3171_v16  ;;  %v3270_v31 = vshrl.u32 %v3266_v60, 16  ;;  %vm3277_vm8 = vc.u32 %v3275_v30, %v3271_v28 }
 0x359   :  { %v3290_v61 = vmul.u32 %v3286_v18, %v3262_v48  ;;  %vm3295_vm9 = vc.u32 %v3287_v10, %v3291_v6  ;;  %v3278_v50 = vsel %vm3277_vm8, 1, %v5462_v54  ;;  %v3293_v12 = vshll.u32 %v3289_v9, 16 }
 0x35a   :  { %v3170_v34 = vor.u32 %v3169_v33, %v3168_v14  ;;  %v3173_v27 = vshll.u32 %v3172_v46, 23  ;;  %v3296_v1 = vsel %vm3295_vm9, 1, %v5462_v54  ;;  %v3280_v11 = vadd.s32 %v3278_v50, %v3276_v13 }
 0x35b   :  { %v3297_v26 = vadd.s32 %v3291_v6, %v3287_v10  ;;  %v3298_v47 = vadd.s32 %v3296_v1, %v3290_v61  ;;  %vm3059_vm10 = vcmp.lt.s32.totalorder %v7540_v22, 0  ;;  %v3248_v49 = vsel %vm3244_vm14, %v3228_v15, %v7779_v3 }
 0x35c   :  { %v3174_v23 = vor.u32 4788187, %v3173_v27  ;;  %v3367_v40 = vand.u32 2147483647, %v7746_v0  ;;  %v3250_v32 = vsel %vm3246_vm0, %v7786_v62, %v3249_v25  ;;  %v3281_v4 = vadd.s32 %v3280_v11, %v3270_v31 }
 0x35d   :  { %vm3299_vm12 = vc.u32 %v3297_v26, %v3293_v12  ;;  %v3370_v48 = vand.u32 2139095040, %v7746_v0  ;;  %v3177_v7 = vcvt.s32.f32 %v3170_v34  ;;  %v3272_v35 = vshrl.u32 %v3267_v24, 16 }
 0x35e   :  { %v3175_v18 = vand.u32 2147483647, %v3174_v23  ;;  %v3300_v38 = vsel %vm3299_vm12, 1, %v5462_v54  ;;  %v3182_v5 = vsel %vm3059_vm10, %v3181_v44, %v7794_v45  ;;  %v3292_v3 = vshrl.u32 %v3288_v20, 16 }
 0x35f   :  { %v3302_v15 = vadd.s32 %v3300_v38, %v3298_v47  ;;  %v3371_v60 = vshrl.u32 %v3370_v48, 23  ;;  %v3282_v43 = vadd.s32 %v3281_v4, %v3272_v35  ;;  %vm3058_vm11 = vcmp.le.f32.partialorder %v3057_v37, 0.7853982 }
 0x360   :  { %v3178_v42 = vmul.f32 %v3177_v7, %v3175_v18  ;;  %v3294_v62 = vshrl.u32 %v3289_v9, 16  ;;  %v3184_v56 = vsel %vm3058_vm11, 0, %v3182_v5  ;;  %v3251_v24 = vsel %vm3245_vm2, %v3248_v49, %v3250_v32 }
 0x361   :  { %v3303_v25 = vadd.s32 %v3302_v15, %v3292_v3  ;;  %v5370_v58 = vadd.s32 4294967169, %v3371_v60  ;;  %v3301_v39 = vadd.s32 %v3297_v26, %v3293_v12  ;;  %v3374_v45 = vand.u32 8388607, %v3367_v40 }
 0x362   :  { %v3179_v41 = vxor.u32 2147483648, %v3178_v42  ;;  %v3525_v44 = vand.u32 2139095040, %v7792_v8  ;;  %v3201_v52 = vadd.s32 3, %v3184_v56  ;;  %v3305_v63 = vmul.u32 %v7812_v29, %v3251_v24 }
 0x363   :  { %v3304_v19 = vadd.s32 %v3303_v25, %v3294_v62  ;;  %v3377_v20 = vadd.s32 1, %v5370_v58  ;;  %vm3307_vm13 = vc.u32 %v3282_v43, %v3301_v39  ;;  %v3522_v30 = vand.u32 2147483647, %v7792_v8 }
 0x364   :  { %v3180_v10 = vsel %vm3059_vm10, %v3179_v41, %v3178_v42  ;;  %v3375_v6 = vor.u32 8388608, %v3374_v45  ;;  %v3526_v33 = vshrl.u32 %v3525_v44, 23  ;;  %v7864_v50 = vand.u32 3, %v3201_v52 }
 0x365   :  { %v3183_v37 = vsel %vm3058_vm11, %v7540_v22, %v3180_v10  ;;  %v3308_v16 = vadd.s32 1, %v3304_v19  ;;  %vm3378_vm14 = vcmp.gt.s32.totalorder %v3377_v20, 0  ;;  %v7866_v11 = vadd.s32 %v3301_v39, %v3282_v43 }
 0x366   :  { %v3185_v28 = vmul.f32 %v3183_v37, %v3183_v37  ;;  %v3379_v21 = vsel %vm3378_vm14, %v3377_v20, 0  ;;  %v7868_v12 = vshll.u32 %v3375_v6, 8  ;;  %v5373_v29 = vadd.s32 4294967169, %v3526_v33 }
 0x367   :  { %v3309_v9 = vsel %vm3307_vm13, %v3308_v16, %v3304_v19  ;;  %v3381_v14 = vand.u32 31, %v3379_v21  ;;  %v7872_v26 = vand.u32 8388607, %v3522_v30  ;;  %v7877_v4 = vshrl.u32 %v3379_v21, 5 }
 0x368   :  { %v3186_v46 = vmul.f32 -0.001358992, %v3185_v28  ;;  %v3193_v13 = vmul.f32 -0.00019511016, %v3185_v28  ;;  %v3310_v31 = vadd.s32 %v3309_v9, %v3305_v63  ;;  %vm3204_vm0 = vcmp.eq.s32.totalorder %v7864_v50, 0 }
 0x369   :  { %v3382_v61 = vsub.s32 32, %v3381_v14  ;;  %v3384_v3 = vshll.u32 %v5456_v51, %v3381_v14  ;;  %vm3207_vm1 = vcmp.eq.s32.totalorder %v7864_v50, 2  ;;  %v3387_v15 = vshll.u32 %v5457_v53, %v3381_v14 }
 0x36a   :  { %v3187_v34 = vadd.f32 0.041655596, %v3186_v46  ;;  %v3194_v27 = vadd.f32 0.008332121, %v3193_v13  ;;  %v3311_v1 = vadd.s32 536870912, %v3310_v31  ;;  %v3390_v60 = vshll.u32 %v5458_v55, %v3381_v14 }
 0x36b   :  { %v3385_v32 = vshrl.u32 %v5457_v53, %v3382_v61  ;;  %v3388_v48 = vshrl.u32 %v5458_v55, %v3382_v61  ;;  %v3391_v18 = vshrl.u32 %v5459_v57, %v3382_v61  ;;  %v3394_v7 = vshrl.u32 %v5460_v59, %v3382_v61 }
 0x36c   :  { %v3188_v47 = vmul.f32 %v3187_v34, %v3185_v28  ;;  %v3195_v23 = vmul.f32 %v3194_v27, %v3185_v28  ;;  %v7874_v49 = vshrl.u32 %v3311_v1, 30  ;;  %v3393_v42 = vshll.u32 %v5459_v57, %v3381_v14 }
 0x36d   :  { %v3397_v43 = vshrl.u32 %v5461_v2, %v3382_v61  ;;  %vm3203_vm15 = vcmp.lt.s32.totalorder %v7864_v50, 2  ;;  %v3386_v41 = vor.u32 %v3385_v32, %v3384_v3  ;;  %vm3200_vm2 = vweird.f32 %v7540_v22 }
 0x36e   :  { %v3189_v35 = vadd.f32 -0.4999988, %v3188_v47  ;;  %v3196_v38 = vadd.f32 -0.16666654, %v3195_v23  ;;  %v3313_v5 = vshll.u32 %v7874_v49, 30  ;;  %v3389_v56 = vor.u32 %v3388_v48, %v3387_v15 }
 0x36f   :  { %v3392_v24 = vor.u32 %v3391_v18, %v3390_v60  ;;  %v3395_v39 = vor.u32 %v3394_v7, %v3393_v42  ;;  %v3396_v19 = vshll.u32 %v5460_v59, %v3381_v14  ;;  %vm3214_vm3 = vcmp.lt.s32.totalorder %v7640_v17, 0 }
 0x370   :  { %v3190_v62 = vmul.f32 %v3189_v35, %v3185_v28  ;;  %v3197_v25 = vmul.f32 %v3196_v38, %v3185_v28  ;;  %v7891_v58 = vsub.s32 %v3310_v31, %v3313_v5  ;;  %vm3399_vm4 = vcmp.lt.s32.totalorder %v7877_v4, 1 }
 0x371   :  { %v3398_v10 = vor.u32 %v3397_v43, %v3396_v19  ;;  %v3416_v52 = vand.u32 65535, %v7868_v12  ;;  %v7900_v16 = vadd.s32 1, %v5373_v29  ;;  %vm3402_vm5 = vcmp.lt.s32.totalorder %v7877_v4, 4 }
 0x372   :  { %v3191_v45 = vadd.f32 1.0, %v3190_v62  ;;  %v3198_v20 = vadd.f32 1.0, %v3197_v25  ;;  %vm3315_vm6 = vcmp.lt.s32.totalorder %v7891_v58, 0  ;;  %v3316_v44 = vsub.s32 0, %v7891_v58 }
 0x373   :  { %vm3401_vm7 = vcmp.lt.s32.totalorder %v7877_v4, 3  ;;  %v3407_v6 = vsel %vm3399_vm4, %v3386_v41, %v3389_v56  ;;  %v3408_v14 = vsel %vm3402_vm5, %v3395_v39, 920167782  ;;  %v3383_v46 = vshrl.u32 %v5456_v51, %v3382_v61 }
 0x374   :  { %v3199_v28 = vmul.f32 %v3198_v20, %v3183_v37  ;;  %v3208_v63 = vxor.u32 2147483648, %v3191_v45  ;;  %v3317_v21 = vsel %vm3315_vm6, %v3316_v44, %v7891_v58  ;;  %v3409_v37 = vsel %vm3401_vm7, %v3392_v24, %v3408_v14 }
 0x375   :  { %v3318_v9 = vclz %v3317_v21  ;;  %v3417_v13 = vshrl.u32 %v7868_v12, 16  ;;  %v3336_v34 = vsub.s32 4, %v7874_v49  ;;  %vm3400_vm8 = vcmp.lt.s32.totalorder %v7877_v4, 2 }
 0x376   :  { %v3205_v33 = vxor.u32 2147483648, %v3199_v28  ;;  %v3411_v27 = vsel %vm3399_vm4, %v3389_v56, %v3392_v24  ;;  %v3209_v29 = vsel %vm3207_vm1, %v3208_v63, %v3199_v28  ;;  %v3410_v61 = vsel %vm3400_vm8, %v3407_v6, %v3409_v37 }
 0x377   :  { %v5368_v31 = vadd.s32 4294967294, %v3318_v9  ;;  %v3412_v47 = vsel %vm3402_vm5, %v3398_v10, 1326507024  ;;  %vm3533_vm9 = vcmp.gt.s32.totalorder %v7900_v16, 0  ;;  %v3440_v48 = vand.u32 65535, %v3410_v61 }
 0x378   :  { %v3206_v1 = vsel %vm3204_vm0, %v3191_v45, %v3205_v33  ;;  %v3413_v32 = vsel %vm3401_vm7, %v3395_v39, %v3412_v47  ;;  %v3441_v38 = vshrl.u32 %v3410_v61, 16  ;;  %v3404_v15 = vsel %vm3402_vm5, %v3392_v24, 2102212464 }
 0x379   :  { %v3210_v23 = vsel %vm3203_vm15, %v3206_v1, %v3209_v29  ;;  %vm5369_vm10 = vcmp.lt.s32.totalorder %v5368_v31, 0  ;;  %v3414_v35 = vsel %vm3400_vm8, %v3411_v27, %v3413_v32  ;;  %v7940_v42 = vsel %vm3214_vm3, %v3336_v34, %v7874_v49 }
 0x37a   :  { %v3211_v18 = vsel %vm3200_vm2, nan, %v3210_v23  ;;  %v3321_v7 = vsel %vm5369_vm10, 0, %v5368_v31  ;;  %v3418_v50 = vand.u32 65535, %v3414_v35  ;;  %v3419_v22 = vshrl.u32 %v3414_v35, 16 }
 0x37b   :  { %v3322_v5 = vsub.s32 32, %v3321_v7  ;;  %v3326_v3 = vsub.s32 4294967266, %v3321_v7  ;;  %5245 = vst [vmem:[#allocation2 + $0x90] sm:$0xff] %v3211_v18  ;;  %v3323_v60 = vshll.u32 %v7891_v58, %v3321_v7  ;;  %v3443_v43 = vmul.u32 %v3441_v38, %v3416_v52 }
 0x37c   :  { %v3422_v39 = vmul.u32 %v3418_v50, %v3417_v13  ;;  %v3444_v19 = vmul.u32 %v3440_v48, %v3417_v13  ;;  %vm7945_vm12 = vcmp.le.f32.partialorder %v3212_v36, 0.7853982  ;;  %v3403_v58 = vsel %vm3399_vm4, %v3383_v46, %v3386_v41 }
 0x37d   :  { %v3324_v62 = vshrl.u32 %v7866_v11, %v3322_v5  ;;  %v3327_v25 = vadd.s32 127, %v3326_v3  ;;  %v3405_v49 = vsel %vm3401_vm7, %v3389_v56, %v3404_v15  ;;  %v3421_v45 = vmul.u32 %v3419_v22, %v3416_v52 }
 0x37e   :  { %v3446_v20 = vshll.u32 %v3443_v43, 16  ;;  %v3420_v11 = vmul.u32 %v3418_v50, %v3416_v52  ;;  %v3442_v28 = vmul.u32 %v3440_v48, %v3416_v52  ;;  %v3423_v63 = vmul.u32 %v3419_v22, %v3417_v13 }
 0x37f   :  { %v3325_v44 = vor.u32 %v3324_v62, %v3323_v60  ;;  %v3328_v10 = vshll.u32 %v3327_v25, 23  ;;  %v3424_v21 = vshll.u32 %v3421_v45, 16  ;;  %v3426_v9 = vshll.u32 %v3422_v39, 16 }
 0x380   :  { %v3445_v6 = vmul.u32 %v3441_v38, %v3417_v13  ;;  %v3448_v33 = vshll.u32 %v3444_v19, 16  ;;  %vm3450_vm11 = vc.u32 %v3442_v28, %v3446_v20  ;;  %v3452_v46 = vadd.s32 %v3446_v20, %v3442_v28 }
 0x381   :  { %v3329_v36 = vor.u32 4788187, %v3328_v10  ;;  %v3332_v14 = vcvt.s32.f32 %v3325_v44  ;;  %vm3428_vm13 = vc.u32 %v3420_v11, %v3424_v21  ;;  %v3430_v37 = vadd.s32 %v3424_v21, %v3420_v11 }
 0x382   :  { %v3451_v41 = vsel %vm3450_vm11, 1, %v5462_v54  ;;  %v3429_v31 = vsel %vm3428_vm13, 1, %v5462_v54  ;;  %v3534_v52 = vsel %vm3533_vm9, %v7900_v16, 0  ;;  %v3406_v13 = vsel %vm3400_vm8, %v3403_v58, %v3405_v49 }
 0x383   :  { %v3330_v56 = vand.u32 2147483647, %v3329_v36  ;;  %v3453_v34 = vadd.s32 %v3451_v41, %v3445_v6  ;;  %v3431_v27 = vadd.s32 %v3429_v31, %v3423_v63  ;;  %vm3432_vm14 = vc.u32 %v3430_v37, %v3426_v9 }
 0x384   :  { %vm3454_vm0 = vc.u32 %v3452_v46, %v3448_v33  ;;  %v3425_v29 = vshrl.u32 %v3421_v45, 16  ;;  %v3433_v61 = vsel %vm3432_vm14, 1, %v5462_v54  ;;  %v3447_v32 = vshrl.u32 %v3443_v43, 16 }
 0x385   :  { %v3333_v1 = vmul.f32 %v3332_v14, %v3330_v56  ;;  %v3455_v47 = vsel %vm3454_vm0, 1, %v5462_v54  ;;  %v3435_v23 = vadd.s32 %v3433_v61, %v3431_v27  ;;  %v3536_v18 = vand.u32 31, %v3534_v52 }
 0x386   :  { %v3457_v48 = vadd.s32 %v3455_v47, %v3453_v34  ;;  %v3339_v16 = vsel %vm7945_vm12, 0, %v7940_v42  ;;  %v3427_v4 = vshrl.u32 %v3422_v39, 16  ;;  %v3460_v35 = vmul.u32 %v7868_v12, %v3406_v13 }
 0x387   :  { %v3334_v7 = vxor.u32 2147483648, %v3333_v1  ;;  %v3436_v38 = vadd.s32 %v3435_v23, %v3425_v29  ;;  %v3449_v5 = vshrl.u32 %v3444_v19, 16  ;;  %v7966_v15 = vsub.s32 32, %v3536_v18 }
 0x388   :  { %v3458_v3 = vadd.s32 %v3457_v48, %v3447_v32  ;;  %v7970_v60 = vadd.s32 %v3452_v46, %v3448_v33  ;;  %v7972_v22 = vshrl.u32 %v3534_v52, 5  ;;  %v3539_v43 = vshll.u32 %v5456_v51, %v3536_v18 }
 0x389   :  { %v3335_v50 = vsel %vm3214_vm3, %v3334_v7, %v3333_v1  ;;  %v7978_v62 = vadd.s32 %v3436_v38, %v3427_v4  ;;  %v3542_v25 = vshll.u32 %v5457_v53, %v3536_v18  ;;  %v3540_v19 = vshrl.u32 %v5457_v53, %v7966_v15  ;;  %v237_v1 = vpop.f32.mrf.mxu2 }
 0x38a   :  { %v3338_v42 = vsel %vm7945_vm12, %v7640_v17, %v3335_v50  ;;  %v3459_v12 = vadd.s32 %v3458_v3, %v3449_v5  ;;  %v3543_v58 = vshrl.u32 %v5458_v55, %v7966_v15  ;;  %v3548_v49 = vshll.u32 %v5459_v57, %v3536_v18 }
 0x38b   :  { %v3340_v39 = vmul.f32 %v3338_v42, %v3338_v42  ;;  %vm3462_vm1 = vc.u32 %v7978_v62, %v7970_v60  ;;  %v3546_v24 = vshrl.u32 %v5459_v57, %v7966_v15  ;;  %v3549_v20 = vshrl.u32 %v5460_v59, %v7966_v15 }
 0x38c   :  { %v3463_v45 = vadd.s32 1, %v3459_v12  ;;  %v7992_v11 = vor.u32 %v3540_v19, %v3539_v43  ;;  %v3545_v28 = vshll.u32 %v5458_v55, %v3536_v18  ;;  %v7995_v21 = vor.u32 %v3543_v58, %v3542_v25 }
 0x38d   :  { %v3341_v44 = vmul.f32 -0.001358992, %v3340_v39  ;;  %v3348_v10 = vmul.f32 -0.00019511016, %v3340_v39  ;;  %v3550_v9 = vor.u32 %v3549_v20, %v3548_v49  ;;  %v3551_v6 = vshll.u32 %v5460_v59, %v3536_v18 }
 0x38e   :  { %v3464_v63 = vsel %vm3462_vm1, %v3463_v45, %v3459_v12  ;;  %v3552_v37 = vshrl.u32 %v5461_v2, %v7966_v15  ;;  %v3356_v41 = vadd.s32 3, %v3339_v16  ;;  %v3547_v46 = vor.u32 %v3546_v24, %v3545_v28 }
 0x38f   :  { %v3342_v36 = vadd.f32 0.041655596, %v3341_v44  ;;  %v3349_v14 = vadd.f32 0.008332121, %v3348_v10  ;;  %v3465_v33 = vadd.s32 %v3464_v63, %v3460_v35  ;;  %vm3557_vm15 = vcmp.lt.s32.totalorder %v7972_v22, 4 }
 0x390   :  { %v3553_v52 = vor.u32 %v3552_v37, %v3551_v6  ;;  %v3530_v13 = vor.u32 8388608, %v7872_v26  ;;  %vm3554_vm2 = vcmp.lt.s32.totalorder %v7972_v22, 1  ;;  %vm3556_vm6 = vcmp.lt.s32.totalorder %v7972_v22, 3  ;;  %v8024_v35 = vld [vmem:[%s9265_s2] ss:$0 sm:$0xff] }
 0x391   :  { %v3343_v56 = vmul.f32 %v3342_v36, %v3340_v39  ;;  %v3350_v31 = vmul.f32 %v3349_v14, %v3340_v39  ;;  %v3466_v34 = vadd.s32 536870912, %v3465_v33  ;;  %v3563_v27 = vsel %vm3557_vm15, %v3550_v9, 920167782 }
 0x392   :  { %v3562_v23 = vsel %vm3554_vm2, %v7992_v11, %v7995_v21  ;;  %v3357_v32 = vand.u32 3, %v3356_v41  ;;  %vm3555_vm3 = vcmp.lt.s32.totalorder %v7972_v22, 2  ;;  %v3564_v26 = vsel %vm3556_vm6, %v3547_v46, %v3563_v27 }
 0x393   :  { %v3344_v29 = vadd.f32 -0.4999988, %v3343_v56  ;;  %v3351_v61 = vadd.f32 -0.16666654, %v3350_v31  ;;  %v8006_v47 = vshrl.u32 %v3466_v34, 30  ;;  %v3566_v4 = vsel %vm3554_vm2, %v7995_v21, %v3547_v46 }
 0x394   :  { %v3567_v48 = vsel %vm3557_vm15, %v3553_v52, 1326507024  ;;  %v8027_v38 = vadd.f32 %v8024_v35, %v237_v1  ;;  %v3565_v5 = vsel %vm3555_vm3, %v3562_v23, %v3564_v26  ;;  %v8033_v50 = vshll.u32 %v3530_v13, 8 }
 0x395   :  { %v3345_v18 = vmul.f32 %v3344_v29, %v3340_v39  ;;  %v3352_v7 = vmul.f32 %v3351_v61, %v3340_v39  ;;  %v3468_v16 = vshll.u32 %v8006_v47, 30  ;;  %v3568_v3 = vsel %vm3556_vm6, %v3550_v9, %v3567_v48 }
 0x396   :  { %vm3355_vm4 = vweird.f32 %v7640_v17  ;;  %vm3358_vm5 = vcmp.lt.s32.totalorder %v3357_v32, 2  ;;  %vm3359_vm7 = vcmp.eq.s32.totalorder %v3357_v32, 0  ;;  %v3569_v39 = vsel %vm3555_vm3, %v3566_v4, %v3568_v3 }
 0x397   :  { %v3346_v43 = vadd.f32 1.0, %v3345_v18  ;;  %v3353_v12 = vadd.f32 1.0, %v3352_v7  ;;  %v3469_v25 = vsub.s32 %v3465_v33, %v3468_v16  ;;  %v3596_v19 = vshrl.u32 %v3565_v5, 16 }
 0x398   :  { %vm3362_vm9 = vcmp.eq.s32.totalorder %v3357_v32, 2  ;;  %v3571_v24 = vand.u32 65535, %v8033_v50  ;;  %v3573_v20 = vand.u32 65535, %v3569_v39  ;;  %v3574_v44 = vshrl.u32 %v3569_v39, 16 }
 0x399   :  { %v3354_v58 = vmul.f32 %v3353_v12, %v3338_v42  ;;  %v3363_v49 = vxor.u32 2147483648, %v3346_v43  ;;  %vm3470_vm8 = vcmp.lt.s32.totalorder %v3469_v25, 0  ;;  %v3471_v45 = vsub.s32 0, %v3469_v25 }
 0x39a   :  { %v3538_v63 = vshrl.u32 %v5456_v51, %v7966_v15  ;;  %v3572_v9 = vshrl.u32 %v8033_v50, 16  ;;  %v3461_v6 = vadd.s32 %v7970_v60, %v7978_v62  ;;  %v3576_v42 = vmul.u32 %v3574_v44, %v3571_v24 }
 0x39b   :  { %v3360_v10 = vxor.u32 2147483648, %v3354_v58  ;;  %v3472_v28 = vsel %vm3470_vm8, %v3471_v45, %v3469_v25  ;;  %v3595_v14 = vand.u32 65535, %v3565_v5  ;;  %v3364_v37 = vsel %vm3362_vm9, %v3363_v49, %v3354_v58 }
 0x39c   :  { %v3473_v36 = vclz %v3472_v28  ;;  %v3577_v41 = vmul.u32 %v3573_v20, %v3572_v9  ;;  %v3598_v56 = vmul.u32 %v3596_v19, %v3571_v24  ;;  %v3558_v15 = vsel %vm3554_vm2, %v3538_v63, %v7992_v11 }
 0x39d   :  { %v3361_v33 = vsel %vm3359_vm7, %v3346_v43, %v3360_v10  ;;  %v3559_v52 = vsel %vm3557_vm15, %v3547_v46, 2102212464  ;;  %v3491_v62 = vsub.s32 4, %v8006_v47  ;;  %v3575_v13 = vmul.u32 %v3573_v20, %v3571_v24  ;;  %v240_v10 = vpop.f32.mrf.mxu2 }
 0x39e   :  { %v3365_v31 = vsel %vm3358_vm5, %v3361_v33, %v3364_v37  ;;  %v5371_v34 = vadd.s32 4294967294, %v3473_v36  ;;  %v3579_v27 = vshll.u32 %v3576_v42, 16  ;;  %vm3369_vm10 = vcmp.lt.s32.totalorder %v7746_v0, 0 }
 0x39f   :  { %v3366_v60 = vsel %vm3355_vm4, nan, %v3365_v31  ;;  %v3578_v1 = vmul.u32 %v3574_v44, %v3572_v9  ;;  %v3581_v29 = vshll.u32 %v3577_v41, 16  ;;  %v3599_v61 = vmul.u32 %v3595_v14, %v3572_v9 }
 0x3a0   :  { %vm5372_vm12 = vcmp.lt.s32.totalorder %v5371_v34, 0  ;;  %5246 = vst [vmem:[#allocation2 + $0x98] sm:$0xff] %v3366_v60  ;;  %vm3583_vm11 = vc.u32 %v3575_v13, %v3579_v27  ;;  %v3585_v11 = vadd.s32 %v3579_v27, %v3575_v13  ;;  %v3601_v32 = vshll.u32 %v3598_v56, 16 }
 0x3a1   :  { %v3476_v23 = vsel %vm5372_vm12, 0, %v5371_v34  ;;  %v3584_v17 = vsel %vm3583_vm11, 1, %v5462_v54  ;;  %v3597_v48 = vmul.u32 %v3595_v14, %v3571_v24  ;;  %v3580_v18 = vshrl.u32 %v3576_v42, 16 }
 0x3a2   :  { %v3477_v26 = vsub.s32 32, %v3476_v23  ;;  %v3481_v46 = vsub.s32 4294967266, %v3476_v23  ;;  %v3586_v7 = vadd.s32 %v3584_v17, %v3578_v1  ;;  %vm3587_vm13 = vc.u32 %v3585_v11, %v3581_v29 }
 0x3a3   :  { %v3600_v16 = vmul.u32 %v3596_v19, %v3572_v9  ;;  %v3478_v4 = vshll.u32 %v3469_v25, %v3476_v23  ;;  %v3588_v43 = vsel %vm3587_vm13, 1, %v5462_v54  ;;  %v3603_v39 = vshll.u32 %v3599_v61, 16 }
 0x3a4   :  { %v3479_v5 = vshrl.u32 %v3461_v6, %v3477_v26  ;;  %v3482_v3 = vadd.s32 127, %v3481_v46  ;;  %v3590_v12 = vadd.s32 %v3588_v43, %v3586_v7  ;;  %vm3605_vm14 = vc.u32 %v3597_v48, %v3601_v32 }
 0x3a5   :  { %v3607_v58 = vadd.s32 %v3601_v32, %v3597_v48  ;;  %v3606_v20 = vsel %vm3605_vm14, 1, %v5462_v54  ;;  %v3677_v44 = vand.u32 2147483647, %v8027_v38  ;;  %v3560_v24 = vsel %vm3556_vm6, %v7995_v21, %v3559_v52 }
 0x3a6   :  { %v3480_v49 = vor.u32 %v3479_v5, %v3478_v4  ;;  %v3483_v45 = vshll.u32 %v3482_v3, 23  ;;  %v3591_v19 = vadd.s32 %v3590_v12, %v3580_v18  ;;  %v3608_v25 = vadd.s32 %v3606_v20, %v3600_v16  ;;  %v243_v18 = vpop.f32.mrf.mxu3 }
 0x3a7   :  { %vm3609_vm0 = vc.u32 %v3607_v58, %v3603_v39  ;;  %v3582_v63 = vshrl.u32 %v3577_v41, 16  ;;  %v3680_v6 = vand.u32 2139095040, %v8027_v38  ;;  %v3492_v42 = vsel %vm3369_vm10, %v3491_v62, %v8006_v47 }
 0x3a8   :  { %v3484_v28 = vor.u32 4788187, %v3483_v45  ;;  %v3610_v9 = vsel %vm3609_vm0, 1, %v5462_v54  ;;  %v3487_v36 = vcvt.s32.f32 %v3480_v49  ;;  %v3602_v14 = vshrl.u32 %v3598_v56, 16 }
 0x3a9   :  { %v3612_v33 = vadd.s32 %v3610_v9, %v3608_v25  ;;  %v3592_v31 = vadd.s32 %v3591_v19, %v3582_v63  ;;  %v3681_v21 = vshrl.u32 %v3680_v6, 23  ;;  %v3684_v34 = vand.u32 8388607, %v3677_v44 }
 0x3aa   :  { %v3485_v37 = vand.u32 2147483647, %v3484_v28  ;;  %v8070_v52 = vadd.f32 %v8024_v35, %v240_v10  ;;  %v3604_v41 = vshrl.u32 %v3599_v61, 16  ;;  %vm8074_vm1 = vcmp.le.f32.partialorder %v3367_v40, 0.7853982 }
 0x3ab   :  { %v3613_v60 = vadd.s32 %v3612_v33, %v3602_v14  ;;  %v3611_v56 = vadd.s32 %v3607_v58, %v3603_v39  ;;  %v5376_v62 = vadd.s32 4294967169, %v3681_v21  ;;  %v3494_v27 = vsel %vm8074_vm1, 0, %v3492_v42 }
 0x3ac   :  { %v3488_v47 = vmul.f32 %v3487_v36, %v3485_v37  ;;  %v3561_v1 = vsel %vm3555_vm3, %v3558_v15, %v3560_v24  ;;  %v3685_v61 = vor.u32 8388608, %v3684_v34  ;;  %v3835_v40 = vand.u32 2139095040, %v8070_v52 }
 0x3ad   :  { %v3614_v29 = vadd.s32 %v3613_v60, %v3604_v41  ;;  %vm3617_vm15 = vc.u32 %v3592_v31, %v3611_v56  ;;  %v3687_v11 = vadd.s32 1, %v5376_v62  ;;  %v3615_v46 = vmul.u32 %v8033_v50, %v3561_v1 }
 0x3ae   :  { %v3489_v23 = vxor.u32 2147483648, %v3488_v47  ;;  %v3511_v22 = vadd.s32 3, %v3494_v27  ;;  %v8093_v5 = vshll.u32 %v3685_v61, 8  ;;  %v3836_v3 = vshrl.u32 %v3835_v40, 23 }
 0x3af   :  { %v3618_v32 = vadd.s32 1, %v3614_v29  ;;  %vm3688_vm2 = vcmp.gt.s32.totalorder %v3687_v11, 0  ;;  %v8096_v58 = vadd.f32 %v8024_v35, %v243_v18  ;;  %v8100_v45 = vadd.s32 %v3611_v56, %v3592_v31 }
 0x3b0   :  { %v3490_v26 = vsel %vm3369_vm10, %v3489_v23, %v3488_v47  ;;  %v3689_v48 = vsel %vm3688_vm2, %v3687_v11, 0  ;;  %v8098_v49 = vand.u32 3, %v3511_v22  ;;  %v3832_v20 = vand.u32 2147483647, %v8070_v52 }
 0x3b1   :  { %v8089_v17 = vsel %vm8074_vm1, %v7746_v0, %v3490_v26  ;;  %v3619_v15 = vsel %vm3617_vm15, %v3618_v32, %v3614_v29  ;;  %v3691_v4 = vand.u32 31, %v3689_v48  ;;  %vm3524_vm6 = vcmp.lt.s32.totalorder %v7792_v8, 0 }
 0x3b2   :  { %v3495_v7 = vmul.f32 %v8089_v17, %v8089_v17  ;;  %v3620_v16 = vadd.s32 %v3619_v15, %v3615_v46  ;;  %v8105_v10 = vand.u32 65535, %v8093_v5  ;;  %v8107_v28 = vshrl.u32 %v3689_v48, 5 }
 0x3b3   :  { %v3692_v39 = vsub.s32 32, %v3691_v4  ;;  %v3694_v63 = vshll.u32 %v5456_v51, %v3691_v4  ;;  %v8111_v6 = vadd.s32 4294967169, %v3836_v3  ;;  %v3697_v33 = vshll.u32 %v5457_v53, %v3691_v4 }
 0x3b4   :  { %v3496_v43 = vmul.f32 -0.001358992, %v3495_v7  ;;  %v3503_v50 = vmul.f32 -0.00019511016, %v3495_v7  ;;  %v3621_v12 = vadd.s32 536870912, %v3620_v16  ;;  %vm3517_vm3 = vcmp.eq.s32.totalorder %v8098_v49, 2 }
 0x3b5   :  { %v3701_v9 = vshrl.u32 %v5459_v57, %v3692_v39  ;;  %v3695_v37 = vshrl.u32 %v5457_v53, %v3692_v39  ;;  %v3698_v31 = vshrl.u32 %v5458_v55, %v3692_v39  ;;  %v3700_v21 = vshll.u32 %v5458_v55, %v3691_v4 }
 0x3b6   :  { %v3497_v24 = vadd.f32 0.041655596, %v3496_v43  ;;  %v3504_v19 = vadd.f32 0.008332121, %v3503_v50  ;;  %v3622_v25 = vshrl.u32 %v3621_v12, 30  ;;  %v3704_v34 = vshrl.u32 %v5460_v59, %v3692_v39 }
 0x3b7   :  { %v3703_v47 = vshll.u32 %v5459_v57, %v3691_v4  ;;  %vm3514_vm4 = vcmp.eq.s32.totalorder %v8098_v49, 0  ;;  %v3693_v62 = vshrl.u32 %v5456_v51, %v3692_v39  ;;  %v3702_v27 = vor.u32 %v3701_v9, %v3700_v21 }
 0x3b8   :  { %v3498_v36 = vmul.f32 %v3497_v24, %v3495_v7  ;;  %v3505_v42 = vmul.f32 %v3504_v19, %v3495_v7  ;;  %v3623_v14 = vshll.u32 %v3622_v25, 30  ;;  %v3646_v56 = vsub.s32 4, %v3622_v25 }
 0x3b9   :  { %v3707_v1 = vshrl.u32 %v5461_v2, %v3692_v39  ;;  %vm3513_vm5 = vcmp.lt.s32.totalorder %v8098_v49, 2  ;;  %vm3510_vm8 = vweird.f32 %v7746_v0  ;;  %v3696_v11 = vor.u32 %v3695_v37, %v3694_v63 }
 0x3ba   :  { %v3499_v41 = vadd.f32 -0.4999988, %v3498_v36  ;;  %v3506_v60 = vadd.f32 -0.16666654, %v3505_v42  ;;  %v8119_v13 = vsub.s32 %v3620_v16, %v3623_v14  ;;  %v3699_v32 = vor.u32 %v3698_v31, %v3697_v33 }
 0x3bb   :  { %v3705_v40 = vor.u32 %v3704_v34, %v3703_v47  ;;  %v3706_v26 = vshll.u32 %v5460_v59, %v3691_v4  ;;  %vm3712_vm9 = vcmp.lt.s32.totalorder %v8107_v28, 4  ;;  %v8134_v18 = vsel %vm3524_vm6, %v3646_v56, %v3622_v25 }
 0x3bc   :  { %v3500_v29 = vmul.f32 %v3499_v41, %v3495_v7  ;;  %v3507_v23 = vmul.f32 %v3506_v60, %v3495_v7  ;;  %vm3625_vm7 = vcmp.lt.s32.totalorder %v8119_v13, 0  ;;  %v3626_v61 = vsub.s32 0, %v8119_v13 }
 0x3bd   :  { %v3708_v7 = vor.u32 %v3707_v1, %v3706_v26  ;;  %v3714_v16 = vsel %vm3712_vm9, %v3702_v27, 2102212464  ;;  %vm8141_vm10 = vcmp.le.f32.partialorder %v3522_v30, 0.7853982  ;;  %vm3709_vm12 = vcmp.lt.s32.totalorder %v8107_v28, 1 }
 0x3be   :  { %v3501_v46 = vadd.f32 1.0, %v3500_v29  ;;  %v3508_v22 = vadd.f32 1.0, %v3507_v23  ;;  %v3627_v15 = vsel %vm3625_vm7, %v3626_v61, %v8119_v13  ;;  %vm3710_vm11 = vcmp.lt.s32.totalorder %v8107_v28, 2 }
 0x3bf   :  { %v3628_v48 = vclz %v3627_v15  ;;  %vm3711_vm13 = vcmp.lt.s32.totalorder %v8107_v28, 3  ;;  %v3713_v12 = vsel %vm3709_vm12, %v3693_v62, %v3696_v11  ;;  %v3717_v39 = vsel %vm3709_vm12, %v3696_v11, %v3699_v32 }
 0x3c0   :  { %v3509_v3 = vmul.f32 %v3508_v22, %v8089_v17  ;;  %v3518_v43 = vxor.u32 2147483648, %v3501_v46  ;;  %v3715_v19 = vsel %vm3711_vm13, %v3699_v32, %v3714_v16  ;;  %v3718_v30 = vsel %vm3712_vm9, %v3705_v40, 920167782 }
 0x3c1   :  { %v5374_v50 = vadd.s32 4294967294, %v3628_v48  ;;  %v3719_v25 = vsel %vm3711_vm13, %v3702_v27, %v3718_v30  ;;  %v3721_v63 = vsel %vm3709_vm12, %v3699_v32, %v3702_v27  ;;  %v3722_v9 = vsel %vm3712_vm9, %v3708_v7, 1326507024 }
 0x3c2   :  { %v3515_v24 = vxor.u32 2147483648, %v3509_v3  ;;  %v3519_v17 = vsel %vm3517_vm3, %v3518_v43, %v3509_v3  ;;  %v3720_v14 = vsel %vm3710_vm11, %v3717_v39, %v3719_v25  ;;  %v3723_v33 = vsel %vm3711_vm13, %v3705_v40, %v3722_v9 }
 0x3c3   :  { %vm5375_vm14 = vcmp.lt.s32.totalorder %v5374_v50, 0  ;;  %v3724_v60 = vsel %vm3710_vm11, %v3721_v63, %v3723_v33  ;;  %v3750_v47 = vand.u32 65535, %v3720_v14  ;;  %v3751_v56 = vshrl.u32 %v3720_v14, 16 }
 0x3c4   :  { %v3516_v36 = vsel %vm3514_vm4, %v3501_v46, %v3515_v24  ;;  %v3631_v42 = vsel %vm5375_vm14, 0, %v5374_v50  ;;  %v3728_v1 = vand.u32 65535, %v3724_v60  ;;  %v3729_v29 = vshrl.u32 %v3724_v60, 16 }
 0x3c5   :  { %v3520_v37 = vsel %vm3513_vm5, %v3516_v36, %v3519_v17  ;;  %v3632_v31 = vsub.s32 32, %v3631_v42  ;;  %v3633_v21 = vshll.u32 %v8119_v13, %v3631_v42  ;;  %v3636_v34 = vsub.s32 4294967266, %v3631_v42 }
 0x3c6   :  { %v3521_v41 = vsel %vm3510_vm8, nan, %v3520_v37  ;;  %v3727_v49 = vshrl.u32 %v8093_v5, 16  ;;  %v3753_v23 = vmul.u32 %v3751_v56, %v8105_v10  ;;  %v8170_v13 = vand.u32 8388607, %v3832_v20 }
 0x3c7   :  { %v3634_v62 = vshrl.u32 %v8100_v45, %v3632_v31  ;;  %v3637_v27 = vadd.s32 127, %v3636_v34  ;;  %5247 = vst [vmem:[#allocation2 + $0xa0] sm:$0xff] %v3521_v41  ;;  %v3842_v0 = vadd.s32 1, %v8111_v6  ;;  %v3649_v45 = vsel %vm8141_vm10, 0, %v8134_v18 }
 0x3c8   :  { %v3731_v32 = vmul.u32 %v3729_v29, %v8105_v10  ;;  %v8179_v40 = vsel %vm3710_vm11, %v3713_v12, %v3715_v19  ;;  %v3732_v26 = vmul.u32 %v3728_v1, %v3727_v49  ;;  %v3754_v46 = vmul.u32 %v3750_v47, %v3727_v49 }
 0x3c9   :  { %v3635_v61 = vor.u32 %v3634_v62, %v3633_v21  ;;  %v3638_v11 = vshll.u32 %v3637_v27, 23  ;;  %v3756_v22 = vshll.u32 %v3753_v23, 16  ;;  %v3730_v48 = vmul.u32 %v3728_v1, %v8105_v10 }
 0x3ca   :  { %v3734_v7 = vshll.u32 %v3731_v32, 16  ;;  %v3752_v6 = vmul.u32 %v3750_v47, %v8105_v10  ;;  %v3733_v3 = vmul.u32 %v3729_v29, %v3727_v49  ;;  %v3736_v43 = vshll.u32 %v3732_v26, 16 }
 0x3cb   :  { %v3639_v15 = vor.u32 4788187, %v3638_v11  ;;  %v3642_v16 = vcvt.s32.f32 %v3635_v61  ;;  %v3755_v50 = vmul.u32 %v3751_v56, %v3727_v49  ;;  %v3758_v12 = vshll.u32 %v3754_v46, 16 }
 0x3cc   :  { %vm3738_vm0 = vc.u32 %v3730_v48, %v3734_v7  ;;  %v3740_v39 = vadd.s32 %v3734_v7, %v3730_v48  ;;  %vm3760_vm1 = vc.u32 %v3752_v6, %v3756_v22  ;;  %v3762_v17 = vadd.s32 %v3756_v22, %v3752_v6 }
 0x3cd   :  { %v3640_v18 = vand.u32 2147483647, %v3639_v15  ;;  %v3739_v28 = vsel %vm3738_vm0, 1, %v5462_v54  ;;  %v3761_v24 = vsel %vm3760_vm1, 1, %v5462_v54  ;;  %v3735_v63 = vshrl.u32 %v3731_v32, 16 }
 0x3ce   :  { %v3741_v30 = vadd.s32 %v3739_v28, %v3733_v3  ;;  %vm3742_vm15 = vc.u32 %v3740_v39, %v3736_v43  ;;  %v3763_v25 = vadd.s32 %v3761_v24, %v3755_v50  ;;  %vm3764_vm2 = vc.u32 %v3762_v17, %v3758_v12 }
 0x3cf   :  { %v3643_v19 = vmul.f32 %v3642_v16, %v3640_v18  ;;  %v3743_v10 = vsel %vm3742_vm15, 1, %v5462_v54  ;;  %vm3843_vm3 = vcmp.gt.s32.totalorder %v3842_v0, 0  ;;  %v3765_v42 = vsel %vm3764_vm2, 1, %v5462_v54 }
 0x3d0   :  { %v3745_v36 = vadd.s32 %v3743_v10, %v3741_v30  ;;  %v3844_v14 = vsel %vm3843_vm3, %v3842_v0, 0  ;;  %v3666_v33 = vadd.s32 3, %v3649_v45  ;;  %v3757_v37 = vshrl.u32 %v3753_v23, 16 }
 0x3d1   :  { %v3644_v9 = vxor.u32 2147483648, %v3643_v19  ;;  %v3767_v31 = vadd.s32 %v3765_v42, %v3763_v25  ;;  %v3846_v21 = vand.u32 31, %v3844_v14  ;;  %v3737_v41 = vshrl.u32 %v3732_v26, 16 }
 0x3d2   :  { %v3746_v60 = vadd.s32 %v3745_v36, %v3735_v63  ;;  %v3759_v47 = vshrl.u32 %v3754_v46, 16  ;;  %v3770_v27 = vmul.u32 %v8093_v5, %v8179_v40  ;;  %v8198_v23 = vadd.s32 %v3762_v17, %v3758_v12 }
 0x3d3   :  { %v3645_v34 = vsel %vm3524_vm6, %v3644_v9, %v3643_v19  ;;  %v3768_v62 = vadd.s32 %v3767_v31, %v3757_v37  ;;  %v8194_v1 = vsub.s32 32, %v3846_v21  ;;  %v8200_v0 = vshrl.u32 %v3844_v14, 5 }
 0x3d4   :  { %v3648_v56 = vsel %vm8141_vm10, %v7792_v8, %v3645_v34  ;;  %v8196_v49 = vadd.s32 %v3746_v60, %v3737_v41  ;;  %v3849_v11 = vshll.u32 %v5456_v51, %v3846_v21  ;;  %v3852_v40 = vshll.u32 %v5457_v53, %v3846_v21 }
 0x3d5   :  { %v3650_v29 = vmul.f32 %v3648_v56, %v3648_v56  ;;  %v3769_v61 = vadd.s32 %v3768_v62, %v3759_v47  ;;  %v3850_v4 = vshrl.u32 %v5457_v53, %v8194_v1  ;;  %v3853_v45 = vshrl.u32 %v5458_v55, %v8194_v1 }
 0x3d6   :  { %vm3772_vm6 = vc.u32 %v8196_v49, %v8198_v23  ;;  %v3855_v22 = vshll.u32 %v5458_v55, %v3846_v21  ;;  %v3856_v15 = vshrl.u32 %v5459_v57, %v8194_v1  ;;  %v3858_v6 = vshll.u32 %v5459_v57, %v3846_v21 }
 0x3d7   :  { %v3651_v32 = vmul.f32 -0.001358992, %v3650_v29  ;;  %v3658_v5 = vmul.f32 -0.00019511016, %v3650_v29  ;;  %v3773_v26 = vadd.s32 1, %v3769_v61  ;;  %v8210_v46 = vor.u32 %v3850_v4, %v3849_v11 }
 0x3d8   :  { %v3859_v16 = vshrl.u32 %v5460_v59, %v8194_v1  ;;  %v8218_v43 = vor.u32 %v3853_v45, %v3852_v40  ;;  %v3861_v50 = vshll.u32 %v5460_v59, %v3846_v21  ;;  %v3862_v18 = vshrl.u32 %v5461_v2, %v8194_v1 }
 0x3d9   :  { %v3652_v48 = vadd.f32 0.041655596, %v3651_v32  ;;  %v3659_v7 = vadd.f32 0.008332121, %v3658_v5  ;;  %v3774_v3 = vsel %vm3772_vm6, %v3773_v26, %v3769_v61  ;;  %v3840_v17 = vor.u32 8388608, %v8170_v13 }
 0x3da   :  { %v3775_v12 = vadd.s32 %v3774_v3, %v3770_v27  ;;  %v3860_v24 = vor.u32 %v3859_v16, %v3858_v6  ;;  %v3857_v19 = vor.u32 %v3856_v15, %v3855_v22  ;;  %v3863_v30 = vor.u32 %v3862_v18, %v3861_v50 }
 0x3db   :  { %v3653_v39 = vmul.f32 %v3652_v48, %v3650_v29  ;;  %v3660_v28 = vmul.f32 %v3659_v7, %v3650_v29  ;;  %v3990_v25 = vand.u32 2139095040, %v8096_v58  ;;  %vm3867_vm4 = vcmp.lt.s32.totalorder %v8200_v0, 4 }
 0x3dc   :  { %v3776_v9 = vadd.s32 536870912, %v3775_v12  ;;  %v3667_v36 = vand.u32 3, %v3666_v33  ;;  %vm3864_vm5 = vcmp.lt.s32.totalorder %v8200_v0, 1  ;;  %vm3866_vm7 = vcmp.lt.s32.totalorder %v8200_v0, 3 }
 0x3dd   :  { %v3654_v63 = vadd.f32 -0.4999988, %v3653_v39  ;;  %v3661_v10 = vadd.f32 -0.16666654, %v3660_v28  ;;  %v3873_v42 = vsel %vm3867_vm4, %v3860_v24, 920167782  ;;  %v3872_v31 = vsel %vm3864_vm5, %v8210_v46, %v8218_v43 }
 0x3de   :  { %v8230_v13 = vshrl.u32 %v3776_v9, 30  ;;  %vm3665_vm8 = vweird.f32 %v7792_v8  ;;  %vm3865_vm9 = vcmp.lt.s32.totalorder %v8200_v0, 2  ;;  %v3874_v33 = vsel %vm3866_vm7, %v3857_v19, %v3873_v42 }
 0x3df   :  { %v3655_v14 = vmul.f32 %v3654_v63, %v3650_v29  ;;  %v3662_v37 = vmul.f32 %v3661_v10, %v3650_v29  ;;  %v3877_v21 = vsel %vm3867_vm4, %v3863_v30, 1326507024  ;;  %v3991_v34 = vshrl.u32 %v3990_v25, 23 }
 0x3e0   :  { %v3778_v47 = vshll.u32 %v8230_v13, 30  ;;  %v3876_v62 = vsel %vm3864_vm5, %v8218_v43, %v3857_v19  ;;  %vm3668_vm10 = vcmp.lt.s32.totalorder %v3667_v36, 2  ;;  %v3875_v27 = vsel %vm3865_vm9, %v3872_v31, %v3874_v33 }
 0x3e1   :  { %v3656_v41 = vadd.f32 1.0, %v3655_v14  ;;  %v3663_v60 = vadd.f32 1.0, %v3662_v37  ;;  %v3878_v29 = vsel %vm3866_vm7, %v3860_v24, %v3877_v21  ;;  %v8250_v61 = vshll.u32 %v3840_v17, 8 }
 0x3e2   :  { %vm3669_vm12 = vcmp.eq.s32.totalorder %v3667_v36, 0  ;;  %v3779_v45 = vsub.s32 %v3775_v12, %v3778_v47  ;;  %vm3672_vm11 = vcmp.eq.s32.totalorder %v3667_v36, 2  ;;  %v3879_v32 = vsel %vm3865_vm9, %v3876_v62, %v3878_v29 }
 0x3e3   :  { %v3664_v11 = vmul.f32 %v3663_v60, %v3648_v56  ;;  %v3673_v4 = vxor.u32 2147483648, %v3656_v41  ;;  %v3906_v5 = vshrl.u32 %v3875_v27, 16  ;;  %v5382_v40 = vadd.s32 4294967169, %v3991_v34 }
 0x3e4   :  { %vm3780_vm13 = vcmp.lt.s32.totalorder %v3779_v45, 0  ;;  %v3781_v22 = vsub.s32 0, %v3779_v45  ;;  %v3869_v15 = vsel %vm3867_vm4, %v3857_v19, 2102212464  ;;  %v3881_v48 = vand.u32 65535, %v8250_v61 }
 0x3e5   :  { %v3670_v26 = vxor.u32 2147483648, %v3664_v11  ;;  %v3882_v7 = vshrl.u32 %v8250_v61, 16  ;;  %v3883_v56 = vand.u32 65535, %v3879_v32  ;;  %v3884_v6 = vshrl.u32 %v3879_v32, 16 }
 0x3e6   :  { %v3674_v3 = vsel %vm3672_vm11, %v3673_v4, %v3664_v11  ;;  %v3782_v50 = vsel %vm3780_vm13, %v3781_v22, %v3779_v45  ;;  %v3905_v18 = vand.u32 65535, %v3875_v27  ;;  %v3848_v12 = vshrl.u32 %v5456_v51, %v8194_v1 }
 0x3e7   :  { %v3671_v16 = vsel %vm3669_vm12, %v3656_v41, %v3670_v26  ;;  %v3783_v28 = vclz %v3782_v50  ;;  %v3908_v24 = vmul.u32 %v3906_v5, %v3881_v48  ;;  %v3771_v19 = vadd.s32 %v8198_v23, %v8196_v49 }
 0x3e8   :  { %v3675_v39 = vsel %vm3668_vm10, %v3671_v16, %v3674_v3  ;;  %v3886_v30 = vmul.u32 %v3884_v6, %v3881_v48  ;;  %v3887_v25 = vmul.u32 %v3883_v56, %v3882_v7  ;;  %v3801_v10 = vsub.s32 4, %v8230_v13 }
 0x3e9   :  { %v3676_v17 = vsel %vm3665_vm8, nan, %v3675_v39  ;;  %v5377_v63 = vadd.s32 4294967294, %v3783_v28  ;;  %v3868_v9 = vsel %vm3864_vm5, %v3848_v12, %v8210_v46  ;;  %v3870_v1 = vsel %vm3866_vm7, %v8218_v43, %v3869_v15 }
 0x3ea   :  { %5248 = vst [vmem:[#allocation2 + $0xa8] sm:$0xff] %v3676_v17  ;;  %v3885_v36 = vmul.u32 %v3883_v56, %v3881_v48  ;;  %v3889_v8 = vshll.u32 %v3886_v30, 16  ;;  %v3907_v42 = vmul.u32 %v3905_v18, %v3881_v48  ;;  %v3909_v14 = vmul.u32 %v3905_v18, %v3882_v7 }
 0x3eb   :  { %vm5378_vm14 = vcmp.lt.s32.totalorder %v5377_v63, 0  ;;  %v3888_v49 = vmul.u32 %v3884_v6, %v3882_v7  ;;  %v3890_v23 = vshrl.u32 %v3886_v30, 16  ;;  %v3911_v37 = vshll.u32 %v3908_v24, 16 }
 0x3ec   :  { %v3786_v31 = vsel %vm5378_vm14, 0, %v5377_v63  ;;  %v3891_v33 = vshll.u32 %v3887_v25, 16  ;;  %vm3893_vm0 = vc.u32 %v3885_v36, %v3889_v8  ;;  %v3895_v21 = vadd.s32 %v3889_v8, %v3885_v36 }
 0x3ed   :  { %v3787_v34 = vsub.s32 32, %v3786_v31  ;;  %v3791_v41 = vsub.s32 4294967266, %v3786_v31  ;;  %v3894_v46 = vsel %vm3893_vm0, 1, %v5462_v54  ;;  %v3910_v60 = vmul.u32 %v3906_v5, %v3882_v7 }
 0x3ee   :  { %v3788_v47 = vshll.u32 %v3779_v45, %v3786_v31  ;;  %v3896_v43 = vadd.s32 %v3894_v46, %v3888_v49  ;;  %vm3897_vm1 = vc.u32 %v3895_v21, %v3891_v33  ;;  %vm3915_vm15 = vc.u32 %v3907_v42, %v3911_v37 }
 0x3ef   :  { %v3789_v62 = vshrl.u32 %v3771_v19, %v3787_v34  ;;  %v3792_v27 = vadd.s32 127, %v3791_v41  ;;  %v3898_v29 = vsel %vm3897_vm1, 1, %v5462_v54  ;;  %v3916_v11 = vsel %vm3915_vm15, 1, %v5462_v54 }
 0x3f0   :  { %v3900_v4 = vadd.s32 %v3898_v29, %v3896_v43  ;;  %v3913_v32 = vshll.u32 %v3909_v14, 16  ;;  %v3917_v26 = vadd.s32 %v3911_v37, %v3907_v42  ;;  %v3918_v22 = vadd.s32 %v3916_v11, %v3910_v60 }
 0x3f1   :  { %vm3679_vm2 = vcmp.lt.s32.totalorder %v8027_v38, 0  ;;  %v3790_v15 = vor.u32 %v3789_v62, %v3788_v47  ;;  %v3793_v48 = vshll.u32 %v3792_v27, 23  ;;  %v3997_v56 = vadd.s32 1, %v5382_v40 }
 0x3f2   :  { %v3871_v45 = vsel %vm3865_vm9, %v3868_v9, %v3870_v1  ;;  %v3901_v5 = vadd.s32 %v3900_v4, %v3890_v23  ;;  %vm3919_vm3 = vc.u32 %v3917_v26, %v3913_v32  ;;  %v3987_v7 = vand.u32 2147483647, %v8096_v58 }
 0x3f3   :  { %v3794_v6 = vor.u32 4788187, %v3793_v48  ;;  %v3892_v16 = vshrl.u32 %v3887_v25, 16  ;;  %v3920_v3 = vsel %vm3919_vm3, 1, %v5462_v54  ;;  %vm3998_vm6 = vcmp.gt.s32.totalorder %v3997_v56, 0 }
 0x3f4   :  { %v3802_v50 = vsel %vm3679_vm2, %v3801_v10, %v8230_v13  ;;  %v3912_v18 = vshrl.u32 %v3908_v24, 16  ;;  %v3922_v39 = vadd.s32 %v3920_v3, %v3918_v22  ;;  %v3999_v28 = vsel %vm3998_vm6, %v3997_v56, 0 }
 0x3f5   :  { %v3795_v40 = vand.u32 2147483647, %v3794_v6  ;;  %v3797_v12 = vcvt.s32.f32 %v3790_v15  ;;  %v8283_v0 = vadd.s32 %v3901_v5, %v3892_v16  ;;  %v4001_v17 = vand.u32 31, %v3999_v28  ;;  %v246_v5 = vpop.f32.mrf.mxu3 }
 0x3f6   :  { %vm8287_vm4 = vcmp.le.f32.partialorder %v3677_v44, 0.7853982  ;;  %v3914_v30 = vshrl.u32 %v3909_v14, 16  ;;  %v3923_v25 = vadd.s32 %v3922_v39, %v3912_v18  ;;  %v8291_v9 = vadd.s32 %v3917_v26, %v3913_v32 }
 0x3f7   :  { %v3798_v63 = vmul.f32 %v3797_v12, %v3795_v40  ;;  %v3994_v13 = vand.u32 8388607, %v3987_v7  ;;  %v8295_v24 = vsub.s32 32, %v4001_v17  ;;  %v3804_v10 = vsel %vm8287_vm4, 0, %v3802_v50 }
 0x3f8   :  { %v3924_v1 = vadd.s32 %v3923_v25, %v3914_v30  ;;  %v3925_v36 = vmul.u32 %v8250_v61, %v3871_v45  ;;  %v8300_v44 = vshrl.u32 %v3999_v28, 5  ;;  %vm3927_vm5 = vc.u32 %v8283_v0, %v8291_v9 }
 0x3f9   :  { %v3799_v8 = vxor.u32 2147483648, %v3798_v63  ;;  %v4007_v42 = vshll.u32 %v5457_v53, %v4001_v17  ;;  %v4008_v14 = vshrl.u32 %v5458_v55, %v8295_v24  ;;  %v4011_v23 = vshrl.u32 %v5459_v57, %v8295_v24 }
 0x3fa   :  { %v3928_v49 = vadd.s32 1, %v3924_v1  ;;  %v4014_v37 = vshrl.u32 %v5460_v59, %v8295_v24  ;;  %v4017_v61 = vshrl.u32 %v5461_v2, %v8295_v24  ;;  %v4010_v33 = vshll.u32 %v5458_v55, %v4001_v17 }
 0x3fb   :  { %v3800_v31 = vsel %vm3679_vm2, %v3799_v8, %v3798_v63  ;;  %v4013_v21 = vshll.u32 %v5459_v57, %v4001_v17  ;;  %v4016_v34 = vshll.u32 %v5460_v59, %v4001_v17  ;;  %v4005_v60 = vshrl.u32 %v5457_v53, %v8295_v24 }
 0x3fc   :  { %v3803_v41 = vsel %vm8287_vm4, %v8027_v38, %v3800_v31  ;;  %v3929_v46 = vsel %vm3927_vm5, %v3928_v49, %v3924_v1  ;;  %v8323_v47 = vor.u32 %v4008_v14, %v4007_v42  ;;  %v8325_v27 = vor.u32 %v4011_v23, %v4010_v33 }
 0x3fd   :  { %v3805_v43 = vmul.f32 %v3803_v41, %v3803_v41  ;;  %v3930_v62 = vadd.s32 %v3929_v46, %v3925_v36  ;;  %v4018_v29 = vor.u32 %v4017_v61, %v4016_v34  ;;  %v3821_v11 = vadd.s32 3, %v3804_v10 }
 0x3fe   :  { %v3995_v4 = vor.u32 8388608, %v3994_v13  ;;  %v4004_v32 = vshll.u32 %v5456_v51, %v4001_v17  ;;  %v4015_v26 = vor.u32 %v4014_v37, %v4013_v21  ;;  %vm4022_vm7 = vcmp.lt.s32.totalorder %v8300_v44, 4 }
 0x3ff   :  { %v3806_v22 = vmul.f32 -0.001358992, %v3805_v43  ;;  %v3813_v15 = vmul.f32 -0.00019511016, %v3805_v43  ;;  %v3931_v48 = vadd.s32 536870912, %v3930_v62  ;;  %vm4019_vm8 = vcmp.lt.s32.totalorder %v8300_v44, 1 }
 0x400   :  { %v8329_v56 = vor.u32 %v4005_v60, %v4004_v32  ;;  %vm4021_vm9 = vcmp.lt.s32.totalorder %v8300_v44, 3  ;;  %v4032_v45 = vsel %vm4022_vm7, %v4018_v29, 1326507024  ;;  %v4031_v50 = vsel %vm4019_vm8, %v8323_v47, %v8325_v27 }
 0x401   :  { %v3807_v6 = vadd.f32 0.041655596, %v3806_v22  ;;  %v3814_v16 = vadd.f32 0.008332121, %v3813_v15  ;;  %v8335_v3 = vshrl.u32 %v3931_v48, 30  ;;  %v4033_v39 = vsel %vm4021_vm9, %v4015_v26, %v4032_v45 }
 0x402   :  { %v4028_v18 = vsel %vm4022_vm7, %v4015_v26, 920167782  ;;  %v8345_v28 = vshll.u32 %v3995_v4, 8  ;;  %vm4020_vm10 = vcmp.lt.s32.totalorder %v8300_v44, 2  ;;  %v8350_v19 = vadd.f32 %v8024_v35, %v246_v5 }
 0x403   :  { %v3808_v40 = vmul.f32 %v3807_v6, %v3805_v43  ;;  %v3815_v12 = vmul.f32 %v3814_v16, %v3805_v43  ;;  %v3933_v17 = vshll.u32 %v8335_v3, 30  ;;  %v3822_v30 = vand.u32 3, %v3821_v11 }
 0x404   :  { %v4027_v25 = vsel %vm4019_vm8, %v8329_v56, %v8323_v47  ;;  %v4034_v63 = vsel %vm4020_vm10, %v4031_v50, %v4033_v39  ;;  %v4029_v36 = vsel %vm4021_vm9, %v8325_v27, %v4028_v18  ;;  %v4036_v8 = vand.u32 65535, %v8345_v28 }
 0x405   :  { %v3809_v13 = vadd.f32 -0.4999988, %v3808_v40  ;;  %v3816_v10 = vadd.f32 -0.16666654, %v3815_v12  ;;  %v3934_v1 = vsub.s32 %v3930_v62, %v3933_v17  ;;  %v4037_v35 = vshrl.u32 %v8345_v28, 16 }
 0x406   :  { %v4038_v42 = vand.u32 65535, %v4034_v63  ;;  %v4039_v14 = vshrl.u32 %v4034_v63, 16  ;;  %vm3820_vm11 = vweird.f32 %v8027_v38  ;;  %vm3823_vm13 = vcmp.lt.s32.totalorder %v3822_v30, 2 }
 0x407   :  { %v3810_v49 = vmul.f32 %v3809_v13, %v3805_v43  ;;  %v3817_v23 = vmul.f32 %v3816_v10, %v3805_v43  ;;  %vm3935_vm12 = vcmp.lt.s32.totalorder %v3934_v1, 0  ;;  %v3936_v37 = vsub.s32 0, %v3934_v1 }
 0x408   :  { %v4030_v61 = vsel %vm4020_vm10, %v4027_v25, %v4029_v36  ;;  %v4041_v31 = vmul.u32 %v4039_v14, %v4036_v8  ;;  %v8366_v46 = vmul.u32 %v4038_v42, %v4037_v35  ;;  %vm3824_vm14 = vcmp.eq.s32.totalorder %v3822_v30, 0 }
 0x409   :  { %v3811_v33 = vadd.f32 1.0, %v3810_v49  ;;  %v3818_v21 = vadd.f32 1.0, %v3817_v23  ;;  %v3937_v34 = vsel %vm3935_vm12, %v3936_v37, %v3934_v1  ;;  %vm3827_vm0 = vcmp.eq.s32.totalorder %v3822_v30, 2 }
 0x40a   :  { %v3938_v60 = vclz %v3937_v34  ;;  %v4044_v62 = vshll.u32 %v4041_v31, 16  ;;  %v4040_v11 = vmul.u32 %v4038_v42, %v4036_v8  ;;  %v4142_v4 = vand.u32 2147483647, %v8350_v19 }
 0x40b   :  { %v3819_v29 = vmul.f32 %v3818_v21, %v3803_v41  ;;  %v3828_v43 = vxor.u32 2147483648, %v3811_v33  ;;  %v3926_v32 = vadd.s32 %v8291_v9, %v8283_v0  ;;  %v4043_v22 = vmul.u32 %v4039_v14, %v4037_v35 }
 0x40c   :  { %v5380_v26 = vadd.s32 4294967294, %v3938_v60  ;;  %v4060_v15 = vand.u32 65535, %v4030_v61  ;;  %v4046_v45 = vshll.u32 %v8366_v46, 16  ;;  %vm4048_vm1 = vc.u32 %v4040_v11, %v4044_v62 }
 0x40d   :  { %v3825_v48 = vxor.u32 2147483648, %v3819_v29  ;;  %v4050_v5 = vadd.s32 %v4044_v62, %v4040_v11  ;;  %v3829_v6 = vsel %vm3827_vm0, %v3828_v43, %v3819_v29  ;;  %vm3834_vm15 = vcmp.lt.s32.totalorder %v8070_v52, 0 }
 0x40e   :  { %vm5381_vm2 = vcmp.lt.s32.totalorder %v5380_v26, 0  ;;  %v4049_v41 = vsel %vm4048_vm1, 1, %v5462_v54  ;;  %v4061_v16 = vshrl.u32 %v4030_v61, 16  ;;  %v4003_v12 = vshrl.u32 %v5456_v51, %v8295_v24 }
 0x40f   :  { %v3826_v50 = vsel %vm3824_vm14, %v3811_v33, %v3825_v48  ;;  %v3941_v18 = vsel %vm5381_vm2, 0, %v5380_v26  ;;  %v4051_v39 = vadd.s32 %v4049_v41, %v4043_v22  ;;  %vm4052_vm3 = vc.u32 %v4050_v5, %v4046_v45 }
 0x410   :  { %v3830_v0 = vsel %vm3823_vm13, %v3826_v50, %v3829_v6  ;;  %v3942_v9 = vsub.s32 32, %v3941_v18  ;;  %v3946_v40 = vsub.s32 4294967266, %v3941_v18  ;;  %vm8382_vm6 = vcmp.le.f32.partialorder %v3832_v20, 0.7853982  ;;  %v249_v50 = vpop.f32.mrf.mxu3 }
 0x411   :  { %v3831_v17 = vsel %vm3820_vm11, nan, %v3830_v0  ;;  %v4053_v63 = vsel %vm4052_vm3, 1, %v5462_v54  ;;  %v4063_v13 = vmul.u32 %v4061_v16, %v4036_v8  ;;  %v4064_v10 = vmul.u32 %v4060_v15, %v4037_v35 }
 0x412   :  { %v3943_v30 = vshll.u32 %v3934_v1, %v3941_v18  ;;  %v3944_v36 = vshrl.u32 %v3926_v32, %v3942_v9  ;;  %v3947_v42 = vadd.s32 127, %v3946_v40  ;;  %v4055_v14 = vadd.s32 %v4053_v63, %v4051_v39  ;;  %5249 = vst [vmem:[#allocation2 + $0xb0] sm:$0xff] %v3831_v17  ;;  %v8415_v17 = vld [vmem:[%s9265_s2] ss:$0 sm:$0xff] }
 0x413   :  { %v3956_v24 = vsub.s32 4, %v8335_v3  ;;  %v4023_v38 = vsel %vm4019_vm8, %v4003_v12, %v8329_v56  ;;  %v4062_v49 = vmul.u32 %v4060_v15, %v4036_v8  ;;  %v4066_v20 = vshll.u32 %v4063_v13, 16 }
 0x414   :  { %v3945_v23 = vor.u32 %v3944_v36, %v3943_v30  ;;  %v3948_v37 = vshll.u32 %v3947_v42, 23  ;;  %v4045_v61 = vshrl.u32 %v4041_v31, 16  ;;  %v4065_v33 = vmul.u32 %v4061_v16, %v4037_v35 }
 0x415   :  { %v4068_v21 = vshll.u32 %v4064_v10, 16  ;;  %vm4070_vm4 = vc.u32 %v4062_v49, %v4066_v20  ;;  %v4072_v34 = vadd.s32 %v4066_v20, %v4062_v49  ;;  %v4145_v1 = vand.u32 2139095040, %v8350_v19 }
 0x416   :  { %v3949_v60 = vor.u32 4788187, %v3948_v37  ;;  %v4024_v62 = vsel %vm4022_vm7, %v8325_v27, 2102212464  ;;  %v4056_v29 = vadd.s32 %v4055_v14, %v4045_v61  ;;  %v4071_v43 = vsel %vm4070_vm4, 1, %v5462_v54 }
 0x417   :  { %v3957_v56 = vsel %vm3834_vm15, %v3956_v24, %v8335_v3  ;;  %v4073_v8 = vadd.s32 %v4071_v43, %v4065_v33  ;;  %vm4074_vm5 = vc.u32 %v4072_v34, %v4068_v21  ;;  %v4146_v35 = vshrl.u32 %v4145_v1, 23 }
 0x418   :  { %v3950_v31 = vand.u32 2147483647, %v3949_v60  ;;  %v3952_v11 = vcvt.s32.f32 %v3945_v23  ;;  %v4047_v32 = vshrl.u32 %v8366_v46, 16  ;;  %v4075_v26 = vsel %vm4074_vm5, 1, %v5462_v54 }
 0x419   :  { %v4025_v27 = vsel %vm4021_vm9, %v8323_v47, %v4024_v62  ;;  %v4067_v22 = vshrl.u32 %v4063_v13, 16  ;;  %v4077_v15 = vadd.s32 %v4075_v26, %v4073_v8  ;;  %v5385_v48 = vadd.s32 4294967169, %v4146_v35 }
 0x41a   :  { %v3953_v45 = vmul.f32 %v3952_v11, %v3950_v31  ;;  %v3959_v3 = vsel %vm8382_vm6, 0, %v3957_v56  ;;  %v4057_v5 = vadd.s32 %v4056_v29, %v4047_v32  ;;  %v4069_v6 = vshrl.u32 %v4064_v10, 16 }
 0x41b   :  { %v4078_v41 = vadd.s32 %v4077_v15, %v4067_v22  ;;  %v4152_v16 = vadd.s32 1, %v5385_v48  ;;  %v4026_v46 = vsel %vm4020_vm10, %v4023_v38, %v4025_v27  ;;  %v4076_v39 = vadd.s32 %v4072_v34, %v4068_v21 }
 0x41c   :  { %v3954_v18 = vxor.u32 2147483648, %v3953_v45  ;;  %v3976_v0 = vadd.s32 3, %v3959_v3  ;;  %v4149_v47 = vand.u32 8388607, %v4142_v4  ;;  %v8418_v44 = vadd.f32 %v8415_v17, %v249_v50 }
 0x41d   :  { %v4079_v9 = vadd.s32 %v4078_v41, %v4069_v6  ;;  %vm4153_vm7 = vcmp.gt.s32.totalorder %v4152_v16, 0  ;;  %vm4082_vm8 = vc.u32 %v4057_v5, %v4076_v39  ;;  %v4080_v36 = vmul.u32 %v8345_v28, %v4026_v46 }
 0x41e   :  { %v3955_v40 = vsel %vm3834_vm15, %v3954_v18, %v3953_v45  ;;  %v4154_v12 = vsel %vm4153_vm7, %v4152_v16, 0  ;;  %v8424_v42 = vand.u32 3, %v3976_v0  ;;  %v4150_v24 = vor.u32 8388608, %v4149_v47 }
 0x41f   :  { %v3958_v63 = vsel %vm8382_vm6, %v8070_v52, %v3955_v40  ;;  %v4083_v13 = vadd.s32 1, %v4079_v9  ;;  %v4156_v10 = vand.u32 31, %v4154_v12  ;;  %v8428_v23 = vadd.s32 %v4076_v39, %v4057_v5 }
 0x420   :  { %v3960_v30 = vmul.f32 %v3958_v63, %v3958_v63  ;;  %v8430_v61 = vshrl.u32 %v4154_v12, 5  ;;  %v4300_v28 = vand.u32 2139095040, %v8418_v44  ;;  %v8452_v3 = vshll.u32 %v4150_v24, 8 }
 0x421   :  { %v4084_v14 = vsel %vm4082_vm8, %v4083_v13, %v4079_v9  ;;  %v8426_v38 = vsub.s32 32, %v4156_v10  ;;  %v4159_v60 = vshll.u32 %v5456_v51, %v4156_v10  ;;  %v4162_v62 = vshll.u32 %v5457_v53, %v4156_v10 }
 0x422   :  { %v3961_v49 = vmul.f32 -0.001358992, %v3960_v30  ;;  %v3968_v20 = vmul.f32 -0.00019511016, %v3960_v30  ;;  %v4085_v37 = vadd.s32 %v4084_v14, %v4080_v36  ;;  %v4168_v43 = vshll.u32 %v5459_v57, %v4156_v10 }
 0x423   :  { %v4160_v25 = vshrl.u32 %v5457_v53, %v8426_v38  ;;  %v4163_v33 = vshrl.u32 %v5458_v55, %v8426_v38  ;;  %v4166_v29 = vshrl.u32 %v5459_v57, %v8426_v38  ;;  %v4169_v56 = vshrl.u32 %v5460_v59, %v8426_v38 }
 0x424   :  { %v3962_v21 = vadd.f32 0.041655596, %v3961_v49  ;;  %v3969_v34 = vadd.f32 0.008332121, %v3968_v20  ;;  %v4086_v1 = vadd.s32 536870912, %v4085_v37  ;;  %v4165_v11 = vshll.u32 %v5458_v55, %v4156_v10 }
 0x425   :  { %v4161_v32 = vor.u32 %v4160_v25, %v4159_v60  ;;  %v8447_v26 = vor.u32 %v4163_v33, %v4162_v62  ;;  %v4170_v27 = vor.u32 %v4169_v56, %v4168_v43  ;;  %v4172_v22 = vshrl.u32 %v5461_v2, %v8426_v38 }
 0x426   :  { %v3963_v8 = vmul.f32 %v3962_v21, %v3960_v30  ;;  %v3970_v35 = vmul.f32 %v3969_v34, %v3960_v30  ;;  %v8444_v31 = vshrl.u32 %v4086_v1, 30  ;;  %vm3979_vm9 = vcmp.eq.s32.totalorder %v8424_v42, 0 }
 0x427   :  { %vm3982_vm10 = vcmp.eq.s32.totalorder %v8424_v42, 2  ;;  %v4167_v5 = vor.u32 %v4166_v29, %v4165_v11  ;;  %v4171_v6 = vshll.u32 %v5460_v59, %v4156_v10  ;;  %vm4174_vm12 = vcmp.lt.s32.totalorder %v8430_v61, 1 }
 0x428   :  { %v3964_v15 = vadd.f32 -0.4999988, %v3963_v8  ;;  %v3971_v48 = vadd.f32 -0.16666654, %v3970_v35  ;;  %v4088_v45 = vshll.u32 %v8444_v31, 30  ;;  %v4301_v41 = vshrl.u32 %v4300_v28, 23 }
 0x429   :  { %vm3978_vm11 = vcmp.lt.s32.totalorder %v8424_v42, 2  ;;  %vm4177_vm13 = vcmp.lt.s32.totalorder %v8430_v61, 4  ;;  %vm3975_vm14 = vweird.f32 %v8070_v52  ;;  %v4173_v46 = vor.u32 %v4172_v22, %v4171_v6 }
 0x42a   :  { %v3965_v16 = vmul.f32 %v3964_v15, %v3960_v30  ;;  %v3972_v50 = vmul.f32 %v3971_v48, %v3960_v30  ;;  %v8459_v18 = vsub.s32 %v4085_v37, %v4088_v45  ;;  %vm4176_vm0 = vcmp.lt.s32.totalorder %v8430_v61, 3 }
 0x42b   :  { %v4182_v39 = vsel %vm4174_vm12, %v4161_v32, %v8447_v26  ;;  %v4183_v0 = vsel %vm4177_vm13, %v4170_v27, 920167782  ;;  %vm3989_vm1 = vcmp.lt.s32.totalorder %v8096_v58, 0  ;;  %v4191_v13 = vand.u32 65535, %v8452_v3 }
 0x42c   :  { %v3966_v9 = vadd.f32 1.0, %v3965_v16  ;;  %v3973_v47 = vadd.f32 1.0, %v3972_v50  ;;  %vm4090_vm15 = vcmp.lt.s32.totalorder %v8459_v18, 0  ;;  %v4091_v40 = vsub.s32 0, %v8459_v18 }
 0x42d   :  { %v4184_v12 = vsel %vm4176_vm0, %v4167_v5, %v4183_v0  ;;  %v4192_v10 = vshrl.u32 %v8452_v3, 16  ;;  %v4297_v30 = vand.u32 2147483647, %v8418_v44  ;;  %vm4175_vm2 = vcmp.lt.s32.totalorder %v8430_v61, 2 }
 0x42e   :  { %v3974_v36 = vmul.f32 %v3973_v47, %v3958_v63  ;;  %v3983_v14 = vxor.u32 2147483648, %v3966_v9  ;;  %v4092_v24 = vsel %vm4090_vm15, %v4091_v40, %v8459_v18  ;;  %v4185_v20 = vsel %vm4175_vm2, %v4182_v39, %v4184_v12 }
 0x42f   :  { %v4093_v49 = vclz %v4092_v24  ;;  %v4186_v37 = vsel %vm4174_vm12, %v8447_v26, %v4167_v5  ;;  %v4187_v25 = vsel %vm4177_vm13, %v4173_v46, 1326507024  ;;  %v4158_v63 = vshrl.u32 %v5456_v51, %v8426_v38 }
 0x430   :  { %v3980_v33 = vxor.u32 2147483648, %v3974_v36  ;;  %v4188_v28 = vsel %vm4176_vm0, %v4170_v27, %v4187_v25  ;;  %v5388_v21 = vadd.s32 4294967169, %v4301_v41  ;;  %v4111_v1 = vsub.s32 4, %v8444_v31 }
 0x431   :  { %v5383_v34 = vadd.s32 4294967294, %v4093_v49  ;;  %v4179_v60 = vsel %vm4177_vm13, %v4167_v5, 2102212464  ;;  %v4215_v62 = vand.u32 65535, %v4185_v20  ;;  %v3984_v43 = vsel %vm3982_vm10, %v3983_v14, %v3974_v36 }
 0x432   :  { %v3981_v29 = vsel %vm3979_vm9, %v3966_v9, %v3980_v33  ;;  %v4189_v38 = vsel %vm4175_vm2, %v4186_v37, %v4188_v28  ;;  %v4216_v56 = vshrl.u32 %v4185_v20, 16  ;;  %v4178_v15 = vsel %vm4174_vm12, %v4158_v63, %v4161_v32 }
 0x433   :  { %v3985_v8 = vsel %vm3978_vm11, %v3981_v29, %v3984_v43  ;;  %vm5384_vm3 = vcmp.lt.s32.totalorder %v5383_v34, 0  ;;  %v4193_v35 = vand.u32 65535, %v4189_v38  ;;  %v4194_v11 = vshrl.u32 %v4189_v38, 16 }
 0x434   :  { %v3986_v27 = vsel %vm3975_vm14, nan, %v3985_v8  ;;  %v4096_v22 = vsel %vm5384_vm3, 0, %v5383_v34  ;;  %v4218_v48 = vmul.u32 %v4216_v56, %v4191_v13  ;;  %v4112_v6 = vsel %vm3989_vm1, %v4111_v1, %v8444_v31 }
 0x435   :  { %v4097_v45 = vsub.s32 32, %v4096_v22  ;;  %v4101_v5 = vsub.s32 4294967266, %v4096_v22  ;;  %v4219_v41 = vmul.u32 %v4215_v62, %v4192_v10  ;;  %5250 = vst [vmem:[#allocation2 + $0xb8] sm:$0xff] %v3986_v27  ;;  %vm8510_vm6 = vcmp.le.f32.partialorder %v3987_v7, 0.7853982 }
 0x436   :  { %v4180_v52 = vsel %vm4176_vm0, %v8447_v26, %v4179_v60  ;;  %v4196_v32 = vmul.u32 %v4194_v11, %v4191_v13  ;;  %v4197_v16 = vmul.u32 %v4193_v35, %v4192_v10  ;;  %v4217_v50 = vmul.u32 %v4215_v62, %v4191_v13 }
 0x437   :  { %v4098_v46 = vshll.u32 %v8459_v18, %v4096_v22  ;;  %v4099_v39 = vshrl.u32 %v8428_v23, %v4097_v45  ;;  %v4102_v31 = vadd.s32 127, %v4101_v5  ;;  %v4221_v0 = vshll.u32 %v4218_v48, 16 }
 0x438   :  { %v4195_v9 = vmul.u32 %v4193_v35, %v4191_v13  ;;  %v4198_v47 = vmul.u32 %v4194_v11, %v4192_v10  ;;  %v4199_v40 = vshll.u32 %v4196_v32, 16  ;;  %v4220_v7 = vmul.u32 %v4216_v56, %v4192_v10 }
 0x439   :  { %v4100_v12 = vor.u32 %v4099_v39, %v4098_v46  ;;  %v4103_v36 = vshll.u32 %v4102_v31, 23  ;;  %v4201_v14 = vshll.u32 %v4197_v16, 16  ;;  %v4223_v24 = vshll.u32 %v4219_v41, 16 }
 0x43a   :  { %vm4203_vm4 = vc.u32 %v4195_v9, %v4199_v40  ;;  %v4205_v49 = vadd.s32 %v4199_v40, %v4195_v9  ;;  %vm4225_vm5 = vc.u32 %v4217_v50, %v4221_v0  ;;  %v4227_v26 = vadd.s32 %v4221_v0, %v4217_v50 }
 0x43b   :  { %v4104_v20 = vor.u32 4788187, %v4103_v36  ;;  %v4204_v37 = vsel %vm4203_vm4, 1, %v5462_v54  ;;  %v4222_v18 = vshrl.u32 %v4218_v48, 16  ;;  %v4226_v23 = vsel %vm4225_vm5, 1, %v5462_v54 }
 0x43c   :  { %v4206_v25 = vadd.s32 %v4204_v37, %v4198_v47  ;;  %vm4207_vm7 = vc.u32 %v4205_v49, %v4201_v14  ;;  %v4228_v13 = vadd.s32 %v4226_v23, %v4220_v7  ;;  %vm4229_vm8 = vc.u32 %v4227_v26, %v4223_v24  ;;  %v252_v49 = vpop.f32.mrf.mxu3 }
 0x43d   :  { %v4105_v33 = vand.u32 2147483647, %v4104_v20  ;;  %v4107_v10 = vcvt.s32.f32 %v4100_v12  ;;  %v4208_v63 = vsel %vm4207_vm7, 1, %v5462_v54  ;;  %v4230_v28 = vsel %vm4229_vm8, 1, %v5462_v54 }
 0x43e   :  { %v4200_v34 = vshrl.u32 %v4196_v32, 16  ;;  %v4210_v1 = vadd.s32 %v4208_v63, %v4206_v25  ;;  %v4232_v60 = vadd.s32 %v4230_v28, %v4228_v13  ;;  %v4307_v62 = vadd.s32 1, %v5388_v21 }
 0x43f   :  { %v4108_v29 = vmul.f32 %v4107_v10, %v4105_v33  ;;  %v4114_v43 = vsel %vm8510_vm6, 0, %v4112_v6  ;;  %v4202_v38 = vshrl.u32 %v4197_v16, 16  ;;  %v4224_v8 = vshrl.u32 %v4219_v41, 16 }
 0x440   :  { %v4211_v56 = vadd.s32 %v4210_v1, %v4200_v34  ;;  %v4233_v35 = vadd.s32 %v4232_v60, %v4222_v18  ;;  %vm4308_vm9 = vcmp.gt.s32.totalorder %v4307_v62, 0  ;;  %v4181_v27 = vsel %vm4175_vm2, %v4178_v15, %v4180_v52 }
 0x441   :  { %v4109_v11 = vxor.u32 2147483648, %v4108_v29  ;;  %v4304_v22 = vand.u32 8388607, %v4297_v30  ;;  %v4309_v48 = vsel %vm4308_vm9, %v4307_v62, 0  ;;  %v8531_v21 = vadd.s32 %v4227_v26, %v4223_v24 }
 0x442   :  { %v8529_v45 = vadd.s32 %v4211_v56, %v4202_v38  ;;  %v4234_v5 = vadd.s32 %v4233_v35, %v4224_v8  ;;  %v4311_v32 = vand.u32 31, %v4309_v48  ;;  %v4131_v41 = vadd.s32 3, %v4114_v43 }
 0x443   :  { %v4110_v6 = vsel %vm3989_vm1, %v4109_v11, %v4108_v29  ;;  %v4235_v52 = vmul.u32 %v8452_v3, %v4181_v27  ;;  %v4305_v39 = vor.u32 8388608, %v4304_v22  ;;  %v8545_v40 = vshrl.u32 %v4309_v48, 5 }
 0x444   :  { %v4113_v16 = vsel %vm8510_vm6, %v8096_v58, %v4110_v6  ;;  %vm4237_vm10 = vc.u32 %v8529_v45, %v8531_v21  ;;  %v4238_v61 = vadd.s32 1, %v4234_v5  ;;  %v8541_v50 = vsub.s32 32, %v4311_v32 }
 0x445   :  { %v4115_v15 = vmul.f32 %v4113_v16, %v4113_v16  ;;  %v8543_v9 = vand.u32 3, %v4131_v41  ;;  %v4323_v24 = vshll.u32 %v5459_v57, %v4311_v32  ;;  %v4317_v20 = vshll.u32 %v5457_v53, %v4311_v32 }
 0x446   :  { %v4239_v46 = vsel %vm4237_vm10, %v4238_v61, %v4234_v5  ;;  %v4318_v42 = vshrl.u32 %v5458_v55, %v8541_v50  ;;  %v4321_v7 = vshrl.u32 %v5459_v57, %v8541_v50  ;;  %v4324_v3 = vshrl.u32 %v5460_v59, %v8541_v50 }
 0x447   :  { %v4116_v31 = vmul.f32 -0.001358992, %v4115_v15  ;;  %v4123_v0 = vmul.f32 -0.00019511016, %v4115_v15  ;;  %v4240_v47 = vadd.s32 %v4239_v46, %v4235_v52  ;;  %v4315_v26 = vshrl.u32 %v5457_v53, %v8541_v50 }
 0x448   :  { %v4320_v37 = vshll.u32 %v5458_v55, %v4311_v32  ;;  %v4327_v18 = vshrl.u32 %v5461_v2, %v8541_v50  ;;  %v4325_v33 = vor.u32 %v4324_v3, %v4323_v24  ;;  %v4314_v10 = vshll.u32 %v5456_v51, %v4311_v32 }
 0x449   :  { %v4117_v12 = vadd.f32 0.041655596, %v4116_v31  ;;  %v4124_v36 = vadd.f32 0.008332121, %v4123_v0  ;;  %v4241_v14 = vadd.s32 536870912, %v4240_v47  ;;  %v8563_v63 = vor.u32 %v4318_v42, %v4317_v20 }
 0x44a   :  { %v8565_v28 = vor.u32 %v4321_v7, %v4320_v37  ;;  %v4326_v34 = vshll.u32 %v5460_v59, %v4311_v32  ;;  %v8569_v1 = vadd.f32 %v8415_v17, %v252_v49  ;;  %vm4134_vm12 = vcmp.eq.s32.totalorder %v8543_v9, 0 }
 0x44b   :  { %v4118_v23 = vmul.f32 %v4117_v12, %v4115_v15  ;;  %v4125_v25 = vmul.f32 %v4124_v36, %v4115_v15  ;;  %v8560_v13 = vshrl.u32 %v4241_v14, 30  ;;  %v8573_v43 = vor.u32 %v4315_v26, %v4314_v10 }
 0x44c   :  { %v4328_v38 = vor.u32 %v4327_v18, %v4326_v34  ;;  %vm4329_vm11 = vcmp.lt.s32.totalorder %v8545_v40, 1  ;;  %vm4332_vm13 = vcmp.lt.s32.totalorder %v8545_v40, 4  ;;  %vm4133_vm14 = vcmp.lt.s32.totalorder %v8543_v9, 2 }
 0x44d   :  { %v4119_v60 = vadd.f32 -0.4999988, %v4118_v23  ;;  %v4126_v62 = vadd.f32 -0.16666654, %v4125_v25  ;;  %v4243_v29 = vshll.u32 %v8560_v13, 30  ;;  %vm4130_vm0 = vweird.f32 %v8096_v58 }
 0x44e   :  { %v4338_v11 = vsel %vm4332_vm13, %v4325_v33, 920167782  ;;  %vm4137_vm1 = vcmp.eq.s32.totalorder %v8543_v9, 2  ;;  %vm4331_vm15 = vcmp.lt.s32.totalorder %v8545_v40, 3  ;;  %v4341_v27 = vsel %vm4329_vm11, %v8563_v63, %v8565_v28 }
 0x44f   :  { %v4120_v56 = vmul.f32 %v4119_v60, %v4115_v15  ;;  %v4127_v8 = vmul.f32 %v4126_v62, %v4115_v15  ;;  %v4244_v35 = vsub.s32 %v4240_v47, %v4243_v29  ;;  %v8587_v22 = vshll.u32 %v4305_v39, 8 }
 0x450   :  { %vm4330_vm3 = vcmp.lt.s32.totalorder %v8545_v40, 2  ;;  %v4337_v6 = vsel %vm4329_vm11, %v8573_v43, %v8563_v63  ;;  %v4339_v41 = vsel %vm4331_vm15, %v8565_v28, %v4338_v11  ;;  %v4342_v61 = vsel %vm4332_vm13, %v4328_v38, 1326507024 }
 0x451   :  { %v4121_v48 = vadd.f32 1.0, %v4120_v56  ;;  %v4128_v5 = vadd.f32 1.0, %v4127_v8  ;;  %vm4245_vm2 = vcmp.lt.s32.totalorder %v4244_v35, 0  ;;  %v4246_v32 = vsub.s32 0, %v4244_v35 }
 0x452   :  { %v4343_v39 = vsel %vm4331_vm15, %v4325_v33, %v4342_v61  ;;  %v4346_v47 = vand.u32 65535, %v8587_v22  ;;  %v4347_v42 = vshrl.u32 %v8587_v22, 16  ;;  %v4340_v3 = vsel %vm4330_vm3, %v4337_v6, %v4339_v41 }
 0x453   :  { %v4129_v15 = vmul.f32 %v4128_v5, %v4113_v16  ;;  %v4138_v52 = vxor.u32 2147483648, %v4121_v48  ;;  %v4247_v46 = vsel %vm4245_vm2, %v4246_v32, %v4244_v35  ;;  %v4344_v0 = vsel %vm4330_vm3, %v4341_v27, %v4343_v39 }
 0x454   :  { %v4248_v31 = vclz %v4247_v46  ;;  %v4348_v12 = vand.u32 65535, %v4344_v0  ;;  %v4349_v36 = vshrl.u32 %v4344_v0, 16  ;;  %v4236_v16 = vadd.s32 %v8531_v21, %v8529_v45 }
 0x455   :  { %v4135_v7 = vxor.u32 2147483648, %v4129_v15  ;;  %v4452_v24 = vand.u32 2147483647, %v8569_v1  ;;  %v4455_v49 = vand.u32 2139095040, %v8569_v1  ;;  %v4139_v20 = vsel %vm4137_vm1, %v4138_v52, %v4129_v15 }
 0x456   :  { %v5386_v14 = vadd.s32 4294967294, %v4248_v31  ;;  %v4351_v37 = vmul.u32 %v4349_v36, %v4346_v47  ;;  %v4352_v18 = vmul.u32 %v4348_v12, %v4347_v42  ;;  %v4370_v25 = vand.u32 65535, %v4340_v3 }
 0x457   :  { %v4136_v26 = vsel %vm4134_vm12, %v4121_v48, %v4135_v7  ;;  %v4371_v33 = vshrl.u32 %v4340_v3, 16  ;;  %v4350_v10 = vmul.u32 %v4348_v12, %v4346_v47  ;;  %vm4144_vm4 = vcmp.lt.s32.totalorder %v8350_v19, 0 }
 0x458   :  { %v4140_v23 = vsel %vm4133_vm14, %v4136_v26, %v4139_v20  ;;  %vm5387_vm6 = vcmp.lt.s32.totalorder %v5386_v14, 0  ;;  %v4354_v34 = vshll.u32 %v4351_v37, 16  ;;  %v4313_v29 = vshrl.u32 %v5456_v51, %v8541_v50 }
 0x459   :  { %v4141_v45 = vsel %vm4130_vm0, nan, %v4140_v23  ;;  %v4251_v21 = vsel %vm5387_vm6, 0, %v5386_v14  ;;  %v4353_v38 = vmul.u32 %v4349_v36, %v4347_v42  ;;  %v4356_v56 = vshll.u32 %v4352_v18, 16 }
 0x45a   :  { %v4252_v60 = vsub.s32 32, %v4251_v21  ;;  %v4256_v62 = vsub.s32 4294967266, %v4251_v21  ;;  %5251 = vst [vmem:[#allocation2 + $0xc0] sm:$0xff] %v4141_v45  ;;  %v4253_v9 = vshll.u32 %v4244_v35, %v4251_v21  ;;  %vm4358_vm5 = vc.u32 %v4350_v10, %v4354_v34 }
 0x45b   :  { %v4360_v8 = vadd.s32 %v4354_v34, %v4350_v10  ;;  %v4359_v58 = vsel %vm4358_vm5, 1, %v5462_v54  ;;  %v4373_v48 = vmul.u32 %v4371_v33, %v4346_v47  ;;  %v4372_v32 = vmul.u32 %v4370_v25, %v4346_v47 }
 0x45c   :  { %v4254_v11 = vshrl.u32 %v4236_v16, %v4252_v60  ;;  %v4257_v27 = vadd.s32 127, %v4256_v62  ;;  %v4361_v5 = vadd.s32 %v4359_v58, %v4353_v38  ;;  %v4374_v6 = vmul.u32 %v4370_v25, %v4347_v42 }
 0x45d   :  { %vm4362_vm7 = vc.u32 %v4360_v8, %v4356_v56  ;;  %v4376_v50 = vshll.u32 %v4373_v48, 16  ;;  %v4266_v52 = vsub.s32 4, %v8560_v13  ;;  %v4355_v35 = vshrl.u32 %v4351_v37, 16  ;;  %v255_v56 = vpop.f32.mrf.mxu3 }
 0x45e   :  { %v4255_v41 = vor.u32 %v4254_v11, %v4253_v9  ;;  %v4258_v61 = vshll.u32 %v4257_v27, 23  ;;  %v4363_v15 = vsel %vm4362_vm7, 1, %v5462_v54  ;;  %v4375_v39 = vmul.u32 %v4371_v33, %v4347_v42 }
 0x45f   :  { %v4365_v46 = vadd.s32 %v4363_v15, %v4361_v5  ;;  %v4378_v0 = vshll.u32 %v4374_v6, 16  ;;  %vm4380_vm8 = vc.u32 %v4372_v32, %v4376_v50  ;;  %v4382_v7 = vadd.s32 %v4376_v50, %v4372_v32 }
 0x460   :  { %v4259_v31 = vor.u32 4788187, %v4258_v61  ;;  %v4334_v3 = vsel %vm4332_vm13, %v8565_v28, 2102212464  ;;  %v4381_v12 = vsel %vm4380_vm8, 1, %v5462_v54  ;;  %v4456_v36 = vshrl.u32 %v4455_v49, 23 }
 0x461   :  { %v4366_v47 = vadd.s32 %v4365_v46, %v4355_v35  ;;  %v4262_v14 = vcvt.s32.f32 %v4255_v41  ;;  %v4383_v26 = vadd.s32 %v4381_v12, %v4375_v39  ;;  %vm4384_vm9 = vc.u32 %v4382_v7, %v4378_v0 }
 0x462   :  { %v4260_v16 = vand.u32 2147483647, %v4259_v31  ;;  %v4267_v42 = vsel %vm4144_vm4, %v4266_v52, %v8560_v13  ;;  %v4357_v20 = vshrl.u32 %v4352_v18, 16  ;;  %v4385_v37 = vsel %vm4384_vm9, 1, %v5462_v54 }
 0x463   :  { %v5391_v23 = vadd.s32 4294967169, %v4456_v36  ;;  %vm8635_vm10 = vcmp.le.f32.partialorder %v4142_v4, 0.7853982  ;;  %v4377_v49 = vshrl.u32 %v4373_v48, 16  ;;  %v4387_v33 = vadd.s32 %v4385_v37, %v4383_v26 }
 0x464   :  { %v4263_v25 = vmul.f32 %v4262_v14, %v4260_v16  ;;  %v4333_v45 = vsel %vm4329_vm11, %v4313_v29, %v8573_v43  ;;  %v4335_v13 = vsel %vm4331_vm15, %v8563_v63, %v4334_v3  ;;  %v4367_v18 = vadd.s32 %v4366_v47, %v4357_v20 }
 0x465   :  { %v4462_v21 = vadd.s32 1, %v5391_v23  ;;  %v4269_v4 = vsel %vm8635_vm10, 0, %v4267_v42  ;;  %v4379_v34 = vshrl.u32 %v4374_v6, 16  ;;  %v4388_v60 = vadd.s32 %v4387_v33, %v4377_v49 }
 0x466   :  { %v4264_v10 = vxor.u32 2147483648, %v4263_v25  ;;  %v4386_v62 = vadd.s32 %v4382_v7, %v4378_v0  ;;  %v4459_v38 = vand.u32 8388607, %v4452_v24  ;;  %v4336_v29 = vsel %vm4330_vm3, %v4333_v45, %v4335_v13 }
 0x467   :  { %vm4463_vm12 = vcmp.gt.s32.totalorder %v4462_v21, 0  ;;  %v4389_v63 = vadd.s32 %v4388_v60, %v4379_v34  ;;  %v4286_v11 = vadd.s32 3, %v4269_v4  ;;  %v4390_v5 = vmul.u32 %v8587_v22, %v4336_v29 }
 0x468   :  { %v4265_v43 = vsel %vm4144_vm4, %v4264_v10, %v4263_v25  ;;  %v4464_v9 = vsel %vm4463_vm12, %v4462_v21, 0  ;;  %vm4392_vm11 = vc.u32 %v4367_v18, %v4386_v62  ;;  %v8660_v6 = vadd.f32 %v8415_v17, %v255_v56 }
 0x469   :  { %v4268_v8 = vsel %vm8635_vm10, %v8350_v19, %v4265_v43  ;;  %v4466_v27 = vand.u32 31, %v4464_v9  ;;  %v4393_v48 = vadd.s32 1, %v4389_v63  ;;  %v8662_v15 = vand.u32 3, %v4286_v11 }
 0x46a   :  { %v4270_v58 = vmul.f32 %v4268_v8, %v4268_v8  ;;  %v4460_v52 = vor.u32 8388608, %v4459_v38  ;;  %v8664_v35 = vshrl.u32 %v4464_v9, 5  ;;  %v8683_v25 = vadd.s32 %v4386_v62, %v4367_v18 }
 0x46b   :  { %v8657_v32 = vsub.s32 32, %v4466_v27  ;;  %v4394_v61 = vsel %vm4392_vm11, %v4393_v48, %v4389_v63  ;;  %v4478_v47 = vshll.u32 %v5459_v57, %v4466_v27  ;;  %v4469_v16 = vshll.u32 %v5456_v51, %v4466_v27 }
 0x46c   :  { %v4271_v40 = vmul.f32 -0.001358992, %v4270_v58  ;;  %v4278_v41 = vmul.f32 -0.00019511016, %v4270_v58  ;;  %v4395_v50 = vadd.s32 %v4394_v61, %v4390_v5  ;;  %v4472_v14 = vshll.u32 %v5457_v53, %v4466_v27 }
 0x46d   :  { %v4470_v31 = vshrl.u32 %v5457_v53, %v8657_v32  ;;  %v4479_v22 = vshrl.u32 %v5460_v59, %v8657_v32  ;;  %v4473_v7 = vshrl.u32 %v5458_v55, %v8657_v32  ;;  %v4476_v3 = vshrl.u32 %v5459_v57, %v8657_v32 }
 0x46e   :  { %v4272_v46 = vadd.f32 0.041655596, %v4271_v40  ;;  %v4279_v39 = vadd.f32 0.008332121, %v4278_v41  ;;  %v4396_v0 = vadd.s32 536870912, %v4395_v50  ;;  %v4475_v42 = vshll.u32 %v5458_v55, %v4466_v27 }
 0x46f   :  { %v4480_v20 = vor.u32 %v4479_v22, %v4478_v47  ;;  %v4482_v37 = vshrl.u32 %v5461_v2, %v8657_v32  ;;  %vm4292_vm13 = vcmp.eq.s32.totalorder %v8662_v15, 2  ;;  %v8685_v49 = vor.u32 %v4470_v31, %v4469_v16 }
 0x470   :  { %v4273_v12 = vmul.f32 %v4272_v46, %v4270_v58  ;;  %v4280_v36 = vmul.f32 %v4279_v39, %v4270_v58  ;;  %v8677_v26 = vshrl.u32 %v4396_v0, 30  ;;  %vm4289_vm14 = vcmp.eq.s32.totalorder %v8662_v15, 0 }
 0x471   :  { %v8689_v45 = vor.u32 %v4473_v7, %v4472_v14  ;;  %v4477_v13 = vor.u32 %v4476_v3, %v4475_v42  ;;  %v4481_v21 = vshll.u32 %v5460_v59, %v4466_v27  ;;  %vm4288_vm0 = vcmp.lt.s32.totalorder %v8662_v15, 2 }
 0x472   :  { %v4274_v23 = vadd.f32 -0.4999988, %v4273_v12  ;;  %v4281_v28 = vadd.f32 -0.16666654, %v4280_v36  ;;  %v4398_v33 = vshll.u32 %v8677_v26, 30  ;;  %vm4487_vm1 = vcmp.lt.s32.totalorder %v8664_v35, 4 }
 0x473   :  { %v8694_v34 = vshll.u32 %v4460_v52, 8  ;;  %vm4285_vm15 = vweird.f32 %v8350_v19  ;;  %v4483_v60 = vor.u32 %v4482_v37, %v4481_v21  ;;  %v4493_v62 = vsel %vm4487_vm1, %v4480_v20, 920167782 }
 0x474   :  { %v4275_v10 = vmul.f32 %v4274_v23, %v4270_v58  ;;  %v4282_v4 = vmul.f32 %v4281_v28, %v4270_v58  ;;  %v8697_v18 = vsub.s32 %v4395_v50, %v4398_v33  ;;  %v4610_v38 = vand.u32 2139095040, %v8660_v6 }
 0x475   :  { %vm4299_vm2 = vcmp.lt.s32.totalorder %v8418_v44, 0  ;;  %vm4484_vm3 = vcmp.lt.s32.totalorder %v8664_v35, 1  ;;  %vm4486_vm6 = vcmp.lt.s32.totalorder %v8664_v35, 3  ;;  %v4501_v48 = vand.u32 65535, %v8694_v34 }
 0x476   :  { %v4276_v43 = vadd.f32 1.0, %v4275_v10  ;;  %v4283_v29 = vadd.f32 1.0, %v4282_v4  ;;  %vm4400_vm4 = vcmp.lt.s32.totalorder %v8697_v18, 0  ;;  %v4401_v63 = vsub.s32 0, %v8697_v18 }
 0x477   :  { %v4492_v9 = vsel %vm4484_vm3, %v8685_v49, %v8689_v45  ;;  %v4494_v56 = vsel %vm4486_vm6, %v4477_v13, %v4493_v62  ;;  %v4496_v58 = vsel %vm4484_vm3, %v8689_v45, %v4477_v13  ;;  %vm4485_vm5 = vcmp.lt.s32.totalorder %v8664_v35, 2 }
 0x478   :  { %v4284_v11 = vmul.f32 %v4283_v29, %v4268_v8  ;;  %v4293_v27 = vxor.u32 2147483648, %v4276_v43  ;;  %v4402_v5 = vsel %vm4400_vm4, %v4401_v63, %v8697_v18  ;;  %v4497_v40 = vsel %vm4487_vm1, %v4483_v60, 1326507024 }
 0x479   :  { %v4502_v41 = vshrl.u32 %v8694_v34, 16  ;;  %v4403_v50 = vclz %v4402_v5  ;;  %v4495_v8 = vsel %vm4485_vm5, %v4492_v9, %v4494_v56  ;;  %v4498_v52 = vsel %vm4486_vm6, %v4480_v20, %v4497_v40 }
 0x47a   :  { %v4290_v61 = vxor.u32 2147483648, %v4284_v11  ;;  %v4294_v46 = vsel %vm4292_vm13, %v4293_v27, %v4284_v11  ;;  %v4421_v39 = vsub.s32 4, %v8677_v26  ;;  %v4499_v31 = vsel %vm4485_vm5, %v4496_v58, %v4498_v52 }
 0x47b   :  { %v4611_v22 = vshrl.u32 %v4610_v38, 23  ;;  %v5389_v7 = vadd.s32 4294967294, %v4403_v50  ;;  %v4503_v3 = vand.u32 65535, %v4499_v31  ;;  %v4504_v47 = vshrl.u32 %v4499_v31, 16 }
 0x47c   :  { %v4291_v0 = vsel %vm4289_vm14, %v4276_v43, %v4290_v61  ;;  %v4468_v36 = vshrl.u32 %v5456_v51, %v8657_v32  ;;  %v4525_v16 = vand.u32 65535, %v4495_v8  ;;  %v4526_v14 = vshrl.u32 %v4495_v8, 16 }
 0x47d   :  { %v4295_v12 = vsel %vm4288_vm0, %v4291_v0, %v4294_v46  ;;  %vm5390_vm7 = vcmp.lt.s32.totalorder %v5389_v7, 0  ;;  %v4489_v20 = vsel %vm4487_vm1, %v4477_v13, 2102212464  ;;  %v4506_v37 = vmul.u32 %v4504_v47, %v4501_v48 }
 0x47e   :  { %v4296_v42 = vsel %vm4285_vm15, nan, %v4295_v12  ;;  %v4406_v23 = vsel %vm5390_vm7, 0, %v5389_v7  ;;  %v4422_v28 = vsel %vm4299_vm2, %v4421_v39, %v8677_v26  ;;  %v4507_v15 = vmul.u32 %v4503_v3, %v4502_v41 }
 0x47f   :  { %v4528_v33 = vmul.u32 %v4526_v14, %v4501_v48  ;;  %5252 = vst [vmem:[#allocation2 + $0xc8] sm:$0xff] %v4296_v42  ;;  %v4407_v21 = vsub.s32 32, %v4406_v23  ;;  %v4411_v32 = vsub.s32 4294967266, %v4406_v23  ;;  %v4505_v10 = vmul.u32 %v4503_v3, %v4501_v48 }
 0x480   :  { %v4509_v4 = vshll.u32 %v4506_v37, 16  ;;  %v4408_v19 = vshll.u32 %v8697_v18, %v4406_v23  ;;  %v4508_v60 = vmul.u32 %v4504_v47, %v4502_v41  ;;  %v4511_v62 = vshll.u32 %v4507_v15, 16 }
 0x481   :  { %v4529_v38 = vmul.u32 %v4525_v16, %v4502_v41  ;;  %vm8747_vm8 = vcmp.le.f32.partialorder %v4297_v30, 0.7853982  ;;  %v4409_v26 = vshrl.u32 %v8683_v25, %v4407_v21  ;;  %v4412_v43 = vadd.s32 127, %v4411_v32 }
 0x482   :  { %vm4513_vm9 = vc.u32 %v4505_v10, %v4509_v4  ;;  %v4515_v29 = vadd.s32 %v4509_v4, %v4505_v10  ;;  %v4527_v9 = vmul.u32 %v4525_v16, %v4501_v48  ;;  %v4530_v56 = vmul.u32 %v4526_v14, %v4502_v41 }
 0x483   :  { %v4514_v63 = vsel %vm4513_vm9, 1, %v5462_v54  ;;  %v4531_v11 = vshll.u32 %v4528_v33, 16  ;;  %v4410_v18 = vor.u32 %v4409_v26, %v4408_v19  ;;  %v4413_v27 = vshll.u32 %v4412_v43, 23 }
 0x484   :  { %v4516_v58 = vadd.s32 %v4514_v63, %v4508_v60  ;;  %vm4517_vm10 = vc.u32 %v4515_v29, %v4511_v62  ;;  %v4533_v30 = vshll.u32 %v4529_v38, 16  ;;  %v4510_v50 = vshrl.u32 %v4506_v37, 16 }
 0x485   :  { %v4518_v5 = vsel %vm4517_vm10, 1, %v5462_v54  ;;  %vm4535_vm12 = vc.u32 %v4527_v9, %v4531_v11  ;;  %v4537_v40 = vadd.s32 %v4531_v11, %v4527_v9  ;;  %v4414_v61 = vor.u32 4788187, %v4413_v27 }
 0x486   :  { %v4520_v25 = vadd.s32 %v4518_v5, %v4516_v58  ;;  %v4536_v8 = vsel %vm4535_vm12, 1, %v5462_v54  ;;  %v4417_v52 = vcvt.s32.f32 %v4410_v18  ;;  %v4512_v46 = vshrl.u32 %v4507_v15, 16 }
 0x487   :  { %v4538_v39 = vadd.s32 %v4536_v8, %v4530_v56  ;;  %vm4539_vm11 = vc.u32 %v4537_v40, %v4533_v30  ;;  %v4415_v48 = vand.u32 2147483647, %v4414_v61  ;;  %v5394_v0 = vadd.s32 4294967169, %v4611_v22 }
 0x488   :  { %v4521_v41 = vadd.s32 %v4520_v25, %v4510_v50  ;;  %v4540_v31 = vsel %vm4539_vm11, 1, %v5462_v54  ;;  %v4488_v7 = vsel %vm4484_vm3, %v4468_v36, %v8685_v49  ;;  %v4532_v3 = vshrl.u32 %v4528_v33, 16 }
 0x489   :  { %v4542_v47 = vadd.s32 %v4540_v31, %v4538_v39  ;;  %v4607_v12 = vand.u32 2147483647, %v8660_v6  ;;  %v4418_v16 = vmul.f32 %v4417_v52, %v4415_v48  ;;  %v4490_v14 = vsel %vm4486_vm6, %v8689_v45, %v4489_v20  ;;  %v258_v20 = vpop.f32.mrf.mxu3 }
 0x48a   :  { %v8763_v42 = vadd.s32 %v4521_v41, %v4512_v46  ;;  %v4617_v37 = vadd.s32 1, %v5394_v0  ;;  %v4424_v23 = vsel %vm8747_vm8, 0, %v4422_v28  ;;  %v4534_v22 = vshrl.u32 %v4529_v38, 16 }
 0x48b   :  { %v4543_v15 = vadd.s32 %v4542_v47, %v4532_v3  ;;  %v4419_v21 = vxor.u32 2147483648, %v4418_v16  ;;  %v8767_v32 = vadd.s32 %v4537_v40, %v4533_v30  ;;  %v4491_v49 = vsel %vm4485_vm5, %v4488_v7, %v4490_v14 }
 0x48c   :  { %vm4618_vm13 = vcmp.gt.s32.totalorder %v4617_v37, 0  ;;  %v4614_v33 = vand.u32 8388607, %v4607_v12  ;;  %v4441_v4 = vadd.s32 3, %v4424_v23  ;;  %v4545_v62 = vmul.u32 %v8694_v34, %v4491_v49 }
 0x48d   :  { %v4544_v36 = vadd.s32 %v4543_v15, %v4534_v22  ;;  %v4619_v45 = vsel %vm4618_vm13, %v4617_v37, 0  ;;  %v4420_v10 = vsel %vm4299_vm2, %v4419_v21, %v4418_v16  ;;  %vm4547_vm14 = vc.u32 %v8763_v42, %v8767_v32 }
 0x48e   :  { %v4621_v28 = vand.u32 31, %v4619_v45  ;;  %v4423_v19 = vsel %vm8747_vm8, %v8418_v44, %v4420_v10  ;;  %v8784_v26 = vadd.f32 %v8415_v17, %v258_v20  ;;  %v4615_v29 = vor.u32 8388608, %v4614_v33 }
 0x48f   :  { %v4548_v35 = vadd.s32 1, %v4544_v36  ;;  %v4425_v60 = vmul.f32 %v4423_v19, %v4423_v19  ;;  %v8786_v56 = vand.u32 3, %v4441_v4  ;;  %v8788_v18 = vshrl.u32 %v4619_v45, 5 }
 0x490   :  { %v8781_v38 = vsub.s32 32, %v4621_v28  ;;  %v4633_v30 = vshll.u32 %v5459_v57, %v4621_v28  ;;  %v4627_v61 = vshll.u32 %v5457_v53, %v4621_v28  ;;  %v4630_v50 = vshll.u32 %v5458_v55, %v4621_v28 }
 0x491   :  { %v4549_v43 = vsel %vm4547_vm14, %v4548_v35, %v4544_v36  ;;  %v4426_v63 = vmul.f32 -0.001358992, %v4425_v60  ;;  %v4433_v9 = vmul.f32 -0.00019511016, %v4425_v60  ;;  %v4624_v48 = vshll.u32 %v5456_v51, %v4621_v28 }
 0x492   :  { %v4550_v11 = vadd.s32 %v4549_v43, %v4545_v62  ;;  %v4628_v13 = vshrl.u32 %v5458_v55, %v8781_v38  ;;  %v4631_v34 = vshrl.u32 %v5459_v57, %v8781_v38  ;;  %v4634_v27 = vshrl.u32 %v5460_v59, %v8781_v38 }
 0x493   :  { %v4427_v17 = vadd.f32 0.041655596, %v4426_v63  ;;  %v4434_v58 = vadd.f32 0.008332121, %v4433_v9  ;;  %v4625_v40 = vshrl.u32 %v5457_v53, %v8781_v38  ;;  %v4637_v25 = vshrl.u32 %v5461_v2, %v8781_v38 }
 0x494   :  { %v4551_v5 = vadd.s32 536870912, %v4550_v11  ;;  %v4635_v39 = vor.u32 %v4634_v27, %v4633_v30  ;;  %v8806_v41 = vor.u32 %v4628_v13, %v4627_v61  ;;  %v8808_v31 = vor.u32 %v4631_v34, %v4630_v50 }
 0x495   :  { %v4428_v8 = vmul.f32 %v4427_v17, %v4425_v60  ;;  %v4435_v52 = vmul.f32 %v4434_v58, %v4425_v60  ;;  %v4636_v0 = vshll.u32 %v5460_v59, %v4621_v28  ;;  %v8812_v16 = vshll.u32 %v4615_v29, 8 }
 0x496   :  { %v8803_v46 = vshrl.u32 %v4551_v5, 30  ;;  %vm4444_vm0 = vcmp.eq.s32.totalorder %v8786_v56, 0  ;;  %vm4447_vm1 = vcmp.eq.s32.totalorder %v8786_v56, 2  ;;  %v8816_v14 = vor.u32 %v4625_v40, %v4624_v48 }
 0x497   :  { %v4429_v7 = vadd.f32 -0.4999988, %v4428_v8  ;;  %v4436_v3 = vadd.f32 -0.16666654, %v4435_v52  ;;  %v4638_v37 = vor.u32 %v4637_v25, %v4636_v0  ;;  %vm4639_vm15 = vcmp.lt.s32.totalorder %v8788_v18, 1 }
 0x498   :  { %v4553_v47 = vshll.u32 %v8803_v46, 30  ;;  %vm4642_vm2 = vcmp.lt.s32.totalorder %v8788_v18, 4  ;;  %vm4443_vm3 = vcmp.lt.s32.totalorder %v8786_v56, 2  ;;  %vm4440_vm6 = vweird.f32 %v8418_v44 }
 0x499   :  { %v4430_v23 = vmul.f32 %v4429_v7, %v4425_v60  ;;  %v4437_v22 = vmul.f32 %v4436_v3, %v4425_v60  ;;  %v4648_v21 = vsel %vm4642_vm2, %v4635_v39, 920167782  ;;  %vm4641_vm4 = vcmp.lt.s32.totalorder %v8788_v18, 3 }
 0x49a   :  { %v8821_v15 = vsub.s32 %v4550_v11, %v4553_v47  ;;  %v4651_v49 = vsel %vm4639_vm15, %v8806_v41, %v8808_v31  ;;  %v4762_v36 = vand.u32 2147483647, %v8784_v26  ;;  %v4765_v33 = vand.u32 2139095040, %v8784_v26 }
 0x49b   :  { %v4431_v45 = vadd.f32 1.0, %v4430_v23  ;;  %v4438_v20 = vadd.f32 1.0, %v4437_v22  ;;  %vm4640_vm7 = vcmp.lt.s32.totalorder %v8788_v18, 2  ;;  %v4647_v4 = vsel %vm4639_vm15, %v8816_v14, %v8806_v41 }
 0x49c   :  { %vm4555_vm5 = vcmp.lt.s32.totalorder %v8821_v15, 0  ;;  %v4556_v10 = vsub.s32 0, %v8821_v15  ;;  %v4649_v28 = vsel %vm4641_vm4, %v8808_v31, %v4648_v21  ;;  %v4652_v35 = vsel %vm4642_vm2, %v4638_v37, 1326507024 }
 0x49d   :  { %v4439_v60 = vmul.f32 %v4438_v20, %v4423_v19  ;;  %v4448_v62 = vxor.u32 2147483648, %v4431_v45  ;;  %v4653_v29 = vsel %vm4641_vm4, %v4635_v39, %v4652_v35  ;;  %v4656_v11 = vand.u32 65535, %v8812_v16 }
 0x49e   :  { %v4557_v43 = vsel %vm4555_vm5, %v4556_v10, %v8821_v15  ;;  %v4654_v9 = vsel %vm4640_vm7, %v4651_v49, %v4653_v29  ;;  %v4657_v13 = vshrl.u32 %v8812_v16, 16  ;;  %v4650_v27 = vsel %vm4640_vm7, %v4647_v4, %v4649_v28 }
 0x49f   :  { %v4558_v63 = vclz %v4557_v43  ;;  %v4445_v34 = vxor.u32 2147483648, %v4439_v60  ;;  %v4658_v17 = vand.u32 65535, %v4654_v9  ;;  %v4659_v19 = vshrl.u32 %v4654_v9, 16 }
 0x4a0   :  { %v4546_v58 = vadd.s32 %v8767_v32, %v8763_v42  ;;  %v4623_v30 = vshrl.u32 %v5456_v51, %v8781_v38  ;;  %v4766_v40 = vshrl.u32 %v4765_v33, 23  ;;  %v4449_v50 = vsel %vm4447_vm1, %v4448_v62, %v4439_v60 }
 0x4a1   :  { %v5392_v5 = vadd.s32 4294967294, %v4558_v63  ;;  %v4446_v61 = vsel %vm4444_vm0, %v4431_v45, %v4445_v34  ;;  %v4661_v25 = vmul.u32 %v4659_v19, %v4656_v11  ;;  %v4662_v8 = vmul.u32 %v4658_v17, %v4657_v13 }
 0x4a2   :  { %v4450_v52 = vsel %vm4443_vm3, %v4446_v61, %v4449_v50  ;;  %vm4454_vm8 = vcmp.lt.s32.totalorder %v8569_v1, 0  ;;  %v4680_v42 = vand.u32 65535, %v4650_v27  ;;  %v4681_v32 = vshrl.u32 %v4650_v27, 16 }
 0x4a3   :  { %vm5393_vm9 = vcmp.lt.s32.totalorder %v5392_v5, 0  ;;  %v4451_v38 = vsel %vm4440_vm6, nan, %v4450_v52  ;;  %v4660_v48 = vmul.u32 %v4658_v17, %v4656_v11  ;;  %v4664_v0 = vshll.u32 %v4661_v25, 16 }
 0x4a4   :  { %v4561_v39 = vsel %vm5393_vm9, 0, %v5392_v5  ;;  %v4576_v47 = vsub.s32 4, %v8803_v46  ;;  %v4663_v37 = vmul.u32 %v4659_v19, %v4657_v13  ;;  %5253 = vst [vmem:[#allocation2 + $0xd0] sm:$0xff] %v4451_v38  ;;  %v4666_v23 = vshll.u32 %v4662_v8, 16 }
 0x4a5   :  { %v4562_v7 = vsub.s32 32, %v4561_v39  ;;  %v4566_v3 = vsub.s32 4294967266, %v4561_v39  ;;  %v4563_v56 = vshll.u32 %v8821_v15, %v4561_v39  ;;  %vm4668_vm10 = vc.u32 %v4660_v48, %v4664_v0 }
 0x4a6   :  { %v4670_v22 = vadd.s32 %v4664_v0, %v4660_v48  ;;  %vm8871_vm12 = vcmp.le.f32.partialorder %v4452_v24, 0.7853982  ;;  %v4669_v33 = vsel %vm4668_vm10, 1, %v5462_v54  ;;  %v4683_v45 = vmul.u32 %v4681_v32, %v4656_v11 }
 0x4a7   :  { %v4564_v44 = vshrl.u32 %v4546_v58, %v4562_v7  ;;  %v4567_v49 = vadd.s32 127, %v4566_v3  ;;  %v4671_v20 = vadd.s32 %v4669_v33, %v4663_v37  ;;  %v4682_v10 = vmul.u32 %v4680_v42, %v4656_v11 }
 0x4a8   :  { %vm4672_vm11 = vc.u32 %v4670_v22, %v4666_v23  ;;  %v4684_v4 = vmul.u32 %v4680_v42, %v4657_v13  ;;  %v4686_v60 = vshll.u32 %v4683_v45, 16  ;;  %v4644_v24 = vsel %vm4642_vm2, %v8808_v31, 2102212464 }
 0x4a9   :  { %v4565_v28 = vor.u32 %v4564_v44, %v4563_v56  ;;  %v4568_v15 = vshll.u32 %v4567_v49, 23  ;;  %v4673_v35 = vsel %vm4672_vm11, 1, %v5462_v54  ;;  %v4665_v62 = vshrl.u32 %v4661_v25, 16 }
 0x4aa   :  { %v4675_v43 = vadd.s32 %v4673_v35, %v4671_v20  ;;  %v4685_v29 = vmul.u32 %v4681_v32, %v4657_v13  ;;  %v4688_v9 = vshll.u32 %v4684_v4, 16  ;;  %vm4690_vm13 = vc.u32 %v4682_v10, %v4686_v60 }
 0x4ab   :  { %v4569_v63 = vor.u32 4788187, %v4568_v15  ;;  %v4692_v34 = vadd.s32 %v4686_v60, %v4682_v10  ;;  %v4577_v11 = vsel %vm4454_vm8, %v4576_v47, %v8803_v46  ;;  %v4691_v17 = vsel %vm4690_vm13, 1, %v5462_v54 }
 0x4ac   :  { %v4676_v27 = vadd.s32 %v4675_v43, %v4665_v62  ;;  %v5397_v19 = vadd.s32 4294967169, %v4766_v40  ;;  %v4572_v5 = vcvt.s32.f32 %v4565_v28  ;;  %v4693_v61 = vadd.s32 %v4691_v17, %v4685_v29  ;;  %v261_v62 = vpop.f32.mrf.mxu3 }
 0x4ad   :  { %v4570_v58 = vand.u32 2147483647, %v4569_v63  ;;  %vm4694_vm14 = vc.u32 %v4692_v34, %v4688_v9  ;;  %v4643_v31 = vsel %vm4639_vm15, %v4623_v30, %v8816_v14  ;;  %v4667_v13 = vshrl.u32 %v4662_v8, 16 }
 0x4ae   :  { %v4695_v50 = vsel %vm4694_vm14, 1, %v5462_v54  ;;  %v4772_v25 = vadd.s32 1, %v5397_v19  ;;  %v4645_v46 = vsel %vm4641_vm4, %v8806_v41, %v4644_v24  ;;  %v4687_v42 = vshrl.u32 %v4683_v45, 16 }
 0x4af   :  { %v4573_v52 = vmul.f32 %v4572_v5, %v4570_v58  ;;  %v4697_v32 = vadd.s32 %v4695_v50, %v4693_v61  ;;  %v4579_v40 = vsel %vm8871_vm12, 0, %v4577_v11  ;;  %v8893_v38 = vadd.s32 %v4676_v27, %v4667_v13 }
 0x4b0   :  { %vm4773_vm0 = vcmp.gt.s32.totalorder %v4772_v25, 0  ;;  %v4689_v48 = vshrl.u32 %v4684_v4, 16  ;;  %v4646_v8 = vsel %vm4640_vm7, %v4643_v31, %v4645_v46  ;;  %v8897_v0 = vadd.s32 %v4692_v34, %v4688_v9  ;;  %v8941_v31 = vld [vmem:[%s9265_s2] ss:$0 sm:$0xff]  ;;  %s5463_s2 = smov [#allocation2]  }
 0x4b1   :  { %v4574_v39 = vxor.u32 2147483648, %v4573_v52  ;;  %v4698_v14 = vadd.s32 %v4697_v32, %v4687_v42  ;;  %v4774_v30 = vsel %vm4773_vm0, %v4772_v25, 0  ;;  %v4769_v47 = vand.u32 8388607, %v4762_v36  ;;  %s5263_s11 = sshll.u32 %s5463_s2, 4  ;;  %s5264_s11 = int_to_ptr.vmem [resolvable:$true] %s5263_s11 }
 0x4b2   :  { %v4776_v7 = vand.u32 31, %v4774_v30  ;;  %v4596_v56 = vadd.s32 3, %v4579_v40  ;;  %vm4702_vm1 = vc.u32 %v8893_v38, %v8897_v0  ;;  %v4700_v22 = vmul.u32 %v8812_v16, %v4646_v8 }
 0x4b3   :  { %v4575_v41 = vsel %vm4454_vm8, %v4574_v39, %v4573_v52  ;;  %v4699_v3 = vadd.s32 %v4698_v14, %v4689_v48  ;;  %v8925_v35 = vshrl.u32 %v4774_v30, 5  ;;  %v8944_v13 = vadd.f32 %v8941_v31, %v261_v62 }
 0x4b4   :  { %v8906_v37 = vsel %vm8871_vm12, %v8569_v1, %v4575_v41  ;;  %v8910_v18 = vsub.s32 32, %v4776_v7  ;;  %v4779_v49 = vshll.u32 %v5456_v51, %v4776_v7  ;;  %v4782_v21 = vshll.u32 %v5457_v53, %v4776_v7 }
 0x4b5   :  { %v4580_v23 = vmul.f32 %v8906_v37, %v8906_v37  ;;  %v4703_v44 = vadd.s32 1, %v4699_v3  ;;  %v4785_v60 = vshll.u32 %v5458_v55, %v4776_v7  ;;  %v4788_v24 = vshll.u32 %v5459_v57, %v4776_v7 }
 0x4b6   :  { %v4780_v33 = vshrl.u32 %v5457_v53, %v8910_v18  ;;  %v4783_v45 = vshrl.u32 %v5458_v55, %v8910_v18  ;;  %v4786_v20 = vshrl.u32 %v5459_v57, %v8910_v18  ;;  %v4789_v16 = vshrl.u32 %v5460_v59, %v8910_v18 }
 0x4b7   :  { %v4581_v10 = vmul.f32 -0.001358992, %v4580_v23  ;;  %v4588_v4 = vmul.f32 -0.00019511016, %v4580_v23  ;;  %v4704_v28 = vsel %vm4702_vm1, %v4703_v44, %v4699_v3  ;;  %v4791_v27 = vshll.u32 %v5460_v59, %v4776_v7 }
 0x4b8   :  { %v4705_v15 = vadd.s32 %v4704_v28, %v4700_v22  ;;  %v8929_v63 = vor.u32 %v4780_v33, %v4779_v49  ;;  %v8931_v9 = vor.u32 %v4783_v45, %v4782_v21  ;;  %v4790_v11 = vor.u32 %v4789_v16, %v4788_v24 }
 0x4b9   :  { %v4582_v43 = vadd.f32 0.041655596, %v4581_v10  ;;  %v4589_v29 = vadd.f32 0.008332121, %v4588_v4  ;;  %v4792_v17 = vshrl.u32 %v5461_v2, %v8910_v18  ;;  %v4597_v5 = vand.u32 3, %v4596_v56 }
 0x4ba   :  { %v4706_v34 = vadd.s32 536870912, %v4705_v15  ;;  %v8936_v61 = vor.u32 %v4786_v20, %v4785_v60  ;;  %v4770_v25 = vor.u32 8388608, %v4769_v47  ;;  %vm4794_vm15 = vcmp.lt.s32.totalorder %v8925_v35, 1 }
 0x4bb   :  { %v4583_v19 = vmul.f32 %v4582_v43, %v4580_v23  ;;  %v4590_v58 = vmul.f32 %v4589_v29, %v4580_v23  ;;  %v4793_v52 = vor.u32 %v4792_v17, %v4791_v27  ;;  %vm4797_vm2 = vcmp.lt.s32.totalorder %v8925_v35, 4 }
 0x4bc   :  { %v8946_v50 = vshrl.u32 %v4706_v34, 30  ;;  %vm4796_vm3 = vcmp.lt.s32.totalorder %v8925_v35, 3  ;;  %v4802_v40 = vsel %vm4794_vm15, %v8929_v63, %v8931_v9  ;;  %v4803_v39 = vsel %vm4797_vm2, %v4790_v11, 920167782 }
 0x4bd   :  { %v4584_v46 = vadd.f32 -0.4999988, %v4583_v19  ;;  %v4591_v42 = vadd.f32 -0.16666654, %v4590_v58  ;;  %vm4598_vm6 = vcmp.lt.s32.totalorder %v4597_v5, 2  ;;  %v4804_v30 = vsel %vm4796_vm3, %v8936_v61, %v4803_v39 }
 0x4be   :  { %v4708_v32 = vshll.u32 %v8946_v50, 30  ;;  %v4806_v8 = vsel %vm4794_vm15, %v8931_v9, %v8936_v61  ;;  %vm4595_vm4 = vweird.f32 %v8569_v1  ;;  %vm4599_vm5 = vcmp.eq.s32.totalorder %v4597_v5, 0 }
 0x4bf   :  { %v4585_v48 = vmul.f32 %v4584_v46, %v4580_v23  ;;  %v4592_v14 = vmul.f32 %v4591_v42, %v4580_v23  ;;  %v4807_v41 = vsel %vm4797_vm2, %v4793_v52, 1326507024  ;;  %v8970_v3 = vshll.u32 %v4770_v25, 8 }
 0x4c0   :  { %v8966_v7 = vsub.s32 %v4705_v15, %v4708_v32  ;;  %vm4795_vm7 = vcmp.lt.s32.totalorder %v8925_v35, 2  ;;  %v4808_v23 = vsel %vm4796_vm3, %v4790_v11, %v4807_v41  ;;  %vm4602_vm9 = vcmp.eq.s32.totalorder %v4597_v5, 2 }
 0x4c1   :  { %v4586_v47 = vadd.f32 1.0, %v4585_v48  ;;  %v4593_v56 = vadd.f32 1.0, %v4592_v14  ;;  %v4805_v44 = vsel %vm4795_vm7, %v4802_v40, %v4804_v30  ;;  %v4809_v49 = vsel %vm4795_vm7, %v4806_v8, %v4808_v23 }
 0x4c2   :  { %vm4710_vm8 = vcmp.lt.s32.totalorder %v8966_v7, 0  ;;  %v4711_v22 = vsub.s32 0, %v8966_v7  ;;  %v4813_v45 = vand.u32 65535, %v4809_v49  ;;  %v4814_v20 = vshrl.u32 %v4809_v49, 16 }
 0x4c3   :  { %v4594_v33 = vmul.f32 %v4593_v56, %v8906_v37  ;;  %v4603_v21 = vxor.u32 2147483648, %v4586_v47  ;;  %v4811_v4 = vand.u32 65535, %v8970_v3  ;;  %v4917_v28 = vand.u32 2147483647, %v8944_v13 }
 0x4c4   :  { %v4712_v10 = vsel %vm4710_vm8, %v4711_v22, %v8966_v7  ;;  %v4701_v15 = vadd.s32 %v8897_v0, %v8893_v38  ;;  %v4812_v24 = vshrl.u32 %v8970_v3, 16  ;;  %v4835_v43 = vand.u32 65535, %v4805_v44 }
 0x4c5   :  { %v4600_v16 = vxor.u32 2147483648, %v4594_v33  ;;  %v4713_v60 = vclz %v4712_v10  ;;  %v4816_v62 = vmul.u32 %v4814_v20, %v4811_v4  ;;  %v4836_v37 = vshrl.u32 %v4805_v44, 16 }
 0x4c6   :  { %v4920_v29 = vand.u32 2139095040, %v8944_v13  ;;  %v4604_v11 = vsel %vm4602_vm9, %v4603_v21, %v4594_v33  ;;  %v4817_v17 = vmul.u32 %v4813_v45, %v4812_v24  ;;  %v4731_v58 = vsub.s32 4, %v8946_v50 }
 0x4c7   :  { %v4601_v34 = vsel %vm4599_vm5, %v4586_v47, %v4600_v16  ;;  %v5395_v27 = vadd.s32 4294967294, %v4713_v60  ;;  %v4815_v25 = vmul.u32 %v4813_v45, %v4811_v4  ;;  %v4819_v52 = vshll.u32 %v4816_v62, 16 }
 0x4c8   :  { %v4605_v19 = vsel %vm4598_vm6, %v4601_v34, %v4604_v11  ;;  %vm4609_vm10 = vcmp.lt.s32.totalorder %v8660_v6, 0  ;;  %v4818_v0 = vmul.u32 %v4814_v20, %v4812_v24  ;;  %v4821_v46 = vshll.u32 %v4817_v17, 16 }
 0x4c9   :  { %v4606_v38 = vsel %vm4595_vm4, nan, %v4605_v19  ;;  %vm5396_vm12 = vcmp.lt.s32.totalorder %v5395_v27, 0  ;;  %vm4823_vm11 = vc.u32 %v4815_v25, %v4819_v52  ;;  %v4825_v32 = vadd.s32 %v4819_v52, %v4815_v25 }
 0x4ca   :  { %v4716_v42 = vsel %vm5396_vm12, 0, %v5395_v27  ;;  %v4838_v40 = vmul.u32 %v4836_v37, %v4811_v4  ;;  %5254 = vst [vmem:[#allocation2 + $0xd8] sm:$0xff] %v4606_v38  ;;  %v4824_v48 = vsel %vm4823_vm11, 1, %v5462_v54  ;;  %v4837_v14 = vmul.u32 %v4835_v43, %v4811_v4 }
 0x4cb   :  { %v4717_v39 = vsub.s32 32, %v4716_v42  ;;  %v4721_v5 = vsub.s32 4294967266, %v4716_v42  ;;  %vm8998_vm13 = vcmp.le.f32.partialorder %v4607_v12, 0.7853982  ;;  %v4718_v30 = vshll.u32 %v8966_v7, %v4716_v42 }
 0x4cc   :  { %v4826_v8 = vadd.s32 %v4824_v48, %v4818_v0  ;;  %vm4827_vm14 = vc.u32 %v4825_v32, %v4821_v46  ;;  %v4839_v41 = vmul.u32 %v4835_v43, %v4812_v24  ;;  %v4841_v22 = vshll.u32 %v4838_v40, 16 }
 0x4cd   :  { %v4719_v47 = vshrl.u32 %v4701_v15, %v4717_v39  ;;  %v4722_v56 = vadd.s32 127, %v4721_v5  ;;  %v4828_v23 = vsel %vm4827_vm14, 1, %v5462_v54  ;;  %v4820_v44 = vshrl.u32 %v4816_v62, 16 }
 0x4ce   :  { %v4830_v49 = vadd.s32 %v4828_v23, %v4826_v8  ;;  %v4840_v33 = vmul.u32 %v4836_v37, %v4812_v24  ;;  %v4843_v21 = vshll.u32 %v4839_v41, 16  ;;  %vm4845_vm0 = vc.u32 %v4837_v14, %v4841_v22 }
 0x4cf   :  { %v4720_v45 = vor.u32 %v4719_v47, %v4718_v30  ;;  %v4723_v20 = vshll.u32 %v4722_v56, 23  ;;  %v4847_v12 = vadd.s32 %v4841_v22, %v4837_v14  ;;  %v4778_v10 = vshrl.u32 %v5456_v51, %v8910_v18 }
 0x4d0   :  { %v4831_v7 = vadd.s32 %v4830_v49, %v4820_v44  ;;  %v4846_v4 = vsel %vm4845_vm0, 1, %v5462_v54  ;;  %v4921_v16 = vshrl.u32 %v4920_v29, 23  ;;  %v4799_v60 = vsel %vm4797_vm2, %v8936_v61, 2102212464 }
 0x4d1   :  { %v4724_v15 = vor.u32 4788187, %v4723_v20  ;;  %v4848_v62 = vadd.s32 %v4846_v4, %v4840_v33  ;;  %vm4849_vm1 = vc.u32 %v4847_v12, %v4843_v21  ;;  %v4732_v24 = vsel %vm4609_vm10, %v4731_v58, %v8946_v50 }
 0x4d2   :  { %v4822_v43 = vshrl.u32 %v4817_v17, 16  ;;  %v4850_v37 = vsel %vm4849_vm1, 1, %v5462_v54  ;;  %v5400_v34 = vadd.s32 4294967169, %v4921_v16  ;;  %v4727_v11 = vcvt.s32.f32 %v4720_v45 }
 0x4d3   :  { %v4725_v18 = vand.u32 2147483647, %v4724_v15  ;;  %v4842_v27 = vshrl.u32 %v4838_v40, 16  ;;  %v4852_v19 = vadd.s32 %v4850_v37, %v4848_v62  ;;  %v4798_v29 = vsel %vm4794_vm15, %v4778_v10, %v8929_v63 }
 0x4d4   :  { %v4800_v61 = vsel %vm4796_vm3, %v8931_v9, %v4799_v60  ;;  %v9020_v25 = vadd.s32 %v4831_v7, %v4822_v43  ;;  %v4927_v52 = vadd.s32 1, %v5400_v34  ;;  %v4734_v17 = vsel %vm8998_vm13, 0, %v4732_v24 }
 0x4d5   :  { %v4728_v50 = vmul.f32 %v4727_v11, %v4725_v18  ;;  %v4844_v58 = vshrl.u32 %v4839_v41, 16  ;;  %v4853_v38 = vadd.s32 %v4852_v19, %v4842_v27  ;;  %v9024_v0 = vadd.s32 %v4847_v12, %v4843_v21  ;;  %v264_v12 = vpop.f32.mrf.mxu3 }
 0x4d6   :  { %vm4928_vm2 = vcmp.gt.s32.totalorder %v4927_v52, 0  ;;  %v4801_v63 = vsel %vm4795_vm7, %v4798_v29, %v4800_v61  ;;  %v4751_v40 = vadd.s32 3, %v4734_v17  ;;  %v4924_v9 = vand.u32 8388607, %v4917_v28 }
 0x4d7   :  { %v4729_v46 = vxor.u32 2147483648, %v4728_v50  ;;  %v4854_v42 = vadd.s32 %v4853_v38, %v4844_v58  ;;  %v4929_v32 = vsel %vm4928_vm2, %v4927_v52, 0  ;;  %vm4857_vm15 = vc.u32 %v9020_v25, %v9024_v0 }
 0x4d8   :  { %v4931_v39 = vand.u32 31, %v4929_v32  ;;  %v4855_v35 = vmul.u32 %v8970_v3, %v4801_v63  ;;  %v9040_v47 = vand.u32 3, %v4751_v40  ;;  %v4925_v23 = vor.u32 8388608, %v4924_v9 }
 0x4d9   :  { %v4730_v5 = vsel %vm4609_vm10, %v4729_v46, %v4728_v50  ;;  %v4858_v48 = vadd.s32 1, %v4854_v42  ;;  %v9048_v21 = vshrl.u32 %v4929_v32, 5  ;;  %v9065_v11 = vadd.f32 %v8941_v31, %v264_v12 }
 0x4da   :  { %v4733_v14 = vsel %vm8998_vm13, %v8660_v6, %v4730_v5  ;;  %v9038_v30 = vsub.s32 32, %v4931_v39  ;;  %v4943_v20 = vshll.u32 %v5459_v57, %v4931_v39  ;;  %v4934_v4 = vshll.u32 %v5456_v51, %v4931_v39 }
 0x4db   :  { %v4735_v8 = vmul.f32 %v4733_v14, %v4733_v14  ;;  %v4859_v41 = vsel %vm4857_vm15, %v4858_v48, %v4854_v42  ;;  %v4937_v16 = vshll.u32 %v5457_v53, %v4931_v39  ;;  %v4940_v60 = vshll.u32 %v5458_v55, %v4931_v39 }
 0x4dc   :  { %v4860_v56 = vadd.s32 %v4859_v41, %v4855_v35  ;;  %v4935_v22 = vshrl.u32 %v5457_v53, %v9038_v30  ;;  %v4938_v33 = vshrl.u32 %v5458_v55, %v9038_v30  ;;  %v4944_v1 = vshrl.u32 %v5460_v59, %v9038_v30 }
 0x4dd   :  { %v4736_v44 = vmul.f32 -0.001358992, %v4735_v8  ;;  %v4743_v49 = vmul.f32 -0.00019511016, %v4735_v8  ;;  %v4941_v45 = vshrl.u32 %v5459_v57, %v9038_v30  ;;  %v4947_v24 = vshrl.u32 %v5461_v2, %v9038_v30 }
 0x4de   :  { %v4861_v3 = vadd.s32 536870912, %v4860_v56  ;;  %v4945_v62 = vor.u32 %v4944_v1, %v4943_v20  ;;  %v9060_v34 = vor.u32 %v4935_v22, %v4934_v4  ;;  %v9062_v18 = vor.u32 %v4938_v33, %v4937_v16 }
 0x4df   :  { %v4737_v10 = vadd.f32 0.041655596, %v4736_v44  ;;  %v4744_v7 = vadd.f32 0.008332121, %v4743_v49  ;;  %v4942_v19 = vor.u32 %v4941_v45, %v4940_v60  ;;  %v4946_v29 = vshll.u32 %v5460_v59, %v4931_v39 }
 0x4e0   :  { %v9055_v15 = vshrl.u32 %v4861_v3, 30  ;;  %vm4952_vm3 = vcmp.lt.s32.totalorder %v9048_v21, 4  ;;  %v9070_v50 = vshll.u32 %v4925_v23, 8  ;;  %vm4754_vm6 = vcmp.eq.s32.totalorder %v9040_v47, 0 }
 0x4e1   :  { %v4738_v43 = vmul.f32 %v4737_v10, %v4735_v8  ;;  %v4745_v37 = vmul.f32 %v4744_v7, %v4735_v8  ;;  %v4948_v58 = vor.u32 %v4947_v24, %v4946_v29  ;;  %vm4949_vm4 = vcmp.lt.s32.totalorder %v9048_v21, 1 }
 0x4e2   :  { %v4863_v27 = vshll.u32 %v9055_v15, 30  ;;  %v4958_v31 = vsel %vm4952_vm3, %v4945_v62, 920167782  ;;  %vm4753_vm5 = vcmp.lt.s32.totalorder %v9040_v47, 2  ;;  %vm4951_vm7 = vcmp.lt.s32.totalorder %v9048_v21, 3 }
 0x4e3   :  { %v4739_v61 = vadd.f32 -0.4999988, %v4738_v43  ;;  %v4746_v52 = vadd.f32 -0.16666654, %v4745_v37  ;;  %v4957_v63 = vsel %vm4949_vm4, %v9060_v34, %v9062_v18  ;;  %vm4750_vm8 = vweird.f32 %v8660_v6 }
 0x4e4   :  { %v9073_v17 = vsub.s32 %v4860_v56, %v4863_v27  ;;  %v4959_v32 = vsel %vm4951_vm7, %v4942_v19, %v4958_v31  ;;  %v5075_v40 = vand.u32 2139095040, %v9065_v11  ;;  %vm4950_vm10 = vcmp.lt.s32.totalorder %v9048_v21, 2 }
 0x4e5   :  { %v4740_v38 = vmul.f32 %v4739_v61, %v4735_v8  ;;  %v4747_v46 = vmul.f32 %v4746_v52, %v4735_v8  ;;  %v4961_v5 = vsel %vm4949_vm4, %v9062_v18, %v4942_v19  ;;  %vm4757_vm12 = vcmp.eq.s32.totalorder %v9040_v47, 2 }
 0x4e6   :  { %vm4865_vm9 = vcmp.lt.s32.totalorder %v9073_v17, 0  ;;  %v4866_v42 = vsub.s32 0, %v9073_v17  ;;  %v4960_v35 = vsel %vm4950_vm10, %v4957_v63, %v4959_v32  ;;  %v4962_v8 = vsel %vm4952_vm3, %v4948_v58, 1326507024 }
 0x4e7   :  { %v4741_v9 = vadd.f32 1.0, %v4740_v38  ;;  %v4748_v39 = vadd.f32 1.0, %v4747_v46  ;;  %v4963_v22 = vsel %vm4951_vm7, %v4945_v62, %v4962_v8  ;;  %v4856_v44 = vadd.s32 %v9024_v0, %v9020_v25 }
 0x4e8   :  { %v4867_v48 = vsel %vm4865_vm9, %v4866_v42, %v9073_v17  ;;  %v4964_v49 = vsel %vm4950_vm10, %v4961_v5, %v4963_v22  ;;  %v4966_v33 = vand.u32 65535, %v9070_v50  ;;  %v4967_v1 = vshrl.u32 %v9070_v50, 16 }
 0x4e9   :  { %v4749_v41 = vmul.f32 %v4748_v39, %v4733_v14  ;;  %v4758_v56 = vxor.u32 2147483648, %v4741_v9  ;;  %v4868_v23 = vclz %v4867_v48  ;;  %v4968_v20 = vand.u32 65535, %v4964_v49 }
 0x4ea   :  { %v5076_v12 = vshrl.u32 %v5075_v40, 23  ;;  %v4886_v14 = vsub.s32 4, %v9055_v15  ;;  %v4933_v10 = vshrl.u32 %v5456_v51, %v9038_v30  ;;  %v4969_v7 = vshrl.u32 %v4964_v49, 16 }
 0x4eb   :  { %v4755_v3 = vxor.u32 2147483648, %v4749_v41  ;;  %v5398_v45 = vadd.s32 4294967294, %v4868_v23  ;;  %v4990_v4 = vand.u32 65535, %v4960_v35  ;;  %v4759_v0 = vsel %vm4757_vm12, %v4758_v56, %v4749_v41 }
 0x4ec   :  { %v4991_v16 = vshrl.u32 %v4960_v35, 16  ;;  %v4971_v24 = vmul.u32 %v4969_v7, %v4966_v33  ;;  %v4972_v43 = vmul.u32 %v4968_v20, %v4967_v1  ;;  %v4954_v29 = vsel %vm4952_vm3, %v4942_v19, 2102212464 }
 0x4ed   :  { %v4756_v25 = vsel %vm4754_vm6, %v4741_v9, %v4755_v3  ;;  %vm5399_vm11 = vcmp.lt.s32.totalorder %v5398_v45, 0  ;;  %v4970_v61 = vmul.u32 %v4968_v20, %v4966_v33  ;;  %v4992_v58 = vmul.u32 %v4990_v4, %v4966_v33 }
 0x4ee   :  { %v4760_v60 = vsel %vm4753_vm5, %v4756_v25, %v4759_v0  ;;  %v4871_v62 = vsel %vm5399_vm11, 0, %v5398_v45  ;;  %v4974_v52 = vshll.u32 %v4971_v24, 16  ;;  %v4994_v31 = vmul.u32 %v4990_v4, %v4967_v1 }
 0x4ef   :  { %v4761_v37 = vsel %vm4750_vm8, nan, %v4760_v60  ;;  %v4872_v30 = vsub.s32 32, %v4871_v62  ;;  %v4876_v27 = vsub.s32 4294967266, %v4871_v62  ;;  %vm4764_vm13 = vcmp.lt.s32.totalorder %v8784_v26, 0 }
 0x4f0   :  { %5255 = vst [vmem:[#allocation2 + $0xe0] sm:$0xff] %v4761_v37  ;;  %v4873_v47 = vshll.u32 %v9073_v17, %v4871_v62  ;;  %v4993_v63 = vmul.u32 %v4991_v16, %v4966_v33  ;;  %v4973_v42 = vmul.u32 %v4969_v7, %v4967_v1  ;;  %v4976_v6 = vshll.u32 %v4972_v43, 16 }
 0x4f1   :  { %v4874_v38 = vshrl.u32 %v4856_v44, %v4872_v30  ;;  %v4877_v46 = vadd.s32 127, %v4876_v27  ;;  %vm4978_vm14 = vc.u32 %v4970_v61, %v4974_v52  ;;  %v4980_v32 = vadd.s32 %v4974_v52, %v4970_v61 }
 0x4f2   :  { %v4979_v19 = vsel %vm4978_vm14, 1, %v5462_v54  ;;  %v4996_v39 = vshll.u32 %v4993_v63, 16  ;;  %v4975_v5 = vshrl.u32 %v4971_v24, 16  ;;  %v4995_v35 = vmul.u32 %v4991_v16, %v4967_v1 }
 0x4f3   :  { %v4875_v40 = vor.u32 %v4874_v38, %v4873_v47  ;;  %v4878_v9 = vshll.u32 %v4877_v46, 23  ;;  %v4981_v48 = vadd.s32 %v4979_v19, %v4973_v42  ;;  %vm4982_vm0 = vc.u32 %v4980_v32, %v4976_v6 }
 0x4f4   :  { %v4983_v41 = vsel %vm4982_vm0, 1, %v5462_v54  ;;  %v4998_v17 = vshll.u32 %v4994_v31, 16  ;;  %vm5000_vm1 = vc.u32 %v4992_v58, %v4996_v39  ;;  %v5002_v22 = vadd.s32 %v4996_v39, %v4992_v58 }
 0x4f5   :  { %v4879_v8 = vor.u32 4788187, %v4878_v9  ;;  %v4985_v56 = vadd.s32 %v4983_v41, %v4981_v48  ;;  %v5001_v23 = vsel %vm5000_vm1, 1, %v5462_v54  ;;  %v5403_v44 = vadd.s32 4294967169, %v5076_v12 }
 0x4f6   :  { %v4882_v33 = vcvt.s32.f32 %v4875_v40  ;;  %v4953_v3 = vsel %vm4949_vm4, %v4933_v10, %v9060_v34  ;;  %v5003_v45 = vadd.s32 %v5001_v23, %v4995_v35  ;;  %v4955_v1 = vsel %vm4951_vm7, %v9062_v18, %v4954_v29 }
 0x4f7   :  { %v4880_v49 = vand.u32 2147483647, %v4879_v8  ;;  %v4986_v20 = vadd.s32 %v4985_v56, %v4975_v5  ;;  %vm5004_vm2 = vc.u32 %v5002_v22, %v4998_v17  ;;  %v5082_v7 = vadd.s32 1, %v5403_v44 }
 0x4f8   :  { %v4977_v25 = vshrl.u32 %v4972_v43, 16  ;;  %v5005_v0 = vsel %vm5004_vm2, 1, %v5462_v54  ;;  %v5072_v12 = vand.u32 2147483647, %v9065_v11  ;;  %v4887_v16 = vsel %vm4764_vm13, %v4886_v14, %v9055_v15 }
 0x4f9   :  { %v4883_v4 = vmul.f32 %v4882_v33, %v4880_v49  ;;  %v4997_v60 = vshrl.u32 %v4993_v63, 16  ;;  %v5007_v34 = vadd.s32 %v5005_v0, %v5003_v45  ;;  %vm5083_vm15 = vcmp.gt.s32.totalorder %v5082_v7, 0 }
 0x4fa   :  { %v4956_v18 = vsel %vm4950_vm10, %v4953_v3, %v4955_v1  ;;  %v9139_v62 = vadd.s32 %v4986_v20, %v4977_v25  ;;  %v5084_v24 = vsel %vm5083_vm15, %v5082_v7, 0  ;;  %vm9143_vm3 = vcmp.le.f32.partialorder %v4762_v36, 0.7853982 }
 0x4fb   :  { %v4884_v10 = vxor.u32 2147483648, %v4883_v4  ;;  %v4999_v37 = vshrl.u32 %v4994_v31, 16  ;;  %v5008_v30 = vadd.s32 %v5007_v34, %v4997_v60  ;;  %v9149_v14 = vadd.s32 %v5002_v22, %v4998_v17 }
 0x4fc   :  { %v5079_v21 = vand.u32 8388607, %v5072_v12  ;;  %v5086_v27 = vand.u32 31, %v5084_v24  ;;  %v4889_v36 = vsel %vm9143_vm3, 0, %v4887_v16  ;;  %v5010_v52 = vmul.u32 %v9070_v50, %v4956_v18 }
 0x4fd   :  { %v4885_v15 = vsel %vm4764_vm13, %v4884_v10, %v4883_v4  ;;  %v5009_v61 = vadd.s32 %v5008_v30, %v4999_v37  ;;  %vm5012_vm6 = vc.u32 %v9139_v62, %v9149_v14  ;;  %v9161_v31 = vshrl.u32 %v5084_v24, 5 }
 0x4fe   :  { %v4888_v29 = vsel %vm9143_vm3, %v8784_v26, %v4885_v15  ;;  %v9163_v47 = vsub.s32 32, %v5086_v27  ;;  %v5089_v46 = vshll.u32 %v5456_v51, %v5086_v27  ;;  %v5092_v63 = vshll.u32 %v5457_v53, %v5086_v27 }
 0x4ff   :  { %v4890_v58 = vmul.f32 %v4888_v29, %v4888_v29  ;;  %v5013_v38 = vadd.s32 1, %v5009_v61  ;;  %v5095_v42 = vshll.u32 %v5458_v55, %v5086_v27  ;;  %v5098_v40 = vshll.u32 %v5459_v57, %v5086_v27 }
 0x500   :  { %v5090_v50 = vshrl.u32 %v5457_v53, %v9163_v47  ;;  %v5093_v19 = vshrl.u32 %v5458_v55, %v9163_v47  ;;  %v5096_v39 = vshrl.u32 %v5459_v57, %v9163_v47  ;;  %v5099_v5 = vshrl.u32 %v5460_v59, %v9163_v47 }
 0x501   :  { %v4891_v6 = vmul.f32 -0.001358992, %v4890_v58  ;;  %v4898_v32 = vmul.f32 -0.00019511016, %v4890_v58  ;;  %v5014_v9 = vsel %vm5012_vm6, %v5013_v38, %v5009_v61  ;;  %v5101_v41 = vshll.u32 %v5460_v59, %v5086_v27 }
 0x502   :  { %v5015_v8 = vadd.s32 %v5014_v9, %v5010_v52  ;;  %v9178_v17 = vor.u32 %v5090_v50, %v5089_v46  ;;  %v9180_v53 = vor.u32 %v5093_v19, %v5092_v63  ;;  %v5100_v56 = vor.u32 %v5099_v5, %v5098_v40 }
 0x503   :  { %v4892_v48 = vadd.f32 0.041655596, %v4891_v6  ;;  %v4899_v35 = vadd.f32 0.008332121, %v4898_v32  ;;  %v5102_v23 = vshrl.u32 %v5461_v2, %v9163_v47  ;;  %v9184_v57 = vor.u32 %v5096_v39, %v5095_v42 }
 0x504   :  { %v5016_v44 = vadd.s32 536870912, %v5015_v8  ;;  %v4906_v49 = vadd.s32 3, %v4889_v36  ;;  %v5080_v33 = vor.u32 8388608, %v5079_v21  ;;  %vm5104_vm4 = vcmp.lt.s32.totalorder %v9161_v31, 1 }
 0x505   :  { %v4893_v55 = vmul.f32 %v4892_v48, %v4890_v58  ;;  %v4900_v22 = vmul.f32 %v4899_v35, %v4890_v58  ;;  %v5103_v3 = vor.u32 %v5102_v23, %v5101_v41  ;;  %vm5107_vm5 = vcmp.lt.s32.totalorder %v9161_v31, 4 }
 0x506   :  { %v9187_v1 = vshrl.u32 %v5016_v44, 30  ;;  %vm5106_vm7 = vcmp.lt.s32.totalorder %v9161_v31, 3  ;;  %v5112_v2 = vsel %vm5104_vm4, %v9178_v17, %v9180_v53  ;;  %v5113_v20 = vsel %vm5107_vm5, %v5100_v56, 920167782 }
 0x507   :  { %v4894_v45 = vadd.f32 -0.4999988, %v4893_v55  ;;  %v4901_v59 = vadd.f32 -0.16666654, %v4900_v22  ;;  %v5117_v7 = vsel %vm5107_vm5, %v5103_v3, 1326507024  ;;  %v5116_v16 = vsel %vm5104_vm4, %v9180_v53, %v9184_v57 }
 0x508   :  { %v5018_v0 = vshll.u32 %v9187_v1, 30  ;;  %v4907_v60 = vand.u32 3, %v4906_v49  ;;  %v5114_v34 = vsel %vm5106_vm7, %v9184_v57, %v5113_v20  ;;  %v5118_v10 = vsel %vm5106_vm7, %v5100_v56, %v5117_v7 }
 0x509   :  { %v4895_v4 = vmul.f32 %v4894_v45, %v4890_v58  ;;  %v4902_v25 = vmul.f32 %v4901_v59, %v4890_v58  ;;  %v9209_v18 = vshll.u32 %v5080_v33, 8  ;;  %vm5105_vm8 = vcmp.lt.s32.totalorder %v9161_v31, 2 }
 0x50a   :  { %v5019_v37 = vsub.s32 %v5015_v8, %v5018_v0  ;;  %v5115_v30 = vsel %vm5105_vm8, %v5112_v2, %v5114_v34  ;;  %v5119_v15 = vsel %vm5105_vm8, %v5116_v16, %v5118_v10  ;;  %vm4908_vm10 = vcmp.lt.s32.totalorder %v4907_v60, 2 }
 0x50b   :  { %v4896_v24 = vadd.f32 1.0, %v4895_v4  ;;  %v4903_v43 = vadd.f32 1.0, %v4902_v25  ;;  %v5121_v61 = vand.u32 65535, %v9209_v18  ;;  %v5123_v52 = vand.u32 65535, %v5119_v15 }
 0x50c   :  { %vm5020_vm9 = vcmp.lt.s32.totalorder %v5019_v37, 0  ;;  %v5021_v36 = vsub.s32 0, %v5019_v37  ;;  %v5124_v58 = vshrl.u32 %v5119_v15, 16  ;;  %vm4909_vm12 = vcmp.eq.s32.totalorder %v4907_v60, 0 }
 0x50d   :  { %v4904_v21 = vmul.f32 %v4903_v43, %v4888_v29  ;;  %v4913_v27 = vxor.u32 2147483648, %v4896_v24  ;;  %v5122_v63 = vshrl.u32 %v9209_v18, 16  ;;  %vm4912_vm11 = vcmp.eq.s32.totalorder %v4907_v60, 2 }
 0x50e   :  { %v5022_v46 = vsel %vm5020_vm9, %v5021_v36, %v5019_v37  ;;  %v5126_v6 = vmul.u32 %v5124_v58, %v5121_v61  ;;  %v5146_v32 = vshrl.u32 %v5115_v30, 16  ;;  %v5145_v9 = vand.u32 65535, %v5115_v30 }
 0x50f   :  { %v4910_v38 = vxor.u32 2147483648, %v4904_v21  ;;  %v5023_v42 = vclz %v5022_v46  ;;  %v4914_v40 = vsel %vm4912_vm11, %v4913_v27, %v4904_v21  ;;  %v5127_v29 = vmul.u32 %v5123_v52, %v5122_v63 }
 0x510   :  { %vm4905_vm13 = vweird.f32 %v8784_v26  ;;  %v5011_v48 = vadd.s32 %v9149_v14, %v9139_v62  ;;  %v5125_v35 = vmul.u32 %v5123_v52, %v5121_v61  ;;  %v5129_v8 = vshll.u32 %v5126_v6, 16 }
 0x511   :  { %v4911_v50 = vsel %vm4909_vm12, %v4896_v24, %v4910_v38  ;;  %v5401_v39 = vadd.s32 4294967294, %v5023_v42  ;;  %v5128_v41 = vmul.u32 %v5124_v58, %v5122_v63  ;;  %v5131_v56 = vshll.u32 %v5127_v29, 16 }
 0x512   :  { %v4915_v19 = vsel %vm4908_vm10, %v4911_v50, %v4914_v40  ;;  %v5148_v23 = vmul.u32 %v5146_v32, %v5121_v61  ;;  %vm5133_vm0 = vc.u32 %v5125_v35, %v5129_v8  ;;  %v5135_v22 = vadd.s32 %v5129_v8, %v5125_v35 }
 0x513   :  { %v4916_v5 = vsel %vm4905_vm13, nan, %v4915_v19  ;;  %vm5402_vm14 = vcmp.lt.s32.totalorder %v5401_v39, 0  ;;  %v5149_v44 = vmul.u32 %v5145_v9, %v5122_v63  ;;  %v5134_v33 = vsel %vm5133_vm0, 1, %v5462_v54 }
 0x514   :  { %5256 = vst [vmem:[#allocation2 + $0xe8] sm:$0xff] %v4916_v5  ;;  %v5026_v55 = vsel %vm5402_vm14, 0, %v5401_v39  ;;  %v5147_v3 = vmul.u32 %v5145_v9, %v5121_v61  ;;  %v5130_v45 = vshrl.u32 %v5126_v6, 16  ;;  %v5136_v59 = vadd.s32 %v5134_v33, %v5128_v41 }
 0x515   :  { %v5027_v49 = vsub.s32 32, %v5026_v55  ;;  %v5031_v26 = vsub.s32 4294967266, %v5026_v55  ;;  %vm5137_vm1 = vc.u32 %v5135_v22, %v5131_v56  ;;  %v5151_v62 = vshll.u32 %v5148_v23, 16 }
 0x516   :  { %v5028_v14 = vshll.u32 %v5019_v37, %v5026_v55  ;;  %v5138_v7 = vsel %vm5137_vm1, 1, %v5462_v54  ;;  %v5150_v25 = vmul.u32 %v5146_v32, %v5122_v63  ;;  %v5153_v0 = vshll.u32 %v5149_v44, 16 }
 0x517   :  { %v5029_v2 = vshrl.u32 %v5011_v48, %v5027_v49  ;;  %v5032_v20 = vadd.s32 127, %v5031_v26  ;;  %v5140_v4 = vadd.s32 %v5138_v7, %v5136_v59  ;;  %vm5155_vm2 = vc.u32 %v5147_v3, %v5151_v62 }
 0x518   :  { %v5156_v34 = vsel %vm5155_vm2, 1, %v5462_v54  ;;  %v5157_v10 = vadd.s32 %v5151_v62, %v5147_v3  ;;  %v5109_v37 = vsel %vm5107_vm5, %v9184_v57, 2102212464  ;;  %v5088_v15 = vshrl.u32 %v5456_v51, %v9163_v47 }
 0x519   :  { %v5030_v16 = vor.u32 %v5029_v2, %v5028_v14  ;;  %v5033_v60 = vshll.u32 %v5032_v20, 23  ;;  %v5141_v24 = vadd.s32 %v5140_v4, %v5130_v45  ;;  %v5158_v43 = vadd.s32 %v5156_v34, %v5150_v25 }
 0x51a   :  { %vm5159_vm15 = vc.u32 %v5157_v10, %v5153_v0  ;;  %v5132_v21 = vshrl.u32 %v5127_v29, 16  ;;  %v5152_v52 = vshrl.u32 %v5148_v23, 16  ;;  %v5108_v38 = vsel %vm5104_vm4, %v5088_v15, %v9178_v17 }
 0x51b   :  { %v5034_v30 = vor.u32 4788187, %v5033_v60  ;;  %v5160_v27 = vsel %vm5159_vm15, 1, %v5462_v54  ;;  %v5037_v61 = vcvt.s32.f32 %v5030_v16  ;;  %v5110_v46 = vsel %vm5106_vm7, %v9180_v53, %v5109_v37 }
 0x51c   :  { %v5162_v58 = vadd.s32 %v5160_v27, %v5158_v43  ;;  %v5142_v57 = vadd.s32 %v5141_v24, %v5132_v21  ;;  %v5154_v42 = vshrl.u32 %v5149_v44, 16  ;;  %v5161_v51 = vadd.s32 %v5157_v10, %v5153_v0 }
 0x51d   :  { %v5035_v36 = vand.u32 2147483647, %v5034_v30  ;;  %v5111_v54 = vsel %vm5105_vm8, %v5108_v38, %v5110_v46  ;;  %vm4919_vm3 = vcmp.lt.s32.totalorder %v8944_v13, 0  ;;  %vm9242_vm4 = vcmp.le.f32.partialorder %v4917_v28, 0.7853982 }
 0x51e   :  { %v5163_v6 = vadd.s32 %v5162_v58, %v5152_v52  ;;  %vm5167_vm6 = vc.u32 %v5142_v57, %v5161_v51  ;;  %v5041_v40 = vsub.s32 4, %v9187_v1  ;;  %v5165_v31 = vmul.u32 %v9209_v18, %v5111_v54 }
 0x51f   :  { %v5038_v63 = vmul.f32 %v5037_v61, %v5035_v36  ;;  %vm5060_vm12 = vweird.f32 %v8944_v13  ;;  %v5166_v43 = vadd.s32 %v5161_v51, %v5142_v57  ;;  %vm5074_vm11 = vcmp.lt.s32.totalorder %v9065_v11, 0 }
 0x520   :  { %v5164_v32 = vadd.s32 %v5163_v6, %v5154_v42  ;;  %v5042_v28 = vsel %vm4919_vm3, %v5041_v40, %v9187_v1  ;;  %vm5073_vm13 = vcmp.le.f32.partialorder %v5072_v12, 0.7853982  ;;  %vm5215_vm2 = vweird.f32 %v9065_v11 }
 0x521   :  { %v5039_v47 = vxor.u32 2147483648, %v5038_v63  ;;  %v5044_v23 = vsel %vm9242_vm4, 0, %v5042_v28 }
 0x522   :  { %v5168_v50 = vadd.s32 1, %v5164_v32  ;;  %v5061_v18 = vadd.s32 3, %v5044_v23 }
 0x523   :  { %v5040_v53 = vsel %vm4919_vm3, %v5039_v47, %v5038_v63 }
 0x524   :  { %v5043_v29 = vsel %vm9242_vm4, %v8944_v13, %v5040_v53  ;;  %v5169_v19 = vsel %vm5167_vm6, %v5168_v50, %v5164_v32  ;;  %v5062_v14 = vand.u32 3, %v5061_v18 }
 0x525   :  { %v5045_v9 = vmul.f32 %v5043_v29, %v5043_v29  ;;  %v5170_v39 = vadd.s32 %v5169_v19, %v5165_v31 }
 0x526   :  { %vm5064_vm7 = vcmp.eq.s32.totalorder %v5062_v14, 0  ;;  %vm5067_vm8 = vcmp.eq.s32.totalorder %v5062_v14, 2  ;;  %vm5063_vm9 = vcmp.lt.s32.totalorder %v5062_v14, 2 }
 0x527   :  { %v5046_v5 = vmul.f32 -0.001358992, %v5045_v9  ;;  %v5053_v48 = vmul.f32 -0.00019511016, %v5045_v9  ;;  %v5171_v35 = vadd.s32 536870912, %v5170_v39 }
 0x529   :  { %v5047_v8 = vadd.f32 0.041655596, %v5046_v5  ;;  %v5054_v41 = vadd.f32 0.008332121, %v5053_v48  ;;  %v5172_v56 = vshrl.u32 %v5171_v35, 30 }
 0x52b   :  { %v5048_v55 = vmul.f32 %v5047_v8, %v5045_v9  ;;  %v5055_v22 = vmul.f32 %v5054_v41, %v5045_v9  ;;  %v5173_v44 = vshll.u32 %v5172_v56, 30  ;;  %v5196_v57 = vsub.s32 4, %v5172_v56 }
 0x52d   :  { %v5049_v49 = vadd.f32 -0.4999988, %v5048_v55  ;;  %v5056_v26 = vadd.f32 -0.16666654, %v5055_v22  ;;  %v5174_v33 = vsub.s32 %v5170_v39, %v5173_v44  ;;  %v5197_v54 = vsel %vm5074_vm11, %v5196_v57, %v5172_v56 }
 0x52e   :  { %v5199_v53 = vsel %vm5073_vm13, 0, %v5197_v54 }
 0x52f   :  { %v5050_v3 = vmul.f32 %v5049_v49, %v5045_v9  ;;  %v5057_v45 = vmul.f32 %v5056_v26, %v5045_v9  ;;  %vm5175_vm5 = vcmp.lt.s32.totalorder %v5174_v33, 0  ;;  %v5176_v59 = vsub.s32 0, %v5174_v33 }
 0x530   :  { %v5216_v9 = vadd.s32 3, %v5199_v53 }
 0x531   :  { %v5051_v62 = vadd.f32 1.0, %v5050_v3  ;;  %v5058_v1 = vadd.f32 1.0, %v5057_v45  ;;  %v5177_v2 = vsel %vm5175_vm5, %v5176_v59, %v5174_v33 }
 0x532   :  { %v5178_v4 = vclz %v5177_v2  ;;  %v5217_v48 = vand.u32 3, %v5216_v9 }
 0x533   :  { %v5059_v20 = vmul.f32 %v5058_v1, %v5043_v29  ;;  %v5068_v7 = vxor.u32 2147483648, %v5051_v62 }
 0x534   :  { %v5404_v0 = vadd.s32 4294967294, %v5178_v4  ;;  %vm5219_vm14 = vcmp.eq.s32.totalorder %v5217_v48, 0  ;;  %vm5222_vm0 = vcmp.eq.s32.totalorder %v5217_v48, 2  ;;  %vm5218_vm1 = vcmp.lt.s32.totalorder %v5217_v48, 2 }
 0x535   :  { %v5065_v25 = vxor.u32 2147483648, %v5059_v20  ;;  %v5069_v60 = vsel %vm5067_vm8, %v5068_v7, %v5059_v20 }
 0x536   :  { %vm5405_vm10 = vcmp.lt.s32.totalorder %v5404_v0, 0 }
 0x537   :  { %v5066_v16 = vsel %vm5064_vm7, %v5051_v62, %v5065_v25  ;;  %v5181_v10 = vsel %vm5405_vm10, 0, %v5404_v0 }
 0x538   :  { %v5070_v34 = vsel %vm5063_vm9, %v5066_v16, %v5069_v60  ;;  %v5182_v30 = vsub.s32 32, %v5181_v10  ;;  %v5186_v37 = vsub.s32 4294967266, %v5181_v10  ;;  %v5183_v15 = vshll.u32 %v5174_v33, %v5181_v10 }
 0x539   :  { %v5071_v24 = vsel %vm5060_vm12, nan, %v5070_v34 }
 0x53a   :  { %5257 = vst [vmem:[#allocation2 + $0xf0] sm:$0xff] %v5071_v24  ;;  %v5184_v21 = vshrl.u32 %v5166_v43, %v5182_v30  ;;  %v5187_v27 = vadd.s32 127, %v5186_v37 }
 0x53c   :  { %v5185_v36 = vor.u32 %v5184_v21, %v5183_v15  ;;  %v5188_v61 = vshll.u32 %v5187_v27, 23 }
 0x53e   :  { %v5189_v52 = vor.u32 4788187, %v5188_v61  ;;  %v5192_v38 = vcvt.s32.f32 %v5185_v36 }
 0x540   :  { %v5190_v58 = vand.u32 2147483647, %v5189_v52 }
 0x542   :  { %v5193_v46 = vmul.f32 %v5192_v38, %v5190_v58 }
 0x544   :  { %v5194_v63 = vxor.u32 2147483648, %v5193_v46 }
 0x546   :  { %v5195_v13 = vsel %vm5074_vm11, %v5194_v63, %v5193_v46 }
 0x547   :  { %v5198_v42 = vsel %vm5073_vm13, %v9065_v11, %v5195_v13 }
 0x548   :  { %v5200_v6 = vmul.f32 %v5198_v42, %v5198_v42 }
 0x54a   :  { %v5201_v51 = vmul.f32 -0.001358992, %v5200_v6  ;;  %v5208_v47 = vmul.f32 -0.00019511016, %v5200_v6 }
 0x54c   :  { %v5202_v32 = vadd.f32 0.041655596, %v5201_v51  ;;  %v5209_v17 = vadd.f32 0.008332121, %v5208_v47 }
 0x54e   :  { %v5203_v50 = vmul.f32 %v5202_v32, %v5200_v6  ;;  %v5210_v40 = vmul.f32 %v5209_v17, %v5200_v6 }
 0x550   :  { %v5204_v29 = vadd.f32 -0.4999988, %v5203_v50  ;;  %v5211_v31 = vadd.f32 -0.16666654, %v5210_v40 }
 0x552   :  { %v5205_v19 = vmul.f32 %v5204_v29, %v5200_v6  ;;  %v5212_v39 = vmul.f32 %v5211_v31, %v5200_v6 }
 0x554   :  { %v5206_v5 = vadd.f32 1.0, %v5205_v19  ;;  %v5213_v12 = vadd.f32 1.0, %v5212_v39 }
 0x556   :  { %v5214_v28 = vmul.f32 %v5213_v12, %v5198_v42  ;;  %v5223_v35 = vxor.u32 2147483648, %v5206_v5 }
 0x558   :  { %v5220_v8 = vxor.u32 2147483648, %v5214_v28  ;;  %v5224_v56 = vsel %vm5222_vm0, %v5223_v35, %v5214_v28 }
 0x55a   :  { %v5221_v41 = vsel %vm5219_vm14, %v5206_v5, %v5220_v8 }
 0x55b   :  { %v5225_v23 = vsel %vm5218_vm1, %v5221_v41, %v5224_v56 }
 0x55c   :  { %v5226_v55 = vsel %vm5215_vm2, nan, %v5225_v23 }
 0x55d   :  { %5258 = vst [vmem:[#allocation2 + $0xf8] sm:$0xff] %v5226_v55 }
 0x55e   :  { %5271 = dma.vmem_to_hbm [thread:$0]  %s5264_s11, 4096, %s5266_s14, [#allocation3], %s5464_s15, %s5464_s15, %s5465_s16  }
 0x55f   :  { %5454 = dma.done.wait [#allocation3], 4096  }
 0x560   :  { %5455 = vsyncadd [#allocation3], 4294963200 }
 0x561   :  { %5276 = vsyncpa [#allocation3], 1 }

</bundles_post_ra>
